<compile_context>
chip_gen: v6e
topology: v6e:2x2x1
jax: 0.10.0
libtpu: 0.0.40
codegen_flags: <defaults>
</compile_context>

<pallas_src>
import functools
import math

import jax
import jax.numpy as jnp
import numpy as np
from jax.experimental import pallas as pl
from jax.experimental.pallas import tpu as pltpu  # noqa: F401  (TPU backend assumed)

# ----------------------------- model config (small) -----------------------------
ODIM = 11        # vocab size
D = 32           # attention_dim
H = 4            # attention_heads
UNITS = 64       # linear_units
NBLOCKS = 2      # num_blocks
B = 2            # batch
T = 8            # maxlen_out (decoder length)
S = 16           # maxlen_in  (encoder length)
EPS = 1e-12      # espnet LayerNorm eps
NEG = -1e30      # mask fill value
OPAD = ((ODIM + 127) // 128) * 128   # lane-dense padded output width


# ================================ fused Pallas kernel ============================

def decoder_kernel(x_ref, mem_ref, smask_ref, xmask_ref, ccn_ref, cen_ref,
                   lng_ref, lnb_ref,
                   wsqkv_ref, bsqkv_ref, wso_ref, bso_ref,
                   wxq_ref, bxq_ref, wxkv_ref, bxkv_ref, wxo_ref, bxo_ref,
                   wf1_ref, bf1_ref, wf2_ref, bf2_ref,
                   ag_ref, ab_ref, wout_ref, bout_ref,
                   o_ref, *, n_layers, n_heads):
    """Whole decoder stack on a (B*T, D) activation slab.

    x_ref:     (BT, D)   embedded + positionally-encoded targets
    mem_ref:   (BS, D)   encoder memory, batch folded into sublanes
    smask_ref: (BT, BT)  block-diagonal causal self-attention mask (0/1 float)
    xmask_ref: (BT, BS)  block-diagonal memory mask (0/1 float)
    ccn/cen:   (BT, 1)   per-row MoE coefficients (CN / EN)
    weights:   stacked across layers on the leading axis (static indexing).
    o_ref:     (BT, OPAD) lane-dense logits (cols >= ODIM are zero padding).
    """
    dm = x_ref.shape[-1]
    dk = dm // n_heads
    scale = 1.0 / math.sqrt(dk)

    x = x_ref[...]                         # (BT, D)
    mem = mem_ref[...]                     # (BS, D)
    self_valid = smask_ref[...] > 0.0      # (BT, BT)
    src_valid = xmask_ref[...] > 0.0       # (BT, BS)
    ccn = ccn_ref[...]                     # (BT, 1)
    cen = cen_ref[...]                     # (BT, 1)

    def layer_norm(v, g, b):
        mu = jnp.mean(v, axis=-1, keepdims=True)
        var = jnp.mean(jnp.square(v - mu), axis=-1, keepdims=True)
        return (v - mu) * jax.lax.rsqrt(var + EPS) * g + b

    def attend(q_all, k_all, v_all, valid, nh, head_scales=None):
        """Per-head scores/softmax/context; contexts concatenated along lanes."""
        ctxs = []
        for h in range(nh):
            sl = slice(h * dk, (h + 1) * dk)
            s = jax.lax.dot_general(q_all[:, sl], k_all[:, sl],
                                    (((1,), (1,)), ((), ())),
                                    preferred_element_type=jnp.float32) * scale
            s = jnp.where(valid, s, NEG)
            m = jnp.max(s, axis=-1, keepdims=True)
            e = jnp.exp(s - m)
            p = e * pl.reciprocal(jnp.sum(e, axis=-1, keepdims=True), approx=True)
            p = jnp.where(valid, p, 0.0)
            ctx = jnp.dot(p, v_all[:, sl], preferred_element_type=jnp.float32)
            if head_scales is not None:
                ctx = ctx * head_scales[h]
            ctxs.append(ctx)
        return jnp.concatenate(ctxs, axis=-1)

    for l in range(n_layers):              # static loop; weights stay in VMEM
        lg = lng_ref[l]                     # (3, D): [ln1, ln2, ln3] gammas
        lb = lnb_ref[l]                     # (3, D): betas

        # -------- self attention (fused QKV, single output matmul) --------
        xn = layer_norm(x, lg[0:1, :], lb[0:1, :])
        qkv = jnp.dot(xn, wsqkv_ref[l], preferred_element_type=jnp.float32) + bsqkv_ref[l]
        q = qkv[:, 0 * dm:1 * dm]
        k = qkv[:, 1 * dm:2 * dm]
        v = qkv[:, 2 * dm:3 * dm]
        ctx = attend(q, k, v, self_valid, n_heads)
        x = x + jnp.dot(ctx, wso_ref[l], preferred_element_type=jnp.float32) + bso_ref[l]

        # -------- dual CN/EN source attention, MoE mixed --------
        xn = layer_norm(x, lg[1:2, :], lb[1:2, :])
        q2 = jnp.dot(xn, wxq_ref[l], preferred_element_type=jnp.float32) + bxq_ref[l]     # (BT, 2D) [Qcn|Qen]
        kv2 = jnp.dot(mem, wxkv_ref[l], preferred_element_type=jnp.float32) + bxkv_ref[l]  # (BS, 4D) [Kcn|Ken|Vcn|Ven]
        k2 = kv2[:, :2 * dm]
        v2 = kv2[:, 2 * dm:]
        head_scales = [ccn] * n_heads + [cen] * n_heads   # coef applied pre-projection
        ctx2 = attend(q2, k2, v2, src_valid, 2 * n_heads, head_scales)                     # (BT, 2D)
        bo = bxo_ref[l]                                                                    # (2, D)
        mix_bias = ccn * bo[0:1, :] + cen * bo[1:2, :]
        x = x + jnp.dot(ctx2, wxo_ref[l], preferred_element_type=jnp.float32) + mix_bias

        # -------- position-wise feed-forward --------
        xn = layer_norm(x, lg[2:3, :], lb[2:3, :])
        hdn = jnp.maximum(
            jnp.dot(xn, wf1_ref[l], preferred_element_type=jnp.float32) + bf1_ref[l], 0.0)
        x = x + jnp.dot(hdn, wf2_ref[l], preferred_element_type=jnp.float32) + bf2_ref[l]

    # -------- final LayerNorm + lane-dense output projection --------
    xf = layer_norm(x, ag_ref[...], ab_ref[...])
    o_ref[...] = jnp.dot(xf, wout_ref[...], preferred_element_type=jnp.float32) + bout_ref[...]


# ============================ parameter packing ==================================

def pack_params(params):
    """Fuse/stack per-layer weights into the layout the fused kernel expects."""
    layers = params['layers']

    def stack(fn):
        return jnp.stack([fn(lp) for lp in layers])

    pk = {
        'ln_g': stack(lambda lp: jnp.concatenate(
            [lp['ln1'][0], lp['ln2'][0], lp['ln3'][0]], axis=0)),           # (L, 3, D)
        'ln_b': stack(lambda lp: jnp.concatenate(
            [lp['ln1'][1], lp['ln2'][1], lp['ln3'][1]], axis=0)),           # (L, 3, D)
        'w_self_qkv': stack(lambda lp: jnp.concatenate(
            [lp['self']['wq'], lp['self']['wk'], lp['self']['wv']], axis=1)),  # (L, D, 3D)
        'b_self_qkv': stack(lambda lp: jnp.concatenate(
            [lp['self']['bq'], lp['self']['bk'], lp['self']['bv']], axis=1)),  # (L, 1, 3D)
        'w_self_o': stack(lambda lp: lp['self']['wo']),                     # (L, D, D)
        'b_self_o': stack(lambda lp: lp['self']['bo']),                     # (L, 1, D)
        'w_src_q': stack(lambda lp: jnp.concatenate(
            [lp['cn']['wq'], lp['en']['wq']], axis=1)),                     # (L, D, 2D)
        'b_src_q': stack(lambda lp: jnp.concatenate(
            [lp['cn']['bq'], lp['en']['bq']], axis=1)),                     # (L, 1, 2D)
        'w_src_kv': stack(lambda lp: jnp.concatenate(
            [lp['cn']['wk'], lp['en']['wk'], lp['cn']['wv'], lp['en']['wv']], axis=1)),  # (L, D, 4D)
        'b_src_kv': stack(lambda lp: jnp.concatenate(
            [lp['cn']['bk'], lp['en']['bk'], lp['cn']['bv'], lp['en']['bv']], axis=1)),  # (L, 1, 4D)
        'w_src_o': stack(lambda lp: jnp.concatenate(
            [lp['cn']['wo'], lp['en']['wo']], axis=0)),                     # (L, 2D, D)
        'b_src_o': stack(lambda lp: jnp.concatenate(
            [lp['cn']['bo'], lp['en']['bo']], axis=0)),                     # (L, 2, D)
        'w_ff1': stack(lambda lp: lp['ffn']['w1']),                         # (L, D, UNITS)
        'b_ff1': stack(lambda lp: lp['ffn']['b1']),                         # (L, 1, UNITS)
        'w_ff2': stack(lambda lp: lp['ffn']['w2']),                         # (L, UNITS, D)
        'b_ff2': stack(lambda lp: lp['ffn']['b2']),                         # (L, 1, D)
        'after_g': params['after_norm'][0],                                 # (1, D)
        'after_b': params['after_norm'][1],                                 # (1, D)
        'w_out': jnp.pad(params['out']['w'],
                         ((0, 0), (0, OPAD - params['out']['w'].shape[1]))),  # (D, OPAD)
        'b_out': jnp.pad(params['out']['b'],
                         ((0, 0), (0, OPAD - params['out']['b'].shape[1]))),  # (1, OPAD)
    }
    return pk


# ============================== Decoder forward =================================

def decoder_forward(params, tgt, tgt_mask, memory, memory_mask, moe_coes):
    """Pallas-backed equivalent of Decoder.forward (eval, return_penultimate_state=False)."""
    bb, tt = tgt.shape
    ss = memory.shape[1]
    dm = D

    # TODO(synk): embedding gather + sinusoidal positional add kept in plain JAX
    # (pure gather, no matmul hot path).
    x = jnp.take(params['embed'], tgt, axis=0) * math.sqrt(dm)
    x = x + params['pe'][None, :tt]
    x2 = x.reshape(bb * tt, dm).astype(jnp.float32)
    mem2 = memory.reshape(bb * ss, dm).astype(jnp.float32)

    # Block-diagonal self-attention mask (B*T, B*T): batch b only sees batch b.
    smask = jnp.zeros((bb * tt, bb * tt), jnp.float32)
    for b in range(bb):
        smask = smask.at[b * tt:(b + 1) * tt, b * tt:(b + 1) * tt].set(
            tgt_mask[b].astype(jnp.float32))

    # Block-diagonal cross-attention mask (B*T, B*S) from memory_mask (B, 1, S).
    xmask = jnp.zeros((bb * tt, bb * ss), jnp.float32)
    for b in range(bb):
        xmask = xmask.at[b * tt:(b + 1) * tt, b * ss:(b + 1) * ss].set(
            jnp.broadcast_to(memory_mask[b].astype(jnp.float32), (tt, ss)))

    # moe_coes[:, 0].unsqueeze(1): per-utterance scalar mix; [:,0]=EN, [:,1]=CN.
    c = moe_coes[:, 0, :, 0].astype(jnp.float32)          # (B, 2)
    ccn = jnp.repeat(c[:, 1:2], tt, axis=0)               # (B*T, 1)
    cen = jnp.repeat(c[:, 0:1], tt, axis=0)               # (B*T, 1)

    pk = pack_params(params)

    out = pl.pallas_call(
        functools.partial(decoder_kernel, n_layers=len(params['layers']), n_heads=H),
        out_shape=jax.ShapeDtypeStruct((bb * tt, OPAD), jnp.float32),
    )(x2, mem2, smask, xmask, ccn, cen,
      pk['ln_g'], pk['ln_b'],
      pk['w_self_qkv'], pk['b_self_qkv'], pk['w_self_o'], pk['b_self_o'],
      pk['w_src_q'], pk['b_src_q'], pk['w_src_kv'], pk['b_src_kv'],
      pk['w_src_o'], pk['b_src_o'],
      pk['w_ff1'], pk['b_ff1'], pk['w_ff2'], pk['b_ff2'],
      pk['after_g'], pk['after_b'], pk['w_out'], pk['b_out'])

    logits = out[:, :ODIM].reshape(bb, tt, ODIM)
    return logits, tgt_mask


# ============================ pure-JAX reference ================================

def _ref_ln(x, gb):
    g, b = gb
    mu = jnp.mean(x, axis=-1, keepdims=True)
    var = jnp.mean(jnp.square(x - mu), axis=-1, keepdims=True)
    return (x - mu) * jax.lax.rsqrt(var + EPS) * g[0] + b[0]


def _ref_mha(q_in, kv_in, mask, w, n_heads):
    bb, tq, dm = q_in.shape
    tk = kv_in.shape[1]
    dk = dm // n_heads
    Q = (q_in @ w['wq'] + w['bq'][0]).reshape(bb, tq, n_heads, dk).transpose(0, 2, 1, 3)
    K = (kv_in @ w['wk'] + w['bk'][0]).reshape(bb, tk, n_heads, dk).transpose(0, 2, 1, 3)
    V = (kv_in @ w['wv'] + w['bv'][0]).reshape(bb, tk, n_heads, dk).transpose(0, 2, 1, 3)
    s = jnp.einsum('bhqd,bhkd->bhqk', Q, K) / math.sqrt(dk)
    valid = (mask > 0.0)[:, None]
    s = jnp.where(valid, s, NEG)
    p = jax.nn.softmax(s, axis=-1)
    p = jnp.where(valid, p, 0.0)
    ctx = jnp.einsum('bhqk,bhkd->bhqd', p, V).transpose(0, 2, 1, 3).reshape(bb, tq, dm)
    return ctx @ w['wo'] + w['bo'][0]


def ref_forward(params, tgt, tgt_mask, memory, memory_mask, moe_coes):
    x = jnp.take(params['embed'], tgt, axis=0) * math.sqrt(D)
    x = x + params['pe'][None, :tgt.shape[1]]
    coefs = moe_coes[:, 0, :, 0][:, None, :]
    cn_c = coefs[:, :, 1:2]
    en_c = coefs[:, :, 0:1]
    for lp in params['layers']:
        res = x
        xn = _ref_ln(x, lp['ln1'])
        x = res + _ref_mha(xn, xn, tgt_mask, lp['self'], H)
        res = x
        xn = _ref_ln(x, lp['ln2'])
        cn = _ref_mha(xn, memory, memory_mask, lp['cn'], H)
        en = _ref_mha(xn, memory, memory_mask, lp['en'], H)
        x = res + cn * cn_c + en * en_c
        res = x
        xn = _ref_ln(x, lp['ln3'])
        h = jnp.maximum(xn @ lp['ffn']['w1'] + lp['ffn']['b1'][0], 0.0)
        x = res + h @ lp['ffn']['w2'] + lp['ffn']['b2'][0]
    x = _ref_ln(x, params['after_norm'])
    return x @ params['out']['w'] + params['out']['b'][0]


# ============================== parameter init ==================================

def positional_encoding(max_len, d_model):
    pos = np.arange(max_len, dtype=np.float32)[:, None]
    div = np.exp(np.arange(0, d_model, 2, dtype=np.float32) * (-math.log(10000.0) / d_model))
    pe = np.zeros((max_len, d_model), np.float32)
    pe[:, 0::2] = np.sin(pos * div)
    pe[:, 1::2] = np.cos(pos * div)
    return jnp.asarray(pe)


def init_params(key):
    keys = iter(jax.random.split(key, 512))

    def nrm(shape, scale):
        return jax.random.normal(next(keys), shape, jnp.float32) * scale

    def lin(din, dout):
        return nrm((din, dout), 1.0 / math.sqrt(din)), nrm((1, dout), 0.02)

    def mha_w():
        p = {}
        for nm in ('q', 'k', 'v', 'o'):
            w, b = lin(D, D)
            p['w' + nm] = w
            p['b' + nm] = b
        return p

    def ln_w():
        return 1.0 + nrm((1, D), 0.1), nrm((1, D), 0.1)

    params = {
        'embed': nrm((ODIM, D), 1.0),
        'pe': positional_encoding(T, D),
    }
    layers = []
    for _ in range(NBLOCKS):
        w1, b1 = lin(D, UNITS)
        w2, b2 = lin(UNITS, D)
        layers.append({
            'ln1': ln_w(), 'ln2': ln_w(), 'ln3': ln_w(),
            'self': mha_w(), 'cn': mha_w(), 'en': mha_w(),
            'ffn': {'w1': w1, 'b1': b1, 'w2': w2, 'b2': b2},
        })
    params['layers'] = layers
    params['after_norm'] = ln_w()
    ow, ob = lin(D, ODIM)
    params['out'] = {'w': ow, 'b': ob}
    return params


# ==================================== main ======================================

if __name__ == "__main__":
    key = jax.random.PRNGKey(0)
    kp, kd = jax.random.split(key)
    params = init_params(kp)

    kt, km, kc = jax.random.split(kd, 3)
    tgt = jax.random.randint(kt, (B, T), 0, ODIM, dtype=jnp.int32)          # token ids
    causal = jnp.tril(jnp.ones((T, T), jnp.float32))
    tgt_mask = jnp.broadcast_to(causal, (B, T, T))                          # (B, T, T)
    memory = jax.random.normal(km, (B, S, D), jnp.float32)                  # encoder output
    mem_lens = jnp.array([S, S - 4])
    memory_mask = (jnp.arange(S)[None, :] < mem_lens[:, None]).astype(jnp.float32)[:, None, :]  # (B,1,S)
    moe_raw = jax.random.uniform(kc, (B, T, 2, 1), jnp.float32) + 0.1
    moe_coes = moe_raw / jnp.sum(moe_raw, axis=2, keepdims=True)            # (B, T, 2, 1)

    logits, out_mask = decoder_forward(params, tgt, tgt_mask, memory, memory_mask, moe_coes)
    logits = jax.block_until_ready(logits)

    ref = jax.block_until_ready(
        ref_forward(params, tgt, tgt_mask, memory, memory_mask, moe_coes))
    # Tolerance is loosened a bit because the kernel softmax uses the EUP
    # approximate reciprocal (pl.reciprocal(approx=True)); real bugs would be
    # off by O(1), far above this threshold.
    np.testing.assert_allclose(np.asarray(logits), np.asarray(ref), rtol=5e-2, atol=5e-2)
    assert logits.shape == (B, T, ODIM)

    print("KERNEL_OK")
</pallas_src>

<mosaic_0001>
module attributes {stable_mosaic.version = 11 : i64} {
  func.func @decoder_kernel(%arg0: memref<16x32xf32, #tpu.memory_space<vmem>>, %arg1: memref<32x32xf32, #tpu.memory_space<vmem>>, %arg2: memref<16x16xf32, #tpu.memory_space<vmem>>, %arg3: memref<16x32xf32, #tpu.memory_space<vmem>>, %arg4: memref<16x1xf32, #tpu.memory_space<vmem>>, %arg5: memref<16x1xf32, #tpu.memory_space<vmem>>, %arg6: memref<2x3x32xf32, #tpu.memory_space<vmem>>, %arg7: memref<2x3x32xf32, #tpu.memory_space<vmem>>, %arg8: memref<2x32x96xf32, #tpu.memory_space<vmem>>, %arg9: memref<2x1x96xf32, #tpu.memory_space<vmem>>, %arg10: memref<2x32x32xf32, #tpu.memory_space<vmem>>, %arg11: memref<2x1x32xf32, #tpu.memory_space<vmem>>, %arg12: memref<2x32x64xf32, #tpu.memory_space<vmem>>, %arg13: memref<2x1x64xf32, #tpu.memory_space<vmem>>, %arg14: memref<2x32x128xf32, #tpu.memory_space<vmem>>, %arg15: memref<2x1x128xf32, #tpu.memory_space<vmem>>, %arg16: memref<2x64x32xf32, #tpu.memory_space<vmem>>, %arg17: memref<2x2x32xf32, #tpu.memory_space<vmem>>, %arg18: memref<2x32x64xf32, #tpu.memory_space<vmem>>, %arg19: memref<2x1x64xf32, #tpu.memory_space<vmem>>, %arg20: memref<2x64x32xf32, #tpu.memory_space<vmem>>, %arg21: memref<2x1x32xf32, #tpu.memory_space<vmem>>, %arg22: memref<1x32xf32, #tpu.memory_space<vmem>>, %arg23: memref<1x32xf32, #tpu.memory_space<vmem>>, %arg24: memref<32x128xf32, #tpu.memory_space<vmem>>, %arg25: memref<1x128xf32, #tpu.memory_space<vmem>>, %arg26: memref<16x128xf32, #tpu.memory_space<vmem>>) attributes {dimension_semantics = [], scalar_prefetch = 0 : i64, scratch_operands = 0 : i64, tpu.core_type = #tpu.core_type<tc>} {
    %c0 = arith.constant 0 : index
    %c0_0 = arith.constant 0 : index
    %0 = vector.load %arg0[%c0, %c0_0] : memref<16x32xf32, #tpu.memory_space<vmem>>, vector<16x32xf32>
    %c0_1 = arith.constant 0 : index
    %c0_2 = arith.constant 0 : index
    %1 = vector.load %arg1[%c0_1, %c0_2] : memref<32x32xf32, #tpu.memory_space<vmem>>, vector<32x32xf32>
    %c0_3 = arith.constant 0 : index
    %c0_4 = arith.constant 0 : index
    %2 = vector.load %arg2[%c0_3, %c0_4] : memref<16x16xf32, #tpu.memory_space<vmem>>, vector<16x16xf32>
    %cst = arith.constant 0.000000e+00 : f32
    %3 = vector.broadcast %cst : f32 to vector<16x16xf32>
    %4 = arith.cmpf ogt, %2, %3 : vector<16x16xf32>
    %c0_5 = arith.constant 0 : index
    %c0_6 = arith.constant 0 : index
    %5 = vector.load %arg3[%c0_5, %c0_6] : memref<16x32xf32, #tpu.memory_space<vmem>>, vector<16x32xf32>
    %cst_7 = arith.constant 0.000000e+00 : f32
    %6 = vector.broadcast %cst_7 : f32 to vector<16x32xf32>
    %7 = arith.cmpf ogt, %5, %6 : vector<16x32xf32>
    %c0_8 = arith.constant 0 : index
    %c0_9 = arith.constant 0 : index
    %8 = vector.load %arg4[%c0_8, %c0_9] : memref<16x1xf32, #tpu.memory_space<vmem>>, vector<16x1xf32>
    %c0_10 = arith.constant 0 : index
    %c0_11 = arith.constant 0 : index
    %9 = vector.load %arg5[%c0_10, %c0_11] : memref<16x1xf32, #tpu.memory_space<vmem>>, vector<16x1xf32>
    %c0_12 = arith.constant 0 : index
    %c0_13 = arith.constant 0 : index
    %c0_14 = arith.constant 0 : index
    %10 = vector.load %arg6[%c0_12, %c0_13, %c0_14] : memref<2x3x32xf32, #tpu.memory_space<vmem>>, vector<1x3x32xf32>
    %11 = vector.shape_cast %10 : vector<1x3x32xf32> to vector<3x32xf32>
    %c0_15 = arith.constant 0 : index
    %c0_16 = arith.constant 0 : index
    %c0_17 = arith.constant 0 : index
    %12 = vector.load %arg7[%c0_15, %c0_16, %c0_17] : memref<2x3x32xf32, #tpu.memory_space<vmem>>, vector<1x3x32xf32>
    %13 = vector.shape_cast %12 : vector<1x3x32xf32> to vector<3x32xf32>
    %14 = vector.extract_strided_slice %11 {offsets = [0, 0], sizes = [1, 32], strides = [1, 1]} : vector<3x32xf32> to vector<1x32xf32>
    %15 = vector.extract_strided_slice %13 {offsets = [0, 0], sizes = [1, 32], strides = [1, 1]} : vector<3x32xf32> to vector<1x32xf32>
    %cst_18 = arith.constant dense<0.000000e+00> : vector<16xf32>
    %16 = vector.multi_reduction <add>, %0, %cst_18 [1] : vector<16x32xf32> to vector<16xf32>
    %17 = vector.shape_cast %16 : vector<16xf32> to vector<16x1xf32>
    %cst_19 = arith.constant 3.200000e+01 : f32
    %18 = vector.broadcast %cst_19 : f32 to vector<16x1xf32>
    %19 = arith.divf %17, %18 : vector<16x1xf32>
    %20 = vector.broadcast %19 : vector<16x1xf32> to vector<16x32xf32>
    %21 = arith.subf %0, %20 : vector<16x32xf32>
    %22 = arith.mulf %21, %21 : vector<16x32xf32>
    %cst_20 = arith.constant dense<0.000000e+00> : vector<16xf32>
    %23 = vector.multi_reduction <add>, %22, %cst_20 [1] : vector<16x32xf32> to vector<16xf32>
    %24 = vector.shape_cast %23 : vector<16xf32> to vector<16x1xf32>
    %cst_21 = arith.constant 3.200000e+01 : f32
    %25 = vector.broadcast %cst_21 : f32 to vector<16x1xf32>
    %26 = arith.divf %24, %25 : vector<16x1xf32>
    %27 = vector.broadcast %19 : vector<16x1xf32> to vector<16x32xf32>
    %28 = arith.subf %0, %27 : vector<16x32xf32>
    %cst_22 = arith.constant 9.99999996E-13 : f32
    %29 = vector.broadcast %cst_22 : f32 to vector<16x1xf32>
    %30 = arith.addf %26, %29 : vector<16x1xf32>
    %31 = math.rsqrt %30 : vector<16x1xf32>
    %32 = vector.broadcast %31 : vector<16x1xf32> to vector<16x32xf32>
    %33 = arith.mulf %28, %32 : vector<16x32xf32>
    %34 = vector.broadcast %14 : vector<1x32xf32> to vector<16x32xf32>
    %35 = arith.mulf %33, %34 : vector<16x32xf32>
    %36 = vector.broadcast %15 : vector<1x32xf32> to vector<16x32xf32>
    %37 = arith.addf %35, %36 : vector<16x32xf32>
    %c0_23 = arith.constant 0 : index
    %c0_24 = arith.constant 0 : index
    %c0_25 = arith.constant 0 : index
    %38 = vector.load %arg8[%c0_23, %c0_24, %c0_25] : memref<2x32x96xf32, #tpu.memory_space<vmem>>, vector<1x32x96xf32>
    %39 = vector.shape_cast %38 : vector<1x32x96xf32> to vector<32x96xf32>
    %cst_26 = arith.constant dense<0.000000e+00> : vector<16x96xf32>
    %40 = tpu.matmul %37, %39, %cst_26 {dimension_numbers = #tpu.dot_dimension_numbers<[1], [0], [0], [1], [0, 0, 1, 1], [], []>} : vector<16x32xf32>, vector<32x96xf32>, vector<16x96xf32> -> vector<16x96xf32>
    %c0_27 = arith.constant 0 : index
    %c0_28 = arith.constant 0 : index
    %c0_29 = arith.constant 0 : index
    %41 = vector.load %arg9[%c0_27, %c0_28, %c0_29] : memref<2x1x96xf32, #tpu.memory_space<vmem>>, vector<1x1x96xf32>
    %42 = vector.shape_cast %41 : vector<1x1x96xf32> to vector<1x96xf32>
    %43 = vector.broadcast %42 : vector<1x96xf32> to vector<16x96xf32>
    %44 = arith.addf %40, %43 : vector<16x96xf32>
    %45 = vector.extract_strided_slice %44 {offsets = [0, 0], sizes = [16, 32], strides = [1, 1]} : vector<16x96xf32> to vector<16x32xf32>
    %46 = vector.extract_strided_slice %44 {offsets = [0, 32], sizes = [16, 32], strides = [1, 1]} : vector<16x96xf32> to vector<16x32xf32>
    %47 = vector.extract_strided_slice %44 {offsets = [0, 64], sizes = [16, 32], strides = [1, 1]} : vector<16x96xf32> to vector<16x32xf32>
    %48 = vector.extract_strided_slice %45 {offsets = [0, 0], sizes = [16, 8], strides = [1, 1]} : vector<16x32xf32> to vector<16x8xf32>
    %49 = vector.extract_strided_slice %46 {offsets = [0, 0], sizes = [16, 8], strides = [1, 1]} : vector<16x32xf32> to vector<16x8xf32>
    %cst_30 = arith.constant dense<0.000000e+00> : vector<16x16xf32>
    %50 = tpu.matmul %48, %49, %cst_30 {dimension_numbers = #tpu.dot_dimension_numbers<[1], [1], [0], [0], [0, 0, 1, 0], [], []>} : vector<16x8xf32>, vector<16x8xf32>, vector<16x16xf32> -> vector<16x16xf32>
    %cst_31 = arith.constant 0.353553385 : f32
    %51 = vector.broadcast %cst_31 : f32 to vector<16x16xf32>
    %52 = arith.mulf %50, %51 : vector<16x16xf32>
    %cst_32 = arith.constant -1.000000e+30 : f32
    %53 = vector.broadcast %cst_32 : f32 to vector<16x16xf32>
    %54 = arith.select %4, %52, %53 : vector<16x16xi1>, vector<16x16xf32>
    %cst_33 = arith.constant dense<0xFF800000> : vector<16xf32>
    %55 = vector.multi_reduction <maximumf>, %54, %cst_33 [1] : vector<16x16xf32> to vector<16xf32>
    %56 = vector.shape_cast %55 : vector<16xf32> to vector<16x1xf32>
    %57 = vector.broadcast %56 : vector<16x1xf32> to vector<16x16xf32>
    %58 = arith.subf %54, %57 : vector<16x16xf32>
    %59 = math.exp %58 : vector<16x16xf32>
    %cst_34 = arith.constant dense<0.000000e+00> : vector<16xf32>
    %60 = vector.multi_reduction <add>, %59, %cst_34 [1] : vector<16x16xf32> to vector<16xf32>
    %61 = vector.shape_cast %60 : vector<16xf32> to vector<16x1xf32>
    %62 = tpu.reciprocal %61 {approx = true} : vector<16x1xf32> -> vector<16x1xf32>
    %63 = vector.broadcast %62 : vector<16x1xf32> to vector<16x16xf32>
    %64 = arith.mulf %59, %63 : vector<16x16xf32>
    %cst_35 = arith.constant 0.000000e+00 : f32
    %65 = vector.broadcast %cst_35 : f32 to vector<16x16xf32>
    %66 = arith.select %4, %64, %65 : vector<16x16xi1>, vector<16x16xf32>
    %67 = vector.extract_strided_slice %47 {offsets = [0, 0], sizes = [16, 8], strides = [1, 1]} : vector<16x32xf32> to vector<16x8xf32>
    %cst_36 = arith.constant dense<0.000000e+00> : vector<16x8xf32>
    %68 = tpu.matmul %66, %67, %cst_36 {dimension_numbers = #tpu.dot_dimension_numbers<[1], [0], [0], [1], [0, 0, 1, 1], [], []>} : vector<16x16xf32>, vector<16x8xf32>, vector<16x8xf32> -> vector<16x8xf32>
    %69 = vector.extract_strided_slice %45 {offsets = [0, 8], sizes = [16, 8], strides = [1, 1]} : vector<16x32xf32> to vector<16x8xf32>
    %70 = vector.extract_strided_slice %46 {offsets = [0, 8], sizes = [16, 8], strides = [1, 1]} : vector<16x32xf32> to vector<16x8xf32>
    %cst_37 = arith.constant dense<0.000000e+00> : vector<16x16xf32>
    %71 = tpu.matmul %69, %70, %cst_37 {dimension_numbers = #tpu.dot_dimension_numbers<[1], [1], [0], [0], [0, 0, 1, 0], [], []>} : vector<16x8xf32>, vector<16x8xf32>, vector<16x16xf32> -> vector<16x16xf32>
    %cst_38 = arith.constant 0.353553385 : f32
    %72 = vector.broadcast %cst_38 : f32 to vector<16x16xf32>
    %73 = arith.mulf %71, %72 : vector<16x16xf32>
    %cst_39 = arith.constant -1.000000e+30 : f32
    %74 = vector.broadcast %cst_39 : f32 to vector<16x16xf32>
    %75 = arith.select %4, %73, %74 : vector<16x16xi1>, vector<16x16xf32>
    %cst_40 = arith.constant dense<0xFF800000> : vector<16xf32>
    %76 = vector.multi_reduction <maximumf>, %75, %cst_40 [1] : vector<16x16xf32> to vector<16xf32>
    %77 = vector.shape_cast %76 : vector<16xf32> to vector<16x1xf32>
    %78 = vector.broadcast %77 : vector<16x1xf32> to vector<16x16xf32>
    %79 = arith.subf %75, %78 : vector<16x16xf32>
    %80 = math.exp %79 : vector<16x16xf32>
    %cst_41 = arith.constant dense<0.000000e+00> : vector<16xf32>
    %81 = vector.multi_reduction <add>, %80, %cst_41 [1] : vector<16x16xf32> to vector<16xf32>
    %82 = vector.shape_cast %81 : vector<16xf32> to vector<16x1xf32>
    %83 = tpu.reciprocal %82 {approx = true} : vector<16x1xf32> -> vector<16x1xf32>
    %84 = vector.broadcast %83 : vector<16x1xf32> to vector<16x16xf32>
    %85 = arith.mulf %80, %84 : vector<16x16xf32>
    %cst_42 = arith.constant 0.000000e+00 : f32
    %86 = vector.broadcast %cst_42 : f32 to vector<16x16xf32>
    %87 = arith.select %4, %85, %86 : vector<16x16xi1>, vector<16x16xf32>
    %88 = vector.extract_strided_slice %47 {offsets = [0, 8], sizes = [16, 8], strides = [1, 1]} : vector<16x32xf32> to vector<16x8xf32>
    %cst_43 = arith.constant dense<0.000000e+00> : vector<16x8xf32>
    %89 = tpu.matmul %87, %88, %cst_43 {dimension_numbers = #tpu.dot_dimension_numbers<[1], [0], [0], [1], [0, 0, 1, 1], [], []>} : vector<16x16xf32>, vector<16x8xf32>, vector<16x8xf32> -> vector<16x8xf32>
    %90 = vector.extract_strided_slice %45 {offsets = [0, 16], sizes = [16, 8], strides = [1, 1]} : vector<16x32xf32> to vector<16x8xf32>
    %91 = vector.extract_strided_slice %46 {offsets = [0, 16], sizes = [16, 8], strides = [1, 1]} : vector<16x32xf32> to vector<16x8xf32>
    %cst_44 = arith.constant dense<0.000000e+00> : vector<16x16xf32>
    %92 = tpu.matmul %90, %91, %cst_44 {dimension_numbers = #tpu.dot_dimension_numbers<[1], [1], [0], [0], [0, 0, 1, 0], [], []>} : vector<16x8xf32>, vector<16x8xf32>, vector<16x16xf32> -> vector<16x16xf32>
    %cst_45 = arith.constant 0.353553385 : f32
    %93 = vector.broadcast %cst_45 : f32 to vector<16x16xf32>
    %94 = arith.mulf %92, %93 : vector<16x16xf32>
    %cst_46 = arith.constant -1.000000e+30 : f32
    %95 = vector.broadcast %cst_46 : f32 to vector<16x16xf32>
    %96 = arith.select %4, %94, %95 : vector<16x16xi1>, vector<16x16xf32>
    %cst_47 = arith.constant dense<0xFF800000> : vector<16xf32>
    %97 = vector.multi_reduction <maximumf>, %96, %cst_47 [1] : vector<16x16xf32> to vector<16xf32>
    %98 = vector.shape_cast %97 : vector<16xf32> to vector<16x1xf32>
    %99 = vector.broadcast %98 : vector<16x1xf32> to vector<16x16xf32>
    %100 = arith.subf %96, %99 : vector<16x16xf32>
    %101 = math.exp %100 : vector<16x16xf32>
    %cst_48 = arith.constant dense<0.000000e+00> : vector<16xf32>
    %102 = vector.multi_reduction <add>, %101, %cst_48 [1] : vector<16x16xf32> to vector<16xf32>
    %103 = vector.shape_cast %102 : vector<16xf32> to vector<16x1xf32>
    %104 = tpu.reciprocal %103 {approx = true} : vector<16x1xf32> -> vector<16x1xf32>
    %105 = vector.broadcast %104 : vector<16x1xf32> to vector<16x16xf32>
    %106 = arith.mulf %101, %105 : vector<16x16xf32>
    %cst_49 = arith.constant 0.000000e+00 : f32
    %107 = vector.broadcast %cst_49 : f32 to vector<16x16xf32>
    %108 = arith.select %4, %106, %107 : vector<16x16xi1>, vector<16x16xf32>
    %109 = vector.extract_strided_slice %47 {offsets = [0, 16], sizes = [16, 8], strides = [1, 1]} : vector<16x32xf32> to vector<16x8xf32>
    %cst_50 = arith.constant dense<0.000000e+00> : vector<16x8xf32>
    %110 = tpu.matmul %108, %109, %cst_50 {dimension_numbers = #tpu.dot_dimension_numbers<[1], [0], [0], [1], [0, 0, 1, 1], [], []>} : vector<16x16xf32>, vector<16x8xf32>, vector<16x8xf32> -> vector<16x8xf32>
    %111 = vector.extract_strided_slice %45 {offsets = [0, 24], sizes = [16, 8], strides = [1, 1]} : vector<16x32xf32> to vector<16x8xf32>
    %112 = vector.extract_strided_slice %46 {offsets = [0, 24], sizes = [16, 8], strides = [1, 1]} : vector<16x32xf32> to vector<16x8xf32>
    %cst_51 = arith.constant dense<0.000000e+00> : vector<16x16xf32>
    %113 = tpu.matmul %111, %112, %cst_51 {dimension_numbers = #tpu.dot_dimension_numbers<[1], [1], [0], [0], [0, 0, 1, 0], [], []>} : vector<16x8xf32>, vector<16x8xf32>, vector<16x16xf32> -> vector<16x16xf32>
    %cst_52 = arith.constant 0.353553385 : f32
    %114 = vector.broadcast %cst_52 : f32 to vector<16x16xf32>
    %115 = arith.mulf %113, %114 : vector<16x16xf32>
    %cst_53 = arith.constant -1.000000e+30 : f32
    %116 = vector.broadcast %cst_53 : f32 to vector<16x16xf32>
    %117 = arith.select %4, %115, %116 : vector<16x16xi1>, vector<16x16xf32>
    %cst_54 = arith.constant dense<0xFF800000> : vector<16xf32>
    %118 = vector.multi_reduction <maximumf>, %117, %cst_54 [1] : vector<16x16xf32> to vector<16xf32>
    %119 = vector.shape_cast %118 : vector<16xf32> to vector<16x1xf32>
    %120 = vector.broadcast %119 : vector<16x1xf32> to vector<16x16xf32>
    %121 = arith.subf %117, %120 : vector<16x16xf32>
    %122 = math.exp %121 : vector<16x16xf32>
    %cst_55 = arith.constant dense<0.000000e+00> : vector<16xf32>
    %123 = vector.multi_reduction <add>, %122, %cst_55 [1] : vector<16x16xf32> to vector<16xf32>
    %124 = vector.shape_cast %123 : vector<16xf32> to vector<16x1xf32>
    %125 = tpu.reciprocal %124 {approx = true} : vector<16x1xf32> -> vector<16x1xf32>
    %126 = vector.broadcast %125 : vector<16x1xf32> to vector<16x16xf32>
    %127 = arith.mulf %122, %126 : vector<16x16xf32>
    %cst_56 = arith.constant 0.000000e+00 : f32
    %128 = vector.broadcast %cst_56 : f32 to vector<16x16xf32>
    %129 = arith.select %4, %127, %128 : vector<16x16xi1>, vector<16x16xf32>
    %130 = vector.extract_strided_slice %47 {offsets = [0, 24], sizes = [16, 8], strides = [1, 1]} : vector<16x32xf32> to vector<16x8xf32>
    %cst_57 = arith.constant dense<0.000000e+00> : vector<16x8xf32>
    %131 = tpu.matmul %129, %130, %cst_57 {dimension_numbers = #tpu.dot_dimension_numbers<[1], [0], [0], [1], [0, 0, 1, 1], [], []>} : vector<16x16xf32>, vector<16x8xf32>, vector<16x8xf32> -> vector<16x8xf32>
    %132 = tpu.concatenate %68, %89, %110, %131 in 1 : vector<16x8xf32>, vector<16x8xf32>, vector<16x8xf32>, vector<16x8xf32> -> vector<16x32xf32>
    %c0_58 = arith.constant 0 : index
    %c0_59 = arith.constant 0 : index
    %c0_60 = arith.constant 0 : index
    %133 = vector.load %arg10[%c0_58, %c0_59, %c0_60] : memref<2x32x32xf32, #tpu.memory_space<vmem>>, vector<1x32x32xf32>
    %134 = vector.shape_cast %133 : vector<1x32x32xf32> to vector<32x32xf32>
    %cst_61 = arith.constant dense<0.000000e+00> : vector<16x32xf32>
    %135 = tpu.matmul %132, %134, %cst_61 {dimension_numbers = #tpu.dot_dimension_numbers<[1], [0], [0], [1], [0, 0, 1, 1], [], []>} : vector<16x32xf32>, vector<32x32xf32>, vector<16x32xf32> -> vector<16x32xf32>
    %136 = arith.addf %0, %135 : vector<16x32xf32>
    %c0_62 = arith.constant 0 : index
    %c0_63 = arith.constant 0 : index
    %c0_64 = arith.constant 0 : index
    %137 = vector.load %arg11[%c0_62, %c0_63, %c0_64] : memref<2x1x32xf32, #tpu.memory_space<vmem>>, vector<1x1x32xf32>
    %138 = vector.shape_cast %137 : vector<1x1x32xf32> to vector<1x32xf32>
    %139 = vector.broadcast %138 : vector<1x32xf32> to vector<16x32xf32>
    %140 = arith.addf %136, %139 : vector<16x32xf32>
    %141 = vector.extract_strided_slice %11 {offsets = [1, 0], sizes = [1, 32], strides = [1, 1]} : vector<3x32xf32> to vector<1x32xf32>
    %142 = vector.extract_strided_slice %13 {offsets = [1, 0], sizes = [1, 32], strides = [1, 1]} : vector<3x32xf32> to vector<1x32xf32>
    %cst_65 = arith.constant dense<0.000000e+00> : vector<16xf32>
    %143 = vector.multi_reduction <add>, %140, %cst_65 [1] : vector<16x32xf32> to vector<16xf32>
    %144 = vector.shape_cast %143 : vector<16xf32> to vector<16x1xf32>
    %cst_66 = arith.constant 3.200000e+01 : f32
    %145 = vector.broadcast %cst_66 : f32 to vector<16x1xf32>
    %146 = arith.divf %144, %145 : vector<16x1xf32>
    %147 = vector.broadcast %146 : vector<16x1xf32> to vector<16x32xf32>
    %148 = arith.subf %140, %147 : vector<16x32xf32>
    %149 = arith.mulf %148, %148 : vector<16x32xf32>
    %cst_67 = arith.constant dense<0.000000e+00> : vector<16xf32>
    %150 = vector.multi_reduction <add>, %149, %cst_67 [1] : vector<16x32xf32> to vector<16xf32>
    %151 = vector.shape_cast %150 : vector<16xf32> to vector<16x1xf32>
    %cst_68 = arith.constant 3.200000e+01 : f32
    %152 = vector.broadcast %cst_68 : f32 to vector<16x1xf32>
    %153 = arith.divf %151, %152 : vector<16x1xf32>
    %154 = vector.broadcast %146 : vector<16x1xf32> to vector<16x32xf32>
    %155 = arith.subf %140, %154 : vector<16x32xf32>
    %cst_69 = arith.constant 9.99999996E-13 : f32
    %156 = vector.broadcast %cst_69 : f32 to vector<16x1xf32>
    %157 = arith.addf %153, %156 : vector<16x1xf32>
    %158 = math.rsqrt %157 : vector<16x1xf32>
    %159 = vector.broadcast %158 : vector<16x1xf32> to vector<16x32xf32>
    %160 = arith.mulf %155, %159 : vector<16x32xf32>
    %161 = vector.broadcast %141 : vector<1x32xf32> to vector<16x32xf32>
    %162 = arith.mulf %160, %161 : vector<16x32xf32>
    %163 = vector.broadcast %142 : vector<1x32xf32> to vector<16x32xf32>
    %164 = arith.addf %162, %163 : vector<16x32xf32>
    %c0_70 = arith.constant 0 : index
    %c0_71 = arith.constant 0 : index
    %c0_72 = arith.constant 0 : index
    %165 = vector.load %arg12[%c0_70, %c0_71, %c0_72] : memref<2x32x64xf32, #tpu.memory_space<vmem>>, vector<1x32x64xf32>
    %166 = vector.shape_cast %165 : vector<1x32x64xf32> to vector<32x64xf32>
    %cst_73 = arith.constant dense<0.000000e+00> : vector<16x64xf32>
    %167 = tpu.matmul %164, %166, %cst_73 {dimension_numbers = #tpu.dot_dimension_numbers<[1], [0], [0], [1], [0, 0, 1, 1], [], []>} : vector<16x32xf32>, vector<32x64xf32>, vector<16x64xf32> -> vector<16x64xf32>
    %c0_74 = arith.constant 0 : index
    %c0_75 = arith.constant 0 : index
    %c0_76 = arith.constant 0 : index
    %168 = vector.load %arg13[%c0_74, %c0_75, %c0_76] : memref<2x1x64xf32, #tpu.memory_space<vmem>>, vector<1x1x64xf32>
    %169 = vector.shape_cast %168 : vector<1x1x64xf32> to vector<1x64xf32>
    %170 = vector.broadcast %169 : vector<1x64xf32> to vector<16x64xf32>
    %171 = arith.addf %167, %170 : vector<16x64xf32>
    %c0_77 = arith.constant 0 : index
    %c0_78 = arith.constant 0 : index
    %c0_79 = arith.constant 0 : index
    %172 = vector.load %arg14[%c0_77, %c0_78, %c0_79] : memref<2x32x128xf32, #tpu.memory_space<vmem>>, vector<1x32x128xf32>
    %173 = vector.shape_cast %172 : vector<1x32x128xf32> to vector<32x128xf32>
    %cst_80 = arith.constant dense<0.000000e+00> : vector<32x128xf32>
    %174 = tpu.matmul %1, %173, %cst_80 {dimension_numbers = #tpu.dot_dimension_numbers<[1], [0], [0], [1], [0, 0, 1, 1], [], []>} : vector<32x32xf32>, vector<32x128xf32>, vector<32x128xf32> -> vector<32x128xf32>
    %c0_81 = arith.constant 0 : index
    %c0_82 = arith.constant 0 : index
    %c0_83 = arith.constant 0 : index
    %175 = vector.load %arg15[%c0_81, %c0_82, %c0_83] : memref<2x1x128xf32, #tpu.memory_space<vmem>>, vector<1x1x128xf32>
    %176 = vector.shape_cast %175 : vector<1x1x128xf32> to vector<1x128xf32>
    %177 = vector.broadcast %176 : vector<1x128xf32> to vector<32x128xf32>
    %178 = arith.addf %174, %177 : vector<32x128xf32>
    %179 = vector.extract_strided_slice %178 {offsets = [0, 0], sizes = [32, 64], strides = [1, 1]} : vector<32x128xf32> to vector<32x64xf32>
    %180 = vector.extract_strided_slice %178 {offsets = [0, 64], sizes = [32, 64], strides = [1, 1]} : vector<32x128xf32> to vector<32x64xf32>
    %181 = vector.extract_strided_slice %171 {offsets = [0, 0], sizes = [16, 8], strides = [1, 1]} : vector<16x64xf32> to vector<16x8xf32>
    %182 = vector.extract_strided_slice %179 {offsets = [0, 0], sizes = [32, 8], strides = [1, 1]} : vector<32x64xf32> to vector<32x8xf32>
    %cst_84 = arith.constant dense<0.000000e+00> : vector<16x32xf32>
    %183 = tpu.matmul %181, %182, %cst_84 {dimension_numbers = #tpu.dot_dimension_numbers<[1], [1], [0], [0], [0, 0, 1, 0], [], []>} : vector<16x8xf32>, vector<32x8xf32>, vector<16x32xf32> -> vector<16x32xf32>
    %cst_85 = arith.constant 0.353553385 : f32
    %184 = vector.broadcast %cst_85 : f32 to vector<16x32xf32>
    %185 = arith.mulf %183, %184 : vector<16x32xf32>
    %cst_86 = arith.constant -1.000000e+30 : f32
    %186 = vector.broadcast %cst_86 : f32 to vector<16x32xf32>
    %187 = arith.select %7, %185, %186 : vector<16x32xi1>, vector<16x32xf32>
    %cst_87 = arith.constant dense<0xFF800000> : vector<16xf32>
    %188 = vector.multi_reduction <maximumf>, %187, %cst_87 [1] : vector<16x32xf32> to vector<16xf32>
    %189 = vector.shape_cast %188 : vector<16xf32> to vector<16x1xf32>
    %190 = vector.broadcast %189 : vector<16x1xf32> to vector<16x32xf32>
    %191 = arith.subf %187, %190 : vector<16x32xf32>
    %192 = math.exp %191 : vector<16x32xf32>
    %cst_88 = arith.constant dense<0.000000e+00> : vector<16xf32>
    %193 = vector.multi_reduction <add>, %192, %cst_88 [1] : vector<16x32xf32> to vector<16xf32>
    %194 = vector.shape_cast %193 : vector<16xf32> to vector<16x1xf32>
    %195 = tpu.reciprocal %194 {approx = true} : vector<16x1xf32> -> vector<16x1xf32>
    %196 = vector.broadcast %195 : vector<16x1xf32> to vector<16x32xf32>
    %197 = arith.mulf %192, %196 : vector<16x32xf32>
    %cst_89 = arith.constant 0.000000e+00 : f32
    %198 = vector.broadcast %cst_89 : f32 to vector<16x32xf32>
    %199 = arith.select %7, %197, %198 : vector<16x32xi1>, vector<16x32xf32>
    %200 = vector.extract_strided_slice %180 {offsets = [0, 0], sizes = [32, 8], strides = [1, 1]} : vector<32x64xf32> to vector<32x8xf32>
    %cst_90 = arith.constant dense<0.000000e+00> : vector<16x8xf32>
    %201 = tpu.matmul %199, %200, %cst_90 {dimension_numbers = #tpu.dot_dimension_numbers<[1], [0], [0], [1], [0, 0, 1, 1], [], []>} : vector<16x32xf32>, vector<32x8xf32>, vector<16x8xf32> -> vector<16x8xf32>
    %202 = vector.broadcast %8 : vector<16x1xf32> to vector<16x8xf32>
    %203 = arith.mulf %201, %202 : vector<16x8xf32>
    %204 = vector.extract_strided_slice %171 {offsets = [0, 8], sizes = [16, 8], strides = [1, 1]} : vector<16x64xf32> to vector<16x8xf32>
    %205 = vector.extract_strided_slice %179 {offsets = [0, 8], sizes = [32, 8], strides = [1, 1]} : vector<32x64xf32> to vector<32x8xf32>
    %cst_91 = arith.constant dense<0.000000e+00> : vector<16x32xf32>
    %206 = tpu.matmul %204, %205, %cst_91 {dimension_numbers = #tpu.dot_dimension_numbers<[1], [1], [0], [0], [0, 0, 1, 0], [], []>} : vector<16x8xf32>, vector<32x8xf32>, vector<16x32xf32> -> vector<16x32xf32>
    %cst_92 = arith.constant 0.353553385 : f32
    %207 = vector.broadcast %cst_92 : f32 to vector<16x32xf32>
    %208 = arith.mulf %206, %207 : vector<16x32xf32>
    %cst_93 = arith.constant -1.000000e+30 : f32
    %209 = vector.broadcast %cst_93 : f32 to vector<16x32xf32>
    %210 = arith.select %7, %208, %209 : vector<16x32xi1>, vector<16x32xf32>
    %cst_94 = arith.constant dense<0xFF800000> : vector<16xf32>
    %211 = vector.multi_reduction <maximumf>, %210, %cst_94 [1] : vector<16x32xf32> to vector<16xf32>
    %212 = vector.shape_cast %211 : vector<16xf32> to vector<16x1xf32>
    %213 = vector.broadcast %212 : vector<16x1xf32> to vector<16x32xf32>
    %214 = arith.subf %210, %213 : vector<16x32xf32>
    %215 = math.exp %214 : vector<16x32xf32>
    %cst_95 = arith.constant dense<0.000000e+00> : vector<16xf32>
    %216 = vector.multi_reduction <add>, %215, %cst_95 [1] : vector<16x32xf32> to vector<16xf32>
    %217 = vector.shape_cast %216 : vector<16xf32> to vector<16x1xf32>
    %218 = tpu.reciprocal %217 {approx = true} : vector<16x1xf32> -> vector<16x1xf32>
    %219 = vector.broadcast %218 : vector<16x1xf32> to vector<16x32xf32>
    %220 = arith.mulf %215, %219 : vector<16x32xf32>
    %cst_96 = arith.constant 0.000000e+00 : f32
    %221 = vector.broadcast %cst_96 : f32 to vector<16x32xf32>
    %222 = arith.select %7, %220, %221 : vector<16x32xi1>, vector<16x32xf32>
    %223 = vector.extract_strided_slice %180 {offsets = [0, 8], sizes = [32, 8], strides = [1, 1]} : vector<32x64xf32> to vector<32x8xf32>
    %cst_97 = arith.constant dense<0.000000e+00> : vector<16x8xf32>
    %224 = tpu.matmul %222, %223, %cst_97 {dimension_numbers = #tpu.dot_dimension_numbers<[1], [0], [0], [1], [0, 0, 1, 1], [], []>} : vector<16x32xf32>, vector<32x8xf32>, vector<16x8xf32> -> vector<16x8xf32>
    %225 = vector.broadcast %8 : vector<16x1xf32> to vector<16x8xf32>
    %226 = arith.mulf %224, %225 : vector<16x8xf32>
    %227 = vector.extract_strided_slice %171 {offsets = [0, 16], sizes = [16, 8], strides = [1, 1]} : vector<16x64xf32> to vector<16x8xf32>
    %228 = vector.extract_strided_slice %179 {offsets = [0, 16], sizes = [32, 8], strides = [1, 1]} : vector<32x64xf32> to vector<32x8xf32>
    %cst_98 = arith.constant dense<0.000000e+00> : vector<16x32xf32>
    %229 = tpu.matmul %227, %228, %cst_98 {dimension_numbers = #tpu.dot_dimension_numbers<[1], [1], [0], [0], [0, 0, 1, 0], [], []>} : vector<16x8xf32>, vector<32x8xf32>, vector<16x32xf32> -> vector<16x32xf32>
    %cst_99 = arith.constant 0.353553385 : f32
    %230 = vector.broadcast %cst_99 : f32 to vector<16x32xf32>
    %231 = arith.mulf %229, %230 : vector<16x32xf32>
    %cst_100 = arith.constant -1.000000e+30 : f32
    %232 = vector.broadcast %cst_100 : f32 to vector<16x32xf32>
    %233 = arith.select %7, %231, %232 : vector<16x32xi1>, vector<16x32xf32>
    %cst_101 = arith.constant dense<0xFF800000> : vector<16xf32>
    %234 = vector.multi_reduction <maximumf>, %233, %cst_101 [1] : vector<16x32xf32> to vector<16xf32>
    %235 = vector.shape_cast %234 : vector<16xf32> to vector<16x1xf32>
    %236 = vector.broadcast %235 : vector<16x1xf32> to vector<16x32xf32>
    %237 = arith.subf %233, %236 : vector<16x32xf32>
    %238 = math.exp %237 : vector<16x32xf32>
    %cst_102 = arith.constant dense<0.000000e+00> : vector<16xf32>
    %239 = vector.multi_reduction <add>, %238, %cst_102 [1] : vector<16x32xf32> to vector<16xf32>
    %240 = vector.shape_cast %239 : vector<16xf32> to vector<16x1xf32>
    %241 = tpu.reciprocal %240 {approx = true} : vector<16x1xf32> -> vector<16x1xf32>
    %242 = vector.broadcast %241 : vector<16x1xf32> to vector<16x32xf32>
    %243 = arith.mulf %238, %242 : vector<16x32xf32>
    %cst_103 = arith.constant 0.000000e+00 : f32
    %244 = vector.broadcast %cst_103 : f32 to vector<16x32xf32>
    %245 = arith.select %7, %243, %244 : vector<16x32xi1>, vector<16x32xf32>
    %246 = vector.extract_strided_slice %180 {offsets = [0, 16], sizes = [32, 8], strides = [1, 1]} : vector<32x64xf32> to vector<32x8xf32>
    %cst_104 = arith.constant dense<0.000000e+00> : vector<16x8xf32>
    %247 = tpu.matmul %245, %246, %cst_104 {dimension_numbers = #tpu.dot_dimension_numbers<[1], [0], [0], [1], [0, 0, 1, 1], [], []>} : vector<16x32xf32>, vector<32x8xf32>, vector<16x8xf32> -> vector<16x8xf32>
    %248 = vector.broadcast %8 : vector<16x1xf32> to vector<16x8xf32>
    %249 = arith.mulf %247, %248 : vector<16x8xf32>
    %250 = vector.extract_strided_slice %171 {offsets = [0, 24], sizes = [16, 8], strides = [1, 1]} : vector<16x64xf32> to vector<16x8xf32>
    %251 = vector.extract_strided_slice %179 {offsets = [0, 24], sizes = [32, 8], strides = [1, 1]} : vector<32x64xf32> to vector<32x8xf32>
    %cst_105 = arith.constant dense<0.000000e+00> : vector<16x32xf32>
    %252 = tpu.matmul %250, %251, %cst_105 {dimension_numbers = #tpu.dot_dimension_numbers<[1], [1], [0], [0], [0, 0, 1, 0], [], []>} : vector<16x8xf32>, vector<32x8xf32>, vector<16x32xf32> -> vector<16x32xf32>
    %cst_106 = arith.constant 0.353553385 : f32
    %253 = vector.broadcast %cst_106 : f32 to vector<16x32xf32>
    %254 = arith.mulf %252, %253 : vector<16x32xf32>
    %cst_107 = arith.constant -1.000000e+30 : f32
    %255 = vector.broadcast %cst_107 : f32 to vector<16x32xf32>
    %256 = arith.select %7, %254, %255 : vector<16x32xi1>, vector<16x32xf32>
    %cst_108 = arith.constant dense<0xFF800000> : vector<16xf32>
    %257 = vector.multi_reduction <maximumf>, %256, %cst_108 [1] : vector<16x32xf32> to vector<16xf32>
    %258 = vector.shape_cast %257 : vector<16xf32> to vector<16x1xf32>
    %259 = vector.broadcast %258 : vector<16x1xf32> to vector<16x32xf32>
    %260 = arith.subf %256, %259 : vector<16x32xf32>
    %261 = math.exp %260 : vector<16x32xf32>
    %cst_109 = arith.constant dense<0.000000e+00> : vector<16xf32>
    %262 = vector.multi_reduction <add>, %261, %cst_109 [1] : vector<16x32xf32> to vector<16xf32>
    %263 = vector.shape_cast %262 : vector<16xf32> to vector<16x1xf32>
    %264 = tpu.reciprocal %263 {approx = true} : vector<16x1xf32> -> vector<16x1xf32>
    %265 = vector.broadcast %264 : vector<16x1xf32> to vector<16x32xf32>
    %266 = arith.mulf %261, %265 : vector<16x32xf32>
    %cst_110 = arith.constant 0.000000e+00 : f32
    %267 = vector.broadcast %cst_110 : f32 to vector<16x32xf32>
    %268 = arith.select %7, %266, %267 : vector<16x32xi1>, vector<16x32xf32>
    %269 = vector.extract_strided_slice %180 {offsets = [0, 24], sizes = [32, 8], strides = [1, 1]} : vector<32x64xf32> to vector<32x8xf32>
    %cst_111 = arith.constant dense<0.000000e+00> : vector<16x8xf32>
    %270 = tpu.matmul %268, %269, %cst_111 {dimension_numbers = #tpu.dot_dimension_numbers<[1], [0], [0], [1], [0, 0, 1, 1], [], []>} : vector<16x32xf32>, vector<32x8xf32>, vector<16x8xf32> -> vector<16x8xf32>
    %271 = vector.broadcast %8 : vector<16x1xf32> to vector<16x8xf32>
    %272 = arith.mulf %270, %271 : vector<16x8xf32>
    %273 = vector.extract_strided_slice %171 {offsets = [0, 32], sizes = [16, 8], strides = [1, 1]} : vector<16x64xf32> to vector<16x8xf32>
    %274 = vector.extract_strided_slice %179 {offsets = [0, 32], sizes = [32, 8], strides = [1, 1]} : vector<32x64xf32> to vector<32x8xf32>
    %cst_112 = arith.constant dense<0.000000e+00> : vector<16x32xf32>
    %275 = tpu.matmul %273, %274, %cst_112 {dimension_numbers = #tpu.dot_dimension_numbers<[1], [1], [0], [0], [0, 0, 1, 0], [], []>} : vector<16x8xf32>, vector<32x8xf32>, vector<16x32xf32> -> vector<16x32xf32>
    %cst_113 = arith.constant 0.353553385 : f32
    %276 = vector.broadcast %cst_113 : f32 to vector<16x32xf32>
    %277 = arith.mulf %275, %276 : vector<16x32xf32>
    %cst_114 = arith.constant -1.000000e+30 : f32
    %278 = vector.broadcast %cst_114 : f32 to vector<16x32xf32>
    %279 = arith.select %7, %277, %278 : vector<16x32xi1>, vector<16x32xf32>
    %cst_115 = arith.constant dense<0xFF800000> : vector<16xf32>
    %280 = vector.multi_reduction <maximumf>, %279, %cst_115 [1] : vector<16x32xf32> to vector<16xf32>
    %281 = vector.shape_cast %280 : vector<16xf32> to vector<16x1xf32>
    %282 = vector.broadcast %281 : vector<16x1xf32> to vector<16x32xf32>
    %283 = arith.subf %279, %282 : vector<16x32xf32>
    %284 = math.exp %283 : vector<16x32xf32>
    %cst_116 = arith.constant dense<0.000000e+00> : vector<16xf32>
    %285 = vector.multi_reduction <add>, %284, %cst_116 [1] : vector<16x32xf32> to vector<16xf32>
    %286 = vector.shape_cast %285 : vector<16xf32> to vector<16x1xf32>
    %287 = tpu.reciprocal %286 {approx = true} : vector<16x1xf32> -> vector<16x1xf32>
    %288 = vector.broadcast %287 : vector<16x1xf32> to vector<16x32xf32>
    %289 = arith.mulf %284, %288 : vector<16x32xf32>
    %cst_117 = arith.constant 0.000000e+00 : f32
    %290 = vector.broadcast %cst_117 : f32 to vector<16x32xf32>
    %291 = arith.select %7, %289, %290 : vector<16x32xi1>, vector<16x32xf32>
    %292 = vector.extract_strided_slice %180 {offsets = [0, 32], sizes = [32, 8], strides = [1, 1]} : vector<32x64xf32> to vector<32x8xf32>
    %cst_118 = arith.constant dense<0.000000e+00> : vector<16x8xf32>
    %293 = tpu.matmul %291, %292, %cst_118 {dimension_numbers = #tpu.dot_dimension_numbers<[1], [0], [0], [1], [0, 0, 1, 1], [], []>} : vector<16x32xf32>, vector<32x8xf32>, vector<16x8xf32> -> vector<16x8xf32>
    %294 = vector.broadcast %9 : vector<16x1xf32> to vector<16x8xf32>
    %295 = arith.mulf %293, %294 : vector<16x8xf32>
    %296 = vector.extract_strided_slice %171 {offsets = [0, 40], sizes = [16, 8], strides = [1, 1]} : vector<16x64xf32> to vector<16x8xf32>
    %297 = vector.extract_strided_slice %179 {offsets = [0, 40], sizes = [32, 8], strides = [1, 1]} : vector<32x64xf32> to vector<32x8xf32>
    %cst_119 = arith.constant dense<0.000000e+00> : vector<16x32xf32>
    %298 = tpu.matmul %296, %297, %cst_119 {dimension_numbers = #tpu.dot_dimension_numbers<[1], [1], [0], [0], [0, 0, 1, 0], [], []>} : vector<16x8xf32>, vector<32x8xf32>, vector<16x32xf32> -> vector<16x32xf32>
    %cst_120 = arith.constant 0.353553385 : f32
    %299 = vector.broadcast %cst_120 : f32 to vector<16x32xf32>
    %300 = arith.mulf %298, %299 : vector<16x32xf32>
    %cst_121 = arith.constant -1.000000e+30 : f32
    %301 = vector.broadcast %cst_121 : f32 to vector<16x32xf32>
    %302 = arith.select %7, %300, %301 : vector<16x32xi1>, vector<16x32xf32>
    %cst_122 = arith.constant dense<0xFF800000> : vector<16xf32>
    %303 = vector.multi_reduction <maximumf>, %302, %cst_122 [1] : vector<16x32xf32> to vector<16xf32>
    %304 = vector.shape_cast %303 : vector<16xf32> to vector<16x1xf32>
    %305 = vector.broadcast %304 : vector<16x1xf32> to vector<16x32xf32>
    %306 = arith.subf %302, %305 : vector<16x32xf32>
    %307 = math.exp %306 : vector<16x32xf32>
    %cst_123 = arith.constant dense<0.000000e+00> : vector<16xf32>
    %308 = vector.multi_reduction <add>, %307, %cst_123 [1] : vector<16x32xf32> to vector<16xf32>
    %309 = vector.shape_cast %308 : vector<16xf32> to vector<16x1xf32>
    %310 = tpu.reciprocal %309 {approx = true} : vector<16x1xf32> -> vector<16x1xf32>
    %311 = vector.broadcast %310 : vector<16x1xf32> to vector<16x32xf32>
    %312 = arith.mulf %307, %311 : vector<16x32xf32>
    %cst_124 = arith.constant 0.000000e+00 : f32
    %313 = vector.broadcast %cst_124 : f32 to vector<16x32xf32>
    %314 = arith.select %7, %312, %313 : vector<16x32xi1>, vector<16x32xf32>
    %315 = vector.extract_strided_slice %180 {offsets = [0, 40], sizes = [32, 8], strides = [1, 1]} : vector<32x64xf32> to vector<32x8xf32>
    %cst_125 = arith.constant dense<0.000000e+00> : vector<16x8xf32>
    %316 = tpu.matmul %314, %315, %cst_125 {dimension_numbers = #tpu.dot_dimension_numbers<[1], [0], [0], [1], [0, 0, 1, 1], [], []>} : vector<16x32xf32>, vector<32x8xf32>, vector<16x8xf32> -> vector<16x8xf32>
    %317 = vector.broadcast %9 : vector<16x1xf32> to vector<16x8xf32>
    %318 = arith.mulf %316, %317 : vector<16x8xf32>
    %319 = vector.extract_strided_slice %171 {offsets = [0, 48], sizes = [16, 8], strides = [1, 1]} : vector<16x64xf32> to vector<16x8xf32>
    %320 = vector.extract_strided_slice %179 {offsets = [0, 48], sizes = [32, 8], strides = [1, 1]} : vector<32x64xf32> to vector<32x8xf32>
    %cst_126 = arith.constant dense<0.000000e+00> : vector<16x32xf32>
    %321 = tpu.matmul %319, %320, %cst_126 {dimension_numbers = #tpu.dot_dimension_numbers<[1], [1], [0], [0], [0, 0, 1, 0], [], []>} : vector<16x8xf32>, vector<32x8xf32>, vector<16x32xf32> -> vector<16x32xf32>
    %cst_127 = arith.constant 0.353553385 : f32
    %322 = vector.broadcast %cst_127 : f32 to vector<16x32xf32>
    %323 = arith.mulf %321, %322 : vector<16x32xf32>
    %cst_128 = arith.constant -1.000000e+30 : f32
    %324 = vector.broadcast %cst_128 : f32 to vector<16x32xf32>
    %325 = arith.select %7, %323, %324 : vector<16x32xi1>, vector<16x32xf32>
    %cst_129 = arith.constant dense<0xFF800000> : vector<16xf32>
    %326 = vector.multi_reduction <maximumf>, %325, %cst_129 [1] : vector<16x32xf32> to vector<16xf32>
    %327 = vector.shape_cast %326 : vector<16xf32> to vector<16x1xf32>
    %328 = vector.broadcast %327 : vector<16x1xf32> to vector<16x32xf32>
    %329 = arith.subf %325, %328 : vector<16x32xf32>
    %330 = math.exp %329 : vector<16x32xf32>
    %cst_130 = arith.constant dense<0.000000e+00> : vector<16xf32>
    %331 = vector.multi_reduction <add>, %330, %cst_130 [1] : vector<16x32xf32> to vector<16xf32>
    %332 = vector.shape_cast %331 : vector<16xf32> to vector<16x1xf32>
    %333 = tpu.reciprocal %332 {approx = true} : vector<16x1xf32> -> vector<16x1xf32>
    %334 = vector.broadcast %333 : vector<16x1xf32> to vector<16x32xf32>
    %335 = arith.mulf %330, %334 : vector<16x32xf32>
    %cst_131 = arith.constant 0.000000e+00 : f32
    %336 = vector.broadcast %cst_131 : f32 to vector<16x32xf32>
    %337 = arith.select %7, %335, %336 : vector<16x32xi1>, vector<16x32xf32>
    %338 = vector.extract_strided_slice %180 {offsets = [0, 48], sizes = [32, 8], strides = [1, 1]} : vector<32x64xf32> to vector<32x8xf32>
    %cst_132 = arith.constant dense<0.000000e+00> : vector<16x8xf32>
    %339 = tpu.matmul %337, %338, %cst_132 {dimension_numbers = #tpu.dot_dimension_numbers<[1], [0], [0], [1], [0, 0, 1, 1], [], []>} : vector<16x32xf32>, vector<32x8xf32>, vector<16x8xf32> -> vector<16x8xf32>
    %340 = vector.broadcast %9 : vector<16x1xf32> to vector<16x8xf32>
    %341 = arith.mulf %339, %340 : vector<16x8xf32>
    %342 = vector.extract_strided_slice %171 {offsets = [0, 56], sizes = [16, 8], strides = [1, 1]} : vector<16x64xf32> to vector<16x8xf32>
    %343 = vector.extract_strided_slice %179 {offsets = [0, 56], sizes = [32, 8], strides = [1, 1]} : vector<32x64xf32> to vector<32x8xf32>
    %cst_133 = arith.constant dense<0.000000e+00> : vector<16x32xf32>
    %344 = tpu.matmul %342, %343, %cst_133 {dimension_numbers = #tpu.dot_dimension_numbers<[1], [1], [0], [0], [0, 0, 1, 0], [], []>} : vector<16x8xf32>, vector<32x8xf32>, vector<16x32xf32> -> vector<16x32xf32>
    %cst_134 = arith.constant 0.353553385 : f32
    %345 = vector.broadcast %cst_134 : f32 to vector<16x32xf32>
    %346 = arith.mulf %344, %345 : vector<16x32xf32>
    %cst_135 = arith.constant -1.000000e+30 : f32
    %347 = vector.broadcast %cst_135 : f32 to vector<16x32xf32>
    %348 = arith.select %7, %346, %347 : vector<16x32xi1>, vector<16x32xf32>
    %cst_136 = arith.constant dense<0xFF800000> : vector<16xf32>
    %349 = vector.multi_reduction <maximumf>, %348, %cst_136 [1] : vector<16x32xf32> to vector<16xf32>
    %350 = vector.shape_cast %349 : vector<16xf32> to vector<16x1xf32>
    %351 = vector.broadcast %350 : vector<16x1xf32> to vector<16x32xf32>
    %352 = arith.subf %348, %351 : vector<16x32xf32>
    %353 = math.exp %352 : vector<16x32xf32>
    %cst_137 = arith.constant dense<0.000000e+00> : vector<16xf32>
    %354 = vector.multi_reduction <add>, %353, %cst_137 [1] : vector<16x32xf32> to vector<16xf32>
    %355 = vector.shape_cast %354 : vector<16xf32> to vector<16x1xf32>
    %356 = tpu.reciprocal %355 {approx = true} : vector<16x1xf32> -> vector<16x1xf32>
    %357 = vector.broadcast %356 : vector<16x1xf32> to vector<16x32xf32>
    %358 = arith.mulf %353, %357 : vector<16x32xf32>
    %cst_138 = arith.constant 0.000000e+00 : f32
    %359 = vector.broadcast %cst_138 : f32 to vector<16x32xf32>
    %360 = arith.select %7, %358, %359 : vector<16x32xi1>, vector<16x32xf32>
    %361 = vector.extract_strided_slice %180 {offsets = [0, 56], sizes = [32, 8], strides = [1, 1]} : vector<32x64xf32> to vector<32x8xf32>
    %cst_139 = arith.constant dense<0.000000e+00> : vector<16x8xf32>
    %362 = tpu.matmul %360, %361, %cst_139 {dimension_numbers = #tpu.dot_dimension_numbers<[1], [0], [0], [1], [0, 0, 1, 1], [], []>} : vector<16x32xf32>, vector<32x8xf32>, vector<16x8xf32> -> vector<16x8xf32>
    %363 = vector.broadcast %9 : vector<16x1xf32> to vector<16x8xf32>
    %364 = arith.mulf %362, %363 : vector<16x8xf32>
    %365 = tpu.concatenate %203, %226, %249, %272, %295, %318, %341, %364 in 1 : vector<16x8xf32>, vector<16x8xf32>, vector<16x8xf32>, vector<16x8xf32>, vector<16x8xf32>, vector<16x8xf32>, vector<16x8xf32>, vector<16x8xf32> -> vector<16x64xf32>
    %c0_140 = arith.constant 0 : index
    %c0_141 = arith.constant 0 : index
    %c0_142 = arith.constant 0 : index
    %366 = vector.load %arg17[%c0_140, %c0_141, %c0_142] : memref<2x2x32xf32, #tpu.memory_space<vmem>>, vector<1x2x32xf32>
    %367 = vector.shape_cast %366 : vector<1x2x32xf32> to vector<2x32xf32>
    %368 = vector.extract_strided_slice %367 {offsets = [0, 0], sizes = [1, 32], strides = [1, 1]} : vector<2x32xf32> to vector<1x32xf32>
    %369 = vector.broadcast %8 : vector<16x1xf32> to vector<16x32xf32>
    %370 = vector.broadcast %368 : vector<1x32xf32> to vector<16x32xf32>
    %371 = arith.mulf %369, %370 : vector<16x32xf32>
    %372 = vector.extract_strided_slice %367 {offsets = [1, 0], sizes = [1, 32], strides = [1, 1]} : vector<2x32xf32> to vector<1x32xf32>
    %373 = vector.broadcast %9 : vector<16x1xf32> to vector<16x32xf32>
    %374 = vector.broadcast %372 : vector<1x32xf32> to vector<16x32xf32>
    %375 = arith.mulf %373, %374 : vector<16x32xf32>
    %376 = arith.addf %371, %375 : vector<16x32xf32>
    %c0_143 = arith.constant 0 : index
    %c0_144 = arith.constant 0 : index
    %c0_145 = arith.constant 0 : index
    %377 = vector.load %arg16[%c0_143, %c0_144, %c0_145] : memref<2x64x32xf32, #tpu.memory_space<vmem>>, vector<1x64x32xf32>
    %378 = vector.shape_cast %377 : vector<1x64x32xf32> to vector<64x32xf32>
    %cst_146 = arith.constant dense<0.000000e+00> : vector<16x32xf32>
    %379 = tpu.matmul %365, %378, %cst_146 {dimension_numbers = #tpu.dot_dimension_numbers<[1], [0], [0], [1], [0, 0, 1, 1], [], []>} : vector<16x64xf32>, vector<64x32xf32>, vector<16x32xf32> -> vector<16x32xf32>
    %380 = arith.addf %140, %379 : vector<16x32xf32>
    %381 = arith.addf %380, %376 : vector<16x32xf32>
    %382 = vector.extract_strided_slice %11 {offsets = [2, 0], sizes = [1, 32], strides = [1, 1]} : vector<3x32xf32> to vector<1x32xf32>
    %383 = vector.extract_strided_slice %13 {offsets = [2, 0], sizes = [1, 32], strides = [1, 1]} : vector<3x32xf32> to vector<1x32xf32>
    %cst_147 = arith.constant dense<0.000000e+00> : vector<16xf32>
    %384 = vector.multi_reduction <add>, %381, %cst_147 [1] : vector<16x32xf32> to vector<16xf32>
    %385 = vector.shape_cast %384 : vector<16xf32> to vector<16x1xf32>
    %cst_148 = arith.constant 3.200000e+01 : f32
    %386 = vector.broadcast %cst_148 : f32 to vector<16x1xf32>
    %387 = arith.divf %385, %386 : vector<16x1xf32>
    %388 = vector.broadcast %387 : vector<16x1xf32> to vector<16x32xf32>
    %389 = arith.subf %381, %388 : vector<16x32xf32>
    %390 = arith.mulf %389, %389 : vector<16x32xf32>
    %cst_149 = arith.constant dense<0.000000e+00> : vector<16xf32>
    %391 = vector.multi_reduction <add>, %390, %cst_149 [1] : vector<16x32xf32> to vector<16xf32>
    %392 = vector.shape_cast %391 : vector<16xf32> to vector<16x1xf32>
    %cst_150 = arith.constant 3.200000e+01 : f32
    %393 = vector.broadcast %cst_150 : f32 to vector<16x1xf32>
    %394 = arith.divf %392, %393 : vector<16x1xf32>
    %395 = vector.broadcast %387 : vector<16x1xf32> to vector<16x32xf32>
    %396 = arith.subf %381, %395 : vector<16x32xf32>
    %cst_151 = arith.constant 9.99999996E-13 : f32
    %397 = vector.broadcast %cst_151 : f32 to vector<16x1xf32>
    %398 = arith.addf %394, %397 : vector<16x1xf32>
    %399 = math.rsqrt %398 : vector<16x1xf32>
    %400 = vector.broadcast %399 : vector<16x1xf32> to vector<16x32xf32>
    %401 = arith.mulf %396, %400 : vector<16x32xf32>
    %402 = vector.broadcast %382 : vector<1x32xf32> to vector<16x32xf32>
    %403 = arith.mulf %401, %402 : vector<16x32xf32>
    %404 = vector.broadcast %383 : vector<1x32xf32> to vector<16x32xf32>
    %405 = arith.addf %403, %404 : vector<16x32xf32>
    %c0_152 = arith.constant 0 : index
    %c0_153 = arith.constant 0 : index
    %c0_154 = arith.constant 0 : index
    %406 = vector.load %arg18[%c0_152, %c0_153, %c0_154] : memref<2x32x64xf32, #tpu.memory_space<vmem>>, vector<1x32x64xf32>
    %407 = vector.shape_cast %406 : vector<1x32x64xf32> to vector<32x64xf32>
    %cst_155 = arith.constant dense<0.000000e+00> : vector<16x64xf32>
    %408 = tpu.matmul %405, %407, %cst_155 {dimension_numbers = #tpu.dot_dimension_numbers<[1], [0], [0], [1], [0, 0, 1, 1], [], []>} : vector<16x32xf32>, vector<32x64xf32>, vector<16x64xf32> -> vector<16x64xf32>
    %c0_156 = arith.constant 0 : index
    %c0_157 = arith.constant 0 : index
    %c0_158 = arith.constant 0 : index
    %409 = vector.load %arg19[%c0_156, %c0_157, %c0_158] : memref<2x1x64xf32, #tpu.memory_space<vmem>>, vector<1x1x64xf32>
    %410 = vector.shape_cast %409 : vector<1x1x64xf32> to vector<1x64xf32>
    %411 = vector.broadcast %410 : vector<1x64xf32> to vector<16x64xf32>
    %412 = arith.addf %408, %411 : vector<16x64xf32>
    %cst_159 = arith.constant 0.000000e+00 : f32
    %413 = vector.broadcast %cst_159 : f32 to vector<16x64xf32>
    %414 = arith.maximumf %412, %413 : vector<16x64xf32>
    %c0_160 = arith.constant 0 : index
    %c0_161 = arith.constant 0 : index
    %c0_162 = arith.constant 0 : index
    %415 = vector.load %arg20[%c0_160, %c0_161, %c0_162] : memref<2x64x32xf32, #tpu.memory_space<vmem>>, vector<1x64x32xf32>
    %416 = vector.shape_cast %415 : vector<1x64x32xf32> to vector<64x32xf32>
    %cst_163 = arith.constant dense<0.000000e+00> : vector<16x32xf32>
    %417 = tpu.matmul %414, %416, %cst_163 {dimension_numbers = #tpu.dot_dimension_numbers<[1], [0], [0], [1], [0, 0, 1, 1], [], []>} : vector<16x64xf32>, vector<64x32xf32>, vector<16x32xf32> -> vector<16x32xf32>
    %418 = arith.addf %381, %417 : vector<16x32xf32>
    %c0_164 = arith.constant 0 : index
    %c0_165 = arith.constant 0 : index
    %c0_166 = arith.constant 0 : index
    %419 = vector.load %arg21[%c0_164, %c0_165, %c0_166] : memref<2x1x32xf32, #tpu.memory_space<vmem>>, vector<1x1x32xf32>
    %420 = vector.shape_cast %419 : vector<1x1x32xf32> to vector<1x32xf32>
    %421 = vector.broadcast %420 : vector<1x32xf32> to vector<16x32xf32>
    %422 = arith.addf %418, %421 : vector<16x32xf32>
    %c1 = arith.constant 1 : index
    %c0_167 = arith.constant 0 : index
    %c0_168 = arith.constant 0 : index
    %423 = vector.load %arg6[%c1, %c0_167, %c0_168] : memref<2x3x32xf32, #tpu.memory_space<vmem>>, vector<1x3x32xf32>
    %424 = vector.shape_cast %423 : vector<1x3x32xf32> to vector<3x32xf32>
    %c1_169 = arith.constant 1 : index
    %c0_170 = arith.constant 0 : index
    %c0_171 = arith.constant 0 : index
    %425 = vector.load %arg7[%c1_169, %c0_170, %c0_171] : memref<2x3x32xf32, #tpu.memory_space<vmem>>, vector<1x3x32xf32>
    %426 = vector.shape_cast %425 : vector<1x3x32xf32> to vector<3x32xf32>
    %427 = vector.extract_strided_slice %424 {offsets = [0, 0], sizes = [1, 32], strides = [1, 1]} : vector<3x32xf32> to vector<1x32xf32>
    %428 = vector.extract_strided_slice %426 {offsets = [0, 0], sizes = [1, 32], strides = [1, 1]} : vector<3x32xf32> to vector<1x32xf32>
    %cst_172 = arith.constant dense<0.000000e+00> : vector<16xf32>
    %429 = vector.multi_reduction <add>, %422, %cst_172 [1] : vector<16x32xf32> to vector<16xf32>
    %430 = vector.shape_cast %429 : vector<16xf32> to vector<16x1xf32>
    %cst_173 = arith.constant 3.200000e+01 : f32
    %431 = vector.broadcast %cst_173 : f32 to vector<16x1xf32>
    %432 = arith.divf %430, %431 : vector<16x1xf32>
    %433 = vector.broadcast %432 : vector<16x1xf32> to vector<16x32xf32>
    %434 = arith.subf %422, %433 : vector<16x32xf32>
    %435 = arith.mulf %434, %434 : vector<16x32xf32>
    %cst_174 = arith.constant dense<0.000000e+00> : vector<16xf32>
    %436 = vector.multi_reduction <add>, %435, %cst_174 [1] : vector<16x32xf32> to vector<16xf32>
    %437 = vector.shape_cast %436 : vector<16xf32> to vector<16x1xf32>
    %cst_175 = arith.constant 3.200000e+01 : f32
    %438 = vector.broadcast %cst_175 : f32 to vector<16x1xf32>
    %439 = arith.divf %437, %438 : vector<16x1xf32>
    %440 = vector.broadcast %432 : vector<16x1xf32> to vector<16x32xf32>
    %441 = arith.subf %422, %440 : vector<16x32xf32>
    %cst_176 = arith.constant 9.99999996E-13 : f32
    %442 = vector.broadcast %cst_176 : f32 to vector<16x1xf32>
    %443 = arith.addf %439, %442 : vector<16x1xf32>
    %444 = math.rsqrt %443 : vector<16x1xf32>
    %445 = vector.broadcast %444 : vector<16x1xf32> to vector<16x32xf32>
    %446 = arith.mulf %441, %445 : vector<16x32xf32>
    %447 = vector.broadcast %427 : vector<1x32xf32> to vector<16x32xf32>
    %448 = arith.mulf %446, %447 : vector<16x32xf32>
    %449 = vector.broadcast %428 : vector<1x32xf32> to vector<16x32xf32>
    %450 = arith.addf %448, %449 : vector<16x32xf32>
    %c1_177 = arith.constant 1 : index
    %c0_178 = arith.constant 0 : index
    %c0_179 = arith.constant 0 : index
    %451 = vector.load %arg8[%c1_177, %c0_178, %c0_179] : memref<2x32x96xf32, #tpu.memory_space<vmem>>, vector<1x32x96xf32>
    %452 = vector.shape_cast %451 : vector<1x32x96xf32> to vector<32x96xf32>
    %cst_180 = arith.constant dense<0.000000e+00> : vector<16x96xf32>
    %453 = tpu.matmul %450, %452, %cst_180 {dimension_numbers = #tpu.dot_dimension_numbers<[1], [0], [0], [1], [0, 0, 1, 1], [], []>} : vector<16x32xf32>, vector<32x96xf32>, vector<16x96xf32> -> vector<16x96xf32>
    %c1_181 = arith.constant 1 : index
    %c0_182 = arith.constant 0 : index
    %c0_183 = arith.constant 0 : index
    %454 = vector.load %arg9[%c1_181, %c0_182, %c0_183] : memref<2x1x96xf32, #tpu.memory_space<vmem>>, vector<1x1x96xf32>
    %455 = vector.shape_cast %454 : vector<1x1x96xf32> to vector<1x96xf32>
    %456 = vector.broadcast %455 : vector<1x96xf32> to vector<16x96xf32>
    %457 = arith.addf %453, %456 : vector<16x96xf32>
    %458 = vector.extract_strided_slice %457 {offsets = [0, 0], sizes = [16, 32], strides = [1, 1]} : vector<16x96xf32> to vector<16x32xf32>
    %459 = vector.extract_strided_slice %457 {offsets = [0, 32], sizes = [16, 32], strides = [1, 1]} : vector<16x96xf32> to vector<16x32xf32>
    %460 = vector.extract_strided_slice %457 {offsets = [0, 64], sizes = [16, 32], strides = [1, 1]} : vector<16x96xf32> to vector<16x32xf32>
    %461 = vector.extract_strided_slice %458 {offsets = [0, 0], sizes = [16, 8], strides = [1, 1]} : vector<16x32xf32> to vector<16x8xf32>
    %462 = vector.extract_strided_slice %459 {offsets = [0, 0], sizes = [16, 8], strides = [1, 1]} : vector<16x32xf32> to vector<16x8xf32>
    %cst_184 = arith.constant dense<0.000000e+00> : vector<16x16xf32>
    %463 = tpu.matmul %461, %462, %cst_184 {dimension_numbers = #tpu.dot_dimension_numbers<[1], [1], [0], [0], [0, 0, 1, 0], [], []>} : vector<16x8xf32>, vector<16x8xf32>, vector<16x16xf32> -> vector<16x16xf32>
    %cst_185 = arith.constant 0.353553385 : f32
    %464 = vector.broadcast %cst_185 : f32 to vector<16x16xf32>
    %465 = arith.mulf %463, %464 : vector<16x16xf32>
    %cst_186 = arith.constant -1.000000e+30 : f32
    %466 = vector.broadcast %cst_186 : f32 to vector<16x16xf32>
    %467 = arith.select %4, %465, %466 : vector<16x16xi1>, vector<16x16xf32>
    %cst_187 = arith.constant dense<0xFF800000> : vector<16xf32>
    %468 = vector.multi_reduction <maximumf>, %467, %cst_187 [1] : vector<16x16xf32> to vector<16xf32>
    %469 = vector.shape_cast %468 : vector<16xf32> to vector<16x1xf32>
    %470 = vector.broadcast %469 : vector<16x1xf32> to vector<16x16xf32>
    %471 = arith.subf %467, %470 : vector<16x16xf32>
    %472 = math.exp %471 : vector<16x16xf32>
    %cst_188 = arith.constant dense<0.000000e+00> : vector<16xf32>
    %473 = vector.multi_reduction <add>, %472, %cst_188 [1] : vector<16x16xf32> to vector<16xf32>
    %474 = vector.shape_cast %473 : vector<16xf32> to vector<16x1xf32>
    %475 = tpu.reciprocal %474 {approx = true} : vector<16x1xf32> -> vector<16x1xf32>
    %476 = vector.broadcast %475 : vector<16x1xf32> to vector<16x16xf32>
    %477 = arith.mulf %472, %476 : vector<16x16xf32>
    %cst_189 = arith.constant 0.000000e+00 : f32
    %478 = vector.broadcast %cst_189 : f32 to vector<16x16xf32>
    %479 = arith.select %4, %477, %478 : vector<16x16xi1>, vector<16x16xf32>
    %480 = vector.extract_strided_slice %460 {offsets = [0, 0], sizes = [16, 8], strides = [1, 1]} : vector<16x32xf32> to vector<16x8xf32>
    %cst_190 = arith.constant dense<0.000000e+00> : vector<16x8xf32>
    %481 = tpu.matmul %479, %480, %cst_190 {dimension_numbers = #tpu.dot_dimension_numbers<[1], [0], [0], [1], [0, 0, 1, 1], [], []>} : vector<16x16xf32>, vector<16x8xf32>, vector<16x8xf32> -> vector<16x8xf32>
    %482 = vector.extract_strided_slice %458 {offsets = [0, 8], sizes = [16, 8], strides = [1, 1]} : vector<16x32xf32> to vector<16x8xf32>
    %483 = vector.extract_strided_slice %459 {offsets = [0, 8], sizes = [16, 8], strides = [1, 1]} : vector<16x32xf32> to vector<16x8xf32>
    %cst_191 = arith.constant dense<0.000000e+00> : vector<16x16xf32>
    %484 = tpu.matmul %482, %483, %cst_191 {dimension_numbers = #tpu.dot_dimension_numbers<[1], [1], [0], [0], [0, 0, 1, 0], [], []>} : vector<16x8xf32>, vector<16x8xf32>, vector<16x16xf32> -> vector<16x16xf32>
    %cst_192 = arith.constant 0.353553385 : f32
    %485 = vector.broadcast %cst_192 : f32 to vector<16x16xf32>
    %486 = arith.mulf %484, %485 : vector<16x16xf32>
    %cst_193 = arith.constant -1.000000e+30 : f32
    %487 = vector.broadcast %cst_193 : f32 to vector<16x16xf32>
    %488 = arith.select %4, %486, %487 : vector<16x16xi1>, vector<16x16xf32>
    %cst_194 = arith.constant dense<0xFF800000> : vector<16xf32>
    %489 = vector.multi_reduction <maximumf>, %488, %cst_194 [1] : vector<16x16xf32> to vector<16xf32>
    %490 = vector.shape_cast %489 : vector<16xf32> to vector<16x1xf32>
    %491 = vector.broadcast %490 : vector<16x1xf32> to vector<16x16xf32>
    %492 = arith.subf %488, %491 : vector<16x16xf32>
    %493 = math.exp %492 : vector<16x16xf32>
    %cst_195 = arith.constant dense<0.000000e+00> : vector<16xf32>
    %494 = vector.multi_reduction <add>, %493, %cst_195 [1] : vector<16x16xf32> to vector<16xf32>
    %495 = vector.shape_cast %494 : vector<16xf32> to vector<16x1xf32>
    %496 = tpu.reciprocal %495 {approx = true} : vector<16x1xf32> -> vector<16x1xf32>
    %497 = vector.broadcast %496 : vector<16x1xf32> to vector<16x16xf32>
    %498 = arith.mulf %493, %497 : vector<16x16xf32>
    %cst_196 = arith.constant 0.000000e+00 : f32
    %499 = vector.broadcast %cst_196 : f32 to vector<16x16xf32>
    %500 = arith.select %4, %498, %499 : vector<16x16xi1>, vector<16x16xf32>
    %501 = vector.extract_strided_slice %460 {offsets = [0, 8], sizes = [16, 8], strides = [1, 1]} : vector<16x32xf32> to vector<16x8xf32>
    %cst_197 = arith.constant dense<0.000000e+00> : vector<16x8xf32>
    %502 = tpu.matmul %500, %501, %cst_197 {dimension_numbers = #tpu.dot_dimension_numbers<[1], [0], [0], [1], [0, 0, 1, 1], [], []>} : vector<16x16xf32>, vector<16x8xf32>, vector<16x8xf32> -> vector<16x8xf32>
    %503 = vector.extract_strided_slice %458 {offsets = [0, 16], sizes = [16, 8], strides = [1, 1]} : vector<16x32xf32> to vector<16x8xf32>
    %504 = vector.extract_strided_slice %459 {offsets = [0, 16], sizes = [16, 8], strides = [1, 1]} : vector<16x32xf32> to vector<16x8xf32>
    %cst_198 = arith.constant dense<0.000000e+00> : vector<16x16xf32>
    %505 = tpu.matmul %503, %504, %cst_198 {dimension_numbers = #tpu.dot_dimension_numbers<[1], [1], [0], [0], [0, 0, 1, 0], [], []>} : vector<16x8xf32>, vector<16x8xf32>, vector<16x16xf32> -> vector<16x16xf32>
    %cst_199 = arith.constant 0.353553385 : f32
    %506 = vector.broadcast %cst_199 : f32 to vector<16x16xf32>
    %507 = arith.mulf %505, %506 : vector<16x16xf32>
    %cst_200 = arith.constant -1.000000e+30 : f32
    %508 = vector.broadcast %cst_200 : f32 to vector<16x16xf32>
    %509 = arith.select %4, %507, %508 : vector<16x16xi1>, vector<16x16xf32>
    %cst_201 = arith.constant dense<0xFF800000> : vector<16xf32>
    %510 = vector.multi_reduction <maximumf>, %509, %cst_201 [1] : vector<16x16xf32> to vector<16xf32>
    %511 = vector.shape_cast %510 : vector<16xf32> to vector<16x1xf32>
    %512 = vector.broadcast %511 : vector<16x1xf32> to vector<16x16xf32>
    %513 = arith.subf %509, %512 : vector<16x16xf32>
    %514 = math.exp %513 : vector<16x16xf32>
    %cst_202 = arith.constant dense<0.000000e+00> : vector<16xf32>
    %515 = vector.multi_reduction <add>, %514, %cst_202 [1] : vector<16x16xf32> to vector<16xf32>
    %516 = vector.shape_cast %515 : vector<16xf32> to vector<16x1xf32>
    %517 = tpu.reciprocal %516 {approx = true} : vector<16x1xf32> -> vector<16x1xf32>
    %518 = vector.broadcast %517 : vector<16x1xf32> to vector<16x16xf32>
    %519 = arith.mulf %514, %518 : vector<16x16xf32>
    %cst_203 = arith.constant 0.000000e+00 : f32
    %520 = vector.broadcast %cst_203 : f32 to vector<16x16xf32>
    %521 = arith.select %4, %519, %520 : vector<16x16xi1>, vector<16x16xf32>
    %522 = vector.extract_strided_slice %460 {offsets = [0, 16], sizes = [16, 8], strides = [1, 1]} : vector<16x32xf32> to vector<16x8xf32>
    %cst_204 = arith.constant dense<0.000000e+00> : vector<16x8xf32>
    %523 = tpu.matmul %521, %522, %cst_204 {dimension_numbers = #tpu.dot_dimension_numbers<[1], [0], [0], [1], [0, 0, 1, 1], [], []>} : vector<16x16xf32>, vector<16x8xf32>, vector<16x8xf32> -> vector<16x8xf32>
    %524 = vector.extract_strided_slice %458 {offsets = [0, 24], sizes = [16, 8], strides = [1, 1]} : vector<16x32xf32> to vector<16x8xf32>
    %525 = vector.extract_strided_slice %459 {offsets = [0, 24], sizes = [16, 8], strides = [1, 1]} : vector<16x32xf32> to vector<16x8xf32>
    %cst_205 = arith.constant dense<0.000000e+00> : vector<16x16xf32>
    %526 = tpu.matmul %524, %525, %cst_205 {dimension_numbers = #tpu.dot_dimension_numbers<[1], [1], [0], [0], [0, 0, 1, 0], [], []>} : vector<16x8xf32>, vector<16x8xf32>, vector<16x16xf32> -> vector<16x16xf32>
    %cst_206 = arith.constant 0.353553385 : f32
    %527 = vector.broadcast %cst_206 : f32 to vector<16x16xf32>
    %528 = arith.mulf %526, %527 : vector<16x16xf32>
    %cst_207 = arith.constant -1.000000e+30 : f32
    %529 = vector.broadcast %cst_207 : f32 to vector<16x16xf32>
    %530 = arith.select %4, %528, %529 : vector<16x16xi1>, vector<16x16xf32>
    %cst_208 = arith.constant dense<0xFF800000> : vector<16xf32>
    %531 = vector.multi_reduction <maximumf>, %530, %cst_208 [1] : vector<16x16xf32> to vector<16xf32>
    %532 = vector.shape_cast %531 : vector<16xf32> to vector<16x1xf32>
    %533 = vector.broadcast %532 : vector<16x1xf32> to vector<16x16xf32>
    %534 = arith.subf %530, %533 : vector<16x16xf32>
    %535 = math.exp %534 : vector<16x16xf32>
    %cst_209 = arith.constant dense<0.000000e+00> : vector<16xf32>
    %536 = vector.multi_reduction <add>, %535, %cst_209 [1] : vector<16x16xf32> to vector<16xf32>
    %537 = vector.shape_cast %536 : vector<16xf32> to vector<16x1xf32>
    %538 = tpu.reciprocal %537 {approx = true} : vector<16x1xf32> -> vector<16x1xf32>
    %539 = vector.broadcast %538 : vector<16x1xf32> to vector<16x16xf32>
    %540 = arith.mulf %535, %539 : vector<16x16xf32>
    %cst_210 = arith.constant 0.000000e+00 : f32
    %541 = vector.broadcast %cst_210 : f32 to vector<16x16xf32>
    %542 = arith.select %4, %540, %541 : vector<16x16xi1>, vector<16x16xf32>
    %543 = vector.extract_strided_slice %460 {offsets = [0, 24], sizes = [16, 8], strides = [1, 1]} : vector<16x32xf32> to vector<16x8xf32>
    %cst_211 = arith.constant dense<0.000000e+00> : vector<16x8xf32>
    %544 = tpu.matmul %542, %543, %cst_211 {dimension_numbers = #tpu.dot_dimension_numbers<[1], [0], [0], [1], [0, 0, 1, 1], [], []>} : vector<16x16xf32>, vector<16x8xf32>, vector<16x8xf32> -> vector<16x8xf32>
    %545 = tpu.concatenate %481, %502, %523, %544 in 1 : vector<16x8xf32>, vector<16x8xf32>, vector<16x8xf32>, vector<16x8xf32> -> vector<16x32xf32>
    %c1_212 = arith.constant 1 : index
    %c0_213 = arith.constant 0 : index
    %c0_214 = arith.constant 0 : index
    %546 = vector.load %arg10[%c1_212, %c0_213, %c0_214] : memref<2x32x32xf32, #tpu.memory_space<vmem>>, vector<1x32x32xf32>
    %547 = vector.shape_cast %546 : vector<1x32x32xf32> to vector<32x32xf32>
    %cst_215 = arith.constant dense<0.000000e+00> : vector<16x32xf32>
    %548 = tpu.matmul %545, %547, %cst_215 {dimension_numbers = #tpu.dot_dimension_numbers<[1], [0], [0], [1], [0, 0, 1, 1], [], []>} : vector<16x32xf32>, vector<32x32xf32>, vector<16x32xf32> -> vector<16x32xf32>
    %549 = arith.addf %422, %548 : vector<16x32xf32>
    %c1_216 = arith.constant 1 : index
    %c0_217 = arith.constant 0 : index
    %c0_218 = arith.constant 0 : index
    %550 = vector.load %arg11[%c1_216, %c0_217, %c0_218] : memref<2x1x32xf32, #tpu.memory_space<vmem>>, vector<1x1x32xf32>
    %551 = vector.shape_cast %550 : vector<1x1x32xf32> to vector<1x32xf32>
    %552 = vector.broadcast %551 : vector<1x32xf32> to vector<16x32xf32>
    %553 = arith.addf %549, %552 : vector<16x32xf32>
    %554 = vector.extract_strided_slice %424 {offsets = [1, 0], sizes = [1, 32], strides = [1, 1]} : vector<3x32xf32> to vector<1x32xf32>
    %555 = vector.extract_strided_slice %426 {offsets = [1, 0], sizes = [1, 32], strides = [1, 1]} : vector<3x32xf32> to vector<1x32xf32>
    %cst_219 = arith.constant dense<0.000000e+00> : vector<16xf32>
    %556 = vector.multi_reduction <add>, %553, %cst_219 [1] : vector<16x32xf32> to vector<16xf32>
    %557 = vector.shape_cast %556 : vector<16xf32> to vector<16x1xf32>
    %cst_220 = arith.constant 3.200000e+01 : f32
    %558 = vector.broadcast %cst_220 : f32 to vector<16x1xf32>
    %559 = arith.divf %557, %558 : vector<16x1xf32>
    %560 = vector.broadcast %559 : vector<16x1xf32> to vector<16x32xf32>
    %561 = arith.subf %553, %560 : vector<16x32xf32>
    %562 = arith.mulf %561, %561 : vector<16x32xf32>
    %cst_221 = arith.constant dense<0.000000e+00> : vector<16xf32>
    %563 = vector.multi_reduction <add>, %562, %cst_221 [1] : vector<16x32xf32> to vector<16xf32>
    %564 = vector.shape_cast %563 : vector<16xf32> to vector<16x1xf32>
    %cst_222 = arith.constant 3.200000e+01 : f32
    %565 = vector.broadcast %cst_222 : f32 to vector<16x1xf32>
    %566 = arith.divf %564, %565 : vector<16x1xf32>
    %567 = vector.broadcast %559 : vector<16x1xf32> to vector<16x32xf32>
    %568 = arith.subf %553, %567 : vector<16x32xf32>
    %cst_223 = arith.constant 9.99999996E-13 : f32
    %569 = vector.broadcast %cst_223 : f32 to vector<16x1xf32>
    %570 = arith.addf %566, %569 : vector<16x1xf32>
    %571 = math.rsqrt %570 : vector<16x1xf32>
    %572 = vector.broadcast %571 : vector<16x1xf32> to vector<16x32xf32>
    %573 = arith.mulf %568, %572 : vector<16x32xf32>
    %574 = vector.broadcast %554 : vector<1x32xf32> to vector<16x32xf32>
    %575 = arith.mulf %573, %574 : vector<16x32xf32>
    %576 = vector.broadcast %555 : vector<1x32xf32> to vector<16x32xf32>
    %577 = arith.addf %575, %576 : vector<16x32xf32>
    %c1_224 = arith.constant 1 : index
    %c0_225 = arith.constant 0 : index
    %c0_226 = arith.constant 0 : index
    %578 = vector.load %arg12[%c1_224, %c0_225, %c0_226] : memref<2x32x64xf32, #tpu.memory_space<vmem>>, vector<1x32x64xf32>
    %579 = vector.shape_cast %578 : vector<1x32x64xf32> to vector<32x64xf32>
    %cst_227 = arith.constant dense<0.000000e+00> : vector<16x64xf32>
    %580 = tpu.matmul %577, %579, %cst_227 {dimension_numbers = #tpu.dot_dimension_numbers<[1], [0], [0], [1], [0, 0, 1, 1], [], []>} : vector<16x32xf32>, vector<32x64xf32>, vector<16x64xf32> -> vector<16x64xf32>
    %c1_228 = arith.constant 1 : index
    %c0_229 = arith.constant 0 : index
    %c0_230 = arith.constant 0 : index
    %581 = vector.load %arg13[%c1_228, %c0_229, %c0_230] : memref<2x1x64xf32, #tpu.memory_space<vmem>>, vector<1x1x64xf32>
    %582 = vector.shape_cast %581 : vector<1x1x64xf32> to vector<1x64xf32>
    %583 = vector.broadcast %582 : vector<1x64xf32> to vector<16x64xf32>
    %584 = arith.addf %580, %583 : vector<16x64xf32>
    %c1_231 = arith.constant 1 : index
    %c0_232 = arith.constant 0 : index
    %c0_233 = arith.constant 0 : index
    %585 = vector.load %arg14[%c1_231, %c0_232, %c0_233] : memref<2x32x128xf32, #tpu.memory_space<vmem>>, vector<1x32x128xf32>
    %586 = vector.shape_cast %585 : vector<1x32x128xf32> to vector<32x128xf32>
    %cst_234 = arith.constant dense<0.000000e+00> : vector<32x128xf32>
    %587 = tpu.matmul %1, %586, %cst_234 {dimension_numbers = #tpu.dot_dimension_numbers<[1], [0], [0], [1], [0, 0, 1, 1], [], []>} : vector<32x32xf32>, vector<32x128xf32>, vector<32x128xf32> -> vector<32x128xf32>
    %c1_235 = arith.constant 1 : index
    %c0_236 = arith.constant 0 : index
    %c0_237 = arith.constant 0 : index
    %588 = vector.load %arg15[%c1_235, %c0_236, %c0_237] : memref<2x1x128xf32, #tpu.memory_space<vmem>>, vector<1x1x128xf32>
    %589 = vector.shape_cast %588 : vector<1x1x128xf32> to vector<1x128xf32>
    %590 = vector.broadcast %589 : vector<1x128xf32> to vector<32x128xf32>
    %591 = arith.addf %587, %590 : vector<32x128xf32>
    %592 = vector.extract_strided_slice %591 {offsets = [0, 0], sizes = [32, 64], strides = [1, 1]} : vector<32x128xf32> to vector<32x64xf32>
    %593 = vector.extract_strided_slice %591 {offsets = [0, 64], sizes = [32, 64], strides = [1, 1]} : vector<32x128xf32> to vector<32x64xf32>
    %594 = vector.extract_strided_slice %584 {offsets = [0, 0], sizes = [16, 8], strides = [1, 1]} : vector<16x64xf32> to vector<16x8xf32>
    %595 = vector.extract_strided_slice %592 {offsets = [0, 0], sizes = [32, 8], strides = [1, 1]} : vector<32x64xf32> to vector<32x8xf32>
    %cst_238 = arith.constant dense<0.000000e+00> : vector<16x32xf32>
    %596 = tpu.matmul %594, %595, %cst_238 {dimension_numbers = #tpu.dot_dimension_numbers<[1], [1], [0], [0], [0, 0, 1, 0], [], []>} : vector<16x8xf32>, vector<32x8xf32>, vector<16x32xf32> -> vector<16x32xf32>
    %cst_239 = arith.constant 0.353553385 : f32
    %597 = vector.broadcast %cst_239 : f32 to vector<16x32xf32>
    %598 = arith.mulf %596, %597 : vector<16x32xf32>
    %cst_240 = arith.constant -1.000000e+30 : f32
    %599 = vector.broadcast %cst_240 : f32 to vector<16x32xf32>
    %600 = arith.select %7, %598, %599 : vector<16x32xi1>, vector<16x32xf32>
    %cst_241 = arith.constant dense<0xFF800000> : vector<16xf32>
    %601 = vector.multi_reduction <maximumf>, %600, %cst_241 [1] : vector<16x32xf32> to vector<16xf32>
    %602 = vector.shape_cast %601 : vector<16xf32> to vector<16x1xf32>
    %603 = vector.broadcast %602 : vector<16x1xf32> to vector<16x32xf32>
    %604 = arith.subf %600, %603 : vector<16x32xf32>
    %605 = math.exp %604 : vector<16x32xf32>
    %cst_242 = arith.constant dense<0.000000e+00> : vector<16xf32>
    %606 = vector.multi_reduction <add>, %605, %cst_242 [1] : vector<16x32xf32> to vector<16xf32>
    %607 = vector.shape_cast %606 : vector<16xf32> to vector<16x1xf32>
    %608 = tpu.reciprocal %607 {approx = true} : vector<16x1xf32> -> vector<16x1xf32>
    %609 = vector.broadcast %608 : vector<16x1xf32> to vector<16x32xf32>
    %610 = arith.mulf %605, %609 : vector<16x32xf32>
    %cst_243 = arith.constant 0.000000e+00 : f32
    %611 = vector.broadcast %cst_243 : f32 to vector<16x32xf32>
    %612 = arith.select %7, %610, %611 : vector<16x32xi1>, vector<16x32xf32>
    %613 = vector.extract_strided_slice %593 {offsets = [0, 0], sizes = [32, 8], strides = [1, 1]} : vector<32x64xf32> to vector<32x8xf32>
    %cst_244 = arith.constant dense<0.000000e+00> : vector<16x8xf32>
    %614 = tpu.matmul %612, %613, %cst_244 {dimension_numbers = #tpu.dot_dimension_numbers<[1], [0], [0], [1], [0, 0, 1, 1], [], []>} : vector<16x32xf32>, vector<32x8xf32>, vector<16x8xf32> -> vector<16x8xf32>
    %615 = vector.broadcast %8 : vector<16x1xf32> to vector<16x8xf32>
    %616 = arith.mulf %614, %615 : vector<16x8xf32>
    %617 = vector.extract_strided_slice %584 {offsets = [0, 8], sizes = [16, 8], strides = [1, 1]} : vector<16x64xf32> to vector<16x8xf32>
    %618 = vector.extract_strided_slice %592 {offsets = [0, 8], sizes = [32, 8], strides = [1, 1]} : vector<32x64xf32> to vector<32x8xf32>
    %cst_245 = arith.constant dense<0.000000e+00> : vector<16x32xf32>
    %619 = tpu.matmul %617, %618, %cst_245 {dimension_numbers = #tpu.dot_dimension_numbers<[1], [1], [0], [0], [0, 0, 1, 0], [], []>} : vector<16x8xf32>, vector<32x8xf32>, vector<16x32xf32> -> vector<16x32xf32>
    %cst_246 = arith.constant 0.353553385 : f32
    %620 = vector.broadcast %cst_246 : f32 to vector<16x32xf32>
    %621 = arith.mulf %619, %620 : vector<16x32xf32>
    %cst_247 = arith.constant -1.000000e+30 : f32
    %622 = vector.broadcast %cst_247 : f32 to vector<16x32xf32>
    %623 = arith.select %7, %621, %622 : vector<16x32xi1>, vector<16x32xf32>
    %cst_248 = arith.constant dense<0xFF800000> : vector<16xf32>
    %624 = vector.multi_reduction <maximumf>, %623, %cst_248 [1] : vector<16x32xf32> to vector<16xf32>
    %625 = vector.shape_cast %624 : vector<16xf32> to vector<16x1xf32>
    %626 = vector.broadcast %625 : vector<16x1xf32> to vector<16x32xf32>
    %627 = arith.subf %623, %626 : vector<16x32xf32>
    %628 = math.exp %627 : vector<16x32xf32>
    %cst_249 = arith.constant dense<0.000000e+00> : vector<16xf32>
    %629 = vector.multi_reduction <add>, %628, %cst_249 [1] : vector<16x32xf32> to vector<16xf32>
    %630 = vector.shape_cast %629 : vector<16xf32> to vector<16x1xf32>
    %631 = tpu.reciprocal %630 {approx = true} : vector<16x1xf32> -> vector<16x1xf32>
    %632 = vector.broadcast %631 : vector<16x1xf32> to vector<16x32xf32>
    %633 = arith.mulf %628, %632 : vector<16x32xf32>
    %cst_250 = arith.constant 0.000000e+00 : f32
    %634 = vector.broadcast %cst_250 : f32 to vector<16x32xf32>
    %635 = arith.select %7, %633, %634 : vector<16x32xi1>, vector<16x32xf32>
    %636 = vector.extract_strided_slice %593 {offsets = [0, 8], sizes = [32, 8], strides = [1, 1]} : vector<32x64xf32> to vector<32x8xf32>
    %cst_251 = arith.constant dense<0.000000e+00> : vector<16x8xf32>
    %637 = tpu.matmul %635, %636, %cst_251 {dimension_numbers = #tpu.dot_dimension_numbers<[1], [0], [0], [1], [0, 0, 1, 1], [], []>} : vector<16x32xf32>, vector<32x8xf32>, vector<16x8xf32> -> vector<16x8xf32>
    %638 = vector.broadcast %8 : vector<16x1xf32> to vector<16x8xf32>
    %639 = arith.mulf %637, %638 : vector<16x8xf32>
    %640 = vector.extract_strided_slice %584 {offsets = [0, 16], sizes = [16, 8], strides = [1, 1]} : vector<16x64xf32> to vector<16x8xf32>
    %641 = vector.extract_strided_slice %592 {offsets = [0, 16], sizes = [32, 8], strides = [1, 1]} : vector<32x64xf32> to vector<32x8xf32>
    %cst_252 = arith.constant dense<0.000000e+00> : vector<16x32xf32>
    %642 = tpu.matmul %640, %641, %cst_252 {dimension_numbers = #tpu.dot_dimension_numbers<[1], [1], [0], [0], [0, 0, 1, 0], [], []>} : vector<16x8xf32>, vector<32x8xf32>, vector<16x32xf32> -> vector<16x32xf32>
    %cst_253 = arith.constant 0.353553385 : f32
    %643 = vector.broadcast %cst_253 : f32 to vector<16x32xf32>
    %644 = arith.mulf %642, %643 : vector<16x32xf32>
    %cst_254 = arith.constant -1.000000e+30 : f32
    %645 = vector.broadcast %cst_254 : f32 to vector<16x32xf32>
    %646 = arith.select %7, %644, %645 : vector<16x32xi1>, vector<16x32xf32>
    %cst_255 = arith.constant dense<0xFF800000> : vector<16xf32>
    %647 = vector.multi_reduction <maximumf>, %646, %cst_255 [1] : vector<16x32xf32> to vector<16xf32>
    %648 = vector.shape_cast %647 : vector<16xf32> to vector<16x1xf32>
    %649 = vector.broadcast %648 : vector<16x1xf32> to vector<16x32xf32>
    %650 = arith.subf %646, %649 : vector<16x32xf32>
    %651 = math.exp %650 : vector<16x32xf32>
    %cst_256 = arith.constant dense<0.000000e+00> : vector<16xf32>
    %652 = vector.multi_reduction <add>, %651, %cst_256 [1] : vector<16x32xf32> to vector<16xf32>
    %653 = vector.shape_cast %652 : vector<16xf32> to vector<16x1xf32>
    %654 = tpu.reciprocal %653 {approx = true} : vector<16x1xf32> -> vector<16x1xf32>
    %655 = vector.broadcast %654 : vector<16x1xf32> to vector<16x32xf32>
    %656 = arith.mulf %651, %655 : vector<16x32xf32>
    %cst_257 = arith.constant 0.000000e+00 : f32
    %657 = vector.broadcast %cst_257 : f32 to vector<16x32xf32>
    %658 = arith.select %7, %656, %657 : vector<16x32xi1>, vector<16x32xf32>
    %659 = vector.extract_strided_slice %593 {offsets = [0, 16], sizes = [32, 8], strides = [1, 1]} : vector<32x64xf32> to vector<32x8xf32>
    %cst_258 = arith.constant dense<0.000000e+00> : vector<16x8xf32>
    %660 = tpu.matmul %658, %659, %cst_258 {dimension_numbers = #tpu.dot_dimension_numbers<[1], [0], [0], [1], [0, 0, 1, 1], [], []>} : vector<16x32xf32>, vector<32x8xf32>, vector<16x8xf32> -> vector<16x8xf32>
    %661 = vector.broadcast %8 : vector<16x1xf32> to vector<16x8xf32>
    %662 = arith.mulf %660, %661 : vector<16x8xf32>
    %663 = vector.extract_strided_slice %584 {offsets = [0, 24], sizes = [16, 8], strides = [1, 1]} : vector<16x64xf32> to vector<16x8xf32>
    %664 = vector.extract_strided_slice %592 {offsets = [0, 24], sizes = [32, 8], strides = [1, 1]} : vector<32x64xf32> to vector<32x8xf32>
    %cst_259 = arith.constant dense<0.000000e+00> : vector<16x32xf32>
    %665 = tpu.matmul %663, %664, %cst_259 {dimension_numbers = #tpu.dot_dimension_numbers<[1], [1], [0], [0], [0, 0, 1, 0], [], []>} : vector<16x8xf32>, vector<32x8xf32>, vector<16x32xf32> -> vector<16x32xf32>
    %cst_260 = arith.constant 0.353553385 : f32
    %666 = vector.broadcast %cst_260 : f32 to vector<16x32xf32>
    %667 = arith.mulf %665, %666 : vector<16x32xf32>
    %cst_261 = arith.constant -1.000000e+30 : f32
    %668 = vector.broadcast %cst_261 : f32 to vector<16x32xf32>
    %669 = arith.select %7, %667, %668 : vector<16x32xi1>, vector<16x32xf32>
    %cst_262 = arith.constant dense<0xFF800000> : vector<16xf32>
    %670 = vector.multi_reduction <maximumf>, %669, %cst_262 [1] : vector<16x32xf32> to vector<16xf32>
    %671 = vector.shape_cast %670 : vector<16xf32> to vector<16x1xf32>
    %672 = vector.broadcast %671 : vector<16x1xf32> to vector<16x32xf32>
    %673 = arith.subf %669, %672 : vector<16x32xf32>
    %674 = math.exp %673 : vector<16x32xf32>
    %cst_263 = arith.constant dense<0.000000e+00> : vector<16xf32>
    %675 = vector.multi_reduction <add>, %674, %cst_263 [1] : vector<16x32xf32> to vector<16xf32>
    %676 = vector.shape_cast %675 : vector<16xf32> to vector<16x1xf32>
    %677 = tpu.reciprocal %676 {approx = true} : vector<16x1xf32> -> vector<16x1xf32>
    %678 = vector.broadcast %677 : vector<16x1xf32> to vector<16x32xf32>
    %679 = arith.mulf %674, %678 : vector<16x32xf32>
    %cst_264 = arith.constant 0.000000e+00 : f32
    %680 = vector.broadcast %cst_264 : f32 to vector<16x32xf32>
    %681 = arith.select %7, %679, %680 : vector<16x32xi1>, vector<16x32xf32>
    %682 = vector.extract_strided_slice %593 {offsets = [0, 24], sizes = [32, 8], strides = [1, 1]} : vector<32x64xf32> to vector<32x8xf32>
    %cst_265 = arith.constant dense<0.000000e+00> : vector<16x8xf32>
    %683 = tpu.matmul %681, %682, %cst_265 {dimension_numbers = #tpu.dot_dimension_numbers<[1], [0], [0], [1], [0, 0, 1, 1], [], []>} : vector<16x32xf32>, vector<32x8xf32>, vector<16x8xf32> -> vector<16x8xf32>
    %684 = vector.broadcast %8 : vector<16x1xf32> to vector<16x8xf32>
    %685 = arith.mulf %683, %684 : vector<16x8xf32>
    %686 = vector.extract_strided_slice %584 {offsets = [0, 32], sizes = [16, 8], strides = [1, 1]} : vector<16x64xf32> to vector<16x8xf32>
    %687 = vector.extract_strided_slice %592 {offsets = [0, 32], sizes = [32, 8], strides = [1, 1]} : vector<32x64xf32> to vector<32x8xf32>
    %cst_266 = arith.constant dense<0.000000e+00> : vector<16x32xf32>
    %688 = tpu.matmul %686, %687, %cst_266 {dimension_numbers = #tpu.dot_dimension_numbers<[1], [1], [0], [0], [0, 0, 1, 0], [], []>} : vector<16x8xf32>, vector<32x8xf32>, vector<16x32xf32> -> vector<16x32xf32>
    %cst_267 = arith.constant 0.353553385 : f32
    %689 = vector.broadcast %cst_267 : f32 to vector<16x32xf32>
    %690 = arith.mulf %688, %689 : vector<16x32xf32>
    %cst_268 = arith.constant -1.000000e+30 : f32
    %691 = vector.broadcast %cst_268 : f32 to vector<16x32xf32>
    %692 = arith.select %7, %690, %691 : vector<16x32xi1>, vector<16x32xf32>
    %cst_269 = arith.constant dense<0xFF800000> : vector<16xf32>
    %693 = vector.multi_reduction <maximumf>, %692, %cst_269 [1] : vector<16x32xf32> to vector<16xf32>
    %694 = vector.shape_cast %693 : vector<16xf32> to vector<16x1xf32>
    %695 = vector.broadcast %694 : vector<16x1xf32> to vector<16x32xf32>
    %696 = arith.subf %692, %695 : vector<16x32xf32>
    %697 = math.exp %696 : vector<16x32xf32>
    %cst_270 = arith.constant dense<0.000000e+00> : vector<16xf32>
    %698 = vector.multi_reduction <add>, %697, %cst_270 [1] : vector<16x32xf32> to vector<16xf32>
    %699 = vector.shape_cast %698 : vector<16xf32> to vector<16x1xf32>
    %700 = tpu.reciprocal %699 {approx = true} : vector<16x1xf32> -> vector<16x1xf32>
    %701 = vector.broadcast %700 : vector<16x1xf32> to vector<16x32xf32>
    %702 = arith.mulf %697, %701 : vector<16x32xf32>
    %cst_271 = arith.constant 0.000000e+00 : f32
    %703 = vector.broadcast %cst_271 : f32 to vector<16x32xf32>
    %704 = arith.select %7, %702, %703 : vector<16x32xi1>, vector<16x32xf32>
    %705 = vector.extract_strided_slice %593 {offsets = [0, 32], sizes = [32, 8], strides = [1, 1]} : vector<32x64xf32> to vector<32x8xf32>
    %cst_272 = arith.constant dense<0.000000e+00> : vector<16x8xf32>
    %706 = tpu.matmul %704, %705, %cst_272 {dimension_numbers = #tpu.dot_dimension_numbers<[1], [0], [0], [1], [0, 0, 1, 1], [], []>} : vector<16x32xf32>, vector<32x8xf32>, vector<16x8xf32> -> vector<16x8xf32>
    %707 = vector.broadcast %9 : vector<16x1xf32> to vector<16x8xf32>
    %708 = arith.mulf %706, %707 : vector<16x8xf32>
    %709 = vector.extract_strided_slice %584 {offsets = [0, 40], sizes = [16, 8], strides = [1, 1]} : vector<16x64xf32> to vector<16x8xf32>
    %710 = vector.extract_strided_slice %592 {offsets = [0, 40], sizes = [32, 8], strides = [1, 1]} : vector<32x64xf32> to vector<32x8xf32>
    %cst_273 = arith.constant dense<0.000000e+00> : vector<16x32xf32>
    %711 = tpu.matmul %709, %710, %cst_273 {dimension_numbers = #tpu.dot_dimension_numbers<[1], [1], [0], [0], [0, 0, 1, 0], [], []>} : vector<16x8xf32>, vector<32x8xf32>, vector<16x32xf32> -> vector<16x32xf32>
    %cst_274 = arith.constant 0.353553385 : f32
    %712 = vector.broadcast %cst_274 : f32 to vector<16x32xf32>
    %713 = arith.mulf %711, %712 : vector<16x32xf32>
    %cst_275 = arith.constant -1.000000e+30 : f32
    %714 = vector.broadcast %cst_275 : f32 to vector<16x32xf32>
    %715 = arith.select %7, %713, %714 : vector<16x32xi1>, vector<16x32xf32>
    %cst_276 = arith.constant dense<0xFF800000> : vector<16xf32>
    %716 = vector.multi_reduction <maximumf>, %715, %cst_276 [1] : vector<16x32xf32> to vector<16xf32>
    %717 = vector.shape_cast %716 : vector<16xf32> to vector<16x1xf32>
    %718 = vector.broadcast %717 : vector<16x1xf32> to vector<16x32xf32>
    %719 = arith.subf %715, %718 : vector<16x32xf32>
    %720 = math.exp %719 : vector<16x32xf32>
    %cst_277 = arith.constant dense<0.000000e+00> : vector<16xf32>
    %721 = vector.multi_reduction <add>, %720, %cst_277 [1] : vector<16x32xf32> to vector<16xf32>
    %722 = vector.shape_cast %721 : vector<16xf32> to vector<16x1xf32>
    %723 = tpu.reciprocal %722 {approx = true} : vector<16x1xf32> -> vector<16x1xf32>
    %724 = vector.broadcast %723 : vector<16x1xf32> to vector<16x32xf32>
    %725 = arith.mulf %720, %724 : vector<16x32xf32>
    %cst_278 = arith.constant 0.000000e+00 : f32
    %726 = vector.broadcast %cst_278 : f32 to vector<16x32xf32>
    %727 = arith.select %7, %725, %726 : vector<16x32xi1>, vector<16x32xf32>
    %728 = vector.extract_strided_slice %593 {offsets = [0, 40], sizes = [32, 8], strides = [1, 1]} : vector<32x64xf32> to vector<32x8xf32>
    %cst_279 = arith.constant dense<0.000000e+00> : vector<16x8xf32>
    %729 = tpu.matmul %727, %728, %cst_279 {dimension_numbers = #tpu.dot_dimension_numbers<[1], [0], [0], [1], [0, 0, 1, 1], [], []>} : vector<16x32xf32>, vector<32x8xf32>, vector<16x8xf32> -> vector<16x8xf32>
    %730 = vector.broadcast %9 : vector<16x1xf32> to vector<16x8xf32>
    %731 = arith.mulf %729, %730 : vector<16x8xf32>
    %732 = vector.extract_strided_slice %584 {offsets = [0, 48], sizes = [16, 8], strides = [1, 1]} : vector<16x64xf32> to vector<16x8xf32>
    %733 = vector.extract_strided_slice %592 {offsets = [0, 48], sizes = [32, 8], strides = [1, 1]} : vector<32x64xf32> to vector<32x8xf32>
    %cst_280 = arith.constant dense<0.000000e+00> : vector<16x32xf32>
    %734 = tpu.matmul %732, %733, %cst_280 {dimension_numbers = #tpu.dot_dimension_numbers<[1], [1], [0], [0], [0, 0, 1, 0], [], []>} : vector<16x8xf32>, vector<32x8xf32>, vector<16x32xf32> -> vector<16x32xf32>
    %cst_281 = arith.constant 0.353553385 : f32
    %735 = vector.broadcast %cst_281 : f32 to vector<16x32xf32>
    %736 = arith.mulf %734, %735 : vector<16x32xf32>
    %cst_282 = arith.constant -1.000000e+30 : f32
    %737 = vector.broadcast %cst_282 : f32 to vector<16x32xf32>
    %738 = arith.select %7, %736, %737 : vector<16x32xi1>, vector<16x32xf32>
    %cst_283 = arith.constant dense<0xFF800000> : vector<16xf32>
    %739 = vector.multi_reduction <maximumf>, %738, %cst_283 [1] : vector<16x32xf32> to vector<16xf32>
    %740 = vector.shape_cast %739 : vector<16xf32> to vector<16x1xf32>
    %741 = vector.broadcast %740 : vector<16x1xf32> to vector<16x32xf32>
    %742 = arith.subf %738, %741 : vector<16x32xf32>
    %743 = math.exp %742 : vector<16x32xf32>
    %cst_284 = arith.constant dense<0.000000e+00> : vector<16xf32>
    %744 = vector.multi_reduction <add>, %743, %cst_284 [1] : vector<16x32xf32> to vector<16xf32>
    %745 = vector.shape_cast %744 : vector<16xf32> to vector<16x1xf32>
    %746 = tpu.reciprocal %745 {approx = true} : vector<16x1xf32> -> vector<16x1xf32>
    %747 = vector.broadcast %746 : vector<16x1xf32> to vector<16x32xf32>
    %748 = arith.mulf %743, %747 : vector<16x32xf32>
    %cst_285 = arith.constant 0.000000e+00 : f32
    %749 = vector.broadcast %cst_285 : f32 to vector<16x32xf32>
    %750 = arith.select %7, %748, %749 : vector<16x32xi1>, vector<16x32xf32>
    %751 = vector.extract_strided_slice %593 {offsets = [0, 48], sizes = [32, 8], strides = [1, 1]} : vector<32x64xf32> to vector<32x8xf32>
    %cst_286 = arith.constant dense<0.000000e+00> : vector<16x8xf32>
    %752 = tpu.matmul %750, %751, %cst_286 {dimension_numbers = #tpu.dot_dimension_numbers<[1], [0], [0], [1], [0, 0, 1, 1], [], []>} : vector<16x32xf32>, vector<32x8xf32>, vector<16x8xf32> -> vector<16x8xf32>
    %753 = vector.broadcast %9 : vector<16x1xf32> to vector<16x8xf32>
    %754 = arith.mulf %752, %753 : vector<16x8xf32>
    %755 = vector.extract_strided_slice %584 {offsets = [0, 56], sizes = [16, 8], strides = [1, 1]} : vector<16x64xf32> to vector<16x8xf32>
    %756 = vector.extract_strided_slice %592 {offsets = [0, 56], sizes = [32, 8], strides = [1, 1]} : vector<32x64xf32> to vector<32x8xf32>
    %cst_287 = arith.constant dense<0.000000e+00> : vector<16x32xf32>
    %757 = tpu.matmul %755, %756, %cst_287 {dimension_numbers = #tpu.dot_dimension_numbers<[1], [1], [0], [0], [0, 0, 1, 0], [], []>} : vector<16x8xf32>, vector<32x8xf32>, vector<16x32xf32> -> vector<16x32xf32>
    %cst_288 = arith.constant 0.353553385 : f32
    %758 = vector.broadcast %cst_288 : f32 to vector<16x32xf32>
    %759 = arith.mulf %757, %758 : vector<16x32xf32>
    %cst_289 = arith.constant -1.000000e+30 : f32
    %760 = vector.broadcast %cst_289 : f32 to vector<16x32xf32>
    %761 = arith.select %7, %759, %760 : vector<16x32xi1>, vector<16x32xf32>
    %cst_290 = arith.constant dense<0xFF800000> : vector<16xf32>
    %762 = vector.multi_reduction <maximumf>, %761, %cst_290 [1] : vector<16x32xf32> to vector<16xf32>
    %763 = vector.shape_cast %762 : vector<16xf32> to vector<16x1xf32>
    %764 = vector.broadcast %763 : vector<16x1xf32> to vector<16x32xf32>
    %765 = arith.subf %761, %764 : vector<16x32xf32>
    %766 = math.exp %765 : vector<16x32xf32>
    %cst_291 = arith.constant dense<0.000000e+00> : vector<16xf32>
    %767 = vector.multi_reduction <add>, %766, %cst_291 [1] : vector<16x32xf32> to vector<16xf32>
    %768 = vector.shape_cast %767 : vector<16xf32> to vector<16x1xf32>
    %769 = tpu.reciprocal %768 {approx = true} : vector<16x1xf32> -> vector<16x1xf32>
    %770 = vector.broadcast %769 : vector<16x1xf32> to vector<16x32xf32>
    %771 = arith.mulf %766, %770 : vector<16x32xf32>
    %cst_292 = arith.constant 0.000000e+00 : f32
    %772 = vector.broadcast %cst_292 : f32 to vector<16x32xf32>
    %773 = arith.select %7, %771, %772 : vector<16x32xi1>, vector<16x32xf32>
    %774 = vector.extract_strided_slice %593 {offsets = [0, 56], sizes = [32, 8], strides = [1, 1]} : vector<32x64xf32> to vector<32x8xf32>
    %cst_293 = arith.constant dense<0.000000e+00> : vector<16x8xf32>
    %775 = tpu.matmul %773, %774, %cst_293 {dimension_numbers = #tpu.dot_dimension_numbers<[1], [0], [0], [1], [0, 0, 1, 1], [], []>} : vector<16x32xf32>, vector<32x8xf32>, vector<16x8xf32> -> vector<16x8xf32>
    %776 = vector.broadcast %9 : vector<16x1xf32> to vector<16x8xf32>
    %777 = arith.mulf %775, %776 : vector<16x8xf32>
    %778 = tpu.concatenate %616, %639, %662, %685, %708, %731, %754, %777 in 1 : vector<16x8xf32>, vector<16x8xf32>, vector<16x8xf32>, vector<16x8xf32>, vector<16x8xf32>, vector<16x8xf32>, vector<16x8xf32>, vector<16x8xf32> -> vector<16x64xf32>
    %c1_294 = arith.constant 1 : index
    %c0_295 = arith.constant 0 : index
    %c0_296 = arith.constant 0 : index
    %779 = vector.load %arg17[%c1_294, %c0_295, %c0_296] : memref<2x2x32xf32, #tpu.memory_space<vmem>>, vector<1x2x32xf32>
    %780 = vector.shape_cast %779 : vector<1x2x32xf32> to vector<2x32xf32>
    %781 = vector.extract_strided_slice %780 {offsets = [0, 0], sizes = [1, 32], strides = [1, 1]} : vector<2x32xf32> to vector<1x32xf32>
    %782 = vector.broadcast %8 : vector<16x1xf32> to vector<16x32xf32>
    %783 = vector.broadcast %781 : vector<1x32xf32> to vector<16x32xf32>
    %784 = arith.mulf %782, %783 : vector<16x32xf32>
    %785 = vector.extract_strided_slice %780 {offsets = [1, 0], sizes = [1, 32], strides = [1, 1]} : vector<2x32xf32> to vector<1x32xf32>
    %786 = vector.broadcast %9 : vector<16x1xf32> to vector<16x32xf32>
    %787 = vector.broadcast %785 : vector<1x32xf32> to vector<16x32xf32>
    %788 = arith.mulf %786, %787 : vector<16x32xf32>
    %789 = arith.addf %784, %788 : vector<16x32xf32>
    %c1_297 = arith.constant 1 : index
    %c0_298 = arith.constant 0 : index
    %c0_299 = arith.constant 0 : index
    %790 = vector.load %arg16[%c1_297, %c0_298, %c0_299] : memref<2x64x32xf32, #tpu.memory_space<vmem>>, vector<1x64x32xf32>
    %791 = vector.shape_cast %790 : vector<1x64x32xf32> to vector<64x32xf32>
    %cst_300 = arith.constant dense<0.000000e+00> : vector<16x32xf32>
    %792 = tpu.matmul %778, %791, %cst_300 {dimension_numbers = #tpu.dot_dimension_numbers<[1], [0], [0], [1], [0, 0, 1, 1], [], []>} : vector<16x64xf32>, vector<64x32xf32>, vector<16x32xf32> -> vector<16x32xf32>
    %793 = arith.addf %553, %792 : vector<16x32xf32>
    %794 = arith.addf %793, %789 : vector<16x32xf32>
    %795 = vector.extract_strided_slice %424 {offsets = [2, 0], sizes = [1, 32], strides = [1, 1]} : vector<3x32xf32> to vector<1x32xf32>
    %796 = vector.extract_strided_slice %426 {offsets = [2, 0], sizes = [1, 32], strides = [1, 1]} : vector<3x32xf32> to vector<1x32xf32>
    %cst_301 = arith.constant dense<0.000000e+00> : vector<16xf32>
    %797 = vector.multi_reduction <add>, %794, %cst_301 [1] : vector<16x32xf32> to vector<16xf32>
    %798 = vector.shape_cast %797 : vector<16xf32> to vector<16x1xf32>
    %cst_302 = arith.constant 3.200000e+01 : f32
    %799 = vector.broadcast %cst_302 : f32 to vector<16x1xf32>
    %800 = arith.divf %798, %799 : vector<16x1xf32>
    %801 = vector.broadcast %800 : vector<16x1xf32> to vector<16x32xf32>
    %802 = arith.subf %794, %801 : vector<16x32xf32>
    %803 = arith.mulf %802, %802 : vector<16x32xf32>
    %cst_303 = arith.constant dense<0.000000e+00> : vector<16xf32>
    %804 = vector.multi_reduction <add>, %803, %cst_303 [1] : vector<16x32xf32> to vector<16xf32>
    %805 = vector.shape_cast %804 : vector<16xf32> to vector<16x1xf32>
    %cst_304 = arith.constant 3.200000e+01 : f32
    %806 = vector.broadcast %cst_304 : f32 to vector<16x1xf32>
    %807 = arith.divf %805, %806 : vector<16x1xf32>
    %808 = vector.broadcast %800 : vector<16x1xf32> to vector<16x32xf32>
    %809 = arith.subf %794, %808 : vector<16x32xf32>
    %cst_305 = arith.constant 9.99999996E-13 : f32
    %810 = vector.broadcast %cst_305 : f32 to vector<16x1xf32>
    %811 = arith.addf %807, %810 : vector<16x1xf32>
    %812 = math.rsqrt %811 : vector<16x1xf32>
    %813 = vector.broadcast %812 : vector<16x1xf32> to vector<16x32xf32>
    %814 = arith.mulf %809, %813 : vector<16x32xf32>
    %815 = vector.broadcast %795 : vector<1x32xf32> to vector<16x32xf32>
    %816 = arith.mulf %814, %815 : vector<16x32xf32>
    %817 = vector.broadcast %796 : vector<1x32xf32> to vector<16x32xf32>
    %818 = arith.addf %816, %817 : vector<16x32xf32>
    %c1_306 = arith.constant 1 : index
    %c0_307 = arith.constant 0 : index
    %c0_308 = arith.constant 0 : index
    %819 = vector.load %arg18[%c1_306, %c0_307, %c0_308] : memref<2x32x64xf32, #tpu.memory_space<vmem>>, vector<1x32x64xf32>
    %820 = vector.shape_cast %819 : vector<1x32x64xf32> to vector<32x64xf32>
    %cst_309 = arith.constant dense<0.000000e+00> : vector<16x64xf32>
    %821 = tpu.matmul %818, %820, %cst_309 {dimension_numbers = #tpu.dot_dimension_numbers<[1], [0], [0], [1], [0, 0, 1, 1], [], []>} : vector<16x32xf32>, vector<32x64xf32>, vector<16x64xf32> -> vector<16x64xf32>
    %c1_310 = arith.constant 1 : index
    %c0_311 = arith.constant 0 : index
    %c0_312 = arith.constant 0 : index
    %822 = vector.load %arg19[%c1_310, %c0_311, %c0_312] : memref<2x1x64xf32, #tpu.memory_space<vmem>>, vector<1x1x64xf32>
    %823 = vector.shape_cast %822 : vector<1x1x64xf32> to vector<1x64xf32>
    %824 = vector.broadcast %823 : vector<1x64xf32> to vector<16x64xf32>
    %825 = arith.addf %821, %824 : vector<16x64xf32>
    %cst_313 = arith.constant 0.000000e+00 : f32
    %826 = vector.broadcast %cst_313 : f32 to vector<16x64xf32>
    %827 = arith.maximumf %825, %826 : vector<16x64xf32>
    %c1_314 = arith.constant 1 : index
    %c0_315 = arith.constant 0 : index
    %c0_316 = arith.constant 0 : index
    %828 = vector.load %arg20[%c1_314, %c0_315, %c0_316] : memref<2x64x32xf32, #tpu.memory_space<vmem>>, vector<1x64x32xf32>
    %829 = vector.shape_cast %828 : vector<1x64x32xf32> to vector<64x32xf32>
    %cst_317 = arith.constant dense<0.000000e+00> : vector<16x32xf32>
    %830 = tpu.matmul %827, %829, %cst_317 {dimension_numbers = #tpu.dot_dimension_numbers<[1], [0], [0], [1], [0, 0, 1, 1], [], []>} : vector<16x64xf32>, vector<64x32xf32>, vector<16x32xf32> -> vector<16x32xf32>
    %831 = arith.addf %794, %830 : vector<16x32xf32>
    %c1_318 = arith.constant 1 : index
    %c0_319 = arith.constant 0 : index
    %c0_320 = arith.constant 0 : index
    %832 = vector.load %arg21[%c1_318, %c0_319, %c0_320] : memref<2x1x32xf32, #tpu.memory_space<vmem>>, vector<1x1x32xf32>
    %833 = vector.shape_cast %832 : vector<1x1x32xf32> to vector<1x32xf32>
    %834 = vector.broadcast %833 : vector<1x32xf32> to vector<16x32xf32>
    %835 = arith.addf %831, %834 : vector<16x32xf32>
    %c0_321 = arith.constant 0 : index
    %c0_322 = arith.constant 0 : index
    %836 = vector.load %arg22[%c0_321, %c0_322] : memref<1x32xf32, #tpu.memory_space<vmem>>, vector<1x32xf32>
    %c0_323 = arith.constant 0 : index
    %c0_324 = arith.constant 0 : index
    %837 = vector.load %arg23[%c0_323, %c0_324] : memref<1x32xf32, #tpu.memory_space<vmem>>, vector<1x32xf32>
    %cst_325 = arith.constant dense<0.000000e+00> : vector<16xf32>
    %838 = vector.multi_reduction <add>, %835, %cst_325 [1] : vector<16x32xf32> to vector<16xf32>
    %839 = vector.shape_cast %838 : vector<16xf32> to vector<16x1xf32>
    %cst_326 = arith.constant 3.200000e+01 : f32
    %840 = vector.broadcast %cst_326 : f32 to vector<16x1xf32>
    %841 = arith.divf %839, %840 : vector<16x1xf32>
    %842 = vector.broadcast %841 : vector<16x1xf32> to vector<16x32xf32>
    %843 = arith.subf %835, %842 : vector<16x32xf32>
    %844 = arith.mulf %843, %843 : vector<16x32xf32>
    %cst_327 = arith.constant dense<0.000000e+00> : vector<16xf32>
    %845 = vector.multi_reduction <add>, %844, %cst_327 [1] : vector<16x32xf32> to vector<16xf32>
    %846 = vector.shape_cast %845 : vector<16xf32> to vector<16x1xf32>
    %cst_328 = arith.constant 3.200000e+01 : f32
    %847 = vector.broadcast %cst_328 : f32 to vector<16x1xf32>
    %848 = arith.divf %846, %847 : vector<16x1xf32>
    %849 = vector.broadcast %841 : vector<16x1xf32> to vector<16x32xf32>
    %850 = arith.subf %835, %849 : vector<16x32xf32>
    %cst_329 = arith.constant 9.99999996E-13 : f32
    %851 = vector.broadcast %cst_329 : f32 to vector<16x1xf32>
    %852 = arith.addf %848, %851 : vector<16x1xf32>
    %853 = math.rsqrt %852 : vector<16x1xf32>
    %854 = vector.broadcast %853 : vector<16x1xf32> to vector<16x32xf32>
    %855 = arith.mulf %850, %854 : vector<16x32xf32>
    %856 = vector.broadcast %836 : vector<1x32xf32> to vector<16x32xf32>
    %857 = arith.mulf %855, %856 : vector<16x32xf32>
    %858 = vector.broadcast %837 : vector<1x32xf32> to vector<16x32xf32>
    %859 = arith.addf %857, %858 : vector<16x32xf32>
    %c0_330 = arith.constant 0 : index
    %c0_331 = arith.constant 0 : index
    %860 = vector.load %arg24[%c0_330, %c0_331] : memref<32x128xf32, #tpu.memory_space<vmem>>, vector<32x128xf32>
    %cst_332 = arith.constant dense<0.000000e+00> : vector<16x128xf32>
    %861 = tpu.matmul %859, %860, %cst_332 {dimension_numbers = #tpu.dot_dimension_numbers<[1], [0], [0], [1], [0, 0, 1, 1], [], []>} : vector<16x32xf32>, vector<32x128xf32>, vector<16x128xf32> -> vector<16x128xf32>
    %c0_333 = arith.constant 0 : index
    %c0_334 = arith.constant 0 : index
    %862 = vector.load %arg25[%c0_333, %c0_334] : memref<1x128xf32, #tpu.memory_space<vmem>>, vector<1x128xf32>
    %863 = vector.broadcast %862 : vector<1x128xf32> to vector<16x128xf32>
    %864 = arith.addf %861, %863 : vector<16x128xf32>
    %c0_335 = arith.constant 0 : index
    %c0_336 = arith.constant 0 : index
    %865 = vector.load %arg26[%c0_335, %c0_336] : memref<16x128xf32, #tpu.memory_space<vmem>>, vector<16x128xf32>
    tpu.vector_store %arg26[%c0_335, %c0_336], %864 {strides = array<i32>} : memref<16x128xf32, #tpu.memory_space<vmem>>, vector<16x128xf32>,
    return
  }
}

</mosaic_0001>

<bundles_post_ra>
// kernel: tpu_custom_call.1
= control target key start
LH: loop header
LB: loop body
LE: loop exit
PB: predicated region body
PF: predicated region fallthrough
CT: control target
= control target key end

     0   :  { %s11187_s0 = inlined_call_operand.hbm [shape: f32[16,32], index: 0, kind: input, shape index: {}]   ;;  %s11188_s1 = inlined_call_operand.hbm [shape: f32[32,32], index: 1, kind: input, shape index: {}]   ;;  %s11189_s2 = inlined_call_operand.hbm [shape: f32[16,16], index: 2, kind: input, shape index: {}]   ;;  %s11190_s3 = inlined_call_operand.hbm [shape: f32[16,32], index: 3, kind: input, shape index: {}]   ;;  %s11191_s4 = inlined_call_operand.vmem [shape: f32[16,1], index: 4, kind: input, shape index: {}]   ;;  %s11192_s5 = inlined_call_operand.vmem [shape: f32[16,1], index: 5, kind: input, shape index: {}]   ;;  %s11193_s6 = inlined_call_operand.vmem [shape: f32[2,3,32], index: 6, kind: input, shape index: {}]   ;;  %s11194_s7 = inlined_call_operand.vmem [shape: f32[2,3,32], index: 7, kind: input, shape index: {}]   ;;  %s11195_s8 = inlined_call_operand.vmem [shape: f32[2,32,96], index: 8, kind: input, shape index: {}]   ;;  %s11196_s9 = inlined_call_operand.hbm [shape: f32[2,1,96], index: 9, kind: input, shape index: {}]   ;;  %s11197_s10 = inlined_call_operand.vmem [shape: f32[2,32,32], index: 10, kind: input, shape index: {}]   ;;  %s11198_s11 = inlined_call_operand.hbm [shape: f32[2,1,32], index: 11, kind: input, shape index: {}]   ;;  %s11199_s12 = inlined_call_operand.vmem [shape: f32[2,32,64], index: 12, kind: input, shape index: {}]   ;;  %s11200_s13 = inlined_call_operand.hbm [shape: f32[2,1,64], index: 13, kind: input, shape index: {}]   ;;  %s11201_s14 = inlined_call_operand.vmem [shape: f32[2,32,128], index: 14, kind: input, shape index: {}]   ;;  %s11202_s15 = inlined_call_operand.hbm [shape: f32[2,1,128], index: 15, kind: input, shape index: {}]   ;;  %s11203_s16 = inlined_call_operand.vmem [shape: f32[2,64,32], index: 16, kind: input, shape index: {}]   ;;  %s11204_s17 = inlined_call_operand.vmem [shape: f32[2,2,32], index: 17, kind: input, shape index: {}]   ;;  %s11205_s18 = inlined_call_operand.vmem [shape: f32[2,32,64], index: 18, kind: input, shape index: {}]   ;;  %s11206_s19 = inlined_call_operand.hbm [shape: f32[2,1,64], index: 19, kind: input, shape index: {}]   ;;  %s11207_s20 = inlined_call_operand.vmem [shape: f32[2,64,32], index: 20, kind: input, shape index: {}]   ;;  %s11208_s21 = inlined_call_operand.hbm [shape: f32[2,1,32], index: 21, kind: input, shape index: {}]   ;;  %s11209_s22 = inlined_call_operand.hbm [shape: f32[1,32], index: 22, kind: input, shape index: {}]   ;;  %s11210_s23 = inlined_call_operand.hbm [shape: f32[1,32], index: 23, kind: input, shape index: {}]   ;;  %s11211_s24 = inlined_call_operand.vmem [shape: f32[32,128], index: 24, kind: input, shape index: {}]   ;;  %s11212_s25 = inlined_call_operand.vmem [shape: f32[1,128], index: 25, kind: input, shape index: {}]   ;;  %s11213_s26 = inlined_call_operand.hbm [shape: f32[16,128], index: 26, kind: output, shape index: {}]  }
   0x1   :  { %11243 = sst [smem:[#allocation31_spill]] %s11187_s0 }
   0x2   :  { %11244 = sst [smem:[#allocation32_spill]] %s11188_s1 }
   0x3   :  { %11245 = sst [smem:[#allocation33_spill]] %s11189_s2 }
   0x4   :  { %11246 = sst [smem:[#allocation34_spill]] %s11190_s3 }
   0x5   :  { %11247 = sst [smem:[#allocation35_spill]] %s11191_s4 }
   0x6   :  { %11248 = sst [smem:[#allocation36_spill]] %s11192_s5 }
   0x7   :  { %11249 = sst [smem:[#allocation37_spill]] %s11193_s6 }
   0x8   :  { %11250 = sst [smem:[#allocation38_spill]] %s11194_s7 }
   0x9   :  { %11251 = sst [smem:[#allocation39_spill]] %s11195_s8 }
   0xa   :  { %11252 = sst [smem:[#allocation40_spill]] %s11196_s9 }
   0xb   :  { %11253 = sst [smem:[#allocation41_spill]] %s11197_s10 }
   0xc   :  { %31 = vsyncpa [#allocation3], 0 }
   0xd   :  { %32 = vsyncpa [#allocation6], 0 }
   0xe   :  { %33 = vsyncpa [#allocation9], 0 }
   0xf   :  { %34 = vsyncpa [#allocation12], 0 }
  0x10   :  { %35 = vsyncpa [#allocation15], 0 }
  0x11   :  { %36 = vsyncpa [#allocation18], 0 }
  0x12   :  { %37 = vsyncpa [#allocation21], 0 }
  0x13   :  { %38 = vsyncpa [#allocation4], 0  ;;  %s9285_s27 = smov [#allocation5]   ;;  %s9286_s7 = smov [#allocation8]  }
  0x14   :  { %s56_s3 = sshll.u32 %s9285_s27, 4  ;;  %s80_s28 = sshll.u32 %s9286_s7, 4  ;;  %s57_s3 = int_to_ptr.vmem [resolvable:$true] %s56_s3  ;;  %s81_s28 = int_to_ptr.vmem [resolvable:$true] %s80_s28 }
  0x15   :  { %s9017_s8 = scalar_lea.vmem %s57_s3, 512  ;;  %p9022_p1 = scmp.lt.s32.totalorder %s57_s3, %s57_s3 }
  0x16   :  { %p9018_p0 = scmp.ne.s32.totalorder %s57_s3, %s9017_s8  ;;  %p9023_p2 = scmp.lt.s32.totalorder %s9017_s8, %s9017_s8 }
  0x18   :  { %p9024_p3 = por %p9023_p2, %p9022_p1 }
  0x1a   :  { %p9025_p4 = pnand %p9024_p3, %p9018_p0 }
  0x1c   :  { %9028 = shalt.err (!%p9025_p4)
}
  0x1d   :  { %s11220_s4 = smov 128   ;;  %s11221_s29 = smov 8  }
  0x1e   :  { %s11254_s30 = sld [smem:[#allocation32_spill]]  ;;  %s9037_s2 = scalar_lea.vmem %s81_s28, 256 }
  0x1f   :  { %p9038_p5 = scmp.ne.s32.totalorder %s81_s28, %s9037_s2  ;;  %p9042_p6 = scmp.lt.s32.totalorder %s81_s28, %s81_s28 }
  0x20   :  { %p9043_p7 = scmp.lt.s32.totalorder %s9037_s2, %s9037_s2 }
  0x22   :  { %p9044_p8 = por %p9043_p7, %p9042_p6 }
  0x24   :  { %62 = dma.hbm_to_vmem [thread:$0]  %s11254_s30, 512, %s57_s3, [#allocation6], %s11220_s4, %s11220_s4, %s11221_s29  }
  0x25   :  { %p9045_p9 = pnand %p9044_p8, %p9038_p5 }
  0x27   :  { %9048 = shalt.err (!%p9045_p9)
}
  0x28   :  { %s11255_s6 = sld [smem:[#allocation34_spill]]  ;;  %s9289_s1 = smov [#allocation11]  }
  0x29   :  { %s116_s27 = sshll.u32 %s9289_s1, 4  ;;  %s9290_s7 = smov [#allocation14]   ;;  %s117_s27 = int_to_ptr.vmem [resolvable:$true] %s116_s27 }
  0x2a   :  { %s144_s8 = sshll.u32 %s9290_s7, 4  ;;  %s9057_s3 = scalar_lea.vmem %s117_s27, 32  ;;  %s145_s8 = int_to_ptr.vmem [resolvable:$true] %s144_s8 }
  0x2b   :  { %p9058_p10 = scmp.ne.s32.totalorder %s117_s27, %s9057_s3  ;;  %p9062_p11 = scmp.lt.s32.totalorder %s117_s27, %s117_s27 }
  0x2c   :  { %p9063_p12 = scmp.lt.s32.totalorder %s9057_s3, %s9057_s3 }
  0x2e   :  { %86 = dma.hbm_to_vmem [thread:$0]  %s11255_s6, 256, %s81_s28, [#allocation9], %s11220_s4, %s11220_s4, %s11221_s29  }
  0x2f   :  { %p9064_p13 = por %p9063_p12, %p9062_p11 }
  0x31   :  { %p9065_p0 = pnand %p9064_p13, %p9058_p10 }
  0x33   :  { %9068 = shalt.err (!%p9065_p0)
}
  0x34   :  { %s11225_s0 = smov 16   ;;  %s9292_s9 = smov 1  }
  0x35   :  { %122 = dma.hbm_to_vmem [thread:$0]  %s11198_s11, 32, %s117_s27, [#allocation12], %s11225_s0, %s11225_s0, %s9292_s9  }
  0x36   :  { %s9077_s2 = scalar_lea.vmem %s145_s8, 32  ;;  %p9082_p2 = scmp.lt.s32.totalorder %s145_s8, %s145_s8 }
  0x37   :  { %p9078_p1 = scmp.ne.s32.totalorder %s145_s8, %s9077_s2  ;;  %p9083_p3 = scmp.lt.s32.totalorder %s9077_s2, %s9077_s2 }
  0x39   :  { %p9084_p4 = por %p9083_p3, %p9082_p2 }
  0x3b   :  { %p9085_p5 = pnand %p9084_p4, %p9078_p1 }
  0x3d   :  { %9088 = shalt.err (!%p9085_p5)
}
  0x3e   :  { %150 = dma.hbm_to_vmem [thread:$0]  %s11202_s15, 32, %s145_s8, [#allocation15], %s11225_s0, %s11225_s0, %s9292_s9  }
  0x3f   :  { %s9293_s6 = smov [#allocation17]   ;;  %s9294_s7 = smov [#allocation2]  }
  0x40   :  { %s176_s1 = sshll.u32 %s9293_s6, 4  ;;  %s44_s3 = sshll.u32 %s9294_s7, 4  ;;  %s177_s1 = int_to_ptr.vmem [resolvable:$true] %s176_s1  ;;  %s45_s3 = int_to_ptr.vmem [resolvable:$true] %s44_s3 }
  0x41   :  { %s9097_s11 = scalar_lea.vmem %s177_s1, 32  ;;  %p9102_p7 = scmp.lt.s32.totalorder %s177_s1, %s177_s1 }
  0x42   :  { %p9098_p6 = scmp.ne.s32.totalorder %s177_s1, %s9097_s11  ;;  %p9103_p8 = scmp.lt.s32.totalorder %s9097_s11, %s9097_s11 }
  0x44   :  { %p9104_p9 = por %p9103_p8, %p9102_p7 }
  0x46   :  { %p9105_p10 = pnand %p9104_p9, %p9098_p6 }
  0x48   :  { %9108 = shalt.err (!%p9105_p10)
}
  0x49   :  { %182 = dma.hbm_to_vmem [thread:$0]  %s11208_s21, 32, %s177_s1, [#allocation18], %s11225_s0, %s11225_s0, %s9292_s9  }
  0x4a   :  { %s9117_s15 = scalar_lea.vmem %s45_s3, 256  ;;  %p9122_p12 = scmp.lt.s32.totalorder %s45_s3, %s45_s3 }
  0x4b   :  { %p9118_p11 = scmp.ne.s32.totalorder %s45_s3, %s9117_s15  ;;  %p9123_p13 = scmp.lt.s32.totalorder %s9117_s15, %s9117_s15 }
  0x4d   :  { %p9124_p0 = por %p9123_p13, %p9122_p12 }
  0x4f   :  { %p9125_p1 = pnand %p9124_p0, %p9118_p11 }
  0x51   :  { %9128 = shalt.err (!%p9125_p1)
}
  0x52   :  { %s11256_s2 = sld [smem:[#allocation31_spill]]  ;;  %s9295_s5 = smov [#allocation7]  }
  0x53   :  { %s68_s10 = sshll.u32 %s9295_s5, 4  ;;  %s9296_s6 = smov [#allocation10]   ;;  %s69_s10 = int_to_ptr.vmem [resolvable:$true] %s68_s10 }
  0x54   :  { %s102_s7 = sshll.u32 %s9296_s6, 4  ;;  %s9137_s21 = scalar_lea.vmem %s69_s10, 256  ;;  %s103_s7 = int_to_ptr.vmem [resolvable:$true] %s102_s7 }
  0x55   :  { %p9138_p2 = scmp.ne.s32.totalorder %s69_s10, %s9137_s21  ;;  %p9142_p3 = scmp.lt.s32.totalorder %s69_s10, %s69_s10 }
  0x56   :  { %p9143_p4 = scmp.lt.s32.totalorder %s9137_s21, %s9137_s21 }
  0x58   :  { %50 = dma.hbm_to_vmem [thread:$0]  %s11256_s2, 256, %s45_s3, [#allocation3], %s11220_s4, %s11220_s4, %s11221_s29  }
  0x59   :  { %p9144_p5 = por %p9143_p4, %p9142_p3 }
  0x5b   :  { %p9145_p6 = pnand %p9144_p5, %p9138_p2 }
  0x5d   :  { %9148 = shalt.err (!%p9145_p6)
}
  0x5e   :  { %s11257_s27 = sld [smem:[#allocation33_spill]]  ;;  %s9157_s3 = scalar_lea.vmem %s103_s7, 32 }
  0x5f   :  { %p9158_p7 = scmp.ne.s32.totalorder %s103_s7, %s9157_s3  ;;  %p9162_p8 = scmp.lt.s32.totalorder %s103_s7, %s103_s7 }
  0x60   :  { %p9163_p9 = scmp.lt.s32.totalorder %s9157_s3, %s9157_s3 }
  0x62   :  { %p9164_p10 = por %p9163_p9, %p9162_p8 }
  0x64   :  { %74 = dma.hbm_to_vmem [thread:$0]  %s11257_s27, 256, %s69_s10, [#allocation6], %s11220_s4, %s11220_s4, %s11221_s29  }
  0x65   :  { %p9165_p11 = pnand %p9164_p10, %p9158_p7 }
  0x67   :  { %9168 = shalt.err (!%p9165_p11)
}
  0x68   :  { %s11258_s8 = sld [smem:[#allocation40_spill]]  ;;  %s9297_s28 = smov [#allocation13]  }
  0x69   :  { %s130_s2 = sshll.u32 %s9297_s28, 4  ;;  %s9298_s5 = smov [#allocation16]   ;;  %s131_s2 = int_to_ptr.vmem [resolvable:$true] %s130_s2 }
  0x6a   :  { %s162_s6 = sshll.u32 %s9298_s5, 4  ;;  %s9177_s10 = scalar_lea.vmem %s131_s2, 32  ;;  %s163_s6 = int_to_ptr.vmem [resolvable:$true] %s162_s6 }
  0x6b   :  { %p9178_p12 = scmp.ne.s32.totalorder %s131_s2, %s9177_s10  ;;  %p9182_p13 = scmp.lt.s32.totalorder %s131_s2, %s131_s2 }
  0x6c   :  { %p9183_p0 = scmp.lt.s32.totalorder %s9177_s10, %s9177_s10 }
  0x6e   :  { %108 = dma.hbm_to_vmem [thread:$0]  %s11258_s8, 32, %s103_s7, [#allocation9], %s11225_s0, %s11225_s0, %s9292_s9  }
  0x6f   :  { %p9184_p1 = por %p9183_p0, %p9182_p13 }
  0x71   :  { %p9185_p2 = pnand %p9184_p1, %p9178_p12 }
  0x73   :  { %9188 = shalt.err (!%p9185_p2)
}
  0x74   :  { %136 = dma.hbm_to_vmem [thread:$0]  %s11200_s13, 32, %s131_s2, [#allocation12], %s11225_s0, %s11225_s0, %s9292_s9  }
  0x75   :  { %s9197_s7 = scalar_lea.vmem %s163_s6, 32  ;;  %p9202_p4 = scmp.lt.s32.totalorder %s163_s6, %s163_s6 }
  0x76   :  { %p9198_p3 = scmp.ne.s32.totalorder %s163_s6, %s9197_s7  ;;  %p9203_p5 = scmp.lt.s32.totalorder %s9197_s7, %s9197_s7 }
  0x78   :  { %p9204_p6 = por %p9203_p5, %p9202_p4 }
  0x7a   :  { %p9205_p7 = pnand %p9204_p6, %p9198_p3 }
  0x7c   :  { %9208 = shalt.err (!%p9205_p7)
}
  0x7d   :  { %168 = dma.hbm_to_vmem [thread:$0]  %s11206_s19, 32, %s163_s6, [#allocation15], %s11225_s0, %s11225_s0, %s9292_s9  }
  0x7e   :  { %s9299_s3 = smov [#allocation19]   ;;  %s9300_s15 = smov [#allocation20]  }
  0x7f   :  { %s189_s30 = sshll.u32 %s9299_s3, 4  ;;  %s199_s8 = sshll.u32 %s9300_s15, 4  ;;  %s190_s30 = int_to_ptr.vmem [resolvable:$true] %s189_s30  ;;  %s200_s8 = int_to_ptr.vmem [resolvable:$true] %s199_s8 }
  0x80   :  { %s9217_s13 = scalar_lea.vmem %s190_s30, 16  ;;  %s9221_s28 = scalar_lea.vmem %s190_s30, 32 }
  0x81   :  { %p9218_p8 = scmp.ne.s32.totalorder %s190_s30, %s9217_s13  ;;  %p9222_p9 = scmp.lt.s32.totalorder %s190_s30, %s190_s30 }
  0x82   :  { %p9223_p10 = scmp.lt.s32.totalorder %s9221_s28, %s9217_s13 }
  0x84   :  { %p9224_p11 = por %p9223_p10, %p9222_p9 }
  0x86   :  { %p9225_p12 = pnand %p9224_p11, %p9218_p8 }
  0x88   :  { %9228 = shalt.err (!%p9225_p12)
}
  0x89   :  { %192 = dma.hbm_to_vmem [thread:$0]  %s11209_s22, 16, %s190_s30, [#allocation18]  }
  0x8a   :  { %s9237_s10 = scalar_lea.vmem %s200_s8, 16  ;;  %s9241_s19 = scalar_lea.vmem %s200_s8, 32 }
  0x8b   :  { %p9238_p13 = scmp.ne.s32.totalorder %s200_s8, %s9237_s10  ;;  %p9242_p0 = scmp.lt.s32.totalorder %s200_s8, %s200_s8 }
  0x8c   :  { %p9243_p1 = scmp.lt.s32.totalorder %s9241_s19, %s9237_s10 }
  0x8e   :  { %p9244_p2 = por %p9243_p1, %p9242_p0 }
  0x90   :  { %p9245_p3 = pnand %p9244_p2, %p9238_p13 }
  0x92   :  { %9248 = shalt.err (!%p9245_p3)
}
  0x93   :  { %202 = dma.hbm_to_vmem [thread:$0]  %s11210_s23, 16, %s200_s8, [#allocation21]  }
  0x94   :  { %9269 = dma.done.wait [#allocation3], 256  }
  0x95   :  { %9270 = vsyncadd [#allocation3], 4294967040 }
  0x96   :  { %9271 = dma.done.wait [#allocation6], 768  }
  0x97   :  { %9272 = vsyncadd [#allocation6], 4294966528 }
  0x98   :  { %9273 = dma.done.wait [#allocation9], 288  }
  0x99   :  { %9274 = vsyncadd [#allocation9], 4294967008 }
  0x9a   :  { %9275 = dma.done.wait [#allocation12], 64  }
  0x9b   :  { %9276 = vsyncadd [#allocation12], 4294967232 }
  0x9c   :  { %9277 = dma.done.wait [#allocation15], 64  }
  0x9d   :  { %9278 = vsyncadd [#allocation15], 4294967232 }
  0x9e   :  { %9279 = dma.done.wait [#allocation18], 48  }
  0x9f   :  { %9280 = vsyncadd [#allocation18], 4294967248 }
  0xa0   :  { %9281 = dma.done.wait [#allocation21], 16  }
  0xa1   :  { %9282 = vsyncadd [#allocation21], 4294967280  ;;  %vm263_vm0 = vcmask 261120   ;;  %v9517_v0 = vld [vmem:[#allocation2] sm:$0xff]  ;;  %v9519_v1 = vld [vmem:[#allocation2 + $0x8] sm:$0xff]  ;;  %s11259_s21 = sld [smem:[#allocation39_spill]]  ;;  %v291_v23 = vlaneseq }
  0xa2   :  { %v264_v2 = vsel %vm263_vm0, %v9517_v0, 0.0  ;;  %v267_v3 = vsel %vm263_vm0, %v9519_v1, 0.0  ;;  %s11260_s13 = sld [smem:[#allocation37_spill]]  ;;  %v7451_v39 = vld [vmem:[#allocation10] ss:$0 sm:$0xff]  ;;  %vm401_vm1 = vcmask 64512  }
  0xa3   :  { %265 = vadd.xlane.f32.xlu0 %v264_v2  ;;  %v9541_v25 = vshrl.u32 %v291_v23, 7  ;;  %s11261_s5 = sld [smem:[#allocation38_spill]]  ;;  %s11241_s10 = smov 96   ;;  %v9578_v46 = vld [vmem:[#allocation7 + $0x8] sm:$0xff]  ;;  %v9580_v47 = vld [vmem:[#allocation7] sm:$0xff]  ;;  %vm489_vm3 = vcmask 130048  }
  0xa4   :  { %vm252_vm2 = vcmp.gt.f32.partialorder %v9578_v46, 0.0  ;;  %vm251_vm4 = vcmp.gt.f32.partialorder %v9580_v47, 0.0  ;;  %s11233_s19 = smov 64   ;;  %s11239_s9 = smov 88   ;;  %vm1247_vm5 = vcmask 195584   ;;  %vm3438_vm8 = vcmask 326656  }
  0xa5   :  { %v9544_v26 = vsub.s32 0, %v9541_v25  ;;  %s9304_s6 = smov 120   ;;  %s9305_s22 = smov 56   ;;  %vm3441_vm9 = vcmask 392192   ;;  %vm3444_vm10 = vcmask 457728   ;;  %vm3470_vm11 = vcmask 523264  }
  0xa6   :  { %s11227_s23 = smov 80   ;;  %s11231_s1 = smov 112  }
  0xa7   :  { %268 = vadd.xlane.f32.xlu0 %v267_v3  ;;  %v306_v14 = vld [vmem:[%s11259_s21 + $0x18] sm:$0xff]  ;;  %v305_v15 = vld [vmem:[%s11259_s21 + $0x10] sm:$0xff]  ;;  %v304_v16 = vld [vmem:[%s11259_s21 + $0x8] sm:$0xff]  ;;  %s9308_s7 = smov 48   ;;  %s11223_s11 = smov 72  }
  0xa8   :  { %8081 = vmatprep.subr.mxu0 %v306_v14  ;;  %v303_v17 = vld [vmem:[%s11259_s21] sm:$0xff]  ;;  %s11229_s27 = smov 104   ;;  %s9311_s3 = smov 40  }
  0xa9   :  { %8082 = vmatpush3.msra.mxu0 %v306_v14  ;;  %v9549_v27 = vld [vmem:[%s11260_s13] sm:$0x7]  ;;  %s11262_s8 = sld [smem:[#allocation41_spill]]  ;;  %s11237_s30 = smov 24  }
  0xaa   :  { %8083 = vmatprep.subr.mxu0 %v305_v15  ;;  %v9554_v28 = vld [vmem:[%s11261_s5] sm:$0x7]  ;;  %v294_v29 = vrot.slane %v9549_v27, %v9544_v26  ;;  %s11263_s4 = smov 80   ;;  %s11267_s2 = sld [smem:[#allocation35_spill]] }
  0xab   :  { %8084 = vmatpush3.msra.mxu0 %v305_v15  ;;  %v300_v32 = vrot.slane %v9554_v28, %v9544_v26  ;;  %s11272_s15 = smov 24  }
  0xac   :  { %8085 = vmatprep.subr.mxu0 %v304_v16 }
  0xad   :  { %8086 = vmatpush3.msra.mxu0 %v304_v16 }
  0xae   :  { %8087 = vmatprep.subr.mxu0 %v303_v17 }
  0xaf   :  { %8088 = vmatpush3.msra.mxu0 %v303_v17  ;;  %v7595_v47 = vld [vmem:[%s11262_s8 + $0x28] sm:$0xff]  ;;  %v7594_v46 = vld [vmem:[%s11262_s8 + $0x20] sm:$0xff] }
 0x12c   :  { %v266_v4 = vpop.xlane.xlu0 %265 }
 0x12d   :  { %v271_v5 = vmul.f32 0.03125, %v266_v4 }
 0x12f   :  { %v273_v6 = vsub.f32 %v9517_v0, %v271_v5 }
 0x130   :  { %v269_v7 = vpop.xlane.xlu0 %268 }
 0x131   :  { %v272_v8 = vmul.f32 0.03125, %v269_v7  ;;  %v275_v9 = vmul.f32 %v273_v6, %v273_v6 }
 0x133   :  { %v274_v10 = vsub.f32 %v9519_v1, %v272_v8  ;;  %v277_v11 = vsel %vm263_vm0, %v275_v9, 0.0 }
 0x134   :  { %278 = vadd.xlane.f32.xlu1 %v277_v11 }
 0x135   :  { %v276_v12 = vmul.f32 %v274_v10, %v274_v10 }
 0x137   :  { %v280_v13 = vsel %vm263_vm0, %v276_v12, 0.0 }
 0x138   :  { %281 = vadd.xlane.f32.xlu1 %v280_v13 }
 0x1bd   :  { %v279_v18 = vpop.xlane.xlu1 %278 }
 0x1be   :  { %v283_v19 = vmul.f32 0.03125, %v279_v18 }
 0x1c0   :  { %v285_v20 = vadd.f32 1e-12, %v283_v19 }
 0x1c1   :  { %v282_v21 = vpop.xlane.xlu1 %281 }
 0x1c2   :  { %8781 = vrsqrt.f32 %v285_v20  ;;  %v284_v22 = vmul.f32 0.03125, %v282_v21 }
 0x1c4   :  { %v286_v24 = vadd.f32 1e-12, %v284_v22 }
 0x1c6   :  { %8783 = vrsqrt.f32 %v286_v24 }
 0x1cf   :  { %v8782_v30 = vpop.eup %8781 }
 0x1d0   :  { %v289_v31 = vmul.f32 %v8782_v30, %v273_v6 }
 0x1d2   :  { %v295_v33 = vmul.f32 %v294_v29, %v289_v31 }
 0x1d3   :  { %v8784_v34 = vpop.eup %8783 }
 0x1d4   :  { %v290_v35 = vmul.f32 %v8784_v34, %v274_v10  ;;  %v301_v36 = vadd.f32 %v300_v32, %v295_v33 }
 0x1d6   :  { %v296_v37 = vmul.f32 %v294_v29, %v290_v35  ;;  %8089 = vmatprep.mubr.msk.f32.mxu0 %vm263_vm0, %v301_v36 }
 0x1d8   :  { %v302_v38 = vadd.f32 %v300_v32, %v296_v37 }
 0x1da   :  { %8090 = vmatmul.mubr.msk.f32.vlgmr.msra.gmra.mxu0 %vm263_vm0, %v302_v38 }
 0x29a   :  { %v8091_v40 = vpop.f32.mrf.mxu0 }
 0x29b   :  { %v9562_v41 = vadd.f32 %v8091_v40, %v7451_v39 }
 0x29c   :  { %v386_v42 = vpop.f32.mrf.mxu0 }
 0x29d   :  { %v9564_v43 = vadd.f32 %v7451_v39, %v386_v42  ;;  %399 = vrot.lane.b32.xlu0 %v9562_v41, %s11241_s10 }
 0x29f   :  { %397 = vrot.lane.b32.xlu1 %v9564_v43, %s11241_s10  ;;  %8096 = vmatprep.mubr.msk.f32.mxu1 %vm401_vm1, %v9564_v43 }
 0x30f   :  { %v400_v44 = vpop.permute.xlu0 %399 }
 0x310   :  { %8092 = vmatprep.subr.msk.mxu1 %vm401_vm1, %v400_v44 }
 0x311   :  { %8093 = vmatpush3.xpose.msk.msra.mxu1 %vm401_vm1, %v400_v44  ;;  %v398_v45 = vpop.permute.xlu1 %397 }
 0x312   :  { %8094 = vmatprep.subr.msk.mxu1 %vm401_vm1, %v398_v45 }
 0x315   :  { %8095 = vmatpush3.xpose.msk.msra.mxu1 %vm401_vm1, %v398_v45 }
 0x318   :  { %8097 = vmatmul.mubr.msk.f32.vlgmr.msra.gmra.mxu1 %vm401_vm1, %v9562_v41 }
 0x3d8   :  { %v8098_v48 = vpop.f32.mrf.mxu1 }
 0x3d9   :  { %v486_v49 = vmul.f32 0.35355338, %v8098_v48 }
 0x3da   :  { %v476_v50 = vpop.f32.mrf.mxu1 }
 0x3db   :  { %v485_v51 = vmul.f32 0.35355338, %v476_v50  ;;  %v488_v52 = vsel %vm252_vm2, %v486_v49, -1e+30 }
 0x3dc   :  { %v493_v53 = vsel %vm489_vm3, %v488_v52, -inf }
 0x3dd   :  { %494 = vmax.xlane.f32.xlu0 %v493_v53  ;;  %v487_v54 = vsel %vm251_vm4, %v485_v51, -1e+30 }
 0x3de   :  { %v490_v55 = vsel %vm489_vm3, %v487_v54, -inf }
 0x3df   :  { %491 = vmax.xlane.f32.xlu1 %v490_v55 }
 0x466   :  { %v495_v56 = vpop.xlane.xlu0 %494 }
 0x467   :  { %v497_v57 = vsub.f32 %v488_v52, %v495_v56 }
 0x468   :  { %v492_v58 = vpop.xlane.xlu1 %491 }
 0x469   :  { %v500_v59 = vmul.f32 1.442695, %v497_v57  ;;  %v496_v60 = vsub.f32 %v487_v54, %v492_v58 }
 0x46b   :  { %8785 = vpow2.f32 %v500_v59  ;;  %v498_v61 = vmul.f32 1.442695, %v496_v60 }
 0x46d   :  { %8787 = vpow2.f32 %v498_v61 }
 0x478   :  { %v8786_v62 = vpop.eup %8785 }
 0x479   :  { %v505_v63 = vsel %vm489_vm3, %v8786_v62, 0.0 }
 0x47a   :  { %v8788_v2 = vpop.eup %8787  ;;  %506 = vadd.xlane.f32.xlu1 %v505_v63 }
 0x47b   :  { %v502_v3 = vsel %vm489_vm3, %v8788_v2, 0.0 }
 0x47c   :  { %503 = vadd.xlane.f32.xlu0 %v502_v3 }
 0x48b   :  { %514 = vrot.lane.b32.xlu1 %v9564_v43, %s11233_s19 }
 0x48f   :  { %607 = vrot.lane.b32.xlu1 %v9562_v41, %s11239_s9 }
 0x492   :  { %516 = vrot.lane.b32.xlu0 %v9562_v41, %s11233_s19 }
 0x493   :  { %605 = vrot.lane.b32.xlu1 %v9564_v43, %s11239_s9 }
 0x496   :  { %601 = vrot.lane.b32.xlu0 %v9564_v43, %s9304_s6 }
 0x497   :  { %603 = vrot.lane.b32.xlu1 %v9562_v41, %s9304_s6 }
 0x503   :  { %v507_v4 = vpop.xlane.xlu1 %506 }
 0x504   :  { %8789 = vrcp.f32 %v507_v4 }
 0x505   :  { %v504_v5 = vpop.xlane.xlu0 %503 }
 0x506   :  { %8791 = vrcp.f32 %v504_v5 }
 0x507   :  { %v515_v6 = vpop.permute.xlu1 %514 }
 0x509   :  { %v517_v7 = vpop.permute.xlu0 %516 }
 0x50a   :  { %8099 = vmatprep.subr.mxu1 %v517_v7 }
 0x50b   :  { %8100 = vmatpush3.msra.mxu1 %v517_v7  ;;  %v608_v8 = vpop.permute.xlu1 %607 }
 0x50c   :  { %8101 = vmatprep.subr.mxu1 %v515_v6 }
 0x50d   :  { %8102 = vmatpush3.msra.mxu1 %v515_v6  ;;  %v602_v15 = vpop.permute.xlu0 %601 }
 0x50e   :  { %8106 = vmatprep.subr.msk.mxu1 %vm401_vm1, %v608_v8 }
 0x50f   :  { %v606_v16 = vpop.permute.xlu1 %605 }
 0x511   :  { %v8790_v9 = vpop.eup %8789 }
 0x512   :  { %v511_v11 = vmul.f32 %v8790_v9, %v8786_v62 }
 0x513   :  { %v8792_v10 = vpop.eup %8791  ;;  %v604_v17 = vpop.permute.xlu1 %603 }
 0x514   :  { %v510_v12 = vmul.f32 %v8792_v10, %v8788_v2  ;;  %v513_v14 = vsel %vm252_vm2, %v511_v11, 0.0 }
 0x516   :  { %v512_v13 = vsel %vm251_vm4, %v510_v12, 0.0 }
 0x517   :  { %8103 = vmatprep.mubr.msk.f32.mxu1 %vm489_vm3, %v512_v13 }
 0x518   :  { %8104 = vmatmul.mubr.msk.f32.vlgmr.msra.gmra.mxu1 %vm489_vm3, %v513_v14 }
 0x519   :  { %8107 = vmatpush3.xpose.msk.msra.mxu1 %vm401_vm1, %v608_v8  ;;  %8110 = vmatprep.mubr.msk.f32.mxu1 %vm401_vm1, %v602_v15 }
 0x51a   :  { %8108 = vmatprep.subr.msk.mxu1 %vm401_vm1, %v606_v16 }
 0x51d   :  { %8109 = vmatpush3.xpose.msk.msra.mxu1 %vm401_vm1, %v606_v16 }
 0x520   :  { %8111 = vmatmul.mubr.msk.f32.vlgmr.msra.gmra.mxu1 %vm401_vm1, %v604_v17 }
 0x5d8   :  { %v9616_v18 = vpop.f32.mrf.mxu1 }
 0x5da   :  { %v9618_v19 = vpop.f32.mrf.mxu1 }
 0x5e0   :  { %v8112_v20 = vpop.f32.mrf.mxu1 }
 0x5e1   :  { %v693_v21 = vmul.f32 0.35355338, %v8112_v20 }
 0x5e2   :  { %v683_v22 = vpop.f32.mrf.mxu1 }
 0x5e3   :  { %v692_v23 = vmul.f32 0.35355338, %v683_v22  ;;  %v695_v24 = vsel %vm252_vm2, %v693_v21, -1e+30 }
 0x5e4   :  { %v699_v29 = vsel %vm489_vm3, %v695_v24, -inf }
 0x5e5   :  { %700 = vmax.xlane.f32.xlu1 %v699_v29  ;;  %v694_v30 = vsel %vm251_vm4, %v692_v23, -1e+30 }
 0x5e6   :  { %v696_v31 = vsel %vm489_vm3, %v694_v30, -inf }
 0x5e7   :  { %697 = vmax.xlane.f32.xlu0 %v696_v31 }
 0x5f6   :  { %720 = vrot.lane.b32.xlu1 %v9564_v43, %s9305_s22 }
 0x5fa   :  { %813 = vrot.lane.b32.xlu1 %v9562_v41, %s11227_s23 }
 0x5fe   :  { %811 = vrot.lane.b32.xlu1 %v9564_v43, %s11227_s23  ;;  %s11235_s23 = smov 32  }
 0x602   :  { %809 = vrot.lane.b32.xlu1 %v9562_v41, %s11231_s1 }
 0x66e   :  { %v701_v32 = vpop.xlane.xlu1 %700 }
 0x66f   :  { %v703_v33 = vsub.f32 %v695_v24, %v701_v32 }
 0x670   :  { %v698_v34 = vpop.xlane.xlu0 %697 }
 0x671   :  { %v706_v35 = vmul.f32 1.442695, %v703_v33  ;;  %v702_v36 = vsub.f32 %v694_v30, %v698_v34 }
 0x672   :  { %v721_v48 = vpop.permute.xlu1 %720 }
 0x673   :  { %8793 = vpow2.f32 %v706_v35  ;;  %v704_v37 = vmul.f32 1.442695, %v702_v36 }
 0x675   :  { %8795 = vpow2.f32 %v704_v37 }
 0x676   :  { %v814_v50 = vpop.permute.xlu1 %813 }
 0x67a   :  { %v812_v58 = vpop.permute.xlu1 %811 }
 0x67e   :  { %v810_v59 = vpop.permute.xlu1 %809 }
 0x680   :  { %v8794_v38 = vpop.eup %8793 }
 0x681   :  { %v711_v39 = vsel %vm489_vm3, %v8794_v38, 0.0 }
 0x682   :  { %v8796_v40 = vpop.eup %8795  ;;  %712 = vadd.xlane.f32.xlu0 %v711_v39 }
 0x683   :  { %v708_v42 = vsel %vm489_vm3, %v8796_v40, 0.0 }
 0x686   :  { %709 = vadd.xlane.f32.xlu0 %v708_v42 }
 0x69c   :  { %722 = vrot.lane.b32.xlu0 %v9562_v41, %s9305_s22 }
 0x6a0   :  { %807 = vrot.lane.b32.xlu0 %v9564_v43, %s11231_s1 }
 0x70b   :  { %v713_v44 = vpop.xlane.xlu0 %712 }
 0x70c   :  { %8797 = vrcp.f32 %v713_v44 }
 0x70f   :  { %v710_v45 = vpop.xlane.xlu0 %709 }
 0x710   :  { %8799 = vrcp.f32 %v710_v45 }
 0x713   :  { %v723_v49 = vpop.permute.xlu0 %722 }
 0x714   :  { %8113 = vmatprep.subr.mxu0 %v723_v49 }
 0x715   :  { %8114 = vmatpush3.msra.mxu0 %v723_v49 }
 0x716   :  { %8115 = vmatprep.subr.mxu0 %v721_v48 }
 0x717   :  { %8116 = vmatpush3.msra.mxu0 %v721_v48  ;;  %v808_v57 = vpop.permute.xlu0 %807 }
 0x718   :  { %8120 = vmatprep.subr.msk.mxu0 %vm401_vm1, %v814_v50 }
 0x719   :  { %v8798_v51 = vpop.eup %8797 }
 0x71a   :  { %v717_v53 = vmul.f32 %v8798_v51, %v8794_v38 }
 0x71c   :  { %v719_v56 = vsel %vm252_vm2, %v717_v53, 0.0 }
 0x71d   :  { %v8800_v52 = vpop.eup %8799 }
 0x71e   :  { %v716_v54 = vmul.f32 %v8800_v52, %v8796_v40 }
 0x720   :  { %v718_v55 = vsel %vm251_vm4, %v716_v54, 0.0 }
 0x721   :  { %8117 = vmatprep.mubr.msk.f32.mxu0 %vm489_vm3, %v718_v55 }
 0x722   :  { %8118 = vmatmul.mubr.msk.f32.vlgmr.msra.gmra.mxu0 %vm489_vm3, %v719_v56 }
 0x723   :  { %8121 = vmatpush3.xpose.msk.msra.mxu0 %vm401_vm1, %v814_v50  ;;  %8124 = vmatprep.mubr.msk.f32.mxu0 %vm401_vm1, %v808_v57 }
 0x724   :  { %8122 = vmatprep.subr.msk.mxu0 %vm401_vm1, %v812_v58 }
 0x727   :  { %8123 = vmatpush3.xpose.msk.msra.mxu0 %vm401_vm1, %v812_v58 }
 0x72a   :  { %8125 = vmatmul.mubr.msk.f32.vlgmr.msra.gmra.mxu0 %vm401_vm1, %v810_v59 }
 0x7e2   :  { %v9652_v60 = vpop.f32.mrf.mxu0 }
 0x7e4   :  { %v9654_v61 = vpop.f32.mrf.mxu0 }
 0x7ea   :  { %v8126_v62 = vpop.f32.mrf.mxu0 }
 0x7eb   :  { %v899_v63 = vmul.f32 0.35355338, %v8126_v62 }
 0x7ec   :  { %v889_v2 = vpop.f32.mrf.mxu0 }
 0x7ed   :  { %v898_v3 = vmul.f32 0.35355338, %v889_v2  ;;  %v901_v4 = vsel %vm252_vm2, %v899_v63, -1e+30 }
 0x7ee   :  { %v905_v5 = vsel %vm489_vm3, %v901_v4, -inf }
 0x7ef   :  { %906 = vmax.xlane.f32.xlu1 %v905_v5  ;;  %v900_v6 = vsel %vm251_vm4, %v898_v3, -1e+30 }
 0x7f0   :  { %v902_v7 = vsel %vm489_vm3, %v900_v6, -inf }
 0x7f1   :  { %903 = vmax.xlane.f32.xlu0 %v902_v7 }
 0x800   :  { %926 = vrot.lane.b32.xlu1 %v9564_v43, %s9308_s7 }
 0x804   :  { %1019 = vrot.lane.b32.xlu1 %v9562_v41, %s11223_s11 }
 0x808   :  { %1017 = vrot.lane.b32.xlu1 %v9564_v43, %s11223_s11  ;;  %s11266_s11 = smov 8  }
 0x80c   :  { %1015 = vrot.lane.b32.xlu1 %v9562_v41, %s11229_s27 }
 0x878   :  { %v907_v8 = vpop.xlane.xlu1 %906 }
 0x879   :  { %v909_v9 = vsub.f32 %v901_v4, %v907_v8  ;;  %v1253_v8 = vld [vmem:[%s11262_s8 + $0x18] sm:$0xff] }
 0x87a   :  { %v904_v10 = vpop.xlane.xlu0 %903 }
 0x87b   :  { %v912_v11 = vmul.f32 1.442695, %v909_v9  ;;  %v908_v12 = vsub.f32 %v900_v6, %v904_v10  ;;  %v1252_v9 = vld [vmem:[%s11262_s8 + $0x10] sm:$0xff]  ;;  %v1251_v10 = vld [vmem:[%s11262_s8 + $0x8] sm:$0xff] }
 0x87c   :  { %v927_v22 = vpop.permute.xlu1 %926 }
 0x87d   :  { %8801 = vpow2.f32 %v912_v11  ;;  %v910_v13 = vmul.f32 1.442695, %v908_v12  ;;  %v1250_v11 = vld [vmem:[%s11262_s8] sm:$0xff] }
 0x87f   :  { %8803 = vpow2.f32 %v910_v13 }
 0x880   :  { %v1020_v24 = vpop.permute.xlu1 %1019 }
 0x884   :  { %v1018_v36 = vpop.permute.xlu1 %1017 }
 0x888   :  { %v1016_v37 = vpop.permute.xlu1 %1015 }
 0x88a   :  { %v8802_v14 = vpop.eup %8801 }
 0x88b   :  { %v917_v15 = vsel %vm489_vm3, %v8802_v14, 0.0 }
 0x88c   :  { %v8804_v16 = vpop.eup %8803  ;;  %918 = vadd.xlane.f32.xlu0 %v917_v15 }
 0x88d   :  { %v914_v17 = vsel %vm489_vm3, %v8804_v16, 0.0 }
 0x890   :  { %915 = vadd.xlane.f32.xlu0 %v914_v17 }
 0x8a6   :  { %928 = vrot.lane.b32.xlu0 %v9562_v41, %s9308_s7 }
 0x8aa   :  { %1013 = vrot.lane.b32.xlu0 %v9564_v43, %s11229_s27 }
 0x915   :  { %v919_v20 = vpop.xlane.xlu0 %918 }
 0x916   :  { %8805 = vrcp.f32 %v919_v20 }
 0x919   :  { %v916_v21 = vpop.xlane.xlu0 %915 }
 0x91a   :  { %8807 = vrcp.f32 %v916_v21 }
 0x91d   :  { %v929_v23 = vpop.permute.xlu0 %928 }
 0x91e   :  { %8127 = vmatprep.subr.mxu1 %v929_v23 }
 0x91f   :  { %8128 = vmatpush3.msra.mxu1 %v929_v23 }
 0x920   :  { %8129 = vmatprep.subr.mxu1 %v927_v22 }
 0x921   :  { %8130 = vmatpush3.msra.mxu1 %v927_v22  ;;  %v1014_v35 = vpop.permute.xlu0 %1013 }
 0x922   :  { %8134 = vmatprep.subr.msk.mxu1 %vm401_vm1, %v1020_v24 }
 0x923   :  { %v8806_v29 = vpop.eup %8805 }
 0x924   :  { %v923_v31 = vmul.f32 %v8806_v29, %v8802_v14 }
 0x926   :  { %v925_v34 = vsel %vm252_vm2, %v923_v31, 0.0 }
 0x927   :  { %v8808_v30 = vpop.eup %8807 }
 0x928   :  { %v922_v32 = vmul.f32 %v8808_v30, %v8804_v16 }
 0x92a   :  { %v924_v33 = vsel %vm251_vm4, %v922_v32, 0.0 }
 0x92b   :  { %8131 = vmatprep.mubr.msk.f32.mxu1 %vm489_vm3, %v924_v33 }
 0x92c   :  { %8132 = vmatmul.mubr.msk.f32.vlgmr.msra.gmra.mxu1 %vm489_vm3, %v925_v34 }
 0x92d   :  { %8135 = vmatpush3.xpose.msk.msra.mxu1 %vm401_vm1, %v1020_v24  ;;  %8138 = vmatprep.mubr.msk.f32.mxu1 %vm401_vm1, %v1014_v35 }
 0x92e   :  { %8136 = vmatprep.subr.msk.mxu1 %vm401_vm1, %v1018_v36 }
 0x931   :  { %8137 = vmatpush3.xpose.msk.msra.mxu1 %vm401_vm1, %v1018_v36 }
 0x934   :  { %8139 = vmatmul.mubr.msk.f32.vlgmr.msra.gmra.mxu1 %vm401_vm1, %v1016_v37 }
 0x9ec   :  { %v8133_v38 = vpop.f32.mrf.mxu1 }
 0x9ee   :  { %v1004_v39 = vpop.f32.mrf.mxu1 }
 0x9f4   :  { %v8140_v40 = vpop.f32.mrf.mxu1 }
 0x9f5   :  { %v1105_v42 = vmul.f32 0.35355338, %v8140_v40  ;;  %v1477_v40 = vld [vmem:[%s11201_s14 + $0x8] sm:$0xff] }
 0x9f6   :  { %v1095_v44 = vpop.f32.mrf.mxu1 }
 0x9f7   :  { %v1104_v45 = vmul.f32 0.35355338, %v1095_v44  ;;  %v1107_v48 = vsel %vm252_vm2, %v1105_v42, -1e+30  ;;  %v1476_v42 = vld [vmem:[%s11201_s14] sm:$0xff]  ;;  %v246_v44 = vld [vmem:[#allocation5 + $0x8] sm:$0xff] }
 0x9f8   :  { %v1111_v49 = vsel %vm489_vm3, %v1107_v48, -inf }
 0x9f9   :  { %1112 = vmax.xlane.f32.xlu1 %v1111_v49  ;;  %v1106_v50 = vsel %vm251_vm4, %v1104_v45, -1e+30  ;;  %v247_v45 = vld [vmem:[#allocation5 + $0x10] sm:$0xff] }
 0x9fa   :  { %v1108_v51 = vsel %vm489_vm3, %v1106_v50, -inf }
 0x9fb   :  { %1109 = vmax.xlane.f32.xlu0 %v1108_v51 }
 0xa0a   :  { %1132 = vrot.lane.b32.xlu1 %v9564_v43, %s9311_s3 }
 0xa0e   :  { %1221 = vrot.lane.b32.xlu1 %v9654_v61, %s11221_s29 }
 0xa12   :  { %1223 = vrot.lane.b32.xlu1 %v9652_v60, %s11221_s29  ;;  %s11264_s29 = smov 16  }
 0xa16   :  { %1231 = vrot.lane.b32.xlu1 %v8133_v38, %s11225_s0 }
 0xa82   :  { %v1113_v52 = vpop.xlane.xlu1 %1112 }
 0xa83   :  { %v1115_v53 = vsub.f32 %v1107_v48, %v1113_v52  ;;  %v248_v48 = vld [vmem:[#allocation5 + $0x18] sm:$0xff] }
 0xa84   :  { %v1110_v54 = vpop.xlane.xlu0 %1109 }
 0xa85   :  { %v1118_v55 = vmul.f32 1.442695, %v1115_v53  ;;  %v1114_v56 = vsub.f32 %v1106_v50, %v1110_v54 }
 0xa86   :  { %v1133_v2 = vpop.permute.xlu1 %1132 }
 0xa87   :  { %8809 = vpow2.f32 %v1118_v55  ;;  %v1116_v57 = vmul.f32 1.442695, %v1114_v56 }
 0xa89   :  { %8811 = vpow2.f32 %v1116_v57 }
 0xa8a   :  { %v1222_v14 = vpop.permute.xlu1 %1221 }
 0xa8b   :  { %v1243_v20 = vsel %vm401_vm1, %v9618_v19, %v1222_v14  ;;  %v7480_v19 = vld [vmem:[#allocation11] ss:$0 sm:$0xff] }
 0xa8e   :  { %v1224_v15 = vpop.permute.xlu1 %1223 }
 0xa8f   :  { %v1244_v22 = vsel %vm401_vm1, %v9616_v18, %v1224_v15 }
 0xa92   :  { %v1232_v16 = vpop.permute.xlu1 %1231 }
 0xa93   :  { %v1246_v29 = vsel %vm489_vm3, %v1244_v22, %v1232_v16 }
 0xa94   :  { %v8810_v58 = vpop.eup %8809 }
 0xa95   :  { %v1123_v59 = vsel %vm489_vm3, %v8810_v58, 0.0 }
 0xa96   :  { %v8812_v43 = vpop.eup %8811  ;;  %1124 = vadd.xlane.f32.xlu0 %v1123_v59  ;;  %v1387_v59 = vld [vmem:[%s11199_s12 + $0x18] sm:$0xff] }
 0xa97   :  { %v1120_v61 = vsel %vm489_vm3, %v8812_v43, 0.0  ;;  %8159 = vmatprep.subr.mxu1 %v1387_v59 }
 0xa98   :  { %8160 = vmatpush3.msra.mxu1 %v1387_v59 }
 0xa9a   :  { %1121 = vadd.xlane.f32.xlu0 %v1120_v61  ;;  %v1385_v61 = vld [vmem:[%s11199_s12 + $0x8] sm:$0xff] }
 0xab0   :  { %1134 = vrot.lane.b32.xlu0 %v9562_v41, %s9311_s3 }
 0xab4   :  { %1229 = vrot.lane.b32.xlu0 %v1004_v39, %s11225_s0  ;;  %v1479_v39 = vld [vmem:[%s11201_s14 + $0x18] sm:$0xff]  ;;  %s11265_s0 = smov 72  }
 0xb1f   :  { %v1125_v60 = vpop.xlane.xlu0 %1124 }
 0xb20   :  { %8813 = vrcp.f32 %v1125_v60  ;;  %v1384_v60 = vld [vmem:[%s11199_s12] sm:$0xff] }
 0xb23   :  { %v1122_v62 = vpop.xlane.xlu0 %1121 }
 0xb24   :  { %8815 = vrcp.f32 %v1122_v62 }
 0xb27   :  { %v1135_v63 = vpop.permute.xlu0 %1134 }
 0xb28   :  { %8141 = vmatprep.subr.mxu0 %v1135_v63 }
 0xb29   :  { %8142 = vmatpush3.msra.mxu0 %v1135_v63  ;;  %v7484_v63 = vld [vmem:[#allocation14] ss:$0 sm:$0xff] }
 0xb2a   :  { %8143 = vmatprep.subr.mxu0 %v1133_v2 }
 0xb2b   :  { %8144 = vmatpush3.msra.mxu0 %v1133_v2  ;;  %v1230_v17 = vpop.permute.xlu0 %1229 }
 0xb2c   :  { %8148 = vmatprep.subr.mxu0 %v1253_v8  ;;  %v1245_v23 = vsel %vm489_vm3, %v1243_v20, %v1230_v17 }
 0xb2d   :  { %v8814_v3 = vpop.eup %8813 }
 0xb2e   :  { %v1129_v5 = vmul.f32 %v8814_v3, %v8810_v58 }
 0xb30   :  { %v1131_v41 = vsel %vm252_vm2, %v1129_v5, 0.0 }
 0xb31   :  { %v8816_v4 = vpop.eup %8815 }
 0xb32   :  { %v1128_v6 = vmul.f32 %v8816_v4, %v8812_v43  ;;  %v1386_v43 = vld [vmem:[%s11199_s12 + $0x10] sm:$0xff] }
 0xb33   :  { %8161 = vmatprep.subr.mxu1 %v1386_v43 }
 0xb34   :  { %v1130_v7 = vsel %vm251_vm4, %v1128_v6, 0.0  ;;  %8162 = vmatpush3.msra.mxu1 %v1386_v43 }
 0xb35   :  { %8145 = vmatprep.mubr.msk.f32.mxu0 %vm489_vm3, %v1130_v7  ;;  %8163 = vmatprep.subr.mxu1 %v1385_v61 }
 0xb36   :  { %8146 = vmatmul.mubr.msk.f32.vlgmr.msra.gmra.mxu0 %vm489_vm3, %v1131_v41  ;;  %8164 = vmatpush3.msra.mxu1 %v1385_v61 }
 0xb37   :  { %8149 = vmatpush3.msra.mxu0 %v1253_v8  ;;  %8165 = vmatprep.subr.mxu1 %v1384_v60 }
 0xb38   :  { %8150 = vmatprep.subr.mxu0 %v1252_v9  ;;  %8166 = vmatpush3.msra.mxu1 %v1384_v60 }
 0xb39   :  { %8151 = vmatpush3.msra.mxu0 %v1252_v9 }
 0xb3a   :  { %8152 = vmatprep.subr.mxu0 %v1251_v10 }
 0xb3b   :  { %8153 = vmatpush3.msra.mxu0 %v1251_v10 }
 0xb3c   :  { %8154 = vmatprep.subr.mxu0 %v1250_v11 }
 0xb3d   :  { %8155 = vmatpush3.msra.mxu0 %v1250_v11 }
 0xb3e   :  { %8170 = vmatprep.subr.mxu0 %v1479_v39 }
 0xbf6   :  { %v8147_v12 = vpop.f32.mrf.mxu0 }
 0xbf7   :  { %1239 = vrot.lane.b32.xlu1 %v8147_v12, %s11237_s30  ;;  %v9787_v12 = vsub.s32 1, %v9541_v25 }
 0xbf8   :  { %v1210_v13 = vpop.f32.mrf.mxu0 }
 0xbf9   :  { %1237 = vrot.lane.b32.xlu0 %v1210_v13, %s11237_s30  ;;  %v1375_v13 = vrot.slane %v9549_v27, %v9787_v12  ;;  %v1381_v15 = vrot.slane %v9554_v28, %v9787_v12  ;;  %v7481_v28 = vld [vmem:[#allocation13] ss:$0 sm:$0xff] }
 0xc69   :  { %v1240_v21 = vpop.permute.xlu1 %1239 }
 0xc6a   :  { %v1249_v31 = vsel %vm1247_vm5, %v1246_v29, %v1240_v21 }
 0xc6b   :  { %v1238_v24 = vpop.permute.xlu0 %1237 }
 0xc6c   :  { %v1248_v30 = vsel %vm1247_vm5, %v1245_v23, %v1238_v24 }
 0xc6d   :  { %8156 = vmatprep.mubr.msk.f32.mxu0 %vm263_vm0, %v1248_v30 }
 0xc6e   :  { %8157 = vmatmul.mubr.msk.f32.vlgmr.msra.gmra.mxu0 %vm263_vm0, %v1249_v31 }
 0xc6f   :  { %8171 = vmatpush3.msra.mxu0 %v1479_v39 }
 0xd2e   :  { %v8158_v32 = vpop.f32.mrf.mxu0 }
 0xd2f   :  { %v1336_v33 = vadd.f32 %v8158_v32, %v9519_v1  ;;  %v1478_v1 = vld [vmem:[%s11201_s14 + $0x10] sm:$0xff] }
 0xd30   :  { %v1326_v34 = vpop.f32.mrf.mxu0  ;;  %8172 = vmatprep.subr.mxu0 %v1478_v1 }
 0xd31   :  { %v9737_v35 = vadd.f32 %v7480_v19, %v1336_v33  ;;  %v1335_v18 = vadd.f32 %v1326_v34, %v9517_v0  ;;  %v245_v0 = vld [vmem:[#allocation5] sm:$0xff]  ;;  %8173 = vmatpush3.msra.mxu0 %v1478_v1  ;;  %v9819_v33 = vld [vmem:[#allocation8 + $0x8] sm:$0xff]  ;;  %v9821_v34 = vld [vmem:[#allocation8] sm:$0xff] }
 0xd32   :  { %8178 = vmatprep.mubr.msk.f32.mxu0 %vm263_vm0, %v245_v0  ;;  %8174 = vmatprep.subr.mxu0 %v1477_v40  ;;  %vm256_vm6 = vcmp.gt.f32.partialorder %v9819_v33, 0.0  ;;  %vm255_vm7 = vcmp.gt.f32.partialorder %v9821_v34, 0.0  ;;  %v7687_v34 = vld [vmem:[%s11203_s16 + $0x68] sm:$0xff]  ;;  %v7686_v33 = vld [vmem:[%s11203_s16 + $0x60] sm:$0xff] }
 0xd33   :  { %v9740_v36 = vadd.f32 %v7480_v19, %v1335_v18  ;;  %v1349_v37 = vsel %vm263_vm0, %v9737_v35, 0.0  ;;  %8175 = vmatpush3.msra.mxu0 %v1477_v40 }
 0xd34   :  { %1350 = vadd.xlane.f32.xlu1 %v1349_v37  ;;  %8176 = vmatprep.subr.mxu0 %v1476_v42 }
 0xd35   :  { %v1346_v38 = vsel %vm263_vm0, %v9740_v36, 0.0  ;;  %8177 = vmatpush3.msra.mxu0 %v1476_v42 }
 0xd36   :  { %1347 = vadd.xlane.f32.xlu0 %v1346_v38  ;;  %8179 = vmatmul.mubr.msk.f32.vlgmr.msra.gmra.mxu0 %vm263_vm0, %v246_v44 }
 0xd37   :  { %8181 = vmatprep.mubr.msk.f32.mxu0 %vm263_vm0, %v247_v45 }
 0xd3a   :  { %8182 = vmatmul.mubr.msk.f32.gmra.mxu0 %vm263_vm0, %v248_v48 }
 0xdbd   :  { %v1351_v49 = vpop.xlane.xlu1 %1350 }
 0xdbe   :  { %v1353_v50 = vmul.f32 0.03125, %v1351_v49 }
 0xdbf   :  { %v1348_v51 = vpop.xlane.xlu0 %1347 }
 0xdc0   :  { %v1352_v52 = vmul.f32 0.03125, %v1348_v51  ;;  %v1355_v53 = vsub.f32 %v9737_v35, %v1353_v50 }
 0xdc2   :  { %v1354_v54 = vsub.f32 %v9740_v36, %v1352_v52  ;;  %v1357_v57 = vmul.f32 %v1355_v53, %v1355_v53 }
 0xdc4   :  { %v1356_v55 = vmul.f32 %v1354_v54, %v1354_v54  ;;  %v1361_v58 = vsel %vm263_vm0, %v1357_v57, 0.0 }
 0xdc6   :  { %v1358_v56 = vsel %vm263_vm0, %v1356_v55, 0.0 }
 0xdc7   :  { %1359 = vadd.xlane.f32.xlu0 %v1358_v56 }
 0xdcb   :  { %1362 = vadd.xlane.f32.xlu0 %v1361_v58 }
 0xdf6   :  { %v8180_v62 = vpop.f32.mrf.mxu0 }
 0xdf7   :  { %v9778_v2 = vadd.f32 %v8180_v62, %v7484_v63 }
 0xdf8   :  { %v1565_v3 = vpop.f32.mrf.mxu0 }
 0xdf9   :  { %v9780_v4 = vadd.f32 %v7484_v63, %v1565_v3 }
 0xdfa   :  { %v8183_v5 = vpop.f32.mrf.mxu0 }
 0xdfb   :  { %v9782_v6 = vadd.f32 %v8183_v5, %v7484_v63 }
 0xdfc   :  { %v1575_v23 = vpop.f32.mrf.mxu0 }
 0xdfd   :  { %8184 = vmatprep.subr.msk.mxu1 %vm401_vm1, %v9782_v6  ;;  %v9794_v30 = vadd.f32 %v7484_v63, %v1575_v23 }
 0xe50   :  { %v1360_v7 = vpop.xlane.xlu0 %1359 }
 0xe51   :  { %v1364_v41 = vmul.f32 0.03125, %v1360_v7 }
 0xe53   :  { %v1366_v8 = vadd.f32 1e-12, %v1364_v41 }
 0xe54   :  { %v1363_v9 = vpop.xlane.xlu0 %1362 }
 0xe55   :  { %8817 = vrsqrt.f32 %v1366_v8  ;;  %v1365_v10 = vmul.f32 0.03125, %v1363_v9 }
 0xe57   :  { %v1367_v11 = vadd.f32 1e-12, %v1365_v10 }
 0xe59   :  { %8819 = vrsqrt.f32 %v1367_v11 }
 0xe62   :  { %v8818_v14 = vpop.eup %8817 }
 0xe63   :  { %v1370_v16 = vmul.f32 %v8818_v14, %v1354_v54 }
 0xe65   :  { %v1376_v17 = vmul.f32 %v1375_v13, %v1370_v16 }
 0xe66   :  { %v8820_v20 = vpop.eup %8819 }
 0xe67   :  { %v1382_v21 = vadd.f32 %v1381_v15, %v1376_v17  ;;  %v1371_v22 = vmul.f32 %v8820_v20, %v1355_v53 }
 0xe69   :  { %8167 = vmatprep.mubr.msk.f32.mxu1 %vm263_vm0, %v1382_v21  ;;  %v1377_v24 = vmul.f32 %v1375_v13, %v1371_v22 }
 0xe6b   :  { %v1383_v29 = vadd.f32 %v1381_v15, %v1377_v24 }
 0xe6d   :  { %8168 = vmatmul.mubr.msk.f32.vlgmr.msra.gmra.mxu1 %vm263_vm0, %v1383_v29 }
 0xe6e   :  { %8185 = vmatpush3.xpose.msk.msra.mxu1 %vm401_vm1, %v9782_v6 }
 0xe6f   :  { %8186 = vmatprep.subr.msk.mxu1 %vm401_vm1, %v9794_v30 }
 0xe72   :  { %8187 = vmatpush3.xpose.msk.msra.mxu1 %vm401_vm1, %v9794_v30 }
 0xe73   :  { %8188 = vmatprep.subr.msk.mxu1 %vm401_vm1, %v9778_v2 }
 0xe76   :  { %8189 = vmatpush3.xpose.msk.msra.mxu1 %vm401_vm1, %v9778_v2 }
 0xe77   :  { %8190 = vmatprep.subr.msk.mxu1 %vm401_vm1, %v9780_v4 }
 0xe7a   :  { %8191 = vmatpush3.xpose.msk.msra.mxu1 %vm401_vm1, %v9780_v4 }
 0xf2d   :  { %v8169_v27 = vpop.f32.mrf.mxu1 }
 0xf2e   :  { %v9813_v19 = vadd.f32 %v8169_v27, %v7481_v28 }
 0xf2f   :  { %v1467_v31 = vpop.f32.mrf.mxu1 }
 0xf30   :  { %v9811_v32 = vadd.f32 %v7481_v28, %v1467_v31 }
 0xf32   :  { %8192 = vmatprep.mubr.msk.f32.mxu1 %vm401_vm1, %v9811_v32 }
 0xf33   :  { %8193 = vmatmul.mubr.msk.f32.vlgmr.msra.gmra.mxu1 %vm401_vm1, %v9813_v19 }
 0xff3   :  { %v8194_v18 = vpop.f32.mrf.mxu1 }
 0xff4   :  { %v1678_v37 = vmul.f32 0.35355338, %v8194_v18 }
 0xff5   :  { %v1668_v38 = vpop.f32.mrf.mxu1 }
 0xff6   :  { %v1677_v39 = vmul.f32 0.35355338, %v1668_v38  ;;  %v1680_v1 = vsel %vm256_vm6, %v1678_v37, -1e+30 }
 0xff7   :  { %v1684_v0 = vsel %vm263_vm0, %v1680_v1, -inf }
 0xff8   :  { %1685 = vmax.xlane.f32.xlu1 %v1684_v0  ;;  %v1679_v40 = vsel %vm255_vm7, %v1677_v39, -1e+30 }
 0xff9   :  { %v1681_v42 = vsel %vm263_vm0, %v1679_v40, -inf }
 0xffa   :  { %1682 = vmax.xlane.f32.xlu0 %v1681_v42 }
0x1009   :  { %1709 = vrot.lane.b32.xlu1 %v9794_v30, %s11233_s19 }
0x100d   :  { %1707 = vrot.lane.b32.xlu1 %v9778_v2, %s11233_s19 }
0x1010   :  { %1711 = vrot.lane.b32.xlu0 %v9782_v6, %s11233_s19 }
0x1011   :  { %1705 = vrot.lane.b32.xlu1 %v9780_v4, %s11233_s19  ;;  %s11268_s19 = sld [smem:[#allocation36_spill]] }
0x1081   :  { %v1686_v44 = vpop.xlane.xlu1 %1685 }
0x1082   :  { %v1688_v45 = vsub.f32 %v1680_v1, %v1686_v44 }
0x1083   :  { %v1683_v48 = vpop.xlane.xlu0 %1682 }
0x1084   :  { %v1691_v49 = vmul.f32 1.442695, %v1688_v45  ;;  %v1687_v50 = vsub.f32 %v1679_v40, %v1683_v48 }
0x1085   :  { %v1710_v51 = vpop.permute.xlu1 %1709 }
0x1086   :  { %8821 = vpow2.f32 %v1691_v49  ;;  %v1689_v52 = vmul.f32 1.442695, %v1687_v50 }
0x1087   :  { %v1712_v53 = vpop.permute.xlu0 %1711 }
0x1088   :  { %8823 = vpow2.f32 %v1689_v52  ;;  %8195 = vmatprep.subr.mxu0 %v1712_v53 }
0x1089   :  { %v1708_v54 = vpop.permute.xlu1 %1707  ;;  %8196 = vmatpush3.msra.mxu0 %v1712_v53 }
0x108a   :  { %8197 = vmatprep.subr.mxu0 %v1710_v51 }
0x108b   :  { %8198 = vmatpush3.msra.mxu0 %v1710_v51 }
0x108c   :  { %8199 = vmatprep.subr.mxu0 %v1708_v54 }
0x108d   :  { %v1706_v55 = vpop.permute.xlu1 %1705  ;;  %8200 = vmatpush3.msra.mxu0 %v1708_v54 }
0x108e   :  { %8201 = vmatprep.subr.mxu0 %v1706_v55 }
0x108f   :  { %8202 = vmatpush3.msra.mxu0 %v1706_v55 }
0x1093   :  { %v8822_v56 = vpop.eup %8821 }
0x1094   :  { %v1696_v57 = vsel %vm263_vm0, %v8822_v56, 0.0 }
0x1095   :  { %v8824_v58 = vpop.eup %8823  ;;  %1697 = vadd.xlane.f32.xlu1 %v1696_v57 }
0x1096   :  { %v1693_v59 = vsel %vm263_vm0, %v8824_v58, 0.0 }
0x1097   :  { %1694 = vadd.xlane.f32.xlu0 %v1693_v59 }
0x10a6   :  { %1818 = vrot.lane.b32.xlu1 %v9794_v30, %s9304_s6 }
0x10aa   :  { %1814 = vrot.lane.b32.xlu1 %v9780_v4, %s9304_s6 }
0x10ad   :  { %1820 = vrot.lane.b32.xlu0 %v9782_v6, %s9304_s6 }
0x10ae   :  { %1812 = vrot.lane.b32.xlu1 %v9813_v19, %s9304_s6 }
0x10b1   :  { %1816 = vrot.lane.b32.xlu0 %v9778_v2, %s9304_s6 }
0x10b5   :  { %1810 = vrot.lane.b32.xlu0 %v9811_v32, %s9304_s6 }
0x111e   :  { %v1698_v43 = vpop.xlane.xlu1 %1697 }
0x111f   :  { %8825 = vrcp.f32 %v1698_v43 }
0x1120   :  { %v1695_v61 = vpop.xlane.xlu0 %1694 }
0x1121   :  { %8827 = vrcp.f32 %v1695_v61 }
0x1122   :  { %v1819_v10 = vpop.permute.xlu1 %1818 }
0x1124   :  { %v1821_v60 = vpop.permute.xlu0 %1820 }
0x1125   :  { %8206 = vmatprep.subr.msk.mxu0 %vm401_vm1, %v1821_v60 }
0x1126   :  { %v1815_v11 = vpop.permute.xlu1 %1814 }
0x1128   :  { %v1817_v63 = vpop.permute.xlu0 %1816 }
0x112a   :  { %v1813_v13 = vpop.permute.xlu1 %1812 }
0x112c   :  { %v8826_v62 = vpop.eup %8825  ;;  %v1811_v9 = vpop.permute.xlu0 %1810 }
0x112d   :  { %v1702_v5 = vmul.f32 %v8826_v62, %v8822_v56 }
0x112e   :  { %v8828_v3 = vpop.eup %8827 }
0x112f   :  { %v1701_v7 = vmul.f32 %v8828_v3, %v8824_v58  ;;  %v1704_v8 = vsel %vm256_vm6, %v1702_v5, 0.0 }
0x1131   :  { %v1703_v41 = vsel %vm255_vm7, %v1701_v7, 0.0 }
0x1132   :  { %8203 = vmatprep.mubr.msk.f32.mxu0 %vm263_vm0, %v1703_v41 }
0x1133   :  { %8204 = vmatmul.mubr.msk.f32.vlgmr.msra.gmra.mxu0 %vm263_vm0, %v1704_v8 }
0x1134   :  { %8207 = vmatpush3.xpose.msk.msra.mxu0 %vm401_vm1, %v1821_v60  ;;  %8214 = vmatprep.mubr.msk.f32.mxu0 %vm401_vm1, %v1811_v9 }
0x1135   :  { %8208 = vmatprep.subr.msk.mxu0 %vm401_vm1, %v1819_v10 }
0x1138   :  { %8209 = vmatpush3.xpose.msk.msra.mxu0 %vm401_vm1, %v1819_v10 }
0x1139   :  { %8210 = vmatprep.subr.msk.mxu0 %vm401_vm1, %v1817_v63 }
0x113c   :  { %8211 = vmatpush3.xpose.msk.msra.mxu0 %vm401_vm1, %v1817_v63 }
0x113d   :  { %8212 = vmatprep.subr.msk.mxu0 %vm401_vm1, %v1815_v11 }
0x1140   :  { %8213 = vmatpush3.xpose.msk.msra.mxu0 %vm401_vm1, %v1815_v11 }
0x1143   :  { %8215 = vmatmul.mubr.msk.f32.vlgmr.msra.gmra.mxu0 %vm401_vm1, %v1813_v13 }
0x11f3   :  { %v9869_v14 = vpop.f32.mrf.mxu0 }
0x11f5   :  { %v9871_v15 = vpop.f32.mrf.mxu0 }
0x1203   :  { %v8216_v16 = vpop.f32.mrf.mxu0 }
0x1204   :  { %v1910_v17 = vmul.f32 0.35355338, %v8216_v16 }
0x1205   :  { %v1900_v20 = vpop.f32.mrf.mxu0 }
0x1206   :  { %v1909_v21 = vmul.f32 0.35355338, %v1900_v20  ;;  %v1912_v22 = vsel %vm256_vm6, %v1910_v17, -1e+30 }
0x1207   :  { %v1916_v23 = vsel %vm263_vm0, %v1912_v22, -inf }
0x1208   :  { %1917 = vmax.xlane.f32.xlu1 %v1916_v23  ;;  %v1911_v24 = vsel %vm255_vm7, %v1909_v21, -1e+30 }
0x1209   :  { %v1913_v29 = vsel %vm263_vm0, %v1911_v24, -inf }
0x120a   :  { %1914 = vmax.xlane.f32.xlu0 %v1913_v29 }
0x1219   :  { %1941 = vrot.lane.b32.xlu1 %v9794_v30, %s9305_s22 }
0x121d   :  { %1939 = vrot.lane.b32.xlu1 %v9778_v2, %s9305_s22 }
0x1220   :  { %1943 = vrot.lane.b32.xlu0 %v9782_v6, %s9305_s22 }
0x1221   :  { %1937 = vrot.lane.b32.xlu1 %v9780_v4, %s9305_s22 }
0x1225   :  { %2040 = vrot.lane.b32.xlu1 %v9794_v30, %s11231_s1 }
0x1229   :  { %2036 = vrot.lane.b32.xlu1 %v9780_v4, %s11231_s1 }
0x122d   :  { %2034 = vrot.lane.b32.xlu1 %v9813_v19, %s11231_s1 }
0x1291   :  { %v1918_v27 = vpop.xlane.xlu1 %1917 }
0x1292   :  { %v1920_v28 = vsub.f32 %v1912_v22, %v1918_v27 }
0x1293   :  { %v1915_v31 = vpop.xlane.xlu0 %1914 }
0x1294   :  { %v1923_v18 = vmul.f32 1.442695, %v1920_v28  ;;  %v1919_v37 = vsub.f32 %v1911_v24, %v1915_v31 }
0x1295   :  { %v1942_v38 = vpop.permute.xlu1 %1941 }
0x1296   :  { %8829 = vpow2.f32 %v1923_v18  ;;  %v1921_v39 = vmul.f32 1.442695, %v1919_v37 }
0x1297   :  { %v1944_v1 = vpop.permute.xlu0 %1943 }
0x1298   :  { %8831 = vpow2.f32 %v1921_v39  ;;  %8217 = vmatprep.subr.mxu1 %v1944_v1 }
0x1299   :  { %v1940_v0 = vpop.permute.xlu1 %1939  ;;  %8218 = vmatpush3.msra.mxu1 %v1944_v1 }
0x129a   :  { %8219 = vmatprep.subr.mxu1 %v1942_v38 }
0x129b   :  { %8220 = vmatpush3.msra.mxu1 %v1942_v38 }
0x129c   :  { %8221 = vmatprep.subr.mxu1 %v1940_v0 }
0x129d   :  { %v1938_v40 = vpop.permute.xlu1 %1937  ;;  %8222 = vmatpush3.msra.mxu1 %v1940_v0 }
0x129e   :  { %8223 = vmatprep.subr.mxu1 %v1938_v40 }
0x129f   :  { %8224 = vmatpush3.msra.mxu1 %v1938_v40 }
0x12a1   :  { %v2041_v43 = vpop.permute.xlu1 %2040 }
0x12a3   :  { %v8830_v42 = vpop.eup %8829 }
0x12a4   :  { %v1928_v44 = vsel %vm263_vm0, %v8830_v42, 0.0 }
0x12a5   :  { %v8832_v45 = vpop.eup %8831  ;;  %1929 = vadd.xlane.f32.xlu0 %v1928_v44  ;;  %v2037_v61 = vpop.permute.xlu1 %2036 }
0x12a6   :  { %v1925_v48 = vsel %vm263_vm0, %v8832_v45, 0.0 }
0x12a9   :  { %1926 = vadd.xlane.f32.xlu0 %v1925_v48  ;;  %v2035_v60 = vpop.permute.xlu1 %2034 }
0x12bf   :  { %2042 = vrot.lane.b32.xlu0 %v9782_v6, %s11231_s1 }
0x12c3   :  { %2038 = vrot.lane.b32.xlu0 %v9778_v2, %s11231_s1 }
0x12c7   :  { %2032 = vrot.lane.b32.xlu0 %v9811_v32, %s11231_s1  ;;  %s11270_s1 = smov 112  }
0x132e   :  { %v1930_v49 = vpop.xlane.xlu0 %1929 }
0x132f   :  { %8833 = vrcp.f32 %v1930_v49 }
0x1332   :  { %v1927_v50 = vpop.xlane.xlu0 %1926 }
0x1333   :  { %8835 = vrcp.f32 %v1927_v50 }
0x1336   :  { %v2043_v51 = vpop.permute.xlu0 %2042 }
0x1337   :  { %8228 = vmatprep.subr.msk.mxu1 %vm401_vm1, %v2043_v51 }
0x133a   :  { %v2039_v53 = vpop.permute.xlu0 %2038 }
0x133c   :  { %v8834_v52 = vpop.eup %8833 }
0x133d   :  { %v1934_v55 = vmul.f32 %v8834_v52, %v8830_v42 }
0x133e   :  { %v2033_v59 = vpop.permute.xlu0 %2032 }
0x133f   :  { %v1936_v58 = vsel %vm256_vm6, %v1934_v55, 0.0 }
0x1340   :  { %v8836_v54 = vpop.eup %8835 }
0x1341   :  { %v1933_v56 = vmul.f32 %v8836_v54, %v8832_v45 }
0x1343   :  { %v1935_v57 = vsel %vm255_vm7, %v1933_v56, 0.0 }
0x1344   :  { %8225 = vmatprep.mubr.msk.f32.mxu1 %vm263_vm0, %v1935_v57 }
0x1345   :  { %8226 = vmatmul.mubr.msk.f32.vlgmr.msra.gmra.mxu1 %vm263_vm0, %v1936_v58 }
0x1346   :  { %8229 = vmatpush3.xpose.msk.msra.mxu1 %vm401_vm1, %v2043_v51  ;;  %8236 = vmatprep.mubr.msk.f32.mxu1 %vm401_vm1, %v2033_v59 }
0x1347   :  { %8230 = vmatprep.subr.msk.mxu1 %vm401_vm1, %v2041_v43 }
0x134a   :  { %8231 = vmatpush3.xpose.msk.msra.mxu1 %vm401_vm1, %v2041_v43 }
0x134b   :  { %8232 = vmatprep.subr.msk.mxu1 %vm401_vm1, %v2039_v53 }
0x134e   :  { %8233 = vmatpush3.xpose.msk.msra.mxu1 %vm401_vm1, %v2039_v53 }
0x134f   :  { %8234 = vmatprep.subr.msk.mxu1 %vm401_vm1, %v2037_v61 }
0x1352   :  { %8235 = vmatpush3.xpose.msk.msra.mxu1 %vm401_vm1, %v2037_v61 }
0x1355   :  { %8237 = vmatmul.mubr.msk.f32.vlgmr.msra.gmra.mxu1 %vm401_vm1, %v2035_v60 }
0x1405   :  { %v9917_v62 = vpop.f32.mrf.mxu1 }
0x1407   :  { %v9919_v63 = vpop.f32.mrf.mxu1 }
0x1415   :  { %v8238_v3 = vpop.f32.mrf.mxu1 }
0x1416   :  { %v2132_v5 = vmul.f32 0.35355338, %v8238_v3 }
0x1417   :  { %v2122_v7 = vpop.f32.mrf.mxu1 }
0x1418   :  { %v2131_v41 = vmul.f32 0.35355338, %v2122_v7  ;;  %v2134_v8 = vsel %vm256_vm6, %v2132_v5, -1e+30 }
0x1419   :  { %v2138_v9 = vsel %vm263_vm0, %v2134_v8, -inf }
0x141a   :  { %2139 = vmax.xlane.f32.xlu1 %v2138_v9  ;;  %v2133_v10 = vsel %vm255_vm7, %v2131_v41, -1e+30 }
0x141b   :  { %v2135_v11 = vsel %vm263_vm0, %v2133_v10, -inf }
0x141c   :  { %2136 = vmax.xlane.f32.xlu0 %v2135_v11 }
0x142b   :  { %2163 = vrot.lane.b32.xlu1 %v9794_v30, %s9308_s7 }
0x142f   :  { %2161 = vrot.lane.b32.xlu1 %v9778_v2, %s9308_s7 }
0x1432   :  { %2165 = vrot.lane.b32.xlu0 %v9782_v6, %s9308_s7 }
0x1433   :  { %2159 = vrot.lane.b32.xlu1 %v9780_v4, %s9308_s7 }
0x1437   :  { %2262 = vrot.lane.b32.xlu1 %v9794_v30, %s11229_s27 }
0x143b   :  { %2258 = vrot.lane.b32.xlu1 %v9780_v4, %s11229_s27 }
0x143f   :  { %2256 = vrot.lane.b32.xlu1 %v9813_v19, %s11229_s27 }
0x14a3   :  { %v2140_v13 = vpop.xlane.xlu1 %2139 }
0x14a4   :  { %v2142_v16 = vsub.f32 %v2134_v8, %v2140_v13 }
0x14a5   :  { %v2137_v17 = vpop.xlane.xlu0 %2136 }
0x14a6   :  { %v2145_v20 = vmul.f32 1.442695, %v2142_v16  ;;  %v2141_v21 = vsub.f32 %v2133_v10, %v2137_v17 }
0x14a7   :  { %v2164_v22 = vpop.permute.xlu1 %2163 }
0x14a8   :  { %8837 = vpow2.f32 %v2145_v20  ;;  %v2143_v23 = vmul.f32 1.442695, %v2141_v21 }
0x14a9   :  { %v2166_v24 = vpop.permute.xlu0 %2165 }
0x14aa   :  { %8839 = vpow2.f32 %v2143_v23  ;;  %8239 = vmatprep.subr.mxu0 %v2166_v24 }
0x14ab   :  { %v2162_v29 = vpop.permute.xlu1 %2161  ;;  %8240 = vmatpush3.msra.mxu0 %v2166_v24 }
0x14ac   :  { %8241 = vmatprep.subr.mxu0 %v2164_v22 }
0x14ad   :  { %8242 = vmatpush3.msra.mxu0 %v2164_v22 }
0x14ae   :  { %8243 = vmatprep.subr.mxu0 %v2162_v29 }
0x14af   :  { %v2160_v27 = vpop.permute.xlu1 %2159  ;;  %8244 = vmatpush3.msra.mxu0 %v2162_v29 }
0x14b0   :  { %8245 = vmatprep.subr.mxu0 %v2160_v27 }
0x14b1   :  { %8246 = vmatpush3.msra.mxu0 %v2160_v27 }
0x14b3   :  { %v2263_v51 = vpop.permute.xlu1 %2262 }
0x14b5   :  { %v8838_v28 = vpop.eup %8837 }
0x14b6   :  { %v2150_v31 = vsel %vm263_vm0, %v8838_v28, 0.0 }
0x14b7   :  { %v8840_v18 = vpop.eup %8839  ;;  %2151 = vadd.xlane.f32.xlu0 %v2150_v31  ;;  %v2259_v52 = vpop.permute.xlu1 %2258 }
0x14b8   :  { %v2147_v37 = vsel %vm263_vm0, %v8840_v18, 0.0 }
0x14bb   :  { %2148 = vadd.xlane.f32.xlu0 %v2147_v37  ;;  %v2257_v53 = vpop.permute.xlu1 %2256 }
0x14d1   :  { %2264 = vrot.lane.b32.xlu0 %v9782_v6, %s11229_s27 }
0x14d5   :  { %2260 = vrot.lane.b32.xlu0 %v9778_v2, %s11229_s27 }
0x14d9   :  { %2254 = vrot.lane.b32.xlu0 %v9811_v32, %s11229_s27  ;;  %s11271_s27 = smov 104  }
0x1540   :  { %v2152_v38 = vpop.xlane.xlu0 %2151 }
0x1541   :  { %8841 = vrcp.f32 %v2152_v38 }
0x1544   :  { %v2149_v39 = vpop.xlane.xlu0 %2148 }
0x1545   :  { %8843 = vrcp.f32 %v2149_v39 }
0x1548   :  { %v2265_v1 = vpop.permute.xlu0 %2264 }
0x1549   :  { %8250 = vmatprep.subr.msk.mxu0 %vm401_vm1, %v2265_v1 }
0x154c   :  { %v2261_v40 = vpop.permute.xlu0 %2260 }
0x154e   :  { %v8842_v0 = vpop.eup %8841 }
0x154f   :  { %v2156_v44 = vmul.f32 %v8842_v0, %v8838_v28 }
0x1550   :  { %v2255_v50 = vpop.permute.xlu0 %2254 }
0x1551   :  { %v2158_v49 = vsel %vm256_vm6, %v2156_v44, 0.0 }
0x1552   :  { %v8844_v42 = vpop.eup %8843 }
0x1553   :  { %v2155_v45 = vmul.f32 %v8844_v42, %v8840_v18 }
0x1555   :  { %v2157_v48 = vsel %vm255_vm7, %v2155_v45, 0.0 }
0x1556   :  { %8247 = vmatprep.mubr.msk.f32.mxu0 %vm263_vm0, %v2157_v48 }
0x1557   :  { %8248 = vmatmul.mubr.msk.f32.vlgmr.msra.gmra.mxu0 %vm263_vm0, %v2158_v49 }
0x1558   :  { %8251 = vmatpush3.xpose.msk.msra.mxu0 %vm401_vm1, %v2265_v1  ;;  %8258 = vmatprep.mubr.msk.f32.mxu0 %vm401_vm1, %v2255_v50 }
0x1559   :  { %8252 = vmatprep.subr.msk.mxu0 %vm401_vm1, %v2263_v51 }
0x155c   :  { %8253 = vmatpush3.xpose.msk.msra.mxu0 %vm401_vm1, %v2263_v51 }
0x155d   :  { %8254 = vmatprep.subr.msk.mxu0 %vm401_vm1, %v2261_v40 }
0x1560   :  { %8255 = vmatpush3.xpose.msk.msra.mxu0 %vm401_vm1, %v2261_v40 }
0x1561   :  { %8256 = vmatprep.subr.msk.mxu0 %vm401_vm1, %v2259_v52 }
0x1564   :  { %8257 = vmatpush3.xpose.msk.msra.mxu0 %vm401_vm1, %v2259_v52 }
0x1567   :  { %8259 = vmatmul.mubr.msk.f32.vlgmr.msra.gmra.mxu0 %vm401_vm1, %v2257_v53 }
0x1617   :  { %v9965_v54 = vpop.f32.mrf.mxu0 }
0x1619   :  { %v9967_v55 = vpop.f32.mrf.mxu0 }
0x1627   :  { %v8260_v56 = vpop.f32.mrf.mxu0 }
0x1628   :  { %v2354_v57 = vmul.f32 0.35355338, %v8260_v56 }
0x1629   :  { %v2344_v58 = vpop.f32.mrf.mxu0 }
0x162a   :  { %v2353_v59 = vmul.f32 0.35355338, %v2344_v58  ;;  %v2356_v43 = vsel %vm256_vm6, %v2354_v57, -1e+30 }
0x162b   :  { %v2360_v61 = vsel %vm263_vm0, %v2356_v43, -inf }
0x162c   :  { %2361 = vmax.xlane.f32.xlu1 %v2360_v61  ;;  %v2355_v60 = vsel %vm255_vm7, %v2353_v59, -1e+30 }
0x162d   :  { %v2357_v3 = vsel %vm263_vm0, %v2355_v60, -inf }
0x162e   :  { %2358 = vmax.xlane.f32.xlu0 %v2357_v3 }
0x163d   :  { %2385 = vrot.lane.b32.xlu1 %v9794_v30, %s9311_s3 }
0x1641   :  { %2383 = vrot.lane.b32.xlu1 %v9778_v2, %s9311_s3 }
0x1644   :  { %2387 = vrot.lane.b32.xlu0 %v9782_v6, %s9311_s3 }
0x1645   :  { %2381 = vrot.lane.b32.xlu1 %v9780_v4, %s9311_s3 }
0x1649   :  { %2484 = vrot.lane.b32.xlu1 %v9794_v30, %s11241_s10 }
0x164d   :  { %2480 = vrot.lane.b32.xlu1 %v9780_v4, %s11241_s10 }
0x1651   :  { %2478 = vrot.lane.b32.xlu1 %v9813_v19, %s11241_s10 }
0x16b5   :  { %v2362_v5 = vpop.xlane.xlu1 %2361 }
0x16b6   :  { %v2364_v7 = vsub.f32 %v2356_v43, %v2362_v5 }
0x16b7   :  { %v2359_v41 = vpop.xlane.xlu0 %2358 }
0x16b8   :  { %v2367_v8 = vmul.f32 1.442695, %v2364_v7  ;;  %v2363_v9 = vsub.f32 %v2355_v60, %v2359_v41 }
0x16b9   :  { %v2386_v10 = vpop.permute.xlu1 %2385 }
0x16ba   :  { %8845 = vpow2.f32 %v2367_v8  ;;  %v2365_v11 = vmul.f32 1.442695, %v2363_v9 }
0x16bb   :  { %v2388_v13 = vpop.permute.xlu0 %2387 }
0x16bc   :  { %8847 = vpow2.f32 %v2365_v11  ;;  %8261 = vmatprep.subr.mxu1 %v2388_v13 }
0x16bd   :  { %v2384_v16 = vpop.permute.xlu1 %2383  ;;  %8262 = vmatpush3.msra.mxu1 %v2388_v13 }
0x16be   :  { %8263 = vmatprep.subr.mxu1 %v2386_v10 }
0x16bf   :  { %8264 = vmatpush3.msra.mxu1 %v2386_v10 }
0x16c0   :  { %8265 = vmatprep.subr.mxu1 %v2384_v16 }
0x16c1   :  { %v2382_v17 = vpop.permute.xlu1 %2381  ;;  %8266 = vmatpush3.msra.mxu1 %v2384_v16 }
0x16c2   :  { %8267 = vmatprep.subr.mxu1 %v2382_v17 }
0x16c3   :  { %8268 = vmatpush3.msra.mxu1 %v2382_v17 }
0x16c5   :  { %v2485_v40 = vpop.permute.xlu1 %2484 }
0x16c7   :  { %v8846_v20 = vpop.eup %8845 }
0x16c8   :  { %v2372_v21 = vsel %vm263_vm0, %v8846_v20, 0.0 }
0x16c9   :  { %v8848_v22 = vpop.eup %8847  ;;  %2373 = vadd.xlane.f32.xlu0 %v2372_v21  ;;  %v2481_v42 = vpop.permute.xlu1 %2480 }
0x16ca   :  { %v2369_v23 = vsel %vm263_vm0, %v8848_v22, 0.0 }
0x16cd   :  { %2370 = vadd.xlane.f32.xlu0 %v2369_v23  ;;  %v2479_v44 = vpop.permute.xlu1 %2478 }
0x16e3   :  { %2486 = vrot.lane.b32.xlu0 %v9782_v6, %s11241_s10 }
0x16e7   :  { %2482 = vrot.lane.b32.xlu0 %v9778_v2, %s11241_s10 }
0x16eb   :  { %2476 = vrot.lane.b32.xlu0 %v9811_v32, %s11241_s10 }
0x1752   :  { %v2374_v24 = vpop.xlane.xlu0 %2373 }
0x1753   :  { %8849 = vrcp.f32 %v2374_v24 }
0x1756   :  { %v2371_v29 = vpop.xlane.xlu0 %2370 }
0x1757   :  { %8851 = vrcp.f32 %v2371_v29 }
0x175a   :  { %v2487_v27 = vpop.permute.xlu0 %2486 }
0x175b   :  { %8272 = vmatprep.subr.msk.mxu1 %vm401_vm1, %v2487_v27 }
0x175e   :  { %v2483_v31 = vpop.permute.xlu0 %2482 }
0x1760   :  { %v8850_v28 = vpop.eup %8849 }
0x1761   :  { %v2378_v37 = vmul.f32 %v8850_v28, %v8846_v20 }
0x1762   :  { %v2477_v0 = vpop.permute.xlu0 %2476 }
0x1763   :  { %v2380_v1 = vsel %vm256_vm6, %v2378_v37, 0.0 }
0x1764   :  { %v8852_v18 = vpop.eup %8851 }
0x1765   :  { %v2377_v38 = vmul.f32 %v8852_v18, %v8848_v22 }
0x1767   :  { %v2379_v39 = vsel %vm255_vm7, %v2377_v38, 0.0 }
0x1768   :  { %8269 = vmatprep.mubr.msk.f32.mxu1 %vm263_vm0, %v2379_v39 }
0x1769   :  { %8270 = vmatmul.mubr.msk.f32.vlgmr.msra.gmra.mxu1 %vm263_vm0, %v2380_v1 }
0x176a   :  { %8273 = vmatpush3.xpose.msk.msra.mxu1 %vm401_vm1, %v2487_v27  ;;  %8280 = vmatprep.mubr.msk.f32.mxu1 %vm401_vm1, %v2477_v0 }
0x176b   :  { %8274 = vmatprep.subr.msk.mxu1 %vm401_vm1, %v2485_v40 }
0x176e   :  { %8275 = vmatpush3.xpose.msk.msra.mxu1 %vm401_vm1, %v2485_v40 }
0x176f   :  { %8276 = vmatprep.subr.msk.mxu1 %vm401_vm1, %v2483_v31 }
0x1772   :  { %8277 = vmatpush3.xpose.msk.msra.mxu1 %vm401_vm1, %v2483_v31 }
0x1773   :  { %8278 = vmatprep.subr.msk.mxu1 %vm401_vm1, %v2481_v42 }
0x1776   :  { %8279 = vmatpush3.xpose.msk.msra.mxu1 %vm401_vm1, %v2481_v42 }
0x1779   :  { %8281 = vmatmul.mubr.msk.f32.vlgmr.msra.gmra.mxu1 %vm401_vm1, %v2479_v44 }
0x1829   :  { %v10013_v45 = vpop.f32.mrf.mxu1 }
0x182b   :  { %v10015_v48 = vpop.f32.mrf.mxu1 }
0x1839   :  { %v8282_v49 = vpop.f32.mrf.mxu1 }
0x183a   :  { %v2576_v50 = vmul.f32 0.35355338, %v8282_v49 }
0x183b   :  { %v2566_v51 = vpop.f32.mrf.mxu1 }
0x183c   :  { %v2578_v52 = vsel %vm256_vm6, %v2576_v50, -1e+30  ;;  %v2575_v53 = vmul.f32 0.35355338, %v2566_v51 }
0x183d   :  { %v2582_v56 = vsel %vm263_vm0, %v2578_v52, -inf }
0x183e   :  { %v2577_v57 = vsel %vm255_vm7, %v2575_v53, -1e+30  ;;  %2583 = vmax.xlane.f32.xlu1 %v2582_v56 }
0x183f   :  { %v2579_v58 = vsel %vm263_vm0, %v2577_v57, -inf }
0x1840   :  { %2580 = vmax.xlane.f32.xlu0 %v2579_v58 }
0x184f   :  { %2607 = vrot.lane.b32.xlu1 %v9794_v30, %s11235_s23 }
0x1853   :  { %2605 = vrot.lane.b32.xlu1 %v9778_v2, %s11235_s23 }
0x1856   :  { %2609 = vrot.lane.b32.xlu0 %v9782_v6, %s11235_s23 }
0x1857   :  { %2603 = vrot.lane.b32.xlu1 %v9780_v4, %s11235_s23 }
0x185b   :  { %2716 = vrot.lane.b32.xlu1 %v9794_v30, %s11239_s9 }
0x185f   :  { %2712 = vrot.lane.b32.xlu1 %v9780_v4, %s11239_s9 }
0x1863   :  { %2710 = vrot.lane.b32.xlu1 %v9813_v19, %s11239_s9 }
0x18c7   :  { %v2584_v59 = vpop.xlane.xlu1 %2583 }
0x18c8   :  { %v2586_v43 = vsub.f32 %v2578_v52, %v2584_v59 }
0x18c9   :  { %v2581_v61 = vpop.xlane.xlu0 %2580 }
0x18ca   :  { %v2589_v60 = vmul.f32 1.442695, %v2586_v43  ;;  %v2585_v3 = vsub.f32 %v2577_v57, %v2581_v61 }
0x18cb   :  { %v2608_v5 = vpop.permute.xlu1 %2607 }
0x18cc   :  { %8853 = vpow2.f32 %v2589_v60  ;;  %v2587_v7 = vmul.f32 1.442695, %v2585_v3 }
0x18cd   :  { %v2610_v41 = vpop.permute.xlu0 %2609 }
0x18ce   :  { %8855 = vpow2.f32 %v2587_v7  ;;  %8283 = vmatprep.subr.mxu0 %v2610_v41 }
0x18cf   :  { %v2606_v8 = vpop.permute.xlu1 %2605  ;;  %8284 = vmatpush3.msra.mxu0 %v2610_v41 }
0x18d0   :  { %8285 = vmatprep.subr.mxu0 %v2608_v5 }
0x18d1   :  { %8286 = vmatpush3.msra.mxu0 %v2608_v5 }
0x18d2   :  { %8287 = vmatprep.subr.mxu0 %v2606_v8 }
0x18d3   :  { %v2604_v9 = vpop.permute.xlu1 %2603  ;;  %8288 = vmatpush3.msra.mxu0 %v2606_v8 }
0x18d4   :  { %8289 = vmatprep.subr.mxu0 %v2604_v9 }
0x18d5   :  { %8290 = vmatpush3.msra.mxu0 %v2604_v9 }
0x18d7   :  { %v2717_v37 = vpop.permute.xlu1 %2716 }
0x18d9   :  { %v8854_v10 = vpop.eup %8853 }
0x18da   :  { %v2594_v11 = vsel %vm263_vm0, %v8854_v10, 0.0 }
0x18db   :  { %v8856_v13 = vpop.eup %8855  ;;  %2595 = vadd.xlane.f32.xlu0 %v2594_v11  ;;  %v2713_v38 = vpop.permute.xlu1 %2712 }
0x18dc   :  { %v2591_v16 = vsel %vm263_vm0, %v8856_v13, 0.0 }
0x18df   :  { %2592 = vadd.xlane.f32.xlu0 %v2591_v16  ;;  %v2711_v39 = vpop.permute.xlu1 %2710 }
0x18f5   :  { %2718 = vrot.lane.b32.xlu0 %v9782_v6, %s11239_s9 }
0x18f9   :  { %2714 = vrot.lane.b32.xlu0 %v9778_v2, %s11239_s9 }
0x18fd   :  { %2708 = vrot.lane.b32.xlu0 %v9811_v32, %s11239_s9 }
0x1964   :  { %v2596_v17 = vpop.xlane.xlu0 %2595 }
0x1965   :  { %8857 = vrcp.f32 %v2596_v17 }
0x1968   :  { %v2593_v20 = vpop.xlane.xlu0 %2592 }
0x1969   :  { %8859 = vrcp.f32 %v2593_v20 }
0x196c   :  { %v2719_v21 = vpop.permute.xlu0 %2718 }
0x196d   :  { %8294 = vmatprep.subr.msk.mxu0 %vm401_vm1, %v2719_v21 }
0x1970   :  { %v2715_v23 = vpop.permute.xlu0 %2714 }
0x1972   :  { %v8858_v22 = vpop.eup %8857 }
0x1973   :  { %v2600_v29 = vmul.f32 %v8858_v22, %v8854_v10 }
0x1974   :  { %v2709_v18 = vpop.permute.xlu0 %2708 }
0x1975   :  { %v2602_v31 = vsel %vm256_vm6, %v2600_v29, 0.0 }
0x1976   :  { %v8860_v24 = vpop.eup %8859 }
0x1977   :  { %v2599_v27 = vmul.f32 %v8860_v24, %v8856_v13 }
0x1979   :  { %v2601_v28 = vsel %vm255_vm7, %v2599_v27, 0.0 }
0x197a   :  { %8291 = vmatprep.mubr.msk.f32.mxu0 %vm263_vm0, %v2601_v28 }
0x197b   :  { %8292 = vmatmul.mubr.msk.f32.vlgmr.msra.gmra.mxu0 %vm263_vm0, %v2602_v31 }
0x197c   :  { %8295 = vmatpush3.xpose.msk.msra.mxu0 %vm401_vm1, %v2719_v21  ;;  %8302 = vmatprep.mubr.msk.f32.mxu0 %vm401_vm1, %v2709_v18 }
0x197d   :  { %8296 = vmatprep.subr.msk.mxu0 %vm401_vm1, %v2717_v37 }
0x1980   :  { %8297 = vmatpush3.xpose.msk.msra.mxu0 %vm401_vm1, %v2717_v37 }
0x1981   :  { %8298 = vmatprep.subr.msk.mxu0 %vm401_vm1, %v2715_v23 }
0x1984   :  { %8299 = vmatpush3.xpose.msk.msra.mxu0 %vm401_vm1, %v2715_v23 }
0x1985   :  { %8300 = vmatprep.subr.msk.mxu0 %vm401_vm1, %v2713_v38 }
0x1988   :  { %8301 = vmatpush3.xpose.msk.msra.mxu0 %vm401_vm1, %v2713_v38 }
0x198b   :  { %8303 = vmatmul.mubr.msk.f32.vlgmr.msra.gmra.mxu0 %vm401_vm1, %v2711_v39 }
0x1a3b   :  { %v10061_v1 = vpop.f32.mrf.mxu0 }
0x1a3d   :  { %v10063_v0 = vpop.f32.mrf.mxu0 }
0x1a4b   :  { %v8304_v40 = vpop.f32.mrf.mxu0 }
0x1a4c   :  { %v2808_v42 = vmul.f32 0.35355338, %v8304_v40 }
0x1a4d   :  { %v2798_v44 = vpop.f32.mrf.mxu0 }
0x1a4e   :  { %v2810_v49 = vsel %vm256_vm6, %v2808_v42, -1e+30  ;;  %v2807_v50 = vmul.f32 0.35355338, %v2798_v44 }
0x1a4f   :  { %v2814_v51 = vsel %vm263_vm0, %v2810_v49, -inf }
0x1a50   :  { %v2809_v52 = vsel %vm255_vm7, %v2807_v50, -1e+30  ;;  %2815 = vmax.xlane.f32.xlu1 %v2814_v51 }
0x1a51   :  { %v2811_v53 = vsel %vm263_vm0, %v2809_v52, -inf }
0x1a52   :  { %2812 = vmax.xlane.f32.xlu0 %v2811_v53 }
0x1a61   :  { %2839 = vrot.lane.b32.xlu1 %v9794_v30, %s11237_s30 }
0x1a65   :  { %2837 = vrot.lane.b32.xlu1 %v9778_v2, %s11237_s30 }
0x1a68   :  { %2841 = vrot.lane.b32.xlu0 %v9782_v6, %s11237_s30 }
0x1a69   :  { %2835 = vrot.lane.b32.xlu1 %v9780_v4, %s11237_s30 }
0x1a6d   :  { %2938 = vrot.lane.b32.xlu1 %v9794_v30, %s11263_s4 }
0x1a71   :  { %2934 = vrot.lane.b32.xlu1 %v9780_v4, %s11263_s4 }
0x1a75   :  { %2932 = vrot.lane.b32.xlu1 %v9813_v19, %s11263_s4 }
0x1ad9   :  { %v2816_v56 = vpop.xlane.xlu1 %2815 }
0x1ada   :  { %v2818_v57 = vsub.f32 %v2810_v49, %v2816_v56 }
0x1adb   :  { %v2813_v58 = vpop.xlane.xlu0 %2812 }
0x1adc   :  { %v2821_v59 = vmul.f32 1.442695, %v2818_v57  ;;  %v2817_v43 = vsub.f32 %v2809_v52, %v2813_v58 }
0x1add   :  { %v2840_v61 = vpop.permute.xlu1 %2839 }
0x1ade   :  { %8861 = vpow2.f32 %v2821_v59  ;;  %v2819_v60 = vmul.f32 1.442695, %v2817_v43 }
0x1adf   :  { %v2842_v3 = vpop.permute.xlu0 %2841 }
0x1ae0   :  { %8863 = vpow2.f32 %v2819_v60  ;;  %8305 = vmatprep.subr.mxu1 %v2842_v3 }
0x1ae1   :  { %v2838_v5 = vpop.permute.xlu1 %2837  ;;  %8306 = vmatpush3.msra.mxu1 %v2842_v3 }
0x1ae2   :  { %8307 = vmatprep.subr.mxu1 %v2840_v61 }
0x1ae3   :  { %8308 = vmatpush3.msra.mxu1 %v2840_v61 }
0x1ae4   :  { %8309 = vmatprep.subr.mxu1 %v2838_v5 }
0x1ae5   :  { %v2836_v7 = vpop.permute.xlu1 %2835  ;;  %8310 = vmatpush3.msra.mxu1 %v2838_v5 }
0x1ae6   :  { %8311 = vmatprep.subr.mxu1 %v2836_v7 }
0x1ae7   :  { %8312 = vmatpush3.msra.mxu1 %v2836_v7 }
0x1ae9   :  { %v2939_v28 = vpop.permute.xlu1 %2938 }
0x1aeb   :  { %v8862_v41 = vpop.eup %8861 }
0x1aec   :  { %v2826_v8 = vsel %vm263_vm0, %v8862_v41, 0.0 }
0x1aed   :  { %v8864_v9 = vpop.eup %8863  ;;  %2827 = vadd.xlane.f32.xlu0 %v2826_v8  ;;  %v2935_v31 = vpop.permute.xlu1 %2934 }
0x1aee   :  { %v2823_v10 = vsel %vm263_vm0, %v8864_v9, 0.0 }
0x1af1   :  { %2824 = vadd.xlane.f32.xlu0 %v2823_v10  ;;  %v2933_v18 = vpop.permute.xlu1 %2932 }
0x1b07   :  { %2940 = vrot.lane.b32.xlu0 %v9782_v6, %s11263_s4 }
0x1b0b   :  { %2936 = vrot.lane.b32.xlu0 %v9778_v2, %s11263_s4 }
0x1b0f   :  { %2930 = vrot.lane.b32.xlu0 %v9811_v32, %s11263_s4 }
0x1b76   :  { %v2828_v11 = vpop.xlane.xlu0 %2827 }
0x1b77   :  { %8865 = vrcp.f32 %v2828_v11 }
0x1b7a   :  { %v2825_v13 = vpop.xlane.xlu0 %2824 }
0x1b7b   :  { %8867 = vrcp.f32 %v2825_v13 }
0x1b7e   :  { %v2941_v16 = vpop.permute.xlu0 %2940 }
0x1b7f   :  { %8316 = vmatprep.subr.msk.mxu1 %vm401_vm1, %v2941_v16 }
0x1b82   :  { %v2937_v20 = vpop.permute.xlu0 %2936 }
0x1b84   :  { %v8866_v17 = vpop.eup %8865 }
0x1b85   :  { %v2832_v22 = vmul.f32 %v8866_v17, %v8862_v41 }
0x1b86   :  { %v2931_v27 = vpop.permute.xlu0 %2930 }
0x1b87   :  { %v2834_v29 = vsel %vm256_vm6, %v2832_v22, 0.0 }
0x1b88   :  { %v8868_v21 = vpop.eup %8867 }
0x1b89   :  { %v2831_v23 = vmul.f32 %v8868_v21, %v8864_v9 }
0x1b8b   :  { %v2833_v24 = vsel %vm255_vm7, %v2831_v23, 0.0 }
0x1b8c   :  { %8313 = vmatprep.mubr.msk.f32.mxu1 %vm263_vm0, %v2833_v24 }
0x1b8d   :  { %8314 = vmatmul.mubr.msk.f32.vlgmr.msra.gmra.mxu1 %vm263_vm0, %v2834_v29 }
0x1b8e   :  { %8317 = vmatpush3.xpose.msk.msra.mxu1 %vm401_vm1, %v2941_v16  ;;  %8324 = vmatprep.mubr.msk.f32.mxu1 %vm401_vm1, %v2931_v27 }
0x1b8f   :  { %8318 = vmatprep.subr.msk.mxu1 %vm401_vm1, %v2939_v28 }
0x1b92   :  { %8319 = vmatpush3.xpose.msk.msra.mxu1 %vm401_vm1, %v2939_v28  ;;  %v9314_v28 = vmov 0  }
0x1b93   :  { %8320 = vmatprep.subr.msk.mxu1 %vm401_vm1, %v2937_v20  ;;  %8780 = vset.pattern.permute.xlu1 %v9314_v28 }
0x1b94   :  { %8779 = vset.pattern.permute.xlu0 %v9314_v28 }
0x1b96   :  { %8321 = vmatpush3.xpose.msk.msra.mxu1 %vm401_vm1, %v2937_v20 }
0x1b97   :  { %8322 = vmatprep.subr.msk.mxu1 %vm401_vm1, %v2935_v31 }
0x1b9a   :  { %8323 = vmatpush3.xpose.msk.msra.mxu1 %vm401_vm1, %v2935_v31 }
0x1b9d   :  { %8325 = vmatmul.mubr.msk.f32.vlgmr.msra.gmra.mxu1 %vm401_vm1, %v2933_v18 }
0x1c4d   :  { %v10109_v37 = vpop.f32.mrf.mxu1 }
0x1c4f   :  { %v10111_v38 = vpop.f32.mrf.mxu1 }
0x1c5d   :  { %v8326_v39 = vpop.f32.mrf.mxu1 }
0x1c5e   :  { %v3030_v40 = vmul.f32 0.35355338, %v8326_v39 }
0x1c5f   :  { %v3020_v42 = vpop.f32.mrf.mxu1 }
0x1c60   :  { %v3032_v44 = vsel %vm256_vm6, %v3030_v40, -1e+30  ;;  %v3029_v49 = vmul.f32 0.35355338, %v3020_v42 }
0x1c61   :  { %v3036_v50 = vsel %vm263_vm0, %v3032_v44, -inf }
0x1c62   :  { %v3031_v51 = vsel %vm255_vm7, %v3029_v49, -1e+30  ;;  %3037 = vmax.xlane.f32.xlu1 %v3036_v50 }
0x1c63   :  { %v3033_v52 = vsel %vm263_vm0, %v3031_v51, -inf }
0x1c64   :  { %3034 = vmax.xlane.f32.xlu0 %v3033_v52 }
0x1c73   :  { %3061 = vrot.lane.b32.xlu1 %v9794_v30, %s11264_s29 }
0x1c77   :  { %3059 = vrot.lane.b32.xlu1 %v9778_v2, %s11264_s29 }
0x1c7a   :  { %3063 = vrot.lane.b32.xlu0 %v9782_v6, %s11264_s29 }
0x1c7b   :  { %3057 = vrot.lane.b32.xlu1 %v9780_v4, %s11264_s29 }
0x1c7f   :  { %3160 = vrot.lane.b32.xlu1 %v9794_v30, %s11265_s0 }
0x1c83   :  { %3156 = vrot.lane.b32.xlu1 %v9780_v4, %s11265_s0 }
0x1c87   :  { %3154 = vrot.lane.b32.xlu1 %v9813_v19, %s11265_s0 }
0x1ceb   :  { %v3038_v53 = vpop.xlane.xlu1 %3037 }
0x1cec   :  { %v3040_v56 = vsub.f32 %v3032_v44, %v3038_v53  ;;  %v258_v53 = vld [vmem:[%s11267_s2 + $0x8] sm:$0xff] }
0x1ced   :  { %v3035_v57 = vpop.xlane.xlu0 %3034 }
0x1cee   :  { %v3043_v58 = vmul.f32 1.442695, %v3040_v56  ;;  %v3039_v59 = vsub.f32 %v3031_v51, %v3035_v57  ;;  %v259_v56 = vld [vmem:[%s11268_s19] sm:$0xff] }
0x1cef   :  { %v3062_v43 = vpop.permute.xlu1 %3061 }
0x1cf0   :  { %8869 = vpow2.f32 %v3043_v58  ;;  %v3041_v61 = vmul.f32 1.442695, %v3039_v59 }
0x1cf1   :  { %v3064_v60 = vpop.permute.xlu0 %3063 }
0x1cf2   :  { %8871 = vpow2.f32 %v3041_v61  ;;  %8327 = vmatprep.subr.mxu0 %v3064_v60 }
0x1cf3   :  { %v3060_v3 = vpop.permute.xlu1 %3059  ;;  %8328 = vmatpush3.msra.mxu0 %v3064_v60 }
0x1cf4   :  { %8329 = vmatprep.subr.mxu0 %v3062_v43 }
0x1cf5   :  { %8330 = vmatpush3.msra.mxu0 %v3062_v43 }
0x1cf6   :  { %8331 = vmatprep.subr.mxu0 %v3060_v3 }
0x1cf7   :  { %v3058_v5 = vpop.permute.xlu1 %3057  ;;  %8332 = vmatpush3.msra.mxu0 %v3060_v3 }
0x1cf8   :  { %8333 = vmatprep.subr.mxu0 %v3058_v5 }
0x1cf9   :  { %8334 = vmatpush3.msra.mxu0 %v3058_v5 }
0x1cfb   :  { %v3161_v24 = vpop.permute.xlu1 %3160 }
0x1cfd   :  { %v8870_v19 = vpop.eup %8869 }
0x1cfe   :  { %v3048_v7 = vsel %vm263_vm0, %v8870_v19, 0.0 }
0x1cff   :  { %v8872_v41 = vpop.eup %8871  ;;  %3049 = vadd.xlane.f32.xlu0 %v3048_v7  ;;  %v3157_v29 = vpop.permute.xlu1 %3156 }
0x1d00   :  { %v3045_v8 = vsel %vm263_vm0, %v8872_v41, 0.0 }
0x1d03   :  { %3046 = vadd.xlane.f32.xlu0 %v3045_v8  ;;  %v3155_v27 = vpop.permute.xlu1 %3154  ;;  %v260_v8 = vld [vmem:[%s11268_s19 + $0x8] sm:$0xff] }
0x1d19   :  { %3162 = vrot.lane.b32.xlu0 %v9782_v6, %s11265_s0 }
0x1d1d   :  { %3158 = vrot.lane.b32.xlu0 %v9778_v2, %s11265_s0 }
0x1d21   :  { %3152 = vrot.lane.b32.xlu0 %v9811_v32, %s11265_s0 }
0x1d88   :  { %v3050_v9 = vpop.xlane.xlu0 %3049 }
0x1d89   :  { %8873 = vrcp.f32 %v3050_v9 }
0x1d8c   :  { %v3047_v10 = vpop.xlane.xlu0 %3046 }
0x1d8d   :  { %8875 = vrcp.f32 %v3047_v10 }
0x1d90   :  { %v3163_v11 = vpop.permute.xlu0 %3162 }
0x1d91   :  { %8338 = vmatprep.subr.msk.mxu0 %vm401_vm1, %v3163_v11 }
0x1d94   :  { %v3159_v16 = vpop.permute.xlu0 %3158 }
0x1d96   :  { %v8874_v13 = vpop.eup %8873 }
0x1d97   :  { %v3054_v20 = vmul.f32 %v8874_v13, %v8870_v19 }
0x1d98   :  { %v3153_v23 = vpop.permute.xlu0 %3152 }
0x1d99   :  { %v3056_v32 = vsel %vm256_vm6, %v3054_v20, 0.0 }
0x1d9a   :  { %v8876_v17 = vpop.eup %8875 }
0x1d9b   :  { %v3053_v21 = vmul.f32 %v8876_v17, %v8872_v41  ;;  %v257_v41 = vld [vmem:[%s11267_s2] sm:$0xff]  ;;  %s11269_s2 = smov 64  }
0x1d9d   :  { %v3055_v22 = vsel %vm255_vm7, %v3053_v21, 0.0 }
0x1d9e   :  { %8335 = vmatprep.mubr.msk.f32.mxu0 %vm263_vm0, %v3055_v22 }
0x1d9f   :  { %8336 = vmatmul.mubr.msk.f32.vlgmr.msra.gmra.mxu0 %vm263_vm0, %v3056_v32 }
0x1da0   :  { %8339 = vmatpush3.xpose.msk.msra.mxu0 %vm401_vm1, %v3163_v11  ;;  %8346 = vmatprep.mubr.msk.f32.mxu0 %vm401_vm1, %v3153_v23 }
0x1da1   :  { %8340 = vmatprep.subr.msk.mxu0 %vm401_vm1, %v3161_v24 }
0x1da4   :  { %8341 = vmatpush3.xpose.msk.msra.mxu0 %vm401_vm1, %v3161_v24 }
0x1da5   :  { %8342 = vmatprep.subr.msk.mxu0 %vm401_vm1, %v3159_v16 }
0x1da8   :  { %8343 = vmatpush3.xpose.msk.msra.mxu0 %vm401_vm1, %v3159_v16 }
0x1da9   :  { %8344 = vmatprep.subr.msk.mxu0 %vm401_vm1, %v3157_v29 }
0x1dac   :  { %8345 = vmatpush3.xpose.msk.msra.mxu0 %vm401_vm1, %v3157_v29 }
0x1daf   :  { %8347 = vmatmul.mubr.msk.f32.vlgmr.msra.gmra.mxu0 %vm401_vm1, %v3155_v27 }
0x1e5f   :  { %v10157_v31 = vpop.f32.mrf.mxu0 }
0x1e61   :  { %v10159_v18 = vpop.f32.mrf.mxu0 }
0x1e6f   :  { %v8348_v39 = vpop.f32.mrf.mxu0 }
0x1e70   :  { %v3252_v40 = vmul.f32 0.35355338, %v8348_v39 }
0x1e71   :  { %v3242_v42 = vpop.f32.mrf.mxu0 }
0x1e72   :  { %v3254_v44 = vsel %vm256_vm6, %v3252_v40, -1e+30  ;;  %v3251_v49 = vmul.f32 0.35355338, %v3242_v42  ;;  %v3465_v40 = vld [vmem:[%s11203_s16 + $0x18] sm:$0xff]  ;;  %v3464_v42 = vld [vmem:[%s11203_s16 + $0x10] sm:$0xff] }
0x1e73   :  { %v3258_v50 = vsel %vm263_vm0, %v3254_v44, -inf }
0x1e74   :  { %v3253_v51 = vsel %vm255_vm7, %v3251_v49, -1e+30  ;;  %3259 = vmax.xlane.f32.xlu1 %v3258_v50  ;;  %v3462_v49 = vld [vmem:[%s11203_s16] sm:$0xff] }
0x1e75   :  { %v3255_v52 = vsel %vm263_vm0, %v3253_v51, -inf }
0x1e76   :  { %3256 = vmax.xlane.f32.xlu0 %v3255_v52 }
0x1e85   :  { %3283 = vrot.lane.b32.xlu1 %v9794_v30, %s11266_s11 }
0x1e89   :  { %3281 = vrot.lane.b32.xlu1 %v9778_v2, %s11266_s11 }
0x1e8d   :  { %3279 = vrot.lane.b32.xlu1 %v9780_v4, %s11266_s11 }
0x1e91   :  { %1805 = vperm.xlu1 %8780, %v258_v53  }
0x1e95   :  { %2698 = vperm.xlu1 %8780, %v259_v56  }
0x1efd   :  { %v3260_v57 = vpop.xlane.xlu1 %3259 }
0x1efe   :  { %v3262_v58 = vsub.f32 %v3254_v44, %v3260_v57  ;;  %v3463_v44 = vld [vmem:[%s11203_s16 + $0x8] sm:$0xff] }
0x1eff   :  { %v3257_v59 = vpop.xlane.xlu0 %3256 }
0x1f00   :  { %v3265_v30 = vmul.f32 1.442695, %v3262_v58  ;;  %v3261_v43 = vsub.f32 %v3253_v51, %v3257_v59 }
0x1f01   :  { %v3284_v5 = vpop.permute.xlu1 %3283 }
0x1f02   :  { %8877 = vpow2.f32 %v3265_v30  ;;  %v3263_v2 = vmul.f32 1.442695, %v3261_v43 }
0x1f04   :  { %8879 = vpow2.f32 %v3263_v2 }
0x1f05   :  { %v3282_v19 = vpop.permute.xlu1 %3281 }
0x1f09   :  { %v3280_v7 = vpop.permute.xlu1 %3279 }
0x1f0d   :  { %v10189_v9 = vpop.permute.xlu1 %1805 }
0x1f0e   :  { %v2031_v10 = vmul.f32 %v9917_v62, %v10189_v9  ;;  %v2475_v11 = vmul.f32 %v10013_v45, %v10189_v9 }
0x1f0f   :  { %v8878_v61 = vpop.eup %8877 }
0x1f10   :  { %v3270_v4 = vsel %vm263_vm0, %v8878_v61, 0.0 }
0x1f11   :  { %v8880_v60 = vpop.eup %8879  ;;  %3271 = vadd.xlane.f32.xlu0 %v3270_v4  ;;  %v10221_v28 = vpop.permute.xlu1 %2698 }
0x1f12   :  { %v3267_v3 = vsel %vm263_vm0, %v8880_v60, 0.0 }
0x1f15   :  { %3268 = vadd.xlane.f32.xlu0 %v3267_v3 }
0x1f2b   :  { %3285 = vrot.lane.b32.xlu0 %v9782_v6, %s11266_s11  ;;  %v2253_v6 = vmul.f32 %v9965_v54, %v10189_v9 }
0x1f2f   :  { %1800 = vperm.xlu0 %8779, %v257_v41  }
0x1f33   :  { %2703 = vperm.xlu0 %8779, %v260_v8  }
0x1f37   :  { %3378 = vrot.lane.b32.xlu0 %v2031_v10, %s11266_s11 }
0x1f3b   :  { %3386 = vrot.lane.b32.xlu0 %v2253_v6, %s11264_s29 }
0x1f3f   :  { %3394 = vrot.lane.b32.xlu0 %v2475_v11, %s11237_s30 }
0x1f9a   :  { %v3272_v13 = vpop.xlane.xlu0 %3271 }
0x1f9b   :  { %8881 = vrcp.f32 %v3272_v13 }
0x1f9e   :  { %v3269_v16 = vpop.xlane.xlu0 %3268 }
0x1f9f   :  { %8883 = vrcp.f32 %v3269_v16 }
0x1fa2   :  { %v3286_v17 = vpop.permute.xlu0 %3285 }
0x1fa3   :  { %8349 = vmatprep.subr.mxu1 %v3286_v17 }
0x1fa4   :  { %8350 = vmatpush3.msra.mxu1 %v3286_v17 }
0x1fa5   :  { %8351 = vmatprep.subr.mxu1 %v3284_v5 }
0x1fa6   :  { %8352 = vmatpush3.msra.mxu1 %v3284_v5  ;;  %v1809_v5 = vmul.f32 %v9869_v14, %v10189_v9 }
0x1fa7   :  { %8353 = vmatprep.subr.mxu1 %v3282_v19 }
0x1fa8   :  { %8354 = vmatpush3.msra.mxu1 %v3282_v19  ;;  %v8882_v62 = vpop.eup %8881 }
0x1fa9   :  { %8355 = vmatprep.subr.mxu1 %v3280_v7  ;;  %v3276_v21 = vmul.f32 %v8882_v62, %v8878_v61 }
0x1faa   :  { %8356 = vmatpush3.msra.mxu1 %v3280_v7  ;;  %v10200_v54 = vpop.permute.xlu0 %1800 }
0x1fab   :  { %v2030_v45 = vmul.f32 %v9919_v63, %v10200_v54  ;;  %v2252_v24 = vmul.f32 %v9967_v55, %v10200_v54  ;;  %v3278_v63 = vsel %vm256_vm6, %v3276_v21, 0.0  ;;  %v2474_v27 = vmul.f32 %v10015_v48, %v10200_v54 }
0x1fac   :  { %v8884_v20 = vpop.eup %8883  ;;  %v2928_v48 = vmul.f32 %v10111_v38, %v10221_v28  ;;  %v3467_v38 = vld [vmem:[%s11203_s16 + $0x28] sm:$0xff]  ;;  %v1808_v3 = vmul.f32 %v10200_v54, %v9871_v15 }
0x1fad   :  { %3376 = vrot.lane.b32.xlu1 %v2030_v45, %s11266_s11  ;;  %v3275_v22 = vmul.f32 %v8884_v20, %v8880_v60 }
0x1fae   :  { %v10205_v32 = vpop.permute.xlu0 %2703 }
0x1faf   :  { %v3277_v23 = vsel %vm255_vm7, %v3275_v22, 0.0  ;;  %v2707_v29 = vmul.f32 %v10061_v1, %v10205_v32  ;;  %v2929_v55 = vmul.f32 %v10109_v37, %v10205_v32  ;;  %v2706_v1 = vmul.f32 %v10221_v28, %v10063_v0  ;;  %v3469_v0 = vld [vmem:[%s11203_s16 + $0x38] sm:$0xff] }
0x1fb0   :  { %8357 = vmatprep.mubr.msk.f32.mxu1 %vm263_vm0, %v3277_v23  ;;  %v3151_v39 = vmul.f32 %v10157_v31, %v10205_v32  ;;  %v3150_v37 = vmul.f32 %v10159_v18, %v10221_v28  ;;  %v3468_v31 = vld [vmem:[%s11203_s16 + $0x30] sm:$0xff]  ;;  %8360 = vmatprep.subr.mxu1 %v3469_v0  ;;  %v3466_v18 = vld [vmem:[%s11203_s16 + $0x20] sm:$0xff] }
0x1fb1   :  { %8358 = vmatmul.mubr.msk.f32.vlgmr.msra.gmra.mxu1 %vm263_vm0, %v3278_v63  ;;  %3384 = vrot.lane.b32.xlu1 %v2252_v24, %s11264_s29  ;;  %v3447_v24 = vld [vmem:[%s11204_s17] sm:$0x3] }
0x1fb2   :  { %3402 = vrot.lane.b32.xlu0 %v2707_v29, %s11235_s23  ;;  %8361 = vmatpush3.msra.mxu1 %v3469_v0  ;;  %v3379_v57 = vpop.permute.xlu0 %3378  ;;  %v3451_v29 = vrot.slane %v3447_v24, %v9544_v26  ;;  %v3457_v63 = vrot.slane %v3447_v24, %v9787_v12  ;;  %v3691_v24 = vld [vmem:[%s11207_s20 + $0x18] sm:$0xff] }
0x1fb3   :  { %8362 = vmatprep.subr.mxu1 %v3468_v31  ;;  %v3431_v41 = vsel %vm401_vm1, %v1809_v5, %v3379_v57 }
0x1fb4   :  { %8363 = vmatpush3.msra.mxu1 %v3468_v31 }
0x1fb5   :  { %3392 = vrot.lane.b32.xlu1 %v2474_v27, %s11237_s30  ;;  %8364 = vmatprep.subr.mxu1 %v3467_v38  ;;  %v3453_v27 = vmul.f32 %v3451_v29, %v10189_v9 }
0x1fb6   :  { %3410 = vrot.lane.b32.xlu0 %v2929_v55, %s9311_s3  ;;  %8365 = vmatpush3.msra.mxu1 %v3467_v38  ;;  %v3387_v59 = vpop.permute.xlu0 %3386  ;;  %v3459_v55 = vmul.f32 %v3457_v63, %v10205_v32 }
0x1fb7   :  { %8366 = vmatprep.subr.mxu1 %v3466_v18  ;;  %v3433_v6 = vsel %vm489_vm3, %v3431_v41, %v3387_v59 }
0x1fb8   :  { %8367 = vmatpush3.msra.mxu1 %v3466_v18 }
0x1fb9   :  { %3400 = vrot.lane.b32.xlu1 %v2706_v1, %s11235_s23  ;;  %8368 = vmatprep.subr.mxu1 %v3465_v40  ;;  %v3452_v1 = vmul.f32 %v3451_v29, %v10200_v54  ;;  %v3690_v29 = vld [vmem:[%s11207_s20 + $0x10] sm:$0xff] }
0x1fba   :  { %3418 = vrot.lane.b32.xlu0 %v3151_v39, %s9308_s7  ;;  %8369 = vmatpush3.msra.mxu1 %v3465_v40  ;;  %v3395_v43 = vpop.permute.xlu0 %3394  ;;  %v3458_v39 = vmul.f32 %v3457_v63, %v10221_v28  ;;  %v3689_v63 = vld [vmem:[%s11207_s20 + $0x8] sm:$0xff] }
0x1fbb   :  { %8370 = vmatprep.subr.mxu1 %v3464_v42  ;;  %v3435_v13 = vsel %vm1247_vm5, %v3433_v6, %v3395_v43  ;;  %v3596_v43 = vld [vmem:[%s11205_s18 + $0x10] sm:$0xff] }
0x1fbc   :  { %8371 = vmatpush3.msra.mxu1 %v3464_v42  ;;  %v3460_v18 = vadd.f32 %v3458_v39, %v3452_v1 }
0x1fbd   :  { %3408 = vrot.lane.b32.xlu1 %v2928_v48, %s9311_s3  ;;  %8372 = vmatprep.subr.mxu1 %v3463_v44 }
0x1fbe   :  { %8373 = vmatpush3.msra.mxu1 %v3463_v44 }
0x1fbf   :  { %8374 = vmatprep.subr.mxu1 %v3462_v49 }
0x1fc0   :  { %8375 = vmatpush3.msra.mxu1 %v3462_v49 }
0x1fc1   :  { %3416 = vrot.lane.b32.xlu1 %v3150_v37, %s9308_s7  ;;  %v3461_v37 = vadd.f32 %v3459_v55, %v3453_v27  ;;  %v3688_v27 = vld [vmem:[%s11207_s20] sm:$0xff]  ;;  %v7555_v55 = vld [vmem:[#allocation16] ss:$0 sm:$0xff] }
0x201f   :  { %v3377_v56 = vpop.permute.xlu1 %3376 }
0x2020   :  { %v3430_v19 = vsel %vm401_vm1, %v1808_v3, %v3377_v56 }
0x2023   :  { %v3385_v58 = vpop.permute.xlu1 %3384 }
0x2024   :  { %v3403_v2 = vpop.permute.xlu0 %3402  ;;  %v3432_v8 = vsel %vm489_vm3, %v3430_v19, %v3385_v58 }
0x2025   :  { %v3437_v14 = vsel %vm263_vm0, %v3435_v13, %v3403_v2  ;;  %v3595_v2 = vld [vmem:[%s11205_s18 + $0x8] sm:$0xff]  ;;  %v9002_v13 = vld [vmem:[%s11261_s5] sm:$0x7] }
0x2027   :  { %v3393_v30 = vpop.permute.xlu1 %3392 }
0x2028   :  { %v3411_v4 = vpop.permute.xlu0 %3410  ;;  %v3434_v11 = vsel %vm1247_vm5, %v3432_v8, %v3393_v30  ;;  %v3597_v30 = vld [vmem:[%s11205_s18 + $0x18] sm:$0xff]  ;;  %v10326_v8 = vsub.s32 2, %v9541_v25 }
0x2029   :  { %v3440_v62 = vsel %vm3438_vm8, %v3437_v14, %v3411_v4  ;;  %8379 = vmatprep.subr.mxu0 %v3597_v30  ;;  %v3695_v4 = vld [vmem:[%s11207_s20 + $0x38] sm:$0xff] }
0x202a   :  { %8380 = vmatpush3.msra.mxu0 %v3597_v30 }
0x202b   :  { %v3401_v61 = vpop.permute.xlu1 %3400  ;;  %8381 = vmatprep.subr.mxu0 %v3596_v43 }
0x202c   :  { %v3419_v7 = vpop.permute.xlu0 %3418  ;;  %v3436_v15 = vsel %vm263_vm0, %v3434_v11, %v3401_v61  ;;  %8382 = vmatpush3.msra.mxu0 %v3596_v43  ;;  %v3594_v61 = vld [vmem:[%s11205_s18] sm:$0xff] }
0x202d   :  { %v3443_v21 = vsel %vm3441_vm9, %v3440_v62, %v3419_v7  ;;  %8383 = vmatprep.subr.mxu0 %v3595_v2 }
0x202e   :  { %8384 = vmatpush3.msra.mxu0 %v3595_v2 }
0x202f   :  { %v3409_v60 = vpop.permute.xlu1 %3408  ;;  %8385 = vmatprep.subr.mxu0 %v3594_v61 }
0x2030   :  { %v3439_v16 = vsel %vm3438_vm8, %v3436_v15, %v3409_v60  ;;  %8386 = vmatpush3.msra.mxu0 %v3594_v61  ;;  %v3591_v15 = vrot.slane %v9002_v13, %v10326_v8  ;;  %v7566_v61 = vld [vmem:[%s11259_s21 + $0x38] sm:$0xff] }
0x2031   :  { %8390 = vmatprep.subr.mxu0 %v3695_v4  ;;  %8409 = vmatprep.subr.mxu1 %v7566_v61 }
0x2033   :  { %v3417_v10 = vpop.permute.xlu1 %3416 }
0x2034   :  { %v3442_v45 = vsel %vm3441_vm9, %v3439_v16, %v3417_v10  ;;  %v9001_v10 = vld [vmem:[%s11260_s13] sm:$0x7] }
0x2035   :  { %v3585_v6 = vrot.slane %v9001_v10, %v10326_v8 }
0x2071   :  { %v8359_v50 = vpop.f32.mrf.mxu1 }
0x2072   :  { %v3373_v51 = vmul.f32 %v8359_v50, %v10205_v32 }
0x2073   :  { %v3363_v52 = vpop.f32.mrf.mxu1 }
0x2074   :  { %v3372_v53 = vmul.f32 %v3363_v52, %v10221_v28  ;;  %3426 = vrot.lane.b32.xlu0 %v3373_v51, %s9305_s22 }
0x2076   :  { %3424 = vrot.lane.b32.xlu1 %v3372_v53, %s9305_s22 }
0x20e6   :  { %v3427_v17 = vpop.permute.xlu0 %3426 }
0x20e7   :  { %v3446_v23 = vsel %vm3444_vm10, %v3443_v21, %v3427_v17  ;;  %v3694_v21 = vld [vmem:[%s11207_s20 + $0x30] sm:$0xff] }
0x20e8   :  { %v3425_v20 = vpop.permute.xlu1 %3424 }
0x20e9   :  { %v3445_v22 = vsel %vm3444_vm10, %v3442_v45, %v3425_v20 }
0x20ea   :  { %8376 = vmatprep.mubr.msk.f32.mxu1 %vm3470_vm11, %v3445_v22  ;;  %v3693_v22 = vld [vmem:[%s11207_s20 + $0x28] sm:$0xff] }
0x20eb   :  { %8377 = vmatmul.mubr.msk.f32.vlgmr.msra.gmra.mxu1 %vm3470_vm11, %v3446_v23  ;;  %v3692_v23 = vld [vmem:[%s11207_s20 + $0x20] sm:$0xff] }
0x20ec   :  { %8410 = vmatpush3.msra.mxu1 %v7566_v61 }
0x21ab   :  { %v8378_v48 = vpop.f32.mrf.mxu1 }
0x21ac   :  { %v3553_v0 = vadd.f32 %v8378_v48, %v9737_v35 }
0x21ad   :  { %v3543_v31 = vpop.f32.mrf.mxu1 }
0x21ae   :  { %v10297_v38 = vadd.f32 %v3553_v0, %v3461_v37  ;;  %v3552_v40 = vadd.f32 %v3543_v31, %v9740_v36 }
0x21b0   :  { %v10300_v42 = vadd.f32 %v3552_v40, %v3460_v18  ;;  %v3559_v44 = vsel %vm263_vm0, %v10297_v38, 0.0  ;;  %v7560_v40 = vld [vmem:[#allocation17] ss:$0 sm:$0xff] }
0x21b1   :  { %3560 = vadd.xlane.f32.xlu0 %v3559_v44 }
0x21b2   :  { %v3556_v49 = vsel %vm263_vm0, %v10300_v42, 0.0 }
0x21b3   :  { %3557 = vadd.xlane.f32.xlu1 %v3556_v49 }
0x223a   :  { %v3561_v50 = vpop.xlane.xlu0 %3560 }
0x223b   :  { %v3563_v51 = vmul.f32 0.03125, %v3561_v50 }
0x223c   :  { %v3558_v52 = vpop.xlane.xlu1 %3557 }
0x223d   :  { %v3562_v35 = vmul.f32 0.03125, %v3558_v52  ;;  %v3565_v53 = vsub.f32 %v10297_v38, %v3563_v51 }
0x223f   :  { %v3564_v56 = vsub.f32 %v10300_v42, %v3562_v35  ;;  %v3567_v58 = vmul.f32 %v3565_v53, %v3565_v53 }
0x2241   :  { %v3566_v57 = vmul.f32 %v3564_v56, %v3564_v56  ;;  %v3571_v59 = vsel %vm263_vm0, %v3567_v58, 0.0 }
0x2243   :  { %v3568_v36 = vsel %vm263_vm0, %v3566_v57, 0.0 }
0x2244   :  { %3569 = vadd.xlane.f32.xlu0 %v3568_v36 }
0x2248   :  { %3572 = vadd.xlane.f32.xlu0 %v3571_v59 }
0x22cd   :  { %v3570_v60 = vpop.xlane.xlu0 %3569 }
0x22ce   :  { %v3574_v3 = vmul.f32 0.03125, %v3570_v60  ;;  %v7564_v60 = vld [vmem:[%s11259_s21 + $0x28] sm:$0xff] }
0x22d0   :  { %v3576_v5 = vadd.f32 1e-12, %v3574_v3  ;;  %v7563_v3 = vld [vmem:[%s11259_s21 + $0x20] sm:$0xff] }
0x22d1   :  { %v3573_v19 = vpop.xlane.xlu0 %3572 }
0x22d2   :  { %8885 = vrsqrt.f32 %v3576_v5  ;;  %v3575_v7 = vmul.f32 0.03125, %v3573_v19 }
0x22d4   :  { %v3577_v41 = vadd.f32 1e-12, %v3575_v7 }
0x22d6   :  { %8887 = vrsqrt.f32 %v3577_v41 }
0x22df   :  { %v8886_v11 = vpop.eup %8885 }
0x22e0   :  { %v3580_v14 = vmul.f32 %v8886_v11, %v3564_v56  ;;  %v10390_v11 = vld [vmem:[%s11260_s13 + $0x4] sm:$0x7] }
0x22e2   :  { %v3586_v16 = vmul.f32 %v3585_v6, %v3580_v14  ;;  %v10397_v14 = vld [vmem:[%s11261_s5 + $0x4] sm:$0x7] }
0x22e3   :  { %v8888_v17 = vpop.eup %8887 }
0x22e4   :  { %v3592_v62 = vadd.f32 %v3591_v15, %v3586_v16  ;;  %v3581_v45 = vmul.f32 %v8888_v17, %v3565_v53 }
0x22e6   :  { %8387 = vmatprep.mubr.msk.f32.mxu0 %vm263_vm0, %v3592_v62  ;;  %v3587_v25 = vmul.f32 %v3585_v6, %v3581_v45 }
0x22e8   :  { %v3593_v20 = vadd.f32 %v3591_v15, %v3587_v25  ;;  %v3821_v15 = vrot.slane %v10390_v11, %v9544_v26  ;;  %v3827_v25 = vrot.slane %v10397_v14, %v9544_v26 }
0x22ea   :  { %8388 = vmatmul.mubr.msk.f32.vlgmr.msra.gmra.mxu0 %vm263_vm0, %v3593_v20 }
0x22eb   :  { %8391 = vmatpush3.msra.mxu0 %v3695_v4  ;;  %v7565_v4 = vld [vmem:[%s11259_s21 + $0x30] sm:$0xff] }
0x22ec   :  { %8392 = vmatprep.subr.mxu0 %v3694_v21  ;;  %8411 = vmatprep.subr.mxu1 %v7565_v4 }
0x22ed   :  { %8393 = vmatpush3.msra.mxu0 %v3694_v21  ;;  %8412 = vmatpush3.msra.mxu1 %v7565_v4 }
0x22ee   :  { %8394 = vmatprep.subr.mxu0 %v3693_v22  ;;  %8413 = vmatprep.subr.mxu1 %v7564_v60 }
0x22ef   :  { %8395 = vmatpush3.msra.mxu0 %v3693_v22  ;;  %8414 = vmatpush3.msra.mxu1 %v7564_v60 }
0x22f0   :  { %8396 = vmatprep.subr.mxu0 %v3692_v23  ;;  %8415 = vmatprep.subr.mxu1 %v7563_v3 }
0x22f1   :  { %8397 = vmatpush3.msra.mxu0 %v3692_v23  ;;  %8416 = vmatpush3.msra.mxu1 %v7563_v3  ;;  %v7567_v23 = vld [vmem:[#allocation10 + $0x1] ss:$0 sm:$0xff] }
0x22f2   :  { %8398 = vmatprep.subr.mxu0 %v3691_v24 }
0x22f3   :  { %8399 = vmatpush3.msra.mxu0 %v3691_v24 }
0x22f4   :  { %8400 = vmatprep.subr.mxu0 %v3690_v29 }
0x22f5   :  { %8401 = vmatpush3.msra.mxu0 %v3690_v29 }
0x22f6   :  { %8402 = vmatprep.subr.mxu0 %v3689_v63 }
0x22f7   :  { %8403 = vmatpush3.msra.mxu0 %v3689_v63 }
0x22f8   :  { %8404 = vmatprep.subr.mxu0 %v3688_v27 }
0x22f9   :  { %8405 = vmatpush3.msra.mxu0 %v3688_v27 }
0x23aa   :  { %v8389_v1 = vpop.f32.mrf.mxu0 }
0x23ab   :  { %v3683_v39 = vadd.f32 %v8389_v1, %v7555_v55 }
0x23ac   :  { %v3677_v48 = vpop.f32.mrf.mxu0 }
0x23ad   :  { %v3678_v37 = vadd.f32 %v7555_v55, %v3677_v48  ;;  %v3687_v31 = vmax.f32 %v3683_v39, 0.0 }
0x23af   :  { %v3686_v0 = vmax.f32 %v3678_v37, 0.0 }
0x23b1   :  { %8406 = vmatprep.mubr.msk.f32.mxu0 %vm3470_vm11, %v3686_v0 }
0x23b2   :  { %8407 = vmatmul.mubr.msk.f32.vlgmr.msra.gmra.mxu0 %vm3470_vm11, %v3687_v31 }
0x2472   :  { %v8408_v18 = vpop.f32.mrf.mxu0 }
0x2473   :  { %v3778_v44 = vadd.f32 %v8408_v18, %v10297_v38 }
0x2474   :  { %v3768_v49 = vpop.f32.mrf.mxu0 }
0x2475   :  { %v10362_v50 = vadd.f32 %v7560_v40, %v3778_v44  ;;  %v3777_v51 = vadd.f32 %v3768_v49, %v10300_v42 }
0x2477   :  { %v10365_v52 = vadd.f32 %v7560_v40, %v3777_v51  ;;  %v3795_v35 = vsel %vm263_vm0, %v10362_v50, 0.0 }
0x2478   :  { %3796 = vadd.xlane.f32.xlu0 %v3795_v35 }
0x2479   :  { %v3792_v53 = vsel %vm263_vm0, %v10365_v52, 0.0 }
0x247a   :  { %3793 = vadd.xlane.f32.xlu1 %v3792_v53 }
0x2501   :  { %v3797_v56 = vpop.xlane.xlu0 %3796 }
0x2502   :  { %v3799_v57 = vmul.f32 0.03125, %v3797_v56 }
0x2503   :  { %v3794_v36 = vpop.xlane.xlu1 %3793 }
0x2504   :  { %v3801_v38 = vsub.f32 %v10362_v50, %v3799_v57  ;;  %v3798_v58 = vmul.f32 0.03125, %v3794_v36 }
0x2506   :  { %v3800_v59 = vsub.f32 %v10365_v52, %v3798_v58  ;;  %v3803_v30 = vmul.f32 %v3801_v38, %v3801_v38 }
0x2508   :  { %v3807_v42 = vsel %vm263_vm0, %v3803_v30, 0.0  ;;  %v3802_v43 = vmul.f32 %v3800_v59, %v3800_v59 }
0x2509   :  { %3808 = vadd.xlane.f32.xlu0 %v3807_v42 }
0x250a   :  { %v3804_v2 = vsel %vm263_vm0, %v3802_v43, 0.0 }
0x250b   :  { %3805 = vadd.xlane.f32.xlu1 %v3804_v2 }
0x2592   :  { %v3809_v5 = vpop.xlane.xlu0 %3808 }
0x2593   :  { %v3811_v19 = vmul.f32 0.03125, %v3809_v5 }
0x2594   :  { %v3806_v7 = vpop.xlane.xlu1 %3805 }
0x2595   :  { %v3813_v41 = vadd.f32 1e-12, %v3811_v19  ;;  %v3810_v10 = vmul.f32 0.03125, %v3806_v7 }
0x2597   :  { %8889 = vrsqrt.f32 %v3813_v41  ;;  %v3812_v6 = vadd.f32 1e-12, %v3810_v10 }
0x2599   :  { %8891 = vrsqrt.f32 %v3812_v6 }
0x25a4   :  { %v8890_v13 = vpop.eup %8889 }
0x25a5   :  { %v3817_v16 = vmul.f32 %v8890_v13, %v3801_v38 }
0x25a6   :  { %v8892_v17 = vpop.eup %8891 }
0x25a7   :  { %v3816_v62 = vmul.f32 %v8892_v17, %v3800_v59  ;;  %v3823_v45 = vmul.f32 %v3821_v15, %v3817_v16 }
0x25a9   :  { %v3822_v20 = vmul.f32 %v3821_v15, %v3816_v62  ;;  %v3829_v22 = vadd.f32 %v3827_v25, %v3823_v45 }
0x25ab   :  { %v3828_v21 = vadd.f32 %v3827_v25, %v3822_v20 }
0x25ad   :  { %8417 = vmatprep.mubr.msk.f32.mxu1 %vm263_vm0, %v3828_v21 }
0x25ae   :  { %8418 = vmatmul.mubr.msk.f32.vlgmr.msra.gmra.mxu1 %vm263_vm0, %v3829_v22 }
0x266e   :  { %v8419_v24 = vpop.f32.mrf.mxu1 }
0x266f   :  { %v10403_v29 = vadd.f32 %v8419_v24, %v7567_v23 }
0x2670   :  { %v3915_v63 = vpop.f32.mrf.mxu1 }
0x2671   :  { %v10405_v27 = vadd.f32 %v7567_v23, %v3915_v63  ;;  %3928 = vrot.lane.b32.xlu1 %v10403_v29, %s11241_s10 }
0x2673   :  { %3926 = vrot.lane.b32.xlu0 %v10405_v27, %s11241_s10  ;;  %8424 = vmatprep.mubr.msk.f32.mxu1 %vm401_vm1, %v10405_v27 }
0x2675   :  { %4134 = vrot.lane.b32.xlu1 %v10403_v29, %s11239_s9 }
0x2677   :  { %4130 = vrot.lane.b32.xlu0 %v10403_v29, %s9304_s6 }
0x2679   :  { %4132 = vrot.lane.b32.xlu1 %v10405_v27, %s11239_s9 }
0x267d   :  { %4128 = vrot.lane.b32.xlu1 %v10405_v27, %s9304_s6 }
0x26e3   :  { %v3929_v55 = vpop.permute.xlu1 %3928 }
0x26e4   :  { %8420 = vmatprep.subr.msk.mxu1 %vm401_vm1, %v3929_v55 }
0x26e5   :  { %8421 = vmatpush3.xpose.msk.msra.mxu1 %vm401_vm1, %v3929_v55  ;;  %v3927_v1 = vpop.permute.xlu0 %3926 }
0x26e6   :  { %8422 = vmatprep.subr.msk.mxu1 %vm401_vm1, %v3927_v1 }
0x26e7   :  { %v4135_v39 = vpop.permute.xlu1 %4134 }
0x26e9   :  { %8423 = vmatpush3.xpose.msk.msra.mxu1 %vm401_vm1, %v3927_v1  ;;  %v4131_v0 = vpop.permute.xlu0 %4130 }
0x26ea   :  { %8434 = vmatprep.subr.msk.mxu1 %vm401_vm1, %v4135_v39 }
0x26eb   :  { %v4133_v48 = vpop.permute.xlu1 %4132 }
0x26ec   :  { %8425 = vmatmul.mubr.msk.f32.vlgmr.msra.gmra.mxu1 %vm401_vm1, %v10403_v29 }
0x26ed   :  { %8435 = vmatpush3.xpose.msk.msra.mxu1 %vm401_vm1, %v4135_v39 }
0x26ee   :  { %8436 = vmatprep.subr.msk.mxu1 %vm401_vm1, %v4133_v48 }
0x26ef   :  { %v4129_v37 = vpop.permute.xlu1 %4128 }
0x26f0   :  { %8438 = vmatprep.mubr.msk.f32.mxu1 %vm401_vm1, %v4129_v37 }
0x26f1   :  { %8437 = vmatpush3.xpose.msk.msra.mxu1 %vm401_vm1, %v4133_v48 }
0x26f4   :  { %8439 = vmatmul.mubr.msk.f32.vlgmr.msra.gmra.mxu1 %vm401_vm1, %v4131_v0 }
0x27ac   :  { %v8426_v31 = vpop.f32.mrf.mxu1 }
0x27ad   :  { %v4014_v18 = vmul.f32 0.35355338, %v8426_v31 }
0x27ae   :  { %v4004_v40 = vpop.f32.mrf.mxu1 }
0x27af   :  { %v4016_v44 = vsel %vm252_vm2, %v4014_v18, -1e+30  ;;  %v4013_v49 = vmul.f32 0.35355338, %v4004_v40 }
0x27b0   :  { %v4020_v51 = vsel %vm489_vm3, %v4016_v44, -inf }
0x27b1   :  { %v4015_v35 = vsel %vm251_vm4, %v4013_v49, -1e+30  ;;  %4021 = vmax.xlane.f32.xlu0 %v4020_v51 }
0x27b2   :  { %v4017_v53 = vsel %vm489_vm3, %v4015_v35, -inf }
0x27b3   :  { %4018 = vmax.xlane.f32.xlu1 %v4017_v53 }
0x27b4   :  { %v8440_v56 = vpop.f32.mrf.mxu1 }
0x27b5   :  { %v4220_v36 = vmul.f32 0.35355338, %v8440_v56 }
0x27b6   :  { %v4210_v57 = vpop.f32.mrf.mxu1 }
0x27b7   :  { %v4219_v38 = vmul.f32 0.35355338, %v4210_v57  ;;  %v4222_v30 = vsel %vm252_vm2, %v4220_v36, -1e+30 }
0x27b8   :  { %v4226_v42 = vsel %vm489_vm3, %v4222_v30, -inf }
0x27b9   :  { %v4221_v58 = vsel %vm251_vm4, %v4219_v38, -1e+30 }
0x27ba   :  { %v4223_v59 = vsel %vm489_vm3, %v4221_v58, -inf }
0x27bb   :  { %4224 = vmax.xlane.f32.xlu0 %v4223_v59 }
0x27bf   :  { %4227 = vmax.xlane.f32.xlu0 %v4226_v42 }
0x27c4   :  { %4043 = vrot.lane.b32.xlu1 %v10403_v29, %s11269_s2 }
0x283a   :  { %v4022_v43 = vpop.xlane.xlu0 %4021 }
0x283b   :  { %v4024_v2 = vsub.f32 %v4016_v44, %v4022_v43 }
0x283c   :  { %v4019_v61 = vpop.xlane.xlu1 %4018 }
0x283d   :  { %v4027_v4 = vmul.f32 1.442695, %v4024_v2  ;;  %v4023_v60 = vsub.f32 %v4015_v35, %v4019_v61 }
0x283f   :  { %8893 = vpow2.f32 %v4027_v4  ;;  %v4025_v3 = vmul.f32 1.442695, %v4023_v60 }
0x2840   :  { %v4044_v5 = vpop.permute.xlu1 %4043 }
0x2841   :  { %8895 = vpow2.f32 %v4025_v3  ;;  %8427 = vmatprep.subr.mxu0 %v4044_v5 }
0x2842   :  { %8428 = vmatpush3.msra.mxu0 %v4044_v5 }
0x2844   :  { %v4225_v19 = vpop.xlane.xlu0 %4224 }
0x2845   :  { %v4229_v45 = vsub.f32 %v4221_v58, %v4225_v19 }
0x2847   :  { %v4231_v25 = vmul.f32 1.442695, %v4229_v45 }
0x2848   :  { %v4228_v7 = vpop.xlane.xlu0 %4227 }
0x2849   :  { %v4230_v41 = vsub.f32 %v4222_v30, %v4228_v7 }
0x284b   :  { %v4233_v10 = vmul.f32 1.442695, %v4230_v41 }
0x284c   :  { %v8894_v6 = vpop.eup %8893 }
0x284d   :  { %8897 = vpow2.f32 %v4233_v10  ;;  %v4032_v13 = vsel %vm489_vm3, %v8894_v6, 0.0 }
0x284e   :  { %v8896_v15 = vpop.eup %8895  ;;  %4033 = vadd.xlane.f32.xlu0 %v4032_v13  ;;  %8899 = vpow2.f32 %v4231_v25 }
0x284f   :  { %v4029_v16 = vsel %vm489_vm3, %v8896_v15, 0.0 }
0x2850   :  { %4030 = vadd.xlane.f32.xlu1 %v4029_v16 }
0x285a   :  { %v8898_v17 = vpop.eup %8897 }
0x285b   :  { %v4238_v62 = vsel %vm489_vm3, %v8898_v17, 0.0  ;;  %v8900_v20 = vpop.eup %8899 }
0x285c   :  { %4239 = vadd.xlane.f32.xlu0 %v4238_v62  ;;  %v4235_v21 = vsel %vm489_vm3, %v8900_v20, 0.0 }
0x2861   :  { %4249 = vrot.lane.b32.xlu1 %v10403_v29, %s9305_s22 }
0x2865   :  { %4247 = vrot.lane.b32.xlu1 %v10405_v27, %s9305_s22 }
0x2869   :  { %4340 = vrot.lane.b32.xlu1 %v10403_v29, %s11263_s4 }
0x2872   :  { %4041 = vrot.lane.b32.xlu0 %v10405_v27, %s11269_s2 }
0x2876   :  { %4338 = vrot.lane.b32.xlu0 %v10405_v27, %s11263_s4 }
0x287a   :  { %4336 = vrot.lane.b32.xlu0 %v10403_v29, %s11270_s1 }
0x288d   :  { %4236 = vadd.xlane.f32.xlu1 %v4235_v21 }
0x289e   :  { %4334 = vrot.lane.b32.xlu1 %v10405_v27, %s11270_s1 }
0x28d7   :  { %v4034_v22 = vpop.xlane.xlu0 %4033 }
0x28d8   :  { %8901 = vrcp.f32 %v4034_v22 }
0x28d9   :  { %v4031_v23 = vpop.xlane.xlu1 %4030 }
0x28da   :  { %8903 = vrcp.f32 %v4031_v23 }
0x28dd   :  { %v4250_v24 = vpop.permute.xlu1 %4249 }
0x28e1   :  { %v4248_v37 = vpop.permute.xlu1 %4247 }
0x28e5   :  { %v8902_v63 = vpop.eup %8901  ;;  %v4240_v55 = vpop.xlane.xlu0 %4239 }
0x28e6   :  { %v4038_v39 = vmul.f32 %v8902_v63, %v8894_v6  ;;  %v4341_v40 = vpop.permute.xlu1 %4340  ;;  %8905 = vrcp.f32 %v4240_v55 }
0x28e7   :  { %v8904_v1 = vpop.eup %8903 }
0x28e8   :  { %v4037_v48 = vmul.f32 %v8904_v1, %v8896_v15  ;;  %v4040_v18 = vsel %vm252_vm2, %v4038_v39, 0.0 }
0x28e9   :  { %v4042_v0 = vpop.permute.xlu0 %4041 }
0x28ea   :  { %8429 = vmatprep.subr.mxu0 %v4042_v0  ;;  %v4039_v31 = vsel %vm251_vm4, %v4037_v48, 0.0 }
0x28eb   :  { %8430 = vmatpush3.msra.mxu0 %v4042_v0  ;;  %8431 = vmatprep.mubr.msk.f32.mxu0 %vm489_vm3, %v4039_v31 }
0x28ec   :  { %8432 = vmatmul.mubr.msk.f32.vlgmr.msra.gmra.mxu0 %vm489_vm3, %v4040_v18  ;;  %8441 = vmatprep.subr.mxu0 %v4250_v24 }
0x28ed   :  { %8442 = vmatpush3.msra.mxu0 %v4250_v24  ;;  %v4339_v38 = vpop.permute.xlu0 %4338 }
0x28ee   :  { %8443 = vmatprep.subr.mxu0 %v4248_v37 }
0x28ef   :  { %8444 = vmatpush3.msra.mxu0 %v4248_v37 }
0x28f0   :  { %8448 = vmatprep.subr.msk.mxu0 %vm401_vm1, %v4341_v40 }
0x28f1   :  { %v4337_v58 = vpop.permute.xlu0 %4336 }
0x28f3   :  { %v8906_v49 = vpop.eup %8905 }
0x28f4   :  { %v4244_v35 = vmul.f32 %v8906_v49, %v8898_v17 }
0x28f6   :  { %v4246_v57 = vsel %vm252_vm2, %v4244_v35, 0.0 }
0x2916   :  { %v4237_v44 = vpop.xlane.xlu1 %4236 }
0x2917   :  { %8907 = vrcp.f32 %v4237_v44 }
0x291a   :  { %v4335_v36 = vpop.permute.xlu1 %4334 }
0x2924   :  { %v8908_v51 = vpop.eup %8907 }
0x2925   :  { %v4243_v53 = vmul.f32 %v8908_v51, %v8900_v20 }
0x2927   :  { %v4245_v56 = vsel %vm251_vm4, %v4243_v53, 0.0 }
0x2928   :  { %8445 = vmatprep.mubr.msk.f32.mxu0 %vm489_vm3, %v4245_v56 }
0x2929   :  { %8446 = vmatmul.mubr.msk.f32.vlgmr.msra.gmra.mxu0 %vm489_vm3, %v4246_v57 }
0x292a   :  { %8449 = vmatpush3.xpose.msk.msra.mxu0 %vm401_vm1, %v4341_v40  ;;  %8452 = vmatprep.mubr.msk.f32.mxu0 %vm401_vm1, %v4335_v36 }
0x292b   :  { %8450 = vmatprep.subr.msk.mxu0 %vm401_vm1, %v4339_v38 }
0x292e   :  { %8451 = vmatpush3.xpose.msk.msra.mxu0 %vm401_vm1, %v4339_v38 }
0x2931   :  { %8453 = vmatmul.mubr.msk.f32.vlgmr.msra.gmra.mxu0 %vm401_vm1, %v4337_v58 }
0x29ac   :  { %v10483_v59 = vpop.f32.mrf.mxu0 }
0x29ae   :  { %v10485_v30 = vpop.f32.mrf.mxu0 }
0x29e9   :  { %v10487_v42 = vpop.f32.mrf.mxu0 }
0x29eb   :  { %v10489_v43 = vpop.f32.mrf.mxu0 }
0x29f1   :  { %v8454_v2 = vpop.f32.mrf.mxu0 }
0x29f2   :  { %v4426_v61 = vmul.f32 0.35355338, %v8454_v2 }
0x29f3   :  { %v4416_v4 = vpop.f32.mrf.mxu0 }
0x29f4   :  { %v4428_v60 = vsel %vm252_vm2, %v4426_v61, -1e+30  ;;  %v4425_v3 = vmul.f32 0.35355338, %v4416_v4 }
0x29f5   :  { %v4432_v5 = vsel %vm489_vm3, %v4428_v60, -inf }
0x29f6   :  { %v4427_v19 = vsel %vm251_vm4, %v4425_v3, -1e+30  ;;  %4433 = vmax.xlane.f32.xlu0 %v4432_v5 }
0x29f7   :  { %v4429_v7 = vsel %vm489_vm3, %v4427_v19, -inf }
0x29f8   :  { %4430 = vmax.xlane.f32.xlu1 %v4429_v7 }
0x2a09   :  { %4455 = vrot.lane.b32.xlu1 %v10403_v29, %s9308_s7 }
0x2a0d   :  { %4546 = vrot.lane.b32.xlu1 %v10403_v29, %s11265_s0 }
0x2a11   :  { %4544 = vrot.lane.b32.xlu1 %v10405_v27, %s11265_s0 }
0x2a15   :  { %4540 = vrot.lane.b32.xlu1 %v10405_v27, %s11271_s27 }
0x2a7f   :  { %v4434_v41 = vpop.xlane.xlu0 %4433 }
0x2a80   :  { %v4436_v10 = vsub.f32 %v4428_v60, %v4434_v41 }
0x2a81   :  { %v4431_v6 = vpop.xlane.xlu1 %4430 }
0x2a82   :  { %v4439_v13 = vmul.f32 1.442695, %v4436_v10  ;;  %v4435_v15 = vsub.f32 %v4427_v19, %v4431_v6 }
0x2a84   :  { %8909 = vpow2.f32 %v4439_v13  ;;  %v4437_v16 = vmul.f32 1.442695, %v4435_v15 }
0x2a85   :  { %v4456_v17 = vpop.permute.xlu1 %4455 }
0x2a86   :  { %8911 = vpow2.f32 %v4437_v16  ;;  %8455 = vmatprep.subr.mxu1 %v4456_v17 }
0x2a87   :  { %8456 = vmatpush3.msra.mxu1 %v4456_v17 }
0x2a89   :  { %v4547_v24 = vpop.permute.xlu1 %4546 }
0x2a8d   :  { %v4545_v55 = vpop.permute.xlu1 %4544 }
0x2a91   :  { %v8910_v62 = vpop.eup %8909  ;;  %v4541_v31 = vpop.permute.xlu1 %4540 }
0x2a92   :  { %v4444_v45 = vsel %vm489_vm3, %v8910_v62, 0.0 }
0x2a93   :  { %v8912_v25 = vpop.eup %8911  ;;  %4445 = vadd.xlane.f32.xlu0 %v4444_v45  ;;  %v7596_v45 = vld [vmem:[%s11262_s8 + $0x30] sm:$0xff] }
0x2a94   :  { %v4441_v20 = vsel %vm489_vm3, %v8912_v25, 0.0 }
0x2a97   :  { %4442 = vadd.xlane.f32.xlu0 %v4441_v20 }
0x2aad   :  { %4453 = vrot.lane.b32.xlu0 %v10405_v27, %s9308_s7 }
0x2ab1   :  { %4542 = vrot.lane.b32.xlu0 %v10403_v29, %s11271_s27 }
0x2b1c   :  { %v4446_v21 = vpop.xlane.xlu0 %4445 }
0x2b1d   :  { %8913 = vrcp.f32 %v4446_v21 }
0x2b20   :  { %v4443_v22 = vpop.xlane.xlu0 %4442 }
0x2b21   :  { %8915 = vrcp.f32 %v4443_v22 }
0x2b24   :  { %v4454_v23 = vpop.permute.xlu0 %4453 }
0x2b25   :  { %8457 = vmatprep.subr.mxu1 %v4454_v23 }
0x2b26   :  { %8458 = vmatpush3.msra.mxu1 %v4454_v23 }
0x2b27   :  { %8462 = vmatprep.subr.msk.mxu1 %vm401_vm1, %v4547_v24 }
0x2b28   :  { %v4543_v18 = vpop.permute.xlu0 %4542 }
0x2b2a   :  { %v8914_v63 = vpop.eup %8913 }
0x2b2b   :  { %v4450_v39 = vmul.f32 %v8914_v63, %v8910_v62  ;;  %v7597_v62 = vld [vmem:[%s11262_s8 + $0x38] sm:$0xff] }
0x2b2d   :  { %v4452_v0 = vsel %vm252_vm2, %v4450_v39, 0.0 }
0x2b2e   :  { %v8916_v1 = vpop.eup %8915 }
0x2b2f   :  { %v4449_v48 = vmul.f32 %v8916_v1, %v8912_v25 }
0x2b31   :  { %v4451_v37 = vsel %vm251_vm4, %v4449_v48, 0.0 }
0x2b32   :  { %8459 = vmatprep.mubr.msk.f32.mxu1 %vm489_vm3, %v4451_v37 }
0x2b33   :  { %8460 = vmatmul.mubr.msk.f32.vlgmr.msra.gmra.mxu1 %vm489_vm3, %v4452_v0 }
0x2b34   :  { %8463 = vmatpush3.xpose.msk.msra.mxu1 %vm401_vm1, %v4547_v24  ;;  %8466 = vmatprep.mubr.msk.f32.mxu1 %vm401_vm1, %v4541_v31 }
0x2b35   :  { %8464 = vmatprep.subr.msk.mxu1 %vm401_vm1, %v4545_v55 }
0x2b38   :  { %8465 = vmatpush3.xpose.msk.msra.mxu1 %vm401_vm1, %v4545_v55 }
0x2b3b   :  { %8467 = vmatmul.mubr.msk.f32.vlgmr.msra.gmra.mxu1 %vm401_vm1, %v4543_v18  ;;  %v9003_v18 = vld [vmem:[#allocation5] sm:$0xff] }
0x2bf3   :  { %v8461_v40 = vpop.f32.mrf.mxu1 }
0x2bf5   :  { %v4531_v44 = vpop.f32.mrf.mxu1 }
0x2bfb   :  { %v8468_v49 = vpop.f32.mrf.mxu1 }
0x2bfc   :  { %v4632_v51 = vmul.f32 0.35355338, %v8468_v49 }
0x2bfd   :  { %v4622_v35 = vpop.f32.mrf.mxu1 }
0x2bfe   :  { %v4634_v53 = vsel %vm252_vm2, %v4632_v51, -1e+30  ;;  %v4631_v56 = vmul.f32 0.35355338, %v4622_v35 }
0x2bff   :  { %v4638_v57 = vsel %vm489_vm3, %v4634_v53, -inf }
0x2c00   :  { %v4633_v36 = vsel %vm251_vm4, %v4631_v56, -1e+30  ;;  %4639 = vmax.xlane.f32.xlu0 %v4638_v57  ;;  %v7611_v57 = vld [vmem:[%s11201_s14 + $0x38] sm:$0xff] }
0x2c01   :  { %v4635_v38 = vsel %vm489_vm3, %v4633_v36, -inf }
0x2c02   :  { %4636 = vmax.xlane.f32.xlu1 %v4635_v38  ;;  %v9004_v38 = vld [vmem:[#allocation5 + $0x8] sm:$0xff] }
0x2c13   :  { %4661 = vrot.lane.b32.xlu1 %v10403_v29, %s9311_s3 }
0x2c17   :  { %4748 = vrot.lane.b32.xlu1 %v10489_v43, %s11266_s11 }
0x2c1b   :  { %4750 = vrot.lane.b32.xlu1 %v10487_v42, %s11266_s11 }
0x2c1f   :  { %4756 = vrot.lane.b32.xlu1 %v4531_v44, %s11264_s29 }
0x2c89   :  { %v4640_v58 = vpop.xlane.xlu0 %4639 }
0x2c8a   :  { %v4642_v2 = vsub.f32 %v4634_v53, %v4640_v58  ;;  %v9005_v58 = vld [vmem:[#allocation5 + $0x10] sm:$0xff] }
0x2c8b   :  { %v4637_v61 = vpop.xlane.xlu1 %4636 }
0x2c8c   :  { %v4645_v4 = vmul.f32 1.442695, %v4642_v2  ;;  %v4641_v60 = vsub.f32 %v4633_v36, %v4637_v61  ;;  %v7608_v36 = vld [vmem:[%s11201_s14 + $0x20] sm:$0xff]  ;;  %v9006_v2 = vld [vmem:[#allocation5 + $0x18] sm:$0xff] }
0x2c8e   :  { %8917 = vpow2.f32 %v4645_v4  ;;  %v4643_v3 = vmul.f32 1.442695, %v4641_v60 }
0x2c8f   :  { %v4662_v5 = vpop.permute.xlu1 %4661 }
0x2c90   :  { %8919 = vpow2.f32 %v4643_v3  ;;  %8469 = vmatprep.subr.mxu0 %v4662_v5 }
0x2c91   :  { %8470 = vmatpush3.msra.mxu0 %v4662_v5 }
0x2c93   :  { %v4749_v21 = vpop.permute.xlu1 %4748 }
0x2c94   :  { %v4770_v63 = vsel %vm401_vm1, %v10485_v30, %v4749_v21 }
0x2c97   :  { %v4751_v22 = vpop.permute.xlu1 %4750 }
0x2c98   :  { %v4771_v1 = vsel %vm401_vm1, %v10483_v59, %v4751_v22 }
0x2c9b   :  { %v8918_v29 = vpop.eup %8917  ;;  %v4757_v24 = vpop.permute.xlu1 %4756 }
0x2c9c   :  { %v4650_v19 = vsel %vm489_vm3, %v8918_v29, 0.0  ;;  %v4772_v39 = vsel %vm489_vm3, %v4770_v63, %v4757_v24  ;;  %v4903_v24 = vrot.slane %v10390_v11, %v9787_v12 }
0x2c9d   :  { %v8920_v43 = vpop.eup %8919  ;;  %4651 = vadd.xlane.f32.xlu0 %v4650_v19 }
0x2c9e   :  { %v4647_v42 = vsel %vm489_vm3, %v8920_v43, 0.0 }
0x2ca1   :  { %4648 = vadd.xlane.f32.xlu0 %v4647_v42 }
0x2cb7   :  { %4659 = vrot.lane.b32.xlu0 %v10405_v27, %s9311_s3 }
0x2cbb   :  { %4758 = vrot.lane.b32.xlu0 %v8461_v40, %s11264_s29  ;;  %v7600_v40 = vld [vmem:[#allocation11 + $0x1] ss:$0 sm:$0xff] }
0x2d26   :  { %v4652_v7 = vpop.xlane.xlu0 %4651 }
0x2d27   :  { %8921 = vrcp.f32 %v4652_v7 }
0x2d2a   :  { %v4649_v41 = vpop.xlane.xlu0 %4648 }
0x2d2b   :  { %8923 = vrcp.f32 %v4649_v41  ;;  %v7604_v41 = vld [vmem:[%s11199_s12 + $0x38] sm:$0xff] }
0x2d2c   :  { %8487 = vmatprep.subr.mxu1 %v7604_v41 }
0x2d2d   :  { %8488 = vmatpush3.msra.mxu1 %v7604_v41 }
0x2d2e   :  { %v4660_v10 = vpop.permute.xlu0 %4659 }
0x2d2f   :  { %8471 = vmatprep.subr.mxu0 %v4660_v10 }
0x2d30   :  { %8472 = vmatpush3.msra.mxu0 %v4660_v10  ;;  %v7603_v10 = vld [vmem:[%s11199_s12 + $0x30] sm:$0xff] }
0x2d31   :  { %8476 = vmatprep.subr.mxu0 %v7597_v62  ;;  %8489 = vmatprep.subr.mxu1 %v7603_v10 }
0x2d32   :  { %v4759_v23 = vpop.permute.xlu0 %4758  ;;  %8490 = vmatpush3.msra.mxu1 %v7603_v10 }
0x2d33   :  { %v4773_v37 = vsel %vm489_vm3, %v4771_v1, %v4759_v23  ;;  %v4909_v1 = vrot.slane %v10397_v14, %v9787_v12  ;;  %v7605_v14 = vld [vmem:[#allocation13 + $0x1] ss:$0 sm:$0xff] }
0x2d34   :  { %v8922_v6 = vpop.eup %8921 }
0x2d35   :  { %v4656_v15 = vmul.f32 %v8922_v6, %v8918_v29  ;;  %v7602_v6 = vld [vmem:[%s11199_s12 + $0x28] sm:$0xff] }
0x2d36   :  { %8491 = vmatprep.subr.mxu1 %v7602_v6 }
0x2d37   :  { %v4658_v27 = vsel %vm252_vm2, %v4656_v15, 0.0  ;;  %8492 = vmatpush3.msra.mxu1 %v7602_v6 }
0x2d38   :  { %v8924_v13 = vpop.eup %8923 }
0x2d39   :  { %v4655_v16 = vmul.f32 %v8924_v13, %v8920_v43  ;;  %v7601_v13 = vld [vmem:[%s11199_s12 + $0x20] sm:$0xff]  ;;  %s11273_s12 = smov 96  }
0x2d3a   :  { %8493 = vmatprep.subr.mxu1 %v7601_v13 }
0x2d3b   :  { %v4657_v17 = vsel %vm251_vm4, %v4655_v16, 0.0  ;;  %8494 = vmatpush3.msra.mxu1 %v7601_v13  ;;  %v7612_v16 = vld [vmem:[#allocation14 + $0x1] ss:$0 sm:$0xff] }
0x2d3c   :  { %8473 = vmatprep.mubr.msk.f32.mxu0 %vm489_vm3, %v4657_v17 }
0x2d3d   :  { %8474 = vmatmul.mubr.msk.f32.vlgmr.msra.gmra.mxu0 %vm489_vm3, %v4658_v27 }
0x2d3e   :  { %8477 = vmatpush3.msra.mxu0 %v7597_v62 }
0x2d3f   :  { %8478 = vmatprep.subr.mxu0 %v7596_v45 }
0x2d40   :  { %8479 = vmatpush3.msra.mxu0 %v7596_v45 }
0x2d41   :  { %8480 = vmatprep.subr.mxu0 %v7595_v47 }
0x2d42   :  { %8481 = vmatpush3.msra.mxu0 %v7595_v47 }
0x2d43   :  { %8482 = vmatprep.subr.mxu0 %v7594_v46 }
0x2d44   :  { %8483 = vmatpush3.msra.mxu0 %v7594_v46 }
0x2d45   :  { %8498 = vmatprep.subr.mxu0 %v7611_v57 }
0x2dfd   :  { %v8475_v25 = vpop.f32.mrf.mxu0 }
0x2dfe   :  { %4766 = vrot.lane.b32.xlu0 %v8475_v25, %s11272_s15 }
0x2dff   :  { %v4737_v20 = vpop.f32.mrf.mxu0 }
0x2e00   :  { %4764 = vrot.lane.b32.xlu1 %v4737_v20, %s11272_s15 }
0x2e70   :  { %v4767_v55 = vpop.permute.xlu0 %4766 }
0x2e71   :  { %v4775_v31 = vsel %vm1247_vm5, %v4773_v37, %v4767_v55 }
0x2e72   :  { %v4765_v48 = vpop.permute.xlu1 %4764 }
0x2e73   :  { %v4774_v0 = vsel %vm1247_vm5, %v4772_v39, %v4765_v48 }
0x2e74   :  { %8484 = vmatprep.mubr.msk.f32.mxu0 %vm263_vm0, %v4774_v0 }
0x2e75   :  { %8485 = vmatmul.mubr.msk.f32.vlgmr.msra.gmra.mxu0 %vm263_vm0, %v4775_v31 }
0x2e76   :  { %8506 = vmatprep.mubr.msk.f32.mxu0 %vm263_vm0, %v9003_v18  ;;  %8499 = vmatpush3.msra.mxu0 %v7611_v57 }
0x2f35   :  { %v8486_v30 = vpop.f32.mrf.mxu0 }
0x2f36   :  { %v4863_v59 = vadd.f32 %v8486_v30, %v10362_v50  ;;  %v7610_v50 = vld [vmem:[%s11201_s14 + $0x30] sm:$0xff] }
0x2f37   :  { %v4853_v44 = vpop.f32.mrf.mxu0  ;;  %8500 = vmatprep.subr.mxu0 %v7610_v50 }
0x2f38   :  { %v10573_v49 = vadd.f32 %v7600_v40, %v4863_v59  ;;  %v4862_v51 = vadd.f32 %v4853_v44, %v10365_v52  ;;  %v7609_v52 = vld [vmem:[%s11201_s14 + $0x28] sm:$0xff]  ;;  %8501 = vmatpush3.msra.mxu0 %v7610_v50 }
0x2f39   :  { %8502 = vmatprep.subr.mxu0 %v7609_v52 }
0x2f3a   :  { %v10576_v35 = vadd.f32 %v7600_v40, %v4862_v51  ;;  %v4877_v53 = vsel %vm263_vm0, %v10573_v49, 0.0  ;;  %8503 = vmatpush3.msra.mxu0 %v7609_v52 }
0x2f3b   :  { %4878 = vadd.xlane.f32.xlu0 %v4877_v53  ;;  %8504 = vmatprep.subr.mxu0 %v7608_v36 }
0x2f3c   :  { %v4874_v56 = vsel %vm263_vm0, %v10576_v35, 0.0  ;;  %8505 = vmatpush3.msra.mxu0 %v7608_v36 }
0x2f3d   :  { %4875 = vadd.xlane.f32.xlu1 %v4874_v56  ;;  %8507 = vmatmul.mubr.msk.f32.vlgmr.msra.gmra.mxu0 %vm263_vm0, %v9004_v38 }
0x2f3e   :  { %8509 = vmatprep.mubr.msk.f32.mxu0 %vm263_vm0, %v9005_v58 }
0x2f41   :  { %8510 = vmatmul.mubr.msk.f32.gmra.mxu0 %vm263_vm0, %v9006_v2 }
0x2fc4   :  { %v4879_v61 = vpop.xlane.xlu0 %4878 }
0x2fc5   :  { %v4881_v4 = vmul.f32 0.03125, %v4879_v61 }
0x2fc6   :  { %v4876_v60 = vpop.xlane.xlu1 %4875 }
0x2fc7   :  { %v4880_v3 = vmul.f32 0.03125, %v4876_v60  ;;  %v4883_v5 = vsub.f32 %v10573_v49, %v4881_v4 }
0x2fc9   :  { %v4882_v29 = vsub.f32 %v10576_v35, %v4880_v3  ;;  %v4885_v42 = vmul.f32 %v4883_v5, %v4883_v5 }
0x2fcb   :  { %v4884_v19 = vmul.f32 %v4882_v29, %v4882_v29  ;;  %v4889_v7 = vsel %vm263_vm0, %v4885_v42, 0.0 }
0x2fcd   :  { %v4886_v43 = vsel %vm263_vm0, %v4884_v19, 0.0 }
0x2fce   :  { %4887 = vadd.xlane.f32.xlu0 %v4886_v43 }
0x2fd2   :  { %4890 = vadd.xlane.f32.xlu0 %v4889_v7 }
0x2ffd   :  { %v8508_v15 = vpop.f32.mrf.mxu0 }
0x2ffe   :  { %v10613_v17 = vadd.f32 %v8508_v15, %v7612_v16 }
0x2fff   :  { %v5085_v27 = vpop.f32.mrf.mxu0 }
0x3000   :  { %v10615_v62 = vadd.f32 %v7612_v16, %v5085_v27 }
0x3001   :  { %v8511_v45 = vpop.f32.mrf.mxu0 }
0x3002   :  { %v10617_v47 = vadd.f32 %v8511_v45, %v7612_v16 }
0x3003   :  { %v5095_v31 = vpop.f32.mrf.mxu0 }
0x3004   :  { %8512 = vmatprep.subr.msk.mxu1 %vm401_vm1, %v10617_v47  ;;  %v10626_v40 = vadd.f32 %v7612_v16, %v5095_v31 }
0x3057   :  { %v4888_v46 = vpop.xlane.xlu0 %4887 }
0x3058   :  { %v4892_v25 = vmul.f32 0.03125, %v4888_v46 }
0x305a   :  { %v4894_v20 = vadd.f32 1e-12, %v4892_v25 }
0x305b   :  { %v4891_v21 = vpop.xlane.xlu0 %4890 }
0x305c   :  { %8925 = vrsqrt.f32 %v4894_v20  ;;  %v4893_v22 = vmul.f32 0.03125, %v4891_v21 }
0x305e   :  { %v4895_v23 = vadd.f32 1e-12, %v4893_v22 }
0x3060   :  { %8927 = vrsqrt.f32 %v4895_v23 }
0x3069   :  { %v8926_v63 = vpop.eup %8925 }
0x306a   :  { %v4898_v55 = vmul.f32 %v8926_v63, %v4882_v29 }
0x306c   :  { %v4904_v39 = vmul.f32 %v4903_v24, %v4898_v55 }
0x306d   :  { %v8928_v48 = vpop.eup %8927 }
0x306e   :  { %v4899_v37 = vmul.f32 %v8928_v48, %v4883_v5  ;;  %v4910_v0 = vadd.f32 %v4909_v1, %v4904_v39 }
0x3070   :  { %v4905_v18 = vmul.f32 %v4903_v24, %v4899_v37  ;;  %8495 = vmatprep.mubr.msk.f32.mxu1 %vm263_vm0, %v4910_v0 }
0x3072   :  { %v4911_v30 = vadd.f32 %v4909_v1, %v4905_v18 }
0x3074   :  { %8496 = vmatmul.mubr.msk.f32.vlgmr.msra.gmra.mxu1 %vm263_vm0, %v4911_v30 }
0x3075   :  { %8513 = vmatpush3.xpose.msk.msra.mxu1 %vm401_vm1, %v10617_v47 }
0x3076   :  { %8514 = vmatprep.subr.msk.mxu1 %vm401_vm1, %v10626_v40 }
0x3079   :  { %8515 = vmatpush3.xpose.msk.msra.mxu1 %vm401_vm1, %v10626_v40 }
0x307a   :  { %8516 = vmatprep.subr.msk.mxu1 %vm401_vm1, %v10613_v17 }
0x307d   :  { %8517 = vmatpush3.xpose.msk.msra.mxu1 %vm401_vm1, %v10613_v17 }
0x307e   :  { %8518 = vmatprep.subr.msk.mxu1 %vm401_vm1, %v10615_v62 }
0x3081   :  { %8519 = vmatpush3.xpose.msk.msra.mxu1 %vm401_vm1, %v10615_v62 }
0x3134   :  { %v8497_v11 = vpop.f32.mrf.mxu1 }
0x3135   :  { %v10645_v51 = vadd.f32 %v8497_v11, %v7605_v14 }
0x3136   :  { %v4997_v59 = vpop.f32.mrf.mxu1 }
0x3137   :  { %v10643_v44 = vadd.f32 %v7605_v14, %v4997_v59 }
0x3139   :  { %8520 = vmatprep.mubr.msk.f32.mxu1 %vm401_vm1, %v10643_v44 }
0x313a   :  { %8521 = vmatmul.mubr.msk.f32.vlgmr.msra.gmra.mxu1 %vm401_vm1, %v10645_v51 }
0x31fa   :  { %v8522_v53 = vpop.f32.mrf.mxu1 }
0x31fb   :  { %v5198_v56 = vmul.f32 0.35355338, %v8522_v53 }
0x31fc   :  { %v5188_v57 = vpop.f32.mrf.mxu1 }
0x31fd   :  { %v5200_v50 = vsel %vm256_vm6, %v5198_v56, -1e+30  ;;  %v5197_v52 = vmul.f32 0.35355338, %v5188_v57 }
0x31fe   :  { %v5204_v36 = vsel %vm263_vm0, %v5200_v50, -inf }
0x31ff   :  { %v5199_v38 = vsel %vm255_vm7, %v5197_v52, -1e+30  ;;  %5205 = vmax.xlane.f32.xlu0 %v5204_v36 }
0x3200   :  { %v5201_v58 = vsel %vm263_vm0, %v5199_v38, -inf }
0x3201   :  { %5202 = vmax.xlane.f32.xlu1 %v5201_v58 }
0x3212   :  { %5231 = vrot.lane.b32.xlu1 %v10617_v47, %s11269_s2 }
0x3216   :  { %5227 = vrot.lane.b32.xlu1 %v10613_v17, %s11269_s2 }
0x321a   :  { %5225 = vrot.lane.b32.xlu1 %v10615_v62, %s11269_s2 }
0x3288   :  { %v5206_v2 = vpop.xlane.xlu0 %5205 }
0x3289   :  { %v5208_v61 = vsub.f32 %v5200_v50, %v5206_v2 }
0x328a   :  { %v5203_v4 = vpop.xlane.xlu1 %5202 }
0x328b   :  { %v5211_v60 = vmul.f32 1.442695, %v5208_v61  ;;  %v5207_v3 = vsub.f32 %v5199_v38, %v5203_v4 }
0x328d   :  { %8929 = vpow2.f32 %v5211_v60  ;;  %v5209_v5 = vmul.f32 1.442695, %v5207_v3 }
0x328e   :  { %v5232_v29 = vpop.permute.xlu1 %5231 }
0x328f   :  { %8931 = vpow2.f32 %v5209_v5  ;;  %8523 = vmatprep.subr.mxu0 %v5232_v29 }
0x3290   :  { %8524 = vmatpush3.msra.mxu0 %v5232_v29 }
0x3292   :  { %v5228_v41 = vpop.permute.xlu1 %5227 }
0x3296   :  { %v5226_v10 = vpop.permute.xlu1 %5225 }
0x329a   :  { %v8930_v19 = vpop.eup %8929 }
0x329b   :  { %v5216_v43 = vsel %vm263_vm0, %v8930_v19, 0.0 }
0x329c   :  { %v8932_v42 = vpop.eup %8931  ;;  %5217 = vadd.xlane.f32.xlu0 %v5216_v43 }
0x329d   :  { %v5213_v7 = vsel %vm263_vm0, %v8932_v42, 0.0 }
0x329e   :  { %5214 = vadd.xlane.f32.xlu1 %v5213_v7 }
0x32af   :  { %5330 = vrot.lane.b32.xlu1 %v10617_v47, %s9304_s6 }
0x32b2   :  { %5229 = vrot.lane.b32.xlu0 %v10626_v40, %s11269_s2  ;;  %s11275_s2 = smov 88  }
0x32b3   :  { %5326 = vrot.lane.b32.xlu1 %v10613_v17, %s9304_s6 }
0x32b6   :  { %5328 = vrot.lane.b32.xlu0 %v10626_v40, %s9304_s6 }
0x32b7   :  { %5320 = vrot.lane.b32.xlu1 %v10643_v44, %s9304_s6 }
0x32ba   :  { %5324 = vrot.lane.b32.xlu0 %v10615_v62, %s9304_s6 }
0x32be   :  { %5322 = vrot.lane.b32.xlu0 %v10645_v51, %s9304_s6  ;;  %s11274_s6 = smov 32  }
0x3325   :  { %v5218_v6 = vpop.xlane.xlu0 %5217 }
0x3326   :  { %8933 = vrcp.f32 %v5218_v6 }
0x3327   :  { %v5215_v13 = vpop.xlane.xlu1 %5214 }
0x3328   :  { %8935 = vrcp.f32 %v5215_v13 }
0x3329   :  { %v5230_v15 = vpop.permute.xlu0 %5229 }
0x332a   :  { %8525 = vmatprep.subr.mxu0 %v5230_v15 }
0x332b   :  { %8526 = vmatpush3.msra.mxu0 %v5230_v15  ;;  %v5331_v16 = vpop.permute.xlu1 %5330 }
0x332c   :  { %8527 = vmatprep.subr.mxu0 %v5228_v41 }
0x332d   :  { %8528 = vmatpush3.msra.mxu0 %v5228_v41  ;;  %v5329_v24 = vpop.permute.xlu0 %5328 }
0x332e   :  { %8529 = vmatprep.subr.mxu0 %v5226_v10 }
0x332f   :  { %8530 = vmatpush3.msra.mxu0 %v5226_v10  ;;  %v5327_v45 = vpop.permute.xlu1 %5326 }
0x3330   :  { %8534 = vmatprep.subr.msk.mxu0 %vm401_vm1, %v5331_v16 }
0x3331   :  { %v5325_v63 = vpop.permute.xlu0 %5324 }
0x3333   :  { %v8934_v27 = vpop.eup %8933  ;;  %v5321_v23 = vpop.permute.xlu1 %5320 }
0x3334   :  { %v5222_v25 = vmul.f32 %v8934_v27, %v8930_v19 }
0x3335   :  { %v8936_v46 = vpop.eup %8935  ;;  %v5323_v55 = vpop.permute.xlu0 %5322 }
0x3336   :  { %v5221_v20 = vmul.f32 %v8936_v46, %v8932_v42  ;;  %v5224_v22 = vsel %vm256_vm6, %v5222_v25, 0.0 }
0x3338   :  { %v5223_v21 = vsel %vm255_vm7, %v5221_v20, 0.0 }
0x3339   :  { %8531 = vmatprep.mubr.msk.f32.mxu0 %vm263_vm0, %v5223_v21 }
0x333a   :  { %8532 = vmatmul.mubr.msk.f32.vlgmr.msra.gmra.mxu0 %vm263_vm0, %v5224_v22 }
0x333b   :  { %8535 = vmatpush3.xpose.msk.msra.mxu0 %vm401_vm1, %v5331_v16  ;;  %8542 = vmatprep.mubr.msk.f32.mxu0 %vm401_vm1, %v5321_v23 }
0x333c   :  { %8536 = vmatprep.subr.msk.mxu0 %vm401_vm1, %v5329_v24 }
0x333f   :  { %8537 = vmatpush3.xpose.msk.msra.mxu0 %vm401_vm1, %v5329_v24 }
0x3340   :  { %8538 = vmatprep.subr.msk.mxu0 %vm401_vm1, %v5327_v45 }
0x3343   :  { %8539 = vmatpush3.xpose.msk.msra.mxu0 %vm401_vm1, %v5327_v45 }
0x3344   :  { %8540 = vmatprep.subr.msk.mxu0 %vm401_vm1, %v5325_v63 }
0x3347   :  { %8541 = vmatpush3.xpose.msk.msra.mxu0 %vm401_vm1, %v5325_v63 }
0x334a   :  { %8543 = vmatmul.mubr.msk.f32.vlgmr.msra.gmra.mxu0 %vm401_vm1, %v5323_v55 }
0x33fa   :  { %v10695_v1 = vpop.f32.mrf.mxu0 }
0x33fc   :  { %v10697_v39 = vpop.f32.mrf.mxu0 }
0x340a   :  { %v8544_v48 = vpop.f32.mrf.mxu0 }
0x340b   :  { %v5420_v37 = vmul.f32 0.35355338, %v8544_v48 }
0x340c   :  { %v5410_v0 = vpop.f32.mrf.mxu0 }
0x340d   :  { %v5422_v31 = vsel %vm256_vm6, %v5420_v37, -1e+30  ;;  %v5419_v18 = vmul.f32 0.35355338, %v5410_v0 }
0x340e   :  { %v5426_v30 = vsel %vm263_vm0, %v5422_v31, -inf }
0x340f   :  { %v5421_v11 = vsel %vm255_vm7, %v5419_v18, -1e+30  ;;  %5427 = vmax.xlane.f32.xlu0 %v5426_v30 }
0x3410   :  { %v5423_v14 = vsel %vm263_vm0, %v5421_v11, -inf }
0x3411   :  { %5424 = vmax.xlane.f32.xlu1 %v5423_v14 }
0x3422   :  { %5453 = vrot.lane.b32.xlu1 %v10617_v47, %s9305_s22 }
0x3426   :  { %5449 = vrot.lane.b32.xlu1 %v10613_v17, %s9305_s22 }
0x342a   :  { %5447 = vrot.lane.b32.xlu1 %v10615_v62, %s9305_s22 }
0x342e   :  { %5552 = vrot.lane.b32.xlu1 %v10617_v47, %s11270_s1 }
0x3432   :  { %5548 = vrot.lane.b32.xlu1 %v10613_v17, %s11270_s1 }
0x3436   :  { %5542 = vrot.lane.b32.xlu1 %v10643_v44, %s11270_s1 }
0x3498   :  { %v5428_v59 = vpop.xlane.xlu0 %5427 }
0x3499   :  { %v5430_v53 = vsub.f32 %v5422_v31, %v5428_v59 }
0x349a   :  { %v5425_v56 = vpop.xlane.xlu1 %5424 }
0x349b   :  { %v5433_v57 = vmul.f32 1.442695, %v5430_v53  ;;  %v5429_v50 = vsub.f32 %v5421_v11, %v5425_v56 }
0x349d   :  { %8937 = vpow2.f32 %v5433_v57  ;;  %v5431_v52 = vmul.f32 1.442695, %v5429_v50 }
0x349e   :  { %v5454_v36 = vpop.permute.xlu1 %5453 }
0x349f   :  { %8939 = vpow2.f32 %v5431_v52  ;;  %8545 = vmatprep.subr.mxu1 %v5454_v36 }
0x34a0   :  { %8546 = vmatpush3.msra.mxu1 %v5454_v36 }
0x34a2   :  { %v5450_v4 = vpop.permute.xlu1 %5449 }
0x34a6   :  { %v5448_v5 = vpop.permute.xlu1 %5447 }
0x34aa   :  { %v8938_v38 = vpop.eup %8937  ;;  %v5553_v19 = vpop.permute.xlu1 %5552 }
0x34ab   :  { %v5438_v58 = vsel %vm263_vm0, %v8938_v38, 0.0 }
0x34ac   :  { %v8940_v2 = vpop.eup %8939  ;;  %5439 = vadd.xlane.f32.xlu0 %v5438_v58 }
0x34ad   :  { %v5435_v61 = vsel %vm263_vm0, %v8940_v2, 0.0 }
0x34ae   :  { %v5549_v42 = vpop.permute.xlu1 %5548 }
0x34b0   :  { %5436 = vadd.xlane.f32.xlu0 %v5435_v61 }
0x34b2   :  { %v5543_v15 = vpop.permute.xlu1 %5542 }
0x34c6   :  { %5451 = vrot.lane.b32.xlu0 %v10626_v40, %s9305_s22 }
0x34ca   :  { %5550 = vrot.lane.b32.xlu0 %v10626_v40, %s11270_s1 }
0x34ce   :  { %5546 = vrot.lane.b32.xlu0 %v10615_v62, %s11270_s1 }
0x34d2   :  { %5544 = vrot.lane.b32.xlu0 %v10645_v51, %s11270_s1  ;;  %s9315_s1 = smov [#allocation22]  }
0x3535   :  { %v5440_v60 = vpop.xlane.xlu0 %5439 }
0x3536   :  { %8941 = vrcp.f32 %v5440_v60 }
0x3539   :  { %v5437_v3 = vpop.xlane.xlu0 %5436 }
0x353a   :  { %8943 = vrcp.f32 %v5437_v3 }
0x353d   :  { %v5452_v29 = vpop.permute.xlu0 %5451 }
0x353e   :  { %8547 = vmatprep.subr.mxu1 %v5452_v29 }
0x353f   :  { %8548 = vmatpush3.msra.mxu1 %v5452_v29 }
0x3540   :  { %8549 = vmatprep.subr.mxu1 %v5450_v4 }
0x3541   :  { %8550 = vmatpush3.msra.mxu1 %v5450_v4  ;;  %v5551_v16 = vpop.permute.xlu0 %5550 }
0x3542   :  { %8551 = vmatprep.subr.mxu1 %v5448_v5 }
0x3543   :  { %8552 = vmatpush3.msra.mxu1 %v5448_v5  ;;  %v8942_v43 = vpop.eup %8941 }
0x3544   :  { %8556 = vmatprep.subr.msk.mxu1 %vm401_vm1, %v5553_v19  ;;  %v5444_v41 = vmul.f32 %v8942_v43, %v8938_v38 }
0x3545   :  { %v5547_v27 = vpop.permute.xlu0 %5546 }
0x3546   :  { %v5446_v13 = vsel %vm256_vm6, %v5444_v41, 0.0 }
0x3547   :  { %v8944_v7 = vpop.eup %8943 }
0x3548   :  { %v5443_v10 = vmul.f32 %v8944_v7, %v8940_v2 }
0x3549   :  { %v5545_v45 = vpop.permute.xlu0 %5544 }
0x354a   :  { %v5445_v6 = vsel %vm255_vm7, %v5443_v10, 0.0 }
0x354b   :  { %8553 = vmatprep.mubr.msk.f32.mxu1 %vm263_vm0, %v5445_v6 }
0x354c   :  { %8554 = vmatmul.mubr.msk.f32.vlgmr.msra.gmra.mxu1 %vm263_vm0, %v5446_v13 }
0x354d   :  { %8557 = vmatpush3.xpose.msk.msra.mxu1 %vm401_vm1, %v5553_v19  ;;  %8564 = vmatprep.mubr.msk.f32.mxu1 %vm401_vm1, %v5543_v15 }
0x354e   :  { %8558 = vmatprep.subr.msk.mxu1 %vm401_vm1, %v5551_v16 }
0x3551   :  { %8559 = vmatpush3.xpose.msk.msra.mxu1 %vm401_vm1, %v5551_v16 }
0x3552   :  { %8560 = vmatprep.subr.msk.mxu1 %vm401_vm1, %v5549_v42 }
0x3555   :  { %8561 = vmatpush3.xpose.msk.msra.mxu1 %vm401_vm1, %v5549_v42 }
0x3556   :  { %8562 = vmatprep.subr.msk.mxu1 %vm401_vm1, %v5547_v27 }
0x3559   :  { %8563 = vmatpush3.xpose.msk.msra.mxu1 %vm401_vm1, %v5547_v27 }
0x355c   :  { %8565 = vmatmul.mubr.msk.f32.vlgmr.msra.gmra.mxu1 %vm401_vm1, %v5545_v45 }
0x360c   :  { %v10743_v46 = vpop.f32.mrf.mxu1 }
0x360e   :  { %v10745_v25 = vpop.f32.mrf.mxu1 }
0x361c   :  { %v8566_v20 = vpop.f32.mrf.mxu1 }
0x361d   :  { %v5642_v21 = vmul.f32 0.35355338, %v8566_v20 }
0x361e   :  { %v5632_v22 = vpop.f32.mrf.mxu1 }
0x361f   :  { %v5644_v23 = vsel %vm256_vm6, %v5642_v21, -1e+30  ;;  %v5641_v24 = vmul.f32 0.35355338, %v5632_v22 }
0x3620   :  { %v5648_v63 = vsel %vm263_vm0, %v5644_v23, -inf }
0x3621   :  { %v5643_v55 = vsel %vm255_vm7, %v5641_v24, -1e+30  ;;  %5649 = vmax.xlane.f32.xlu0 %v5648_v63 }
0x3622   :  { %v5645_v48 = vsel %vm263_vm0, %v5643_v55, -inf }
0x3623   :  { %5646 = vmax.xlane.f32.xlu1 %v5645_v48 }
0x3634   :  { %5675 = vrot.lane.b32.xlu1 %v10617_v47, %s9308_s7 }
0x3638   :  { %5671 = vrot.lane.b32.xlu1 %v10613_v17, %s9308_s7 }
0x363c   :  { %5669 = vrot.lane.b32.xlu1 %v10615_v62, %s9308_s7 }
0x3640   :  { %5774 = vrot.lane.b32.xlu1 %v10617_v47, %s11271_s27 }
0x3644   :  { %5770 = vrot.lane.b32.xlu1 %v10613_v17, %s11271_s27 }
0x3648   :  { %5764 = vrot.lane.b32.xlu1 %v10643_v44, %s11271_s27 }
0x36aa   :  { %v5650_v37 = vpop.xlane.xlu0 %5649 }
0x36ab   :  { %v5652_v0 = vsub.f32 %v5644_v23, %v5650_v37 }
0x36ac   :  { %v5647_v31 = vpop.xlane.xlu1 %5646 }
0x36ad   :  { %v5655_v18 = vmul.f32 1.442695, %v5652_v0  ;;  %v5651_v30 = vsub.f32 %v5643_v55, %v5647_v31 }
0x36af   :  { %8945 = vpow2.f32 %v5655_v18  ;;  %v5653_v11 = vmul.f32 1.442695, %v5651_v30 }
0x36b0   :  { %v5676_v14 = vpop.permute.xlu1 %5675 }
0x36b1   :  { %8947 = vpow2.f32 %v5653_v11  ;;  %8567 = vmatprep.subr.mxu0 %v5676_v14 }
0x36b2   :  { %8568 = vmatpush3.msra.mxu0 %v5676_v14 }
0x36b4   :  { %v5672_v50 = vpop.permute.xlu1 %5671 }
0x36b8   :  { %v5670_v38 = vpop.permute.xlu1 %5669 }
0x36bc   :  { %v8946_v59 = vpop.eup %8945  ;;  %v5775_v2 = vpop.permute.xlu1 %5774 }
0x36bd   :  { %v5660_v53 = vsel %vm263_vm0, %v8946_v59, 0.0 }
0x36be   :  { %v8948_v56 = vpop.eup %8947  ;;  %5661 = vadd.xlane.f32.xlu0 %v5660_v53 }
0x36bf   :  { %v5657_v57 = vsel %vm263_vm0, %v8948_v56, 0.0 }
0x36c0   :  { %v5771_v4 = vpop.permute.xlu1 %5770 }
0x36c2   :  { %5658 = vadd.xlane.f32.xlu0 %v5657_v57 }
0x36c4   :  { %v5765_v43 = vpop.permute.xlu1 %5764 }
0x36d8   :  { %5673 = vrot.lane.b32.xlu0 %v10626_v40, %s9308_s7 }
0x36dc   :  { %5772 = vrot.lane.b32.xlu0 %v10626_v40, %s11271_s27 }
0x36e0   :  { %5768 = vrot.lane.b32.xlu0 %v10615_v62, %s11271_s27 }
0x36e4   :  { %5766 = vrot.lane.b32.xlu0 %v10645_v51, %s11271_s27  ;;  %s7433_s27 = sshll.u32 %s9315_s1, 4  ;;  %s7434_s27 = int_to_ptr.vmem [resolvable:$true] %s7433_s27 }
0x36e5   :  { %p9254_p5 = scmp.lt.s32.totalorder %s7434_s27, %s7434_s27 }
0x3747   :  { %v5662_v52 = vpop.xlane.xlu0 %5661 }
0x3748   :  { %8949 = vrcp.f32 %v5662_v52 }
0x374b   :  { %v5659_v36 = vpop.xlane.xlu0 %5658 }
0x374c   :  { %8951 = vrcp.f32 %v5659_v36 }
0x374f   :  { %v5674_v58 = vpop.permute.xlu0 %5673 }
0x3750   :  { %8569 = vmatprep.subr.mxu0 %v5674_v58 }
0x3751   :  { %8570 = vmatpush3.msra.mxu0 %v5674_v58 }
0x3752   :  { %8571 = vmatprep.subr.mxu0 %v5672_v50 }
0x3753   :  { %8572 = vmatpush3.msra.mxu0 %v5672_v50  ;;  %v5773_v42 = vpop.permute.xlu0 %5772 }
0x3754   :  { %8573 = vmatprep.subr.mxu0 %v5670_v38 }
0x3755   :  { %8574 = vmatpush3.msra.mxu0 %v5670_v38  ;;  %v8950_v61 = vpop.eup %8949 }
0x3756   :  { %8578 = vmatprep.subr.msk.mxu0 %vm401_vm1, %v5775_v2  ;;  %v5666_v3 = vmul.f32 %v8950_v61, %v8946_v59 }
0x3757   :  { %v5769_v7 = vpop.permute.xlu0 %5768 }
0x3758   :  { %v5668_v19 = vsel %vm256_vm6, %v5666_v3, 0.0 }
0x3759   :  { %v8952_v60 = vpop.eup %8951 }
0x375a   :  { %v5665_v5 = vmul.f32 %v8952_v60, %v8948_v56 }
0x375b   :  { %v5767_v41 = vpop.permute.xlu0 %5766 }
0x375c   :  { %v5667_v29 = vsel %vm255_vm7, %v5665_v5, 0.0 }
0x375d   :  { %8575 = vmatprep.mubr.msk.f32.mxu0 %vm263_vm0, %v5667_v29 }
0x375e   :  { %8576 = vmatmul.mubr.msk.f32.vlgmr.msra.gmra.mxu0 %vm263_vm0, %v5668_v19 }
0x375f   :  { %8579 = vmatpush3.xpose.msk.msra.mxu0 %vm401_vm1, %v5775_v2  ;;  %8586 = vmatprep.mubr.msk.f32.mxu0 %vm401_vm1, %v5765_v43 }
0x3760   :  { %8580 = vmatprep.subr.msk.mxu0 %vm401_vm1, %v5773_v42 }
0x3763   :  { %8581 = vmatpush3.xpose.msk.msra.mxu0 %vm401_vm1, %v5773_v42 }
0x3764   :  { %8582 = vmatprep.subr.msk.mxu0 %vm401_vm1, %v5771_v4 }
0x3767   :  { %8583 = vmatpush3.xpose.msk.msra.mxu0 %vm401_vm1, %v5771_v4 }
0x3768   :  { %8584 = vmatprep.subr.msk.mxu0 %vm401_vm1, %v5769_v7 }
0x376b   :  { %8585 = vmatpush3.xpose.msk.msra.mxu0 %vm401_vm1, %v5769_v7 }
0x376e   :  { %8587 = vmatmul.mubr.msk.f32.vlgmr.msra.gmra.mxu0 %vm401_vm1, %v5767_v41 }
0x381e   :  { %v10791_v10 = vpop.f32.mrf.mxu0 }
0x3820   :  { %v10793_v6 = vpop.f32.mrf.mxu0 }
0x382e   :  { %v8588_v13 = vpop.f32.mrf.mxu0 }
0x382f   :  { %v5864_v15 = vmul.f32 0.35355338, %v8588_v13 }
0x3830   :  { %v5854_v16 = vpop.f32.mrf.mxu0 }
0x3831   :  { %v5866_v27 = vsel %vm256_vm6, %v5864_v15, -1e+30  ;;  %v5863_v45 = vmul.f32 0.35355338, %v5854_v16 }
0x3832   :  { %v5870_v20 = vsel %vm263_vm0, %v5866_v27, -inf }
0x3833   :  { %v5865_v21 = vsel %vm255_vm7, %v5863_v45, -1e+30  ;;  %5871 = vmax.xlane.f32.xlu0 %v5870_v20 }
0x3834   :  { %v5867_v22 = vsel %vm263_vm0, %v5865_v21, -inf }
0x3835   :  { %5868 = vmax.xlane.f32.xlu1 %v5867_v22 }
0x3846   :  { %5897 = vrot.lane.b32.xlu1 %v10617_v47, %s9311_s3 }
0x384a   :  { %5893 = vrot.lane.b32.xlu1 %v10613_v17, %s9311_s3 }
0x384e   :  { %5891 = vrot.lane.b32.xlu1 %v10615_v62, %s9311_s3 }
0x3852   :  { %5996 = vrot.lane.b32.xlu1 %v10617_v47, %s11273_s12 }
0x3856   :  { %5992 = vrot.lane.b32.xlu1 %v10613_v17, %s11273_s12 }
0x385a   :  { %5986 = vrot.lane.b32.xlu1 %v10643_v44, %s11273_s12 }
0x38bc   :  { %v5872_v23 = vpop.xlane.xlu0 %5871 }
0x38bd   :  { %v5874_v24 = vsub.f32 %v5866_v27, %v5872_v23 }
0x38be   :  { %v5869_v63 = vpop.xlane.xlu1 %5868 }
0x38bf   :  { %v5877_v55 = vmul.f32 1.442695, %v5874_v24  ;;  %v5873_v48 = vsub.f32 %v5865_v21, %v5869_v63 }
0x38c1   :  { %8953 = vpow2.f32 %v5877_v55  ;;  %v5875_v37 = vmul.f32 1.442695, %v5873_v48 }
0x38c2   :  { %v5898_v0 = vpop.permute.xlu1 %5897 }
0x38c3   :  { %8955 = vpow2.f32 %v5875_v37  ;;  %8589 = vmatprep.subr.mxu1 %v5898_v0 }
0x38c4   :  { %8590 = vmatpush3.msra.mxu1 %v5898_v0 }
0x38c6   :  { %v5894_v14 = vpop.permute.xlu1 %5893 }
0x38ca   :  { %v5892_v56 = vpop.permute.xlu1 %5891 }
0x38ce   :  { %v8954_v31 = vpop.eup %8953  ;;  %v5997_v50 = vpop.permute.xlu1 %5996 }
0x38cf   :  { %v5882_v18 = vsel %vm263_vm0, %v8954_v31, 0.0 }
0x38d0   :  { %v8956_v30 = vpop.eup %8955  ;;  %5883 = vadd.xlane.f32.xlu0 %v5882_v18 }
0x38d1   :  { %v5879_v11 = vsel %vm263_vm0, %v8956_v30, 0.0 }
0x38d2   :  { %v5993_v36 = vpop.permute.xlu1 %5992 }
0x38d4   :  { %5880 = vadd.xlane.f32.xlu0 %v5879_v11 }
0x38d6   :  { %v5987_v60 = vpop.permute.xlu1 %5986 }
0x38ea   :  { %5895 = vrot.lane.b32.xlu0 %v10626_v40, %s9311_s3 }
0x38ee   :  { %5994 = vrot.lane.b32.xlu0 %v10626_v40, %s11273_s12 }
0x38f2   :  { %5990 = vrot.lane.b32.xlu0 %v10615_v62, %s11273_s12 }
0x38f6   :  { %5988 = vrot.lane.b32.xlu0 %v10645_v51, %s11273_s12 }
0x3959   :  { %v5884_v59 = vpop.xlane.xlu0 %5883 }
0x395a   :  { %8957 = vrcp.f32 %v5884_v59 }
0x395d   :  { %v5881_v53 = vpop.xlane.xlu0 %5880 }
0x395e   :  { %8959 = vrcp.f32 %v5881_v53 }
0x3961   :  { %v5896_v57 = vpop.permute.xlu0 %5895 }
0x3962   :  { %8591 = vmatprep.subr.mxu1 %v5896_v57 }
0x3963   :  { %8592 = vmatpush3.msra.mxu1 %v5896_v57 }
0x3964   :  { %8593 = vmatprep.subr.mxu1 %v5894_v14 }
0x3965   :  { %8594 = vmatpush3.msra.mxu1 %v5894_v14  ;;  %v5995_v3 = vpop.permute.xlu0 %5994 }
0x3966   :  { %8595 = vmatprep.subr.mxu1 %v5892_v56 }
0x3967   :  { %8596 = vmatpush3.msra.mxu1 %v5892_v56  ;;  %v8958_v52 = vpop.eup %8957 }
0x3968   :  { %8600 = vmatprep.subr.msk.mxu1 %vm401_vm1, %v5997_v50  ;;  %v5888_v58 = vmul.f32 %v8958_v52, %v8954_v31 }
0x3969   :  { %v5991_v5 = vpop.permute.xlu0 %5990 }
0x396a   :  { %v5890_v4 = vsel %vm256_vm6, %v5888_v58, 0.0 }
0x396b   :  { %v8960_v38 = vpop.eup %8959 }
0x396c   :  { %v5887_v2 = vmul.f32 %v8960_v38, %v8956_v30 }
0x396d   :  { %v5989_v29 = vpop.permute.xlu0 %5988 }
0x396e   :  { %v5889_v61 = vsel %vm255_vm7, %v5887_v2, 0.0 }
0x396f   :  { %8597 = vmatprep.mubr.msk.f32.mxu1 %vm263_vm0, %v5889_v61 }
0x3970   :  { %8598 = vmatmul.mubr.msk.f32.vlgmr.msra.gmra.mxu1 %vm263_vm0, %v5890_v4 }
0x3971   :  { %8601 = vmatpush3.xpose.msk.msra.mxu1 %vm401_vm1, %v5997_v50  ;;  %8608 = vmatprep.mubr.msk.f32.mxu1 %vm401_vm1, %v5987_v60 }
0x3972   :  { %8602 = vmatprep.subr.msk.mxu1 %vm401_vm1, %v5995_v3 }
0x3975   :  { %8603 = vmatpush3.xpose.msk.msra.mxu1 %vm401_vm1, %v5995_v3 }
0x3976   :  { %8604 = vmatprep.subr.msk.mxu1 %vm401_vm1, %v5993_v36 }
0x3979   :  { %8605 = vmatpush3.xpose.msk.msra.mxu1 %vm401_vm1, %v5993_v36 }
0x397a   :  { %8606 = vmatprep.subr.msk.mxu1 %vm401_vm1, %v5991_v5 }
0x397d   :  { %8607 = vmatpush3.xpose.msk.msra.mxu1 %vm401_vm1, %v5991_v5 }
0x3980   :  { %8609 = vmatmul.mubr.msk.f32.vlgmr.msra.gmra.mxu1 %vm401_vm1, %v5989_v29 }
0x3a30   :  { %v10839_v19 = vpop.f32.mrf.mxu1 }
0x3a32   :  { %v10841_v43 = vpop.f32.mrf.mxu1 }
0x3a40   :  { %v8610_v42 = vpop.f32.mrf.mxu1 }
0x3a41   :  { %v6086_v7 = vmul.f32 0.35355338, %v8610_v42 }
0x3a42   :  { %v6076_v41 = vpop.f32.mrf.mxu1 }
0x3a43   :  { %v6088_v13 = vsel %vm256_vm6, %v6086_v7, -1e+30  ;;  %v6085_v15 = vmul.f32 0.35355338, %v6076_v41 }
0x3a44   :  { %v6092_v16 = vsel %vm263_vm0, %v6088_v13, -inf }
0x3a45   :  { %v6087_v27 = vsel %vm255_vm7, %v6085_v15, -1e+30  ;;  %6093 = vmax.xlane.f32.xlu0 %v6092_v16 }
0x3a46   :  { %v6089_v45 = vsel %vm263_vm0, %v6087_v27, -inf }
0x3a47   :  { %6090 = vmax.xlane.f32.xlu1 %v6089_v45 }
0x3a58   :  { %6119 = vrot.lane.b32.xlu1 %v10617_v47, %s11274_s6 }
0x3a5c   :  { %6115 = vrot.lane.b32.xlu1 %v10613_v17, %s11274_s6 }
0x3a60   :  { %6113 = vrot.lane.b32.xlu1 %v10615_v62, %s11274_s6 }
0x3a64   :  { %6218 = vrot.lane.b32.xlu1 %v10617_v47, %s11275_s2 }
0x3a68   :  { %6214 = vrot.lane.b32.xlu1 %v10613_v17, %s11275_s2 }
0x3a6c   :  { %6208 = vrot.lane.b32.xlu1 %v10643_v44, %s11275_s2 }
0x3ace   :  { %v6094_v20 = vpop.xlane.xlu0 %6093 }
0x3acf   :  { %v6096_v21 = vsub.f32 %v6088_v13, %v6094_v20 }
0x3ad0   :  { %v6091_v22 = vpop.xlane.xlu1 %6090 }
0x3ad1   :  { %v6099_v23 = vmul.f32 1.442695, %v6096_v21  ;;  %v6095_v24 = vsub.f32 %v6087_v27, %v6091_v22 }
0x3ad3   :  { %8961 = vpow2.f32 %v6099_v23  ;;  %v6097_v63 = vmul.f32 1.442695, %v6095_v24 }
0x3ad4   :  { %v6120_v55 = vpop.permute.xlu1 %6119 }
0x3ad5   :  { %8963 = vpow2.f32 %v6097_v63  ;;  %8611 = vmatprep.subr.mxu0 %v6120_v55 }
0x3ad6   :  { %8612 = vmatpush3.msra.mxu0 %v6120_v55 }
0x3ad8   :  { %v6116_v18 = vpop.permute.xlu1 %6115 }
0x3adc   :  { %v6114_v14 = vpop.permute.xlu1 %6113 }
0x3ae0   :  { %v8962_v48 = vpop.eup %8961  ;;  %v6219_v53 = vpop.permute.xlu1 %6218 }
0x3ae1   :  { %v6104_v37 = vsel %vm263_vm0, %v8962_v48, 0.0 }
0x3ae2   :  { %v8964_v0 = vpop.eup %8963  ;;  %6105 = vadd.xlane.f32.xlu0 %v6104_v37 }
0x3ae3   :  { %v6101_v31 = vsel %vm263_vm0, %v8964_v0, 0.0 }
0x3ae4   :  { %v6215_v57 = vpop.permute.xlu1 %6214 }
0x3ae6   :  { %6102 = vadd.xlane.f32.xlu0 %v6101_v31 }
0x3ae8   :  { %v6209_v2 = vpop.permute.xlu1 %6208 }
0x3afc   :  { %6117 = vrot.lane.b32.xlu0 %v10626_v40, %s11274_s6 }
0x3b00   :  { %6216 = vrot.lane.b32.xlu0 %v10626_v40, %s11275_s2 }
0x3b04   :  { %6212 = vrot.lane.b32.xlu0 %v10615_v62, %s11275_s2 }
0x3b08   :  { %6210 = vrot.lane.b32.xlu0 %v10645_v51, %s11275_s2 }
0x3b6b   :  { %v6106_v30 = vpop.xlane.xlu0 %6105 }
0x3b6c   :  { %8965 = vrcp.f32 %v6106_v30 }
0x3b6f   :  { %v6103_v11 = vpop.xlane.xlu0 %6102 }
0x3b70   :  { %8967 = vrcp.f32 %v6103_v11 }
0x3b73   :  { %v6118_v59 = vpop.permute.xlu0 %6117 }
0x3b74   :  { %8613 = vmatprep.subr.mxu0 %v6118_v59 }
0x3b75   :  { %8614 = vmatpush3.msra.mxu0 %v6118_v59 }
0x3b76   :  { %8615 = vmatprep.subr.mxu0 %v6116_v18 }
0x3b77   :  { %8616 = vmatpush3.msra.mxu0 %v6116_v18  ;;  %v6217_v61 = vpop.permute.xlu0 %6216 }
0x3b78   :  { %8617 = vmatprep.subr.mxu0 %v6114_v14 }
0x3b79   :  { %8618 = vmatpush3.msra.mxu0 %v6114_v14  ;;  %v8966_v56 = vpop.eup %8965 }
0x3b7a   :  { %8622 = vmatprep.subr.msk.mxu0 %vm401_vm1, %v6219_v53  ;;  %v6110_v52 = vmul.f32 %v8966_v56, %v8962_v48 }
0x3b7b   :  { %v6213_v4 = vpop.permute.xlu0 %6212 }
0x3b7c   :  { %v6112_v58 = vsel %vm256_vm6, %v6110_v52, 0.0 }
0x3b7d   :  { %v8968_v50 = vpop.eup %8967 }
0x3b7e   :  { %v6109_v36 = vmul.f32 %v8968_v50, %v8964_v0 }
0x3b7f   :  { %v6211_v60 = vpop.permute.xlu0 %6210 }
0x3b80   :  { %v6111_v38 = vsel %vm255_vm7, %v6109_v36, 0.0 }
0x3b81   :  { %8619 = vmatprep.mubr.msk.f32.mxu0 %vm263_vm0, %v6111_v38 }
0x3b82   :  { %8620 = vmatmul.mubr.msk.f32.vlgmr.msra.gmra.mxu0 %vm263_vm0, %v6112_v58 }
0x3b83   :  { %8623 = vmatpush3.xpose.msk.msra.mxu0 %vm401_vm1, %v6219_v53  ;;  %8630 = vmatprep.mubr.msk.f32.mxu0 %vm401_vm1, %v6209_v2 }
0x3b84   :  { %8624 = vmatprep.subr.msk.mxu0 %vm401_vm1, %v6217_v61 }
0x3b87   :  { %8625 = vmatpush3.xpose.msk.msra.mxu0 %vm401_vm1, %v6217_v61 }
0x3b88   :  { %8626 = vmatprep.subr.msk.mxu0 %vm401_vm1, %v6215_v57 }
0x3b8b   :  { %8627 = vmatpush3.xpose.msk.msra.mxu0 %vm401_vm1, %v6215_v57 }
0x3b8c   :  { %8628 = vmatprep.subr.msk.mxu0 %vm401_vm1, %v6213_v4 }
0x3b8f   :  { %8629 = vmatpush3.xpose.msk.msra.mxu0 %vm401_vm1, %v6213_v4 }
0x3b92   :  { %8631 = vmatmul.mubr.msk.f32.vlgmr.msra.gmra.mxu0 %vm401_vm1, %v6211_v60 }
0x3c42   :  { %v10887_v3 = vpop.f32.mrf.mxu0 }
0x3c44   :  { %v10889_v5 = vpop.f32.mrf.mxu0 }
0x3c52   :  { %v8632_v29 = vpop.f32.mrf.mxu0 }
0x3c53   :  { %v6308_v42 = vmul.f32 0.35355338, %v8632_v29 }
0x3c54   :  { %v6298_v7 = vpop.f32.mrf.mxu0 }
0x3c55   :  { %v6310_v41 = vsel %vm256_vm6, %v6308_v42, -1e+30  ;;  %v6307_v13 = vmul.f32 0.35355338, %v6298_v7 }
0x3c56   :  { %v6314_v15 = vsel %vm263_vm0, %v6310_v41, -inf }
0x3c57   :  { %v6309_v16 = vsel %vm255_vm7, %v6307_v13, -1e+30  ;;  %6315 = vmax.xlane.f32.xlu0 %v6314_v15 }
0x3c58   :  { %v6311_v27 = vsel %vm263_vm0, %v6309_v16, -inf }
0x3c59   :  { %6312 = vmax.xlane.f32.xlu1 %v6311_v27 }
0x3c6a   :  { %6341 = vrot.lane.b32.xlu1 %v10617_v47, %s11272_s15 }
0x3c6e   :  { %6337 = vrot.lane.b32.xlu1 %v10613_v17, %s11272_s15 }
0x3c72   :  { %6335 = vrot.lane.b32.xlu1 %v10615_v62, %s11272_s15 }
0x3c76   :  { %6440 = vrot.lane.b32.xlu1 %v10617_v47, %s11263_s4 }
0x3c7a   :  { %6436 = vrot.lane.b32.xlu1 %v10613_v17, %s11263_s4 }
0x3c7e   :  { %6430 = vrot.lane.b32.xlu1 %v10643_v44, %s11263_s4 }
0x3ce0   :  { %v6316_v45 = vpop.xlane.xlu0 %6315 }
0x3ce1   :  { %v6318_v20 = vsub.f32 %v6310_v41, %v6316_v45 }
0x3ce2   :  { %v6313_v21 = vpop.xlane.xlu1 %6312 }
0x3ce3   :  { %v6321_v22 = vmul.f32 1.442695, %v6318_v20  ;;  %v6317_v23 = vsub.f32 %v6309_v16, %v6313_v21 }
0x3ce5   :  { %8969 = vpow2.f32 %v6321_v22  ;;  %v6319_v24 = vmul.f32 1.442695, %v6317_v23 }
0x3ce6   :  { %v6342_v63 = vpop.permute.xlu1 %6341 }
0x3ce7   :  { %8971 = vpow2.f32 %v6319_v24  ;;  %8633 = vmatprep.subr.mxu1 %v6342_v63 }
0x3ce8   :  { %8634 = vmatpush3.msra.mxu1 %v6342_v63 }
0x3cea   :  { %v6338_v31 = vpop.permute.xlu1 %6337 }
0x3cee   :  { %v6336_v11 = vpop.permute.xlu1 %6335 }
0x3cf2   :  { %v8970_v55 = vpop.eup %8969  ;;  %v6441_v59 = vpop.permute.xlu1 %6440 }
0x3cf3   :  { %v6326_v48 = vsel %vm263_vm0, %v8970_v55, 0.0 }
0x3cf4   :  { %v8972_v37 = vpop.eup %8971  ;;  %6327 = vadd.xlane.f32.xlu0 %v6326_v48 }
0x3cf5   :  { %v6323_v0 = vsel %vm263_vm0, %v8972_v37, 0.0 }
0x3cf6   :  { %v6437_v56 = vpop.permute.xlu1 %6436 }
0x3cf8   :  { %6324 = vadd.xlane.f32.xlu0 %v6323_v0 }
0x3cfa   :  { %v6431_v58 = vpop.permute.xlu1 %6430 }
0x3d0e   :  { %6339 = vrot.lane.b32.xlu0 %v10626_v40, %s11272_s15 }
0x3d12   :  { %6438 = vrot.lane.b32.xlu0 %v10626_v40, %s11263_s4 }
0x3d16   :  { %6434 = vrot.lane.b32.xlu0 %v10615_v62, %s11263_s4 }
0x3d1a   :  { %6432 = vrot.lane.b32.xlu0 %v10645_v51, %s11263_s4 }
0x3d7d   :  { %v6328_v18 = vpop.xlane.xlu0 %6327 }
0x3d7e   :  { %8973 = vrcp.f32 %v6328_v18 }
0x3d81   :  { %v6325_v30 = vpop.xlane.xlu0 %6324 }
0x3d82   :  { %8975 = vrcp.f32 %v6325_v30 }
0x3d85   :  { %v6340_v14 = vpop.permute.xlu0 %6339 }
0x3d86   :  { %8635 = vmatprep.subr.mxu1 %v6340_v14 }
0x3d87   :  { %8636 = vmatpush3.msra.mxu1 %v6340_v14 }
0x3d88   :  { %8637 = vmatprep.subr.mxu1 %v6338_v31 }
0x3d89   :  { %8638 = vmatpush3.msra.mxu1 %v6338_v31  ;;  %v6439_v2 = vpop.permute.xlu0 %6438 }
0x3d8a   :  { %8639 = vmatprep.subr.mxu1 %v6336_v11 }
0x3d8b   :  { %8640 = vmatpush3.msra.mxu1 %v6336_v11  ;;  %v8974_v53 = vpop.eup %8973 }
0x3d8c   :  { %8644 = vmatprep.subr.msk.mxu1 %vm401_vm1, %v6441_v59  ;;  %v6332_v50 = vmul.f32 %v8974_v53, %v8970_v55 }
0x3d8d   :  { %v6435_v61 = vpop.permute.xlu0 %6434 }
0x3d8e   :  { %v6334_v38 = vsel %vm256_vm6, %v6332_v50, 0.0 }
0x3d8f   :  { %v8976_v57 = vpop.eup %8975 }
0x3d90   :  { %v6331_v52 = vmul.f32 %v8976_v57, %v8972_v37 }
0x3d91   :  { %v6433_v4 = vpop.permute.xlu0 %6432 }
0x3d92   :  { %v6333_v36 = vsel %vm255_vm7, %v6331_v52, 0.0 }
0x3d93   :  { %8641 = vmatprep.mubr.msk.f32.mxu1 %vm263_vm0, %v6333_v36 }
0x3d94   :  { %8642 = vmatmul.mubr.msk.f32.vlgmr.msra.gmra.mxu1 %vm263_vm0, %v6334_v38 }
0x3d95   :  { %8645 = vmatpush3.xpose.msk.msra.mxu1 %vm401_vm1, %v6441_v59  ;;  %8652 = vmatprep.mubr.msk.f32.mxu1 %vm401_vm1, %v6431_v58 }
0x3d96   :  { %8646 = vmatprep.subr.msk.mxu1 %vm401_vm1, %v6439_v2 }
0x3d99   :  { %8647 = vmatpush3.xpose.msk.msra.mxu1 %vm401_vm1, %v6439_v2 }
0x3d9a   :  { %8648 = vmatprep.subr.msk.mxu1 %vm401_vm1, %v6437_v56 }
0x3d9d   :  { %8649 = vmatpush3.xpose.msk.msra.mxu1 %vm401_vm1, %v6437_v56 }
0x3d9e   :  { %8650 = vmatprep.subr.msk.mxu1 %vm401_vm1, %v6435_v61 }
0x3da1   :  { %8651 = vmatpush3.xpose.msk.msra.mxu1 %vm401_vm1, %v6435_v61 }
0x3da4   :  { %8653 = vmatmul.mubr.msk.f32.vlgmr.msra.gmra.mxu1 %vm401_vm1, %v6433_v4 }
0x3e54   :  { %v10935_v60 = vpop.f32.mrf.mxu1 }
0x3e56   :  { %v10937_v29 = vpop.f32.mrf.mxu1 }
0x3e64   :  { %v8654_v42 = vpop.f32.mrf.mxu1 }
0x3e65   :  { %v6530_v7 = vmul.f32 0.35355338, %v8654_v42 }
0x3e66   :  { %v6520_v41 = vpop.f32.mrf.mxu1 }
0x3e67   :  { %v6532_v13 = vsel %vm256_vm6, %v6530_v7, -1e+30  ;;  %v6529_v15 = vmul.f32 0.35355338, %v6520_v41 }
0x3e68   :  { %v6536_v16 = vsel %vm263_vm0, %v6532_v13, -inf }
0x3e69   :  { %v6531_v27 = vsel %vm255_vm7, %v6529_v15, -1e+30  ;;  %6537 = vmax.xlane.f32.xlu0 %v6536_v16 }
0x3e6a   :  { %v6533_v45 = vsel %vm263_vm0, %v6531_v27, -inf }
0x3e6b   :  { %6534 = vmax.xlane.f32.xlu1 %v6533_v45 }
0x3e7c   :  { %6563 = vrot.lane.b32.xlu1 %v10617_v47, %s11264_s29 }
0x3e80   :  { %6559 = vrot.lane.b32.xlu1 %v10613_v17, %s11264_s29 }
0x3e84   :  { %6557 = vrot.lane.b32.xlu1 %v10615_v62, %s11264_s29 }
0x3e88   :  { %6662 = vrot.lane.b32.xlu1 %v10617_v47, %s11265_s0 }
0x3e8c   :  { %6658 = vrot.lane.b32.xlu1 %v10613_v17, %s11265_s0 }
0x3e90   :  { %6652 = vrot.lane.b32.xlu1 %v10643_v44, %s11265_s0 }
0x3ef2   :  { %v6538_v20 = vpop.xlane.xlu0 %6537 }
0x3ef3   :  { %v6540_v21 = vsub.f32 %v6532_v13, %v6538_v20 }
0x3ef4   :  { %v6535_v22 = vpop.xlane.xlu1 %6534 }
0x3ef5   :  { %v6543_v23 = vmul.f32 1.442695, %v6540_v21  ;;  %v6539_v24 = vsub.f32 %v6531_v27, %v6535_v22  ;;  %v5540_v21 = vmul.f32 %v10745_v25, %v10200_v54  ;;  %v5762_v22 = vmul.f32 %v10793_v6, %v10200_v54 }
0x3ef7   :  { %8977 = vpow2.f32 %v6543_v23  ;;  %v6541_v63 = vmul.f32 1.442695, %v6539_v24  ;;  %v5984_v23 = vmul.f32 %v10841_v43, %v10200_v54 }
0x3ef8   :  { %v6564_v55 = vpop.permute.xlu1 %6563 }
0x3ef9   :  { %8979 = vpow2.f32 %v6541_v63  ;;  %8655 = vmatprep.subr.mxu0 %v6564_v55 }
0x3efa   :  { %8656 = vmatpush3.msra.mxu0 %v6564_v55 }
0x3efc   :  { %v6560_v44 = vpop.permute.xlu1 %6559 }
0x3f00   :  { %v6558_v11 = vpop.permute.xlu1 %6557 }
0x3f04   :  { %v8978_v48 = vpop.eup %8977  ;;  %v6663_v59 = vpop.permute.xlu1 %6662 }
0x3f05   :  { %v6548_v37 = vsel %vm263_vm0, %v8978_v48, 0.0 }
0x3f06   :  { %v8980_v0 = vpop.eup %8979  ;;  %6549 = vadd.xlane.f32.xlu0 %v6548_v37 }
0x3f07   :  { %v6545_v31 = vsel %vm263_vm0, %v8980_v0, 0.0 }
0x3f08   :  { %v6659_v56 = vpop.permute.xlu1 %6658 }
0x3f0a   :  { %6546 = vadd.xlane.f32.xlu0 %v6545_v31  ;;  %v5541_v31 = vmul.f32 %v10743_v46, %v10189_v9 }
0x3f0c   :  { %v6653_v38 = vpop.permute.xlu1 %6652 }
0x3f20   :  { %6561 = vrot.lane.b32.xlu0 %v10626_v40, %s11264_s29 }
0x3f24   :  { %6660 = vrot.lane.b32.xlu0 %v10626_v40, %s11265_s0 }
0x3f28   :  { %6656 = vrot.lane.b32.xlu0 %v10615_v62, %s11265_s0 }
0x3f2c   :  { %6654 = vrot.lane.b32.xlu0 %v10645_v51, %s11265_s0 }
0x3f8f   :  { %v6550_v18 = vpop.xlane.xlu0 %6549 }
0x3f90   :  { %8981 = vrcp.f32 %v6550_v18  ;;  %v5985_v18 = vmul.f32 %v10839_v19, %v10189_v9 }
0x3f93   :  { %v6547_v30 = vpop.xlane.xlu0 %6546 }
0x3f94   :  { %8983 = vrcp.f32 %v6547_v30  ;;  %v6207_v30 = vmul.f32 %v10887_v3, %v10205_v32 }
0x3f97   :  { %v6562_v14 = vpop.permute.xlu0 %6561 }
0x3f98   :  { %8657 = vmatprep.subr.mxu0 %v6562_v14 }
0x3f99   :  { %8658 = vmatpush3.msra.mxu0 %v6562_v14 }
0x3f9a   :  { %8659 = vmatprep.subr.mxu0 %v6560_v44 }
0x3f9b   :  { %8660 = vmatpush3.msra.mxu0 %v6560_v44  ;;  %v6661_v58 = vpop.permute.xlu0 %6660  ;;  %v5763_v44 = vmul.f32 %v10791_v10, %v10189_v9 }
0x3f9c   :  { %8661 = vmatprep.subr.mxu0 %v6558_v11 }
0x3f9d   :  { %8662 = vmatpush3.msra.mxu0 %v6558_v11  ;;  %v8982_v53 = vpop.eup %8981 }
0x3f9e   :  { %8666 = vmatprep.subr.msk.mxu0 %vm401_vm1, %v6663_v59  ;;  %v6554_v51 = vmul.f32 %v8982_v53, %v8978_v48 }
0x3f9f   :  { %v6657_v2 = vpop.permute.xlu0 %6656 }
0x3fa0   :  { %v6556_v36 = vsel %vm256_vm6, %v6554_v51, 0.0 }
0x3fa1   :  { %v8984_v57 = vpop.eup %8983 }
0x3fa2   :  { %v6553_v50 = vmul.f32 %v8984_v57, %v8980_v0 }
0x3fa3   :  { %v6655_v61 = vpop.permute.xlu0 %6654 }
0x3fa4   :  { %v6555_v52 = vsel %vm255_vm7, %v6553_v50, 0.0  ;;  %v7689_v50 = vld [vmem:[%s11203_s16 + $0x78] sm:$0xff] }
0x3fa5   :  { %8663 = vmatprep.mubr.msk.f32.mxu0 %vm263_vm0, %v6555_v52  ;;  %v7688_v52 = vld [vmem:[%s11203_s16 + $0x70] sm:$0xff] }
0x3fa6   :  { %8664 = vmatmul.mubr.msk.f32.vlgmr.msra.gmra.mxu0 %vm263_vm0, %v6556_v36  ;;  %v7685_v36 = vld [vmem:[%s11203_s16 + $0x58] sm:$0xff] }
0x3fa7   :  { %8667 = vmatpush3.xpose.msk.msra.mxu0 %vm401_vm1, %v6663_v59  ;;  %8674 = vmatprep.mubr.msk.f32.mxu0 %vm401_vm1, %v6653_v38  ;;  %v7684_v38 = vld [vmem:[%s11203_s16 + $0x50] sm:$0xff] }
0x3fa8   :  { %8668 = vmatprep.subr.msk.mxu0 %vm401_vm1, %v6661_v58 }
0x3fab   :  { %8669 = vmatpush3.xpose.msk.msra.mxu0 %vm401_vm1, %v6661_v58  ;;  %v7683_v58 = vld [vmem:[%s11203_s16 + $0x48] sm:$0xff] }
0x3fac   :  { %8670 = vmatprep.subr.msk.mxu0 %vm401_vm1, %v6659_v56 }
0x3faf   :  { %8671 = vmatpush3.xpose.msk.msra.mxu0 %vm401_vm1, %v6659_v56 }
0x3fb0   :  { %8672 = vmatprep.subr.msk.mxu0 %vm401_vm1, %v6657_v2 }
0x3fb3   :  { %8673 = vmatpush3.xpose.msk.msra.mxu0 %vm401_vm1, %v6657_v2  ;;  %v7682_v2 = vld [vmem:[%s11203_s16 + $0x40] sm:$0xff] }
0x3fb6   :  { %8675 = vmatmul.mubr.msk.f32.vlgmr.msra.gmra.mxu0 %vm401_vm1, %v6655_v61 }
0x4066   :  { %v8665_v4 = vpop.f32.mrf.mxu0 }
0x4067   :  { %v6651_v46 = vmul.f32 %v8665_v4, %v10205_v32 }
0x4068   :  { %v6641_v42 = vpop.f32.mrf.mxu0 }
0x4076   :  { %v8676_v7 = vpop.f32.mrf.mxu0 }
0x4077   :  { %v6752_v41 = vmul.f32 0.35355338, %v8676_v7 }
0x4078   :  { %v6742_v13 = vpop.f32.mrf.mxu0 }
0x4079   :  { %v6754_v15 = vsel %vm256_vm6, %v6752_v41, -1e+30  ;;  %v6751_v16 = vmul.f32 0.35355338, %v6742_v13 }
0x407a   :  { %v6758_v27 = vsel %vm263_vm0, %v6754_v15, -inf }
0x407b   :  { %v6753_v45 = vsel %vm255_vm7, %v6751_v16, -1e+30  ;;  %6759 = vmax.xlane.f32.xlu0 %v6758_v27 }
0x407c   :  { %v6755_v20 = vsel %vm263_vm0, %v6753_v45, -inf }
0x407d   :  { %6756 = vmax.xlane.f32.xlu1 %v6755_v20 }
0x408e   :  { %6785 = vrot.lane.b32.xlu1 %v10617_v47, %s11266_s11  ;;  %v6650_v47 = vmul.f32 %v6641_v42, %v10221_v28 }
0x4092   :  { %6781 = vrot.lane.b32.xlu1 %v10613_v17, %s11266_s11  ;;  %v6206_v17 = vmul.f32 %v10889_v5, %v10221_v28 }
0x4096   :  { %6779 = vrot.lane.b32.xlu1 %v10615_v62, %s11266_s11  ;;  %v6428_v62 = vmul.f32 %v10937_v29, %v10221_v28 }
0x409a   :  { %6876 = vrot.lane.b32.xlu1 %v5540_v21, %s11266_s11 }
0x409e   :  { %6884 = vrot.lane.b32.xlu1 %v5762_v22, %s11264_s29 }
0x40a2   :  { %6892 = vrot.lane.b32.xlu1 %v5984_v23, %s11272_s15 }
0x40a6   :  { %6900 = vrot.lane.b32.xlu1 %v6206_v17, %s11274_s6  ;;  %v5318_v17 = vmul.f32 %v10697_v39, %v10200_v54 }
0x40aa   :  { %6908 = vrot.lane.b32.xlu1 %v6428_v62, %s9311_s3  ;;  %v5319_v62 = vmul.f32 %v10695_v1, %v10189_v9 }
0x40ae   :  { %6916 = vrot.lane.b32.xlu1 %v6650_v47, %s9308_s7 }
0x4104   :  { %v6760_v25 = vpop.xlane.xlu0 %6759 }
0x4105   :  { %v6762_v6 = vsub.f32 %v6754_v15, %v6760_v25 }
0x4106   :  { %v6757_v24 = vpop.xlane.xlu1 %6756 }
0x4107   :  { %v6765_v43 = vmul.f32 1.442695, %v6762_v6  ;;  %v6761_v63 = vsub.f32 %v6753_v45, %v6757_v24 }
0x4109   :  { %8985 = vpow2.f32 %v6765_v43  ;;  %v6763_v55 = vmul.f32 1.442695, %v6761_v63 }
0x410a   :  { %v6786_v48 = vpop.permute.xlu1 %6785 }
0x410b   :  { %8987 = vpow2.f32 %v6763_v55  ;;  %8677 = vmatprep.subr.mxu1 %v6786_v48 }
0x410c   :  { %8678 = vmatpush3.msra.mxu1 %v6786_v48 }
0x410e   :  { %v6782_v19 = vpop.permute.xlu1 %6781 }
0x4112   :  { %v6780_v3 = vpop.permute.xlu1 %6779 }
0x4116   :  { %v8986_v5 = vpop.eup %8985  ;;  %v6877_v13 = vpop.permute.xlu1 %6876 }
0x4117   :  { %v6770_v29 = vsel %vm263_vm0, %v8986_v5, 0.0  ;;  %v6930_v47 = vsel %vm401_vm1, %v5318_v17, %v6877_v13 }
0x4118   :  { %v8988_v37 = vpop.eup %8987  ;;  %6771 = vadd.xlane.f32.xlu0 %v6770_v29 }
0x4119   :  { %v6767_v0 = vsel %vm263_vm0, %v8988_v37, 0.0 }
0x411a   :  { %v6885_v16 = vpop.permute.xlu1 %6884 }
0x411b   :  { %v6932_v6 = vsel %vm489_vm3, %v6930_v47, %v6885_v16 }
0x411c   :  { %6768 = vadd.xlane.f32.xlu0 %v6767_v0 }
0x411e   :  { %v6893_v45 = vpop.permute.xlu1 %6892 }
0x411f   :  { %v6934_v63 = vsel %vm1247_vm5, %v6932_v6, %v6893_v45  ;;  %v9007_v45 = vld [vmem:[%s11260_s13 + $0x4] sm:$0x7] }
0x4122   :  { %v6901_v21 = vpop.permute.xlu1 %6900 }
0x4123   :  { %v6936_v48 = vsel %vm263_vm0, %v6934_v63, %v6901_v21  ;;  %v7705_v63 = vld [vmem:[%s11207_s20 + $0x70] sm:$0xff] }
0x4126   :  { %v6909_v23 = vpop.permute.xlu1 %6908 }
0x4127   :  { %v6938_v39 = vsel %vm3438_vm8, %v6936_v48, %v6909_v23  ;;  %v9008_v23 = vld [vmem:[%s11261_s5 + $0x4] sm:$0x7]  ;;  %v7702_v48 = vld [vmem:[%s11207_s20 + $0x58] sm:$0xff] }
0x4128   :  { %v7089_v17 = vrot.slane %v9008_v23, %v10326_v8 }
0x412a   :  { %v6917_v24 = vpop.permute.xlu1 %6916 }
0x4132   :  { %6783 = vrot.lane.b32.xlu0 %v10626_v40, %s11266_s11  ;;  %v6429_v40 = vmul.f32 %v10935_v60, %v10205_v32 }
0x4136   :  { %6878 = vrot.lane.b32.xlu0 %v5541_v31, %s11266_s11 }
0x413a   :  { %6886 = vrot.lane.b32.xlu0 %v5763_v44, %s11264_s29 }
0x413e   :  { %6894 = vrot.lane.b32.xlu0 %v5985_v18, %s11272_s15 }
0x4142   :  { %6902 = vrot.lane.b32.xlu0 %v6207_v30, %s11274_s6 }
0x4146   :  { %6910 = vrot.lane.b32.xlu0 %v6429_v40, %s9311_s3  ;;  %v7681_v40 = vld [vmem:[%s11204_s17 + $0x2] sm:$0x3] }
0x414a   :  { %6918 = vrot.lane.b32.xlu0 %v6651_v46, %s9308_s7  ;;  %v6949_v46 = vrot.slane %v7681_v40, %v9544_v26 }
0x41a1   :  { %v6772_v10 = vpop.xlane.xlu0 %6771 }
0x41a2   :  { %8989 = vrcp.f32 %v6772_v10  ;;  %v6955_v10 = vrot.slane %v7681_v40, %v9787_v12 }
0x41a5   :  { %v6769_v11 = vpop.xlane.xlu0 %6768 }
0x41a6   :  { %8991 = vrcp.f32 %v6769_v11  ;;  %v6951_v11 = vmul.f32 %v6949_v46, %v10189_v9 }
0x41a9   :  { %v6784_v14 = vpop.permute.xlu0 %6783 }
0x41aa   :  { %8679 = vmatprep.subr.mxu1 %v6784_v14 }
0x41ab   :  { %8680 = vmatpush3.msra.mxu1 %v6784_v14  ;;  %v6950_v14 = vmul.f32 %v6949_v46, %v10200_v54  ;;  %v7709_v46 = vld [vmem:[#allocation17 + $0x1] ss:$0 sm:$0xff] }
0x41ac   :  { %8681 = vmatprep.subr.mxu1 %v6782_v19 }
0x41ad   :  { %8682 = vmatpush3.msra.mxu1 %v6782_v19  ;;  %v6879_v41 = vpop.permute.xlu0 %6878  ;;  %v6957_v19 = vmul.f32 %v6955_v10, %v10205_v32 }
0x41ae   :  { %8683 = vmatprep.subr.mxu1 %v6780_v3  ;;  %v6931_v43 = vsel %vm401_vm1, %v5319_v62, %v6879_v41 }
0x41af   :  { %8684 = vmatpush3.msra.mxu1 %v6780_v3  ;;  %v8990_v60 = vpop.eup %8989  ;;  %v6956_v3 = vmul.f32 %v6955_v10, %v10221_v28 }
0x41b0   :  { %v6776_v53 = vmul.f32 %v8990_v60, %v8986_v5  ;;  %8688 = vmatprep.subr.mxu1 %v7689_v50 }
0x41b1   :  { %v6887_v15 = vpop.permute.xlu0 %6886 }
0x41b2   :  { %v6778_v51 = vsel %vm256_vm6, %v6776_v53, 0.0  ;;  %v6933_v55 = vsel %vm489_vm3, %v6931_v43, %v6887_v15 }
0x41b3   :  { %v8992_v59 = vpop.eup %8991 }
0x41b4   :  { %v6775_v56 = vmul.f32 %v8992_v59, %v8988_v37  ;;  %v6940_v37 = vsel %vm3441_vm9, %v6938_v39, %v6917_v24  ;;  %v6959_v59 = vadd.f32 %v6957_v19, %v6951_v11  ;;  %v7700_v39 = vld [vmem:[%s11207_s20 + $0x48] sm:$0xff] }
0x41b5   :  { %v6895_v27 = vpop.permute.xlu0 %6894 }
0x41b6   :  { %v6777_v57 = vsel %vm255_vm7, %v6775_v56, 0.0  ;;  %v6935_v5 = vsel %vm1247_vm5, %v6933_v55, %v6895_v27  ;;  %v7704_v55 = vld [vmem:[%s11207_s20 + $0x68] sm:$0xff] }
0x41b7   :  { %8685 = vmatprep.mubr.msk.f32.mxu1 %vm263_vm0, %v6777_v57 }
0x41b8   :  { %8686 = vmatmul.mubr.msk.f32.vlgmr.msra.gmra.mxu1 %vm263_vm0, %v6778_v51  ;;  %v6958_v51 = vadd.f32 %v6956_v3, %v6950_v14 }
0x41b9   :  { %8689 = vmatpush3.msra.mxu1 %v7689_v50  ;;  %v6903_v20 = vpop.permute.xlu0 %6902 }
0x41ba   :  { %8690 = vmatprep.subr.mxu1 %v7688_v52  ;;  %v6937_v1 = vsel %vm263_vm0, %v6935_v5, %v6903_v20  ;;  %v7083_v20 = vrot.slane %v9007_v45, %v10326_v8  ;;  %v7703_v8 = vld [vmem:[%s11207_s20 + $0x60] sm:$0xff]  ;;  %v7701_v5 = vld [vmem:[%s11207_s20 + $0x50] sm:$0xff] }
0x41bb   :  { %8691 = vmatpush3.msra.mxu1 %v7688_v52 }
0x41bc   :  { %8692 = vmatprep.subr.mxu1 %v7687_v34 }
0x41bd   :  { %8693 = vmatpush3.msra.mxu1 %v7687_v34  ;;  %v6911_v22 = vpop.permute.xlu0 %6910 }
0x41be   :  { %8694 = vmatprep.subr.mxu1 %v7686_v33  ;;  %v6939_v0 = vsel %vm3438_vm8, %v6937_v1, %v6911_v22  ;;  %v7699_v1 = vld [vmem:[%s11207_s20 + $0x40] sm:$0xff] }
0x41bf   :  { %8695 = vmatpush3.msra.mxu1 %v7686_v33 }
0x41c0   :  { %8696 = vmatprep.subr.mxu1 %v7685_v36 }
0x41c1   :  { %8697 = vmatpush3.msra.mxu1 %v7685_v36  ;;  %v6919_v25 = vpop.permute.xlu0 %6918 }
0x41c2   :  { %8698 = vmatprep.subr.mxu1 %v7684_v38  ;;  %v6941_v44 = vsel %vm3441_vm9, %v6939_v0, %v6919_v25 }
0x41c3   :  { %8699 = vmatpush3.msra.mxu1 %v7684_v38 }
0x41c4   :  { %8700 = vmatprep.subr.mxu1 %v7683_v58 }
0x41c5   :  { %8701 = vmatpush3.msra.mxu1 %v7683_v58  ;;  %v7695_v58 = vld [vmem:[%s11205_s18 + $0x38] sm:$0xff] }
0x41c6   :  { %8702 = vmatprep.subr.mxu1 %v7682_v2  ;;  %8707 = vmatprep.subr.mxu0 %v7695_v58 }
0x41c7   :  { %8703 = vmatpush3.msra.mxu1 %v7682_v2  ;;  %v7694_v2 = vld [vmem:[%s11205_s18 + $0x30] sm:$0xff]  ;;  %8708 = vmatpush3.msra.mxu0 %v7695_v58 }
0x41c8   :  { %8709 = vmatprep.subr.mxu0 %v7694_v2 }
0x41c9   :  { %8710 = vmatpush3.msra.mxu0 %v7694_v2 }
0x4278   :  { %v8687_v61 = vpop.f32.mrf.mxu1 }
0x4279   :  { %v6873_v4 = vmul.f32 %v8687_v61, %v10205_v32  ;;  %v7693_v61 = vld [vmem:[%s11205_s18 + $0x28] sm:$0xff] }
0x427a   :  { %v6863_v42 = vpop.f32.mrf.mxu1  ;;  %8711 = vmatprep.subr.mxu0 %v7693_v61 }
0x427b   :  { %v6872_v7 = vmul.f32 %v6863_v42, %v10221_v28  ;;  %6926 = vrot.lane.b32.xlu0 %v6873_v4, %s9305_s22  ;;  %8712 = vmatpush3.msra.mxu0 %v7693_v61  ;;  %v7692_v4 = vld [vmem:[%s11205_s18 + $0x20] sm:$0xff]  ;;  %v7706_v42 = vld [vmem:[%s11207_s20 + $0x78] sm:$0xff]  ;;  %s9249_s18 = scalar_lea.vmem %s7434_s27, 256 }
0x427c   :  { %8713 = vmatprep.subr.mxu0 %v7692_v4  ;;  %p9250_p4 = scmp.ne.s32.totalorder %s7434_s27, %s9249_s18  ;;  %p9255_p6 = scmp.lt.s32.totalorder %s9249_s18, %s9249_s18 }
0x427d   :  { %6924 = vrot.lane.b32.xlu1 %v6872_v7, %s9305_s22  ;;  %8714 = vmatpush3.msra.mxu0 %v7692_v4  ;;  %v7710_v4 = vld [vmem:[#allocation19] ss:$0 sm:$0xff] }
0x427e   :  { %8718 = vmatprep.subr.mxu0 %v7706_v42  ;;  %p9256_p7 = por %p9255_p6, %p9254_p5 }
0x4280   :  { %p9257_p8 = pnand %p9256_p7, %p9250_p4 }
0x42ed   :  { %v6927_v29 = vpop.permute.xlu0 %6926 }
0x42ee   :  { %v6943_v30 = vsel %vm3444_vm10, %v6941_v44, %v6927_v29  ;;  %v7696_v29 = vld [vmem:[#allocation16 + $0x1] ss:$0 sm:$0xff] }
0x42ef   :  { %v6925_v31 = vpop.permute.xlu1 %6924 }
0x42f0   :  { %v6942_v18 = vsel %vm3444_vm10, %v6940_v37, %v6925_v31 }
0x42f1   :  { %8704 = vmatprep.mubr.msk.f32.mxu1 %vm3470_vm11, %v6942_v18 }
0x42f2   :  { %8705 = vmatmul.mubr.msk.f32.vlgmr.msra.gmra.mxu1 %vm3470_vm11, %v6943_v30 }
0x43b2   :  { %v8706_v60 = vpop.f32.mrf.mxu1 }
0x43b3   :  { %v7051_v53 = vadd.f32 %v8706_v60, %v10573_v49 }
0x43b4   :  { %v7041_v56 = vpop.f32.mrf.mxu1 }
0x43b5   :  { %v11097_v57 = vadd.f32 %v7051_v53, %v6959_v59  ;;  %v7050_v26 = vadd.f32 %v7041_v56, %v10576_v35 }
0x43b7   :  { %v11100_v50 = vadd.f32 %v7050_v26, %v6958_v51  ;;  %v7057_v12 = vsel %vm263_vm0, %v11097_v57, 0.0 }
0x43b8   :  { %7058 = vadd.xlane.f32.xlu0 %v7057_v12 }
0x43b9   :  { %v7054_v9 = vsel %vm263_vm0, %v11100_v50, 0.0 }
0x43ba   :  { %7055 = vadd.xlane.f32.xlu1 %v7054_v9 }
0x4441   :  { %v7059_v54 = vpop.xlane.xlu0 %7058 }
0x4442   :  { %v7061_v32 = vmul.f32 0.03125, %v7059_v54 }
0x4443   :  { %v7056_v28 = vpop.xlane.xlu1 %7055 }
0x4444   :  { %v7060_v49 = vmul.f32 0.03125, %v7056_v28  ;;  %v7063_v52 = vsub.f32 %v11097_v57, %v7061_v32  ;;  %v7337_v28 = vld [vmem:[%s11211_s24 + $0x18] sm:$0xff] }
0x4445   :  { %8737 = vmatprep.subr.mxu1 %v7337_v28 }
0x4446   :  { %v7062_v34 = vsub.f32 %v11100_v50, %v7060_v49  ;;  %v7065_v36 = vmul.f32 %v7063_v52, %v7063_v52  ;;  %v7336_v49 = vld [vmem:[%s11211_s24 + $0x10] sm:$0xff]  ;;  %8738 = vmatpush3.msra.mxu1 %v7337_v28 }
0x4447   :  { %8739 = vmatprep.subr.mxu1 %v7336_v49 }
0x4448   :  { %v7064_v33 = vmul.f32 %v7062_v34, %v7062_v34  ;;  %v7069_v38 = vsel %vm263_vm0, %v7065_v36, 0.0  ;;  %8740 = vmatpush3.msra.mxu1 %v7336_v49 }
0x444a   :  { %v7066_v35 = vsel %vm263_vm0, %v7064_v33, 0.0 }
0x444b   :  { %7067 = vadd.xlane.f32.xlu0 %v7066_v35 }
0x444f   :  { %7070 = vadd.xlane.f32.xlu0 %v7069_v38 }
0x44d4   :  { %v7068_v7 = vpop.xlane.xlu0 %7067 }
0x44d5   :  { %v7072_v41 = vmul.f32 0.03125, %v7068_v7 }
0x44d7   :  { %v7074_v13 = vadd.f32 1e-12, %v7072_v41 }
0x44d8   :  { %v7071_v15 = vpop.xlane.xlu0 %7070 }
0x44d9   :  { %8993 = vrsqrt.f32 %v7074_v13  ;;  %v7073_v16 = vmul.f32 0.03125, %v7071_v15  ;;  %v7711_v15 = vld [vmem:[#allocation20] ss:$0 sm:$0xff] }
0x44db   :  { %v7075_v27 = vadd.f32 1e-12, %v7073_v16 }
0x44dd   :  { %8995 = vrsqrt.f32 %v7075_v27 }
0x44e6   :  { %v8994_v21 = vpop.eup %8993 }
0x44e7   :  { %v7078_v22 = vmul.f32 %v8994_v21, %v7062_v34  ;;  %v7334_v34 = vld [vmem:[%s11211_s24] sm:$0xff] }
0x44e9   :  { %v7084_v62 = vmul.f32 %v7083_v20, %v7078_v22 }
0x44ea   :  { %v8996_v47 = vpop.eup %8995 }
0x44eb   :  { %v7079_v25 = vmul.f32 %v8996_v47, %v7063_v52  ;;  %v7090_v6 = vadd.f32 %v7089_v17, %v7084_v62  ;;  %v7335_v52 = vld [vmem:[%s11211_s24 + $0x8] sm:$0xff] }
0x44ec   :  { %8741 = vmatprep.subr.mxu1 %v7335_v52 }
0x44ed   :  { %v7085_v24 = vmul.f32 %v7083_v20, %v7079_v25  ;;  %8715 = vmatprep.mubr.msk.f32.mxu0 %vm263_vm0, %v7090_v6  ;;  %8742 = vmatpush3.msra.mxu1 %v7335_v52  ;;  %v7712_v20 = vld [vmem:[%s11212_s25] ss:$0 sm:$0xff] }
0x44ee   :  { %8743 = vmatprep.subr.mxu1 %v7334_v34 }
0x44ef   :  { %v7091_v43 = vadd.f32 %v7089_v17, %v7085_v24  ;;  %8744 = vmatpush3.msra.mxu1 %v7334_v34 }
0x44f1   :  { %8716 = vmatmul.mubr.msk.f32.vlgmr.msra.gmra.mxu0 %vm263_vm0, %v7091_v43 }
0x44f2   :  { %8719 = vmatpush3.msra.mxu0 %v7706_v42 }
0x44f3   :  { %8720 = vmatprep.subr.mxu0 %v7705_v63 }
0x44f4   :  { %8721 = vmatpush3.msra.mxu0 %v7705_v63 }
0x44f5   :  { %8722 = vmatprep.subr.mxu0 %v7704_v55 }
0x44f6   :  { %8723 = vmatpush3.msra.mxu0 %v7704_v55 }
0x44f7   :  { %8724 = vmatprep.subr.mxu0 %v7703_v8 }
0x44f8   :  { %8725 = vmatpush3.msra.mxu0 %v7703_v8 }
0x44f9   :  { %8726 = vmatprep.subr.mxu0 %v7702_v48 }
0x44fa   :  { %8727 = vmatpush3.msra.mxu0 %v7702_v48 }
0x44fb   :  { %8728 = vmatprep.subr.mxu0 %v7701_v5 }
0x44fc   :  { %8729 = vmatpush3.msra.mxu0 %v7701_v5 }
0x44fd   :  { %8730 = vmatprep.subr.mxu0 %v7700_v39 }
0x44fe   :  { %8731 = vmatpush3.msra.mxu0 %v7700_v39 }
0x44ff   :  { %8732 = vmatprep.subr.mxu0 %v7699_v1 }
0x4500   :  { %8733 = vmatpush3.msra.mxu0 %v7699_v1 }
0x45b1   :  { %v8717_v37 = vpop.f32.mrf.mxu0 }
0x45b2   :  { %v7183_v0 = vadd.f32 %v8717_v37, %v7696_v29 }
0x45b3   :  { %v7177_v31 = vpop.f32.mrf.mxu0 }
0x45b4   :  { %v7178_v44 = vadd.f32 %v7696_v29, %v7177_v31  ;;  %v7187_v30 = vmax.f32 %v7183_v0, 0.0 }
0x45b6   :  { %v7186_v18 = vmax.f32 %v7178_v44, 0.0 }
0x45b8   :  { %8734 = vmatprep.mubr.msk.f32.mxu0 %vm3470_vm11, %v7186_v18 }
0x45b9   :  { %8735 = vmatmul.mubr.msk.f32.vlgmr.msra.gmra.mxu0 %vm3470_vm11, %v7187_v30 }
0x4679   :  { %v8736_v40 = vpop.f32.mrf.mxu0 }
0x467a   :  { %v7279_v10 = vadd.f32 %v8736_v40, %v11097_v57 }
0x467b   :  { %v7269_v11 = vpop.f32.mrf.mxu0 }
0x467c   :  { %v7289_v19 = vadd.f32 %v7709_v46, %v7279_v10  ;;  %v7278_v14 = vadd.f32 %v7269_v11, %v11100_v50 }
0x467e   :  { %v7288_v3 = vadd.f32 %v7709_v46, %v7278_v14  ;;  %v7295_v60 = vsel %vm263_vm0, %v7289_v19, 0.0 }
0x467f   :  { %7296 = vadd.xlane.f32.xlu0 %v7295_v60 }
0x4680   :  { %v7292_v59 = vsel %vm263_vm0, %v7288_v3, 0.0 }
0x4681   :  { %7293 = vadd.xlane.f32.xlu1 %v7292_v59 }
0x4708   :  { %v7297_v53 = vpop.xlane.xlu0 %7296 }
0x4709   :  { %v7299_v56 = vmul.f32 0.03125, %v7297_v53 }
0x470a   :  { %v7294_v51 = vpop.xlane.xlu1 %7293 }
0x470b   :  { %v7301_v26 = vsub.f32 %v7289_v19, %v7299_v56  ;;  %v7298_v12 = vmul.f32 0.03125, %v7294_v51 }
0x470d   :  { %v7300_v9 = vsub.f32 %v7288_v3, %v7298_v12  ;;  %v7303_v54 = vmul.f32 %v7301_v26, %v7301_v26 }
0x470f   :  { %v7307_v57 = vsel %vm263_vm0, %v7303_v54, 0.0  ;;  %v7302_v32 = vmul.f32 %v7300_v9, %v7300_v9 }
0x4710   :  { %7308 = vadd.xlane.f32.xlu0 %v7307_v57 }
0x4711   :  { %v7304_v50 = vsel %vm263_vm0, %v7302_v32, 0.0 }
0x4712   :  { %7305 = vadd.xlane.f32.xlu1 %v7304_v50 }
0x4799   :  { %v7309_v33 = vpop.xlane.xlu0 %7308 }
0x479a   :  { %v7311_v35 = vmul.f32 0.03125, %v7309_v33 }
0x479b   :  { %v7306_v36 = vpop.xlane.xlu1 %7305 }
0x479c   :  { %v7313_v38 = vadd.f32 1e-12, %v7311_v35  ;;  %v7310_v58 = vmul.f32 0.03125, %v7306_v36 }
0x479e   :  { %8997 = vrsqrt.f32 %v7313_v38  ;;  %v7312_v2 = vadd.f32 1e-12, %v7310_v58 }
0x47a0   :  { %8999 = vrsqrt.f32 %v7312_v2 }
0x47ab   :  { %v8998_v61 = vpop.eup %8997 }
0x47ac   :  { %v7317_v42 = vmul.f32 %v8998_v61, %v7301_v26 }
0x47ad   :  { %v9000_v7 = vpop.eup %8999 }
0x47ae   :  { %v7316_v41 = vmul.f32 %v9000_v7, %v7300_v9  ;;  %v7325_v13 = vmul.f32 %v7710_v4, %v7317_v42 }
0x47b0   :  { %v7324_v16 = vmul.f32 %v7710_v4, %v7316_v41  ;;  %v7333_v45 = vadd.f32 %v7711_v15, %v7325_v13 }
0x47b2   :  { %v7332_v27 = vadd.f32 %v7711_v15, %v7324_v16 }
0x47b4   :  { %8745 = vmatprep.mubr.msk.f32.mxu1 %vm263_vm0, %v7332_v27 }
0x47b5   :  { %8746 = vmatmul.mubr.msk.f32.vlgmr.msra.gmra.mxu1 %vm263_vm0, %v7333_v45 }
0x4875   :  { %v8747_v21 = vpop.f32.mrf.mxu1 }
0x4876   :  { %v7423_v22 = vadd.f32 %v8747_v21, %v7712_v20 }
0x4877   :  { %v7417_v23 = vpop.f32.mrf.mxu1 }
0x4878   :  { %7427 = vst [vmem:[#allocation22 + $0x8] sm:$0xff] %v7423_v22  ;;  %v7418_v17 = vadd.f32 %v7712_v20, %v7417_v23 }
0x487a   :  { %7426 = vst [vmem:[#allocation22] sm:$0xff] %v7418_v17 }
0x487b   :  { %9260 = shalt.err (!%p9257_p8)
}
0x487c   :  { %s11276_s15 = smov 128  }
0x487d   :  { %7439 = dma.vmem_to_hbm [thread:$0]  %s7434_s27, 256, %s11213_s26, [#allocation4], %s11276_s15, %s11276_s15, %s11266_s11  }
0x487e   :  { %9283 = dma.done.wait [#allocation4], 256  }
0x487f   :  { %9284 = vsyncadd [#allocation4], 4294967040 }
0x4880   :  { %7443 = vsyncpa [#allocation3], 1 }
0x4881   :  { %7444 = vsyncpa [#allocation6], 1 }
0x4882   :  { %7445 = vsyncpa [#allocation9], 1 }
0x4883   :  { %7446 = vsyncpa [#allocation12], 1 }
0x4884   :  { %7447 = vsyncpa [#allocation15], 1 }
0x4885   :  { %7448 = vsyncpa [#allocation18], 1 }
0x4886   :  { %7449 = vsyncpa [#allocation21], 1 }
0x4887   :  { %7450 = vsyncpa [#allocation4], 1 }

</bundles_post_ra>
